<compile_context>
chip_gen: v6e
topology: v6e:2x2x1
jax: 0.10.0
libtpu: 0.0.40
codegen_flags: <defaults>
</compile_context>

<pallas_src>
import functools

import jax
import jax.numpy as jnp
from jax.experimental import pallas as pl
from jax.experimental.pallas import tpu as pltpu

LANES = 128

# conv1: 3x32x32 -> 16x28x28 -> pool -> 16x14x14
H1 = W1 = 32
C_IN, K1, C1 = 3, 5, 16
O1 = W1 - K1 + 1            # 28  (conv1 output width)
P1 = O1 // 2                # 14  (pool1 output width)
R1 = O1 * O1                # 784 conv1 rows per image   (row = ho*28 + wo)
KC1 = K1 * K1 * C_IN        # 75  tap-concatenated contraction for conv1

# conv2: 16x14x14 -> 36x12x12 -> pool -> 36x6x6
W2, K2, C2 = P1, 3, 36
O2 = W2 - K2 + 1            # 12  (conv2 output width)
P2 = O2 // 2                # 6   (pool2 output width)
R2 = O2 * W2                # 168 conv2 rows per image incl. junk cols (row = ho*14 + w)
KC2 = K2 * K2 * C1          # 144 tap-concatenated contraction for conv2
Y1 = P1 * P1                # 196 pooled conv1 rows (row = hp*14 + wp)
Y1_PAD = 200                # padded so every conv2 tap read stays in bounds

FC1_IN = C2 * P2 * P2       # 1296
FC1_OUT = 128
FC2_OUT = 10

CONV_BATCH_BLOCK = 4        # images per grid step in the fused conv kernel

# Geometry guards (review correctness concern: pooling must never sample junk columns).
assert 2 * (P1 - 1) + 1 < O1
assert 2 * (P2 - 1) + 1 < O2
assert (K2 - 1) * W2 + (K2 - 1) + R2 <= Y1_PAD


# ----------------------------------------------------------------------------
# Fused conv1 + pool1 + conv2 + pool2 kernel (one batch block per grid step)
# ----------------------------------------------------------------------------
def _conv_stack_kernel(p1_ref, w1_ref, b1_ref, w2_ref, b2_ref, o_ref,
                       c1_ref, y1_ref, p2_ref, c2_ref, *, nb):
    """p1_ref : (nb*784, 75)  conv1 im2col patches, lane k = (i*5+j)*3 + c
       w1_ref : (75, 16)      conv1 weights (tap-concatenated rows)
       b1_ref : (1, 16)
       w2_ref : (144, 36)     conv2 weights, row = (i*3+j)*16 + c
       b2_ref : (1, 36)
       o_ref  : (nb*36, 36)   pooled conv2 features, row = img*36 + hp*6 + wp
       scratches: c1 (784,16), y1 (200,16), p2 (168,144), c2 (168,36)  [per-image reuse]
    """
    b1 = b1_ref[...]                                   # hoisted bias loads
    b2 = b2_ref[...]

    for b in range(nb):                                # static unroll over the batch block
        # ---- conv1: ONE matmul, tap-concatenated K = 75 (no per-tap accumulator RMW) ----
        c1_ref[...] = jnp.dot(p1_ref[b * R1:(b + 1) * R1, :], w1_ref[...],
                              preferred_element_type=jnp.float32)          # (784, 16)

        # ---- pool1 (2x2/2) + bias + relu -> y1 (row hp*14+wp, 16 dense channels) ----
        for hp in range(P1):
            r0 = 2 * hp * O1
            r1 = r0 + O1
            m = jnp.maximum(
                jnp.maximum(c1_ref[pl.ds(r0, P1, stride=2), :],
                            c1_ref[pl.ds(r0 + 1, P1, stride=2), :]),
                jnp.maximum(c1_ref[pl.ds(r1, P1, stride=2), :],
                            c1_ref[pl.ds(r1 + 1, P1, stride=2), :]))
            y1_ref[hp * P1:(hp + 1) * P1, :] = jnp.maximum(m + b1, 0.0)
        # Padded tail rows are read into junk output columns only; keep them finite.
        y1_ref[Y1:Y1_PAD, :] = jnp.zeros((Y1_PAD - Y1, C1), jnp.float32)

        # ---- conv2 im2col in VMEM: stage the 9 tap slabs side by side along K ----
        for i in range(K2):
            for j in range(K2):
                t = i * K2 + j
                p2_ref[:, t * C1:(t + 1) * C1] = y1_ref[pl.ds(i * W2 + j, R2), :]

        # ---- conv2: ONE matmul, K = 144 (no zero channels in the contraction) ----
        c2_ref[...] = jnp.dot(p2_ref[...], w2_ref[...],
                              preferred_element_type=jnp.float32)          # (168, 36)

        # ---- pool2 + bias + relu -> output rows s2 = hp*6 + wp, 36 channels ----
        for hp in range(P2):
            r0 = 2 * hp * W2
            r1 = r0 + W2
            m = jnp.maximum(
                jnp.maximum(c2_ref[pl.ds(r0, P2, stride=2), :],
                            c2_ref[pl.ds(r0 + 1, P2, stride=2), :]),
                jnp.maximum(c2_ref[pl.ds(r1, P2, stride=2), :],
                            c2_ref[pl.ds(r1 + 1, P2, stride=2), :]))
            base = b * (P2 * P2) + hp * P2
            o_ref[base:base + P2, :] = jnp.maximum(m + b2, 0.0)


def conv_stack(patches, w1, b1, w2, b2, *, nb, n_pad):
    """patches: (n_pad*784, 75) -> pooled conv2 features (n_pad*36, 36)."""
    kernel = functools.partial(_conv_stack_kernel, nb=nb)
    return pl.pallas_call(
        kernel,
        out_shape=jax.ShapeDtypeStruct((n_pad * P2 * P2, C2), jnp.float32),
        grid=(n_pad // nb,),
        in_specs=[
            pl.BlockSpec((nb * R1, KC1), lambda i: (i, 0)),
            pl.BlockSpec((KC1, C1), lambda i: (0, 0)),
            pl.BlockSpec((1, C1), lambda i: (0, 0)),
            pl.BlockSpec((KC2, C2), lambda i: (0, 0)),
            pl.BlockSpec((1, C2), lambda i: (0, 0)),
        ],
        out_specs=pl.BlockSpec((nb * P2 * P2, C2), lambda i: (i, 0)),
        scratch_shapes=[
            pltpu.VMEM((R1, C1), jnp.float32),      # conv1 output (one image)
            pltpu.VMEM((Y1_PAD, C1), jnp.float32),  # pooled conv1, 16 dense channels
            pltpu.VMEM((R2, KC2), jnp.float32),     # conv2 tap-concatenated LHS
            pltpu.VMEM((R2, C2), jnp.float32),      # conv2 output
        ],
        compiler_params=pltpu.CompilerParams(dimension_semantics=("parallel",)),
    )(patches, w1, b1, w2, b2)


# ----------------------------------------------------------------------------
# Fused classifier head: relu(relu(x @ W1 + b1) @ W2 + b2) in one pallas_call
# ----------------------------------------------------------------------------
def _fc_head_kernel(x_ref, w1_ref, b1_ref, w2_ref, b2_ref, o_ref):
    h = jnp.dot(x_ref[...], w1_ref[...], preferred_element_type=jnp.float32)
    h = jnp.maximum(h + b1_ref[...], 0.0)
    z = jnp.dot(h, w2_ref[...], preferred_element_type=jnp.float32)
    # The reference CNNNet applies ReLU to the fc2 output as well.
    o_ref[...] = jnp.maximum(z + b2_ref[...], 0.0)


def fc_head(feats, w1, b1, w2, b2):
    n, f = feats.shape
    tb = min(128, n)                                   # batch row tile
    n_pad = ((n + tb - 1) // tb) * tb
    if n_pad > n:                                      # keep tb | n: no OOB LHS rows
        feats = jnp.pad(feats, ((0, n_pad - n), (0, 0)))
    out = pl.pallas_call(
        _fc_head_kernel,
        out_shape=jax.ShapeDtypeStruct((n_pad, LANES), jnp.float32),
        grid=(n_pad // tb,),
        in_specs=[
            pl.BlockSpec((tb, f), lambda i: (i, 0)),
            pl.BlockSpec((f, FC1_OUT), lambda i: (0, 0)),
            pl.BlockSpec((1, FC1_OUT), lambda i: (0, 0)),
            pl.BlockSpec((FC1_OUT, LANES), lambda i: (0, 0)),
            pl.BlockSpec((1, LANES), lambda i: (0, 0)),
        ],
        out_specs=pl.BlockSpec((tb, LANES), lambda i: (i, 0)),
        compiler_params=pltpu.CompilerParams(dimension_semantics=("parallel",)),
    )(feats, w1, b1, w2, b2)
    return out[:n]


# ----------------------------------------------------------------------------
# Parameters: PyTorch-native layouts + one-time packing into kernel layouts
# ----------------------------------------------------------------------------
def init_natural_params(key):
    ks = jax.random.split(key, 8)
    s = 0.05
    return dict(
        conv1_w=jax.random.normal(ks[0], (C1, C_IN, K1, K1), jnp.float32) * s,
        conv1_b=jax.random.normal(ks[1], (C1,), jnp.float32) * s,
        conv2_w=jax.random.normal(ks[2], (C2, C1, K2, K2), jnp.float32) * s,
        conv2_b=jax.random.normal(ks[3], (C2,), jnp.float32) * s,
        fc1_w=jax.random.normal(ks[4], (FC1_OUT, FC1_IN), jnp.float32) * s,
        fc1_b=jax.random.normal(ks[5], (FC1_OUT,), jnp.float32) * s,
        fc2_w=jax.random.normal(ks[6], (FC2_OUT, FC1_OUT), jnp.float32) * s,
        fc2_b=jax.random.normal(ks[7], (FC2_OUT,), jnp.float32) * s,
    )


def pack_params(nat):
    """One-time conversion of PyTorch-layout params into the Pallas kernel layouts."""
    p = {}
    # conv1: OIHW (16,3,5,5) -> (75,16), row = (i*5+j)*3 + c (matches the im2col lanes).
    p['w1'] = jnp.transpose(nat['conv1_w'], (2, 3, 1, 0)).reshape(KC1, C1)
    p['b1'] = nat['conv1_b'].reshape(1, C1)
    # conv2: OIHW (36,16,3,3) -> (144,36), row = (i*3+j)*16 + c (matches the staged LHS).
    p['w2'] = jnp.transpose(nat['conv2_w'], (2, 3, 1, 0)).reshape(KC2, C2)
    p['b2'] = nat['conv2_b'].reshape(1, C2)
    # fc1: fold the PyTorch NCHW flatten (feature = c*36 + s, s = hp*6 + wp) into the
    # weight rows so the kernel consumes the natural (s*36 + c) feature order.
    w = nat['fc1_w'].T.reshape(C2, P2 * P2, FC1_OUT)       # [c, s, out]
    w = jnp.transpose(w, (1, 0, 2)).reshape(FC1_IN, FC1_OUT)
    p['fc1_w'] = w
    p['fc1_b'] = nat['fc1_b'].reshape(1, FC1_OUT)
    # fc2: (10,128) -> (128,128) with logits zero-padded to 128 lanes (lane-dense store).
    p['fc2_w'] = jnp.pad(nat['fc2_w'].T, ((0, 0), (0, LANES - FC2_OUT)))
    p['fc2_b'] = jnp.pad(nat['fc2_b'], (0, LANES - FC2_OUT)).reshape(1, LANES)
    return p


# ----------------------------------------------------------------------------
# Forward pass (Pallas) and pure-JAX reference
# ----------------------------------------------------------------------------
def cnn_forward(x_nchw, p):
    """CNNNet forward: NCHW input (N,3,32,32) -> logits (N,10)."""
    n = x_nchw.shape[0]
    nb = min(CONV_BATCH_BLOCK, n)
    n_pad = ((n + nb - 1) // nb) * nb

    x = jnp.transpose(x_nchw, (0, 2, 3, 1))                     # NHWC
    if n_pad > n:
        x = jnp.pad(x, ((0, n_pad - n), (0, 0), (0, 0), (0, 0)))

    # conv1 im2col at the wrapper level (XLA): row = ho*28 + wo, lane = (i*5+j)*3 + c.
    patches = jnp.concatenate(
        [x[:, i:i + O1, j:j + O1, :] for i in range(K1) for j in range(K1)], axis=-1)
    patches = patches.reshape(n_pad * R1, KC1)

    feats = conv_stack(patches, p['w1'], p['b1'], p['w2'], p['b2'],
                       nb=nb, n_pad=n_pad)                      # (n_pad*36, 36)
    feats = feats.reshape(n_pad, FC1_IN)                        # feature = s2*36 + c2

    logits = fc_head(feats, p['fc1_w'], p['fc1_b'], p['fc2_w'], p['fc2_b'])
    return logits[:n, :FC2_OUT]


def cnn_forward_ref(x_nchw, nat):
    """Pure-JAX reference using the PyTorch-native parameter layouts."""
    n = x_nchw.shape[0]
    hi = jax.lax.Precision.HIGHEST
    x = jnp.transpose(x_nchw, (0, 2, 3, 1))

    def conv_relu(x, w_oihw, b):
        w = jnp.transpose(w_oihw, (2, 3, 1, 0))                 # OIHW -> HWIO
        y = jax.lax.conv_general_dilated(
            x, w, (1, 1), 'VALID',
            dimension_numbers=('NHWC', 'HWIO', 'NHWC'), precision=hi) + b
        return jnp.maximum(y, 0.0)

    def pool(x):
        return jax.lax.reduce_window(x, -jnp.inf, jax.lax.max,
                                     (1, 2, 2, 1), (1, 2, 2, 1), 'VALID')

    y = pool(conv_relu(x, nat['conv1_w'], nat['conv1_b']))
    y = pool(conv_relu(y, nat['conv2_w'], nat['conv2_b']))
    flat = jnp.transpose(y, (0, 3, 1, 2)).reshape(n, FC1_IN)    # PyTorch NCHW flatten
    h = jnp.maximum(jnp.dot(flat, nat['fc1_w'].T, precision=hi) + nat['fc1_b'], 0.0)
    return jnp.maximum(jnp.dot(h, nat['fc2_w'].T, precision=hi) + nat['fc2_b'], 0.0)


# ----------------------------------------------------------------------------
if __name__ == "__main__":
    key = jax.random.PRNGKey(0)
    k_x, k_p = jax.random.split(key)

    batch = 2
    x = jax.random.normal(k_x, (batch, 3, 32, 32), jnp.float32)
    nat = init_natural_params(k_p)
    params = pack_params(nat)

    fwd = jax.jit(cnn_forward)
    out = jax.block_until_ready(fwd(x, params))
    assert out.shape == (batch, FC2_OUT), out.shape

    ref = jax.block_until_ready(cnn_forward_ref(x, nat))
    err = float(jnp.max(jnp.abs(out - ref)))
    assert err < 2e-3, f"max abs diff {err}"

    print("KERNEL_OK")
</pallas_src>

<mosaic_0001>
module attributes {stable_mosaic.version = 11 : i64} {
  func.func @_conv_stack_kernel(%arg0: i32, %arg1: memref<1568x75xf32, #tpu.memory_space<vmem>>, %arg2: memref<75x16xf32, #tpu.memory_space<vmem>>, %arg3: memref<1x16xf32, #tpu.memory_space<vmem>>, %arg4: memref<144x36xf32, #tpu.memory_space<vmem>>, %arg5: memref<1x36xf32, #tpu.memory_space<vmem>>, %arg6: memref<72x36xf32, #tpu.memory_space<vmem>>, %arg7: memref<784x16xf32, #tpu.memory_space<vmem>>, %arg8: memref<200x16xf32, #tpu.memory_space<vmem>>, %arg9: memref<168x144xf32, #tpu.memory_space<vmem>>, %arg10: memref<168x36xf32, #tpu.memory_space<vmem>>) attributes {dimension_semantics = [#tpu.dimension_semantics<parallel>], iteration_bounds = array<i64: 1>, scalar_prefetch = 0 : i64, scratch_operands = 4 : i64, tpu.core_type = #tpu.core_type<tc>, window_params = [{transform_indices = @transform_0, window_bounds = array<i64: 1568, 75>}, {pipeline_mode = #tpu.pipeline_mode<synchronous>, transform_indices = @transform_1, window_bounds = array<i64: 75, 16>}, {pipeline_mode = #tpu.pipeline_mode<synchronous>, transform_indices = @transform_2, window_bounds = array<i64: 1, 16>}, {pipeline_mode = #tpu.pipeline_mode<synchronous>, transform_indices = @transform_3, window_bounds = array<i64: 144, 36>}, {pipeline_mode = #tpu.pipeline_mode<synchronous>, transform_indices = @transform_4, window_bounds = array<i64: 1, 36>}, {transform_indices = @transform_5, window_bounds = array<i64: 72, 36>}]} {
    %c0 = arith.constant 0 : index
    %c0_0 = arith.constant 0 : index
    %0 = vector.load %arg3[%c0, %c0_0] : memref<1x16xf32, #tpu.memory_space<vmem>>, vector<1x16xf32>
    %c0_1 = arith.constant 0 : index
    %c0_2 = arith.constant 0 : index
    %1 = vector.load %arg5[%c0_1, %c0_2] : memref<1x36xf32, #tpu.memory_space<vmem>>, vector<1x36xf32>
    %c0_3 = arith.constant 0 : index
    %c0_4 = arith.constant 0 : index
    %2 = vector.load %arg1[%c0_3, %c0_4] : memref<1568x75xf32, #tpu.memory_space<vmem>>, vector<784x75xf32>
    %c0_5 = arith.constant 0 : index
    %c0_6 = arith.constant 0 : index
    %3 = vector.load %arg2[%c0_5, %c0_6] : memref<75x16xf32, #tpu.memory_space<vmem>>, vector<75x16xf32>
    %cst = arith.constant dense<0.000000e+00> : vector<784x16xf32>
    %4 = tpu.matmul %2, %3, %cst {dimension_numbers = #tpu.dot_dimension_numbers<[1], [0], [0], [1], [0, 0, 1, 1], [], []>} : vector<784x75xf32>, vector<75x16xf32>, vector<784x16xf32> -> vector<784x16xf32>
    %c0_7 = arith.constant 0 : index
    %c0_8 = arith.constant 0 : index
    %5 = vector.load %arg7[%c0_7, %c0_8] : memref<784x16xf32, #tpu.memory_space<vmem>>, vector<784x16xf32>
    tpu.vector_store %arg7[%c0_7, %c0_8], %4 {strides = array<i32>} : memref<784x16xf32, #tpu.memory_space<vmem>>, vector<784x16xf32>,
    %c0_9 = arith.constant 0 : index
    %c0_10 = arith.constant 0 : index
    %6 = tpu.strided_load %arg7[%c0_9, %c0_10] {strides = array<i32: 2, 1>} : memref<784x16xf32, #tpu.memory_space<vmem>>, vector<14x16xf32>
    %c1 = arith.constant 1 : index
    %c0_11 = arith.constant 0 : index
    %7 = tpu.strided_load %arg7[%c1, %c0_11] {strides = array<i32: 2, 1>} : memref<784x16xf32, #tpu.memory_space<vmem>>, vector<14x16xf32>
    %8 = arith.maximumf %6, %7 : vector<14x16xf32>
    %c28 = arith.constant 28 : index
    %c0_12 = arith.constant 0 : index
    %9 = tpu.strided_load %arg7[%c28, %c0_12] {strides = array<i32: 2, 1>} : memref<784x16xf32, #tpu.memory_space<vmem>>, vector<14x16xf32>
    %c29 = arith.constant 29 : index
    %c0_13 = arith.constant 0 : index
    %10 = tpu.strided_load %arg7[%c29, %c0_13] {strides = array<i32: 2, 1>} : memref<784x16xf32, #tpu.memory_space<vmem>>, vector<14x16xf32>
    %11 = arith.maximumf %9, %10 : vector<14x16xf32>
    %12 = arith.maximumf %8, %11 : vector<14x16xf32>
    %13 = vector.broadcast %0 : vector<1x16xf32> to vector<14x16xf32>
    %14 = arith.addf %12, %13 : vector<14x16xf32>
    %cst_14 = arith.constant 0.000000e+00 : f32
    %15 = vector.broadcast %cst_14 : f32 to vector<14x16xf32>
    %16 = arith.maximumf %14, %15 : vector<14x16xf32>
    %c0_15 = arith.constant 0 : index
    %c0_16 = arith.constant 0 : index
    %17 = vector.load %arg8[%c0_15, %c0_16] : memref<200x16xf32, #tpu.memory_space<vmem>>, vector<14x16xf32>
    tpu.vector_store %arg8[%c0_15, %c0_16], %16 {strides = array<i32>} : memref<200x16xf32, #tpu.memory_space<vmem>>, vector<14x16xf32>,
    %c56 = arith.constant 56 : index
    %c0_17 = arith.constant 0 : index
    %18 = tpu.strided_load %arg7[%c56, %c0_17] {strides = array<i32: 2, 1>} : memref<784x16xf32, #tpu.memory_space<vmem>>, vector<14x16xf32>
    %c57 = arith.constant 57 : index
    %c0_18 = arith.constant 0 : index
    %19 = tpu.strided_load %arg7[%c57, %c0_18] {strides = array<i32: 2, 1>} : memref<784x16xf32, #tpu.memory_space<vmem>>, vector<14x16xf32>
    %20 = arith.maximumf %18, %19 : vector<14x16xf32>
    %c84 = arith.constant 84 : index
    %c0_19 = arith.constant 0 : index
    %21 = tpu.strided_load %arg7[%c84, %c0_19] {strides = array<i32: 2, 1>} : memref<784x16xf32, #tpu.memory_space<vmem>>, vector<14x16xf32>
    %c85 = arith.constant 85 : index
    %c0_20 = arith.constant 0 : index
    %22 = tpu.strided_load %arg7[%c85, %c0_20] {strides = array<i32: 2, 1>} : memref<784x16xf32, #tpu.memory_space<vmem>>, vector<14x16xf32>
    %23 = arith.maximumf %21, %22 : vector<14x16xf32>
    %24 = arith.maximumf %20, %23 : vector<14x16xf32>
    %25 = vector.broadcast %0 : vector<1x16xf32> to vector<14x16xf32>
    %26 = arith.addf %24, %25 : vector<14x16xf32>
    %cst_21 = arith.constant 0.000000e+00 : f32
    %27 = vector.broadcast %cst_21 : f32 to vector<14x16xf32>
    %28 = arith.maximumf %26, %27 : vector<14x16xf32>
    %c14 = arith.constant 14 : index
    %c0_22 = arith.constant 0 : index
    %29 = vector.load %arg8[%c14, %c0_22] : memref<200x16xf32, #tpu.memory_space<vmem>>, vector<14x16xf32>
    tpu.vector_store %arg8[%c14, %c0_22], %28 {strides = array<i32>} : memref<200x16xf32, #tpu.memory_space<vmem>>, vector<14x16xf32>,
    %c112 = arith.constant 112 : index
    %c0_23 = arith.constant 0 : index
    %30 = tpu.strided_load %arg7[%c112, %c0_23] {strides = array<i32: 2, 1>} : memref<784x16xf32, #tpu.memory_space<vmem>>, vector<14x16xf32>
    %c113 = arith.constant 113 : index
    %c0_24 = arith.constant 0 : index
    %31 = tpu.strided_load %arg7[%c113, %c0_24] {strides = array<i32: 2, 1>} : memref<784x16xf32, #tpu.memory_space<vmem>>, vector<14x16xf32>
    %32 = arith.maximumf %30, %31 : vector<14x16xf32>
    %c140 = arith.constant 140 : index
    %c0_25 = arith.constant 0 : index
    %33 = tpu.strided_load %arg7[%c140, %c0_25] {strides = array<i32: 2, 1>} : memref<784x16xf32, #tpu.memory_space<vmem>>, vector<14x16xf32>
    %c141 = arith.constant 141 : index
    %c0_26 = arith.constant 0 : index
    %34 = tpu.strided_load %arg7[%c141, %c0_26] {strides = array<i32: 2, 1>} : memref<784x16xf32, #tpu.memory_space<vmem>>, vector<14x16xf32>
    %35 = arith.maximumf %33, %34 : vector<14x16xf32>
    %36 = arith.maximumf %32, %35 : vector<14x16xf32>
    %37 = vector.broadcast %0 : vector<1x16xf32> to vector<14x16xf32>
    %38 = arith.addf %36, %37 : vector<14x16xf32>
    %cst_27 = arith.constant 0.000000e+00 : f32
    %39 = vector.broadcast %cst_27 : f32 to vector<14x16xf32>
    %40 = arith.maximumf %38, %39 : vector<14x16xf32>
    %c28_28 = arith.constant 28 : index
    %c0_29 = arith.constant 0 : index
    %41 = vector.load %arg8[%c28_28, %c0_29] : memref<200x16xf32, #tpu.memory_space<vmem>>, vector<14x16xf32>
    tpu.vector_store %arg8[%c28_28, %c0_29], %40 {strides = array<i32>} : memref<200x16xf32, #tpu.memory_space<vmem>>, vector<14x16xf32>,
    %c168 = arith.constant 168 : index
    %c0_30 = arith.constant 0 : index
    %42 = tpu.strided_load %arg7[%c168, %c0_30] {strides = array<i32: 2, 1>} : memref<784x16xf32, #tpu.memory_space<vmem>>, vector<14x16xf32>
    %c169 = arith.constant 169 : index
    %c0_31 = arith.constant 0 : index
    %43 = tpu.strided_load %arg7[%c169, %c0_31] {strides = array<i32: 2, 1>} : memref<784x16xf32, #tpu.memory_space<vmem>>, vector<14x16xf32>
    %44 = arith.maximumf %42, %43 : vector<14x16xf32>
    %c196 = arith.constant 196 : index
    %c0_32 = arith.constant 0 : index
    %45 = tpu.strided_load %arg7[%c196, %c0_32] {strides = array<i32: 2, 1>} : memref<784x16xf32, #tpu.memory_space<vmem>>, vector<14x16xf32>
    %c197 = arith.constant 197 : index
    %c0_33 = arith.constant 0 : index
    %46 = tpu.strided_load %arg7[%c197, %c0_33] {strides = array<i32: 2, 1>} : memref<784x16xf32, #tpu.memory_space<vmem>>, vector<14x16xf32>
    %47 = arith.maximumf %45, %46 : vector<14x16xf32>
    %48 = arith.maximumf %44, %47 : vector<14x16xf32>
    %49 = vector.broadcast %0 : vector<1x16xf32> to vector<14x16xf32>
    %50 = arith.addf %48, %49 : vector<14x16xf32>
    %cst_34 = arith.constant 0.000000e+00 : f32
    %51 = vector.broadcast %cst_34 : f32 to vector<14x16xf32>
    %52 = arith.maximumf %50, %51 : vector<14x16xf32>
    %c42 = arith.constant 42 : index
    %c0_35 = arith.constant 0 : index
    %53 = vector.load %arg8[%c42, %c0_35] : memref<200x16xf32, #tpu.memory_space<vmem>>, vector<14x16xf32>
    tpu.vector_store %arg8[%c42, %c0_35], %52 {strides = array<i32>} : memref<200x16xf32, #tpu.memory_space<vmem>>, vector<14x16xf32>,
    %c224 = arith.constant 224 : index
    %c0_36 = arith.constant 0 : index
    %54 = tpu.strided_load %arg7[%c224, %c0_36] {strides = array<i32: 2, 1>} : memref<784x16xf32, #tpu.memory_space<vmem>>, vector<14x16xf32>
    %c225 = arith.constant 225 : index
    %c0_37 = arith.constant 0 : index
    %55 = tpu.strided_load %arg7[%c225, %c0_37] {strides = array<i32: 2, 1>} : memref<784x16xf32, #tpu.memory_space<vmem>>, vector<14x16xf32>
    %56 = arith.maximumf %54, %55 : vector<14x16xf32>
    %c252 = arith.constant 252 : index
    %c0_38 = arith.constant 0 : index
    %57 = tpu.strided_load %arg7[%c252, %c0_38] {strides = array<i32: 2, 1>} : memref<784x16xf32, #tpu.memory_space<vmem>>, vector<14x16xf32>
    %c253 = arith.constant 253 : index
    %c0_39 = arith.constant 0 : index
    %58 = tpu.strided_load %arg7[%c253, %c0_39] {strides = array<i32: 2, 1>} : memref<784x16xf32, #tpu.memory_space<vmem>>, vector<14x16xf32>
    %59 = arith.maximumf %57, %58 : vector<14x16xf32>
    %60 = arith.maximumf %56, %59 : vector<14x16xf32>
    %61 = vector.broadcast %0 : vector<1x16xf32> to vector<14x16xf32>
    %62 = arith.addf %60, %61 : vector<14x16xf32>
    %cst_40 = arith.constant 0.000000e+00 : f32
    %63 = vector.broadcast %cst_40 : f32 to vector<14x16xf32>
    %64 = arith.maximumf %62, %63 : vector<14x16xf32>
    %c56_41 = arith.constant 56 : index
    %c0_42 = arith.constant 0 : index
    %65 = vector.load %arg8[%c56_41, %c0_42] : memref<200x16xf32, #tpu.memory_space<vmem>>, vector<14x16xf32>
    tpu.vector_store %arg8[%c56_41, %c0_42], %64 {strides = array<i32>} : memref<200x16xf32, #tpu.memory_space<vmem>>, vector<14x16xf32>,
    %c280 = arith.constant 280 : index
    %c0_43 = arith.constant 0 : index
    %66 = tpu.strided_load %arg7[%c280, %c0_43] {strides = array<i32: 2, 1>} : memref<784x16xf32, #tpu.memory_space<vmem>>, vector<14x16xf32>
    %c281 = arith.constant 281 : index
    %c0_44 = arith.constant 0 : index
    %67 = tpu.strided_load %arg7[%c281, %c0_44] {strides = array<i32: 2, 1>} : memref<784x16xf32, #tpu.memory_space<vmem>>, vector<14x16xf32>
    %68 = arith.maximumf %66, %67 : vector<14x16xf32>
    %c308 = arith.constant 308 : index
    %c0_45 = arith.constant 0 : index
    %69 = tpu.strided_load %arg7[%c308, %c0_45] {strides = array<i32: 2, 1>} : memref<784x16xf32, #tpu.memory_space<vmem>>, vector<14x16xf32>
    %c309 = arith.constant 309 : index
    %c0_46 = arith.constant 0 : index
    %70 = tpu.strided_load %arg7[%c309, %c0_46] {strides = array<i32: 2, 1>} : memref<784x16xf32, #tpu.memory_space<vmem>>, vector<14x16xf32>
    %71 = arith.maximumf %69, %70 : vector<14x16xf32>
    %72 = arith.maximumf %68, %71 : vector<14x16xf32>
    %73 = vector.broadcast %0 : vector<1x16xf32> to vector<14x16xf32>
    %74 = arith.addf %72, %73 : vector<14x16xf32>
    %cst_47 = arith.constant 0.000000e+00 : f32
    %75 = vector.broadcast %cst_47 : f32 to vector<14x16xf32>
    %76 = arith.maximumf %74, %75 : vector<14x16xf32>
    %c70 = arith.constant 70 : index
    %c0_48 = arith.constant 0 : index
    %77 = vector.load %arg8[%c70, %c0_48] : memref<200x16xf32, #tpu.memory_space<vmem>>, vector<14x16xf32>
    tpu.vector_store %arg8[%c70, %c0_48], %76 {strides = array<i32>} : memref<200x16xf32, #tpu.memory_space<vmem>>, vector<14x16xf32>,
    %c336 = arith.constant 336 : index
    %c0_49 = arith.constant 0 : index
    %78 = tpu.strided_load %arg7[%c336, %c0_49] {strides = array<i32: 2, 1>} : memref<784x16xf32, #tpu.memory_space<vmem>>, vector<14x16xf32>
    %c337 = arith.constant 337 : index
    %c0_50 = arith.constant 0 : index
    %79 = tpu.strided_load %arg7[%c337, %c0_50] {strides = array<i32: 2, 1>} : memref<784x16xf32, #tpu.memory_space<vmem>>, vector<14x16xf32>
    %80 = arith.maximumf %78, %79 : vector<14x16xf32>
    %c364 = arith.constant 364 : index
    %c0_51 = arith.constant 0 : index
    %81 = tpu.strided_load %arg7[%c364, %c0_51] {strides = array<i32: 2, 1>} : memref<784x16xf32, #tpu.memory_space<vmem>>, vector<14x16xf32>
    %c365 = arith.constant 365 : index
    %c0_52 = arith.constant 0 : index
    %82 = tpu.strided_load %arg7[%c365, %c0_52] {strides = array<i32: 2, 1>} : memref<784x16xf32, #tpu.memory_space<vmem>>, vector<14x16xf32>
    %83 = arith.maximumf %81, %82 : vector<14x16xf32>
    %84 = arith.maximumf %80, %83 : vector<14x16xf32>
    %85 = vector.broadcast %0 : vector<1x16xf32> to vector<14x16xf32>
    %86 = arith.addf %84, %85 : vector<14x16xf32>
    %cst_53 = arith.constant 0.000000e+00 : f32
    %87 = vector.broadcast %cst_53 : f32 to vector<14x16xf32>
    %88 = arith.maximumf %86, %87 : vector<14x16xf32>
    %c84_54 = arith.constant 84 : index
    %c0_55 = arith.constant 0 : index
    %89 = vector.load %arg8[%c84_54, %c0_55] : memref<200x16xf32, #tpu.memory_space<vmem>>, vector<14x16xf32>
    tpu.vector_store %arg8[%c84_54, %c0_55], %88 {strides = array<i32>} : memref<200x16xf32, #tpu.memory_space<vmem>>, vector<14x16xf32>,
    %c392 = arith.constant 392 : index
    %c0_56 = arith.constant 0 : index
    %90 = tpu.strided_load %arg7[%c392, %c0_56] {strides = array<i32: 2, 1>} : memref<784x16xf32, #tpu.memory_space<vmem>>, vector<14x16xf32>
    %c393 = arith.constant 393 : index
    %c0_57 = arith.constant 0 : index
    %91 = tpu.strided_load %arg7[%c393, %c0_57] {strides = array<i32: 2, 1>} : memref<784x16xf32, #tpu.memory_space<vmem>>, vector<14x16xf32>
    %92 = arith.maximumf %90, %91 : vector<14x16xf32>
    %c420 = arith.constant 420 : index
    %c0_58 = arith.constant 0 : index
    %93 = tpu.strided_load %arg7[%c420, %c0_58] {strides = array<i32: 2, 1>} : memref<784x16xf32, #tpu.memory_space<vmem>>, vector<14x16xf32>
    %c421 = arith.constant 421 : index
    %c0_59 = arith.constant 0 : index
    %94 = tpu.strided_load %arg7[%c421, %c0_59] {strides = array<i32: 2, 1>} : memref<784x16xf32, #tpu.memory_space<vmem>>, vector<14x16xf32>
    %95 = arith.maximumf %93, %94 : vector<14x16xf32>
    %96 = arith.maximumf %92, %95 : vector<14x16xf32>
    %97 = vector.broadcast %0 : vector<1x16xf32> to vector<14x16xf32>
    %98 = arith.addf %96, %97 : vector<14x16xf32>
    %cst_60 = arith.constant 0.000000e+00 : f32
    %99 = vector.broadcast %cst_60 : f32 to vector<14x16xf32>
    %100 = arith.maximumf %98, %99 : vector<14x16xf32>
    %c98 = arith.constant 98 : index
    %c0_61 = arith.constant 0 : index
    %101 = vector.load %arg8[%c98, %c0_61] : memref<200x16xf32, #tpu.memory_space<vmem>>, vector<14x16xf32>
    tpu.vector_store %arg8[%c98, %c0_61], %100 {strides = array<i32>} : memref<200x16xf32, #tpu.memory_space<vmem>>, vector<14x16xf32>,
    %c448 = arith.constant 448 : index
    %c0_62 = arith.constant 0 : index
    %102 = tpu.strided_load %arg7[%c448, %c0_62] {strides = array<i32: 2, 1>} : memref<784x16xf32, #tpu.memory_space<vmem>>, vector<14x16xf32>
    %c449 = arith.constant 449 : index
    %c0_63 = arith.constant 0 : index
    %103 = tpu.strided_load %arg7[%c449, %c0_63] {strides = array<i32: 2, 1>} : memref<784x16xf32, #tpu.memory_space<vmem>>, vector<14x16xf32>
    %104 = arith.maximumf %102, %103 : vector<14x16xf32>
    %c476 = arith.constant 476 : index
    %c0_64 = arith.constant 0 : index
    %105 = tpu.strided_load %arg7[%c476, %c0_64] {strides = array<i32: 2, 1>} : memref<784x16xf32, #tpu.memory_space<vmem>>, vector<14x16xf32>
    %c477 = arith.constant 477 : index
    %c0_65 = arith.constant 0 : index
    %106 = tpu.strided_load %arg7[%c477, %c0_65] {strides = array<i32: 2, 1>} : memref<784x16xf32, #tpu.memory_space<vmem>>, vector<14x16xf32>
    %107 = arith.maximumf %105, %106 : vector<14x16xf32>
    %108 = arith.maximumf %104, %107 : vector<14x16xf32>
    %109 = vector.broadcast %0 : vector<1x16xf32> to vector<14x16xf32>
    %110 = arith.addf %108, %109 : vector<14x16xf32>
    %cst_66 = arith.constant 0.000000e+00 : f32
    %111 = vector.broadcast %cst_66 : f32 to vector<14x16xf32>
    %112 = arith.maximumf %110, %111 : vector<14x16xf32>
    %c112_67 = arith.constant 112 : index
    %c0_68 = arith.constant 0 : index
    %113 = vector.load %arg8[%c112_67, %c0_68] : memref<200x16xf32, #tpu.memory_space<vmem>>, vector<14x16xf32>
    tpu.vector_store %arg8[%c112_67, %c0_68], %112 {strides = array<i32>} : memref<200x16xf32, #tpu.memory_space<vmem>>, vector<14x16xf32>,
    %c504 = arith.constant 504 : index
    %c0_69 = arith.constant 0 : index
    %114 = tpu.strided_load %arg7[%c504, %c0_69] {strides = array<i32: 2, 1>} : memref<784x16xf32, #tpu.memory_space<vmem>>, vector<14x16xf32>
    %c505 = arith.constant 505 : index
    %c0_70 = arith.constant 0 : index
    %115 = tpu.strided_load %arg7[%c505, %c0_70] {strides = array<i32: 2, 1>} : memref<784x16xf32, #tpu.memory_space<vmem>>, vector<14x16xf32>
    %116 = arith.maximumf %114, %115 : vector<14x16xf32>
    %c532 = arith.constant 532 : index
    %c0_71 = arith.constant 0 : index
    %117 = tpu.strided_load %arg7[%c532, %c0_71] {strides = array<i32: 2, 1>} : memref<784x16xf32, #tpu.memory_space<vmem>>, vector<14x16xf32>
    %c533 = arith.constant 533 : index
    %c0_72 = arith.constant 0 : index
    %118 = tpu.strided_load %arg7[%c533, %c0_72] {strides = array<i32: 2, 1>} : memref<784x16xf32, #tpu.memory_space<vmem>>, vector<14x16xf32>
    %119 = arith.maximumf %117, %118 : vector<14x16xf32>
    %120 = arith.maximumf %116, %119 : vector<14x16xf32>
    %121 = vector.broadcast %0 : vector<1x16xf32> to vector<14x16xf32>
    %122 = arith.addf %120, %121 : vector<14x16xf32>
    %cst_73 = arith.constant 0.000000e+00 : f32
    %123 = vector.broadcast %cst_73 : f32 to vector<14x16xf32>
    %124 = arith.maximumf %122, %123 : vector<14x16xf32>
    %c126 = arith.constant 126 : index
    %c0_74 = arith.constant 0 : index
    %125 = vector.load %arg8[%c126, %c0_74] : memref<200x16xf32, #tpu.memory_space<vmem>>, vector<14x16xf32>
    tpu.vector_store %arg8[%c126, %c0_74], %124 {strides = array<i32>} : memref<200x16xf32, #tpu.memory_space<vmem>>, vector<14x16xf32>,
    %c560 = arith.constant 560 : index
    %c0_75 = arith.constant 0 : index
    %126 = tpu.strided_load %arg7[%c560, %c0_75] {strides = array<i32: 2, 1>} : memref<784x16xf32, #tpu.memory_space<vmem>>, vector<14x16xf32>
    %c561 = arith.constant 561 : index
    %c0_76 = arith.constant 0 : index
    %127 = tpu.strided_load %arg7[%c561, %c0_76] {strides = array<i32: 2, 1>} : memref<784x16xf32, #tpu.memory_space<vmem>>, vector<14x16xf32>
    %128 = arith.maximumf %126, %127 : vector<14x16xf32>
    %c588 = arith.constant 588 : index
    %c0_77 = arith.constant 0 : index
    %129 = tpu.strided_load %arg7[%c588, %c0_77] {strides = array<i32: 2, 1>} : memref<784x16xf32, #tpu.memory_space<vmem>>, vector<14x16xf32>
    %c589 = arith.constant 589 : index
    %c0_78 = arith.constant 0 : index
    %130 = tpu.strided_load %arg7[%c589, %c0_78] {strides = array<i32: 2, 1>} : memref<784x16xf32, #tpu.memory_space<vmem>>, vector<14x16xf32>
    %131 = arith.maximumf %129, %130 : vector<14x16xf32>
    %132 = arith.maximumf %128, %131 : vector<14x16xf32>
    %133 = vector.broadcast %0 : vector<1x16xf32> to vector<14x16xf32>
    %134 = arith.addf %132, %133 : vector<14x16xf32>
    %cst_79 = arith.constant 0.000000e+00 : f32
    %135 = vector.broadcast %cst_79 : f32 to vector<14x16xf32>
    %136 = arith.maximumf %134, %135 : vector<14x16xf32>
    %c140_80 = arith.constant 140 : index
    %c0_81 = arith.constant 0 : index
    %137 = vector.load %arg8[%c140_80, %c0_81] : memref<200x16xf32, #tpu.memory_space<vmem>>, vector<14x16xf32>
    tpu.vector_store %arg8[%c140_80, %c0_81], %136 {strides = array<i32>} : memref<200x16xf32, #tpu.memory_space<vmem>>, vector<14x16xf32>,
    %c616 = arith.constant 616 : index
    %c0_82 = arith.constant 0 : index
    %138 = tpu.strided_load %arg7[%c616, %c0_82] {strides = array<i32: 2, 1>} : memref<784x16xf32, #tpu.memory_space<vmem>>, vector<14x16xf32>
    %c617 = arith.constant 617 : index
    %c0_83 = arith.constant 0 : index
    %139 = tpu.strided_load %arg7[%c617, %c0_83] {strides = array<i32: 2, 1>} : memref<784x16xf32, #tpu.memory_space<vmem>>, vector<14x16xf32>
    %140 = arith.maximumf %138, %139 : vector<14x16xf32>
    %c644 = arith.constant 644 : index
    %c0_84 = arith.constant 0 : index
    %141 = tpu.strided_load %arg7[%c644, %c0_84] {strides = array<i32: 2, 1>} : memref<784x16xf32, #tpu.memory_space<vmem>>, vector<14x16xf32>
    %c645 = arith.constant 645 : index
    %c0_85 = arith.constant 0 : index
    %142 = tpu.strided_load %arg7[%c645, %c0_85] {strides = array<i32: 2, 1>} : memref<784x16xf32, #tpu.memory_space<vmem>>, vector<14x16xf32>
    %143 = arith.maximumf %141, %142 : vector<14x16xf32>
    %144 = arith.maximumf %140, %143 : vector<14x16xf32>
    %145 = vector.broadcast %0 : vector<1x16xf32> to vector<14x16xf32>
    %146 = arith.addf %144, %145 : vector<14x16xf32>
    %cst_86 = arith.constant 0.000000e+00 : f32
    %147 = vector.broadcast %cst_86 : f32 to vector<14x16xf32>
    %148 = arith.maximumf %146, %147 : vector<14x16xf32>
    %c154 = arith.constant 154 : index
    %c0_87 = arith.constant 0 : index
    %149 = vector.load %arg8[%c154, %c0_87] : memref<200x16xf32, #tpu.memory_space<vmem>>, vector<14x16xf32>
    tpu.vector_store %arg8[%c154, %c0_87], %148 {strides = array<i32>} : memref<200x16xf32, #tpu.memory_space<vmem>>, vector<14x16xf32>,
    %c672 = arith.constant 672 : index
    %c0_88 = arith.constant 0 : index
    %150 = tpu.strided_load %arg7[%c672, %c0_88] {strides = array<i32: 2, 1>} : memref<784x16xf32, #tpu.memory_space<vmem>>, vector<14x16xf32>
    %c673 = arith.constant 673 : index
    %c0_89 = arith.constant 0 : index
    %151 = tpu.strided_load %arg7[%c673, %c0_89] {strides = array<i32: 2, 1>} : memref<784x16xf32, #tpu.memory_space<vmem>>, vector<14x16xf32>
    %152 = arith.maximumf %150, %151 : vector<14x16xf32>
    %c700 = arith.constant 700 : index
    %c0_90 = arith.constant 0 : index
    %153 = tpu.strided_load %arg7[%c700, %c0_90] {strides = array<i32: 2, 1>} : memref<784x16xf32, #tpu.memory_space<vmem>>, vector<14x16xf32>
    %c701 = arith.constant 701 : index
    %c0_91 = arith.constant 0 : index
    %154 = tpu.strided_load %arg7[%c701, %c0_91] {strides = array<i32: 2, 1>} : memref<784x16xf32, #tpu.memory_space<vmem>>, vector<14x16xf32>
    %155 = arith.maximumf %153, %154 : vector<14x16xf32>
    %156 = arith.maximumf %152, %155 : vector<14x16xf32>
    %157 = vector.broadcast %0 : vector<1x16xf32> to vector<14x16xf32>
    %158 = arith.addf %156, %157 : vector<14x16xf32>
    %cst_92 = arith.constant 0.000000e+00 : f32
    %159 = vector.broadcast %cst_92 : f32 to vector<14x16xf32>
    %160 = arith.maximumf %158, %159 : vector<14x16xf32>
    %c168_93 = arith.constant 168 : index
    %c0_94 = arith.constant 0 : index
    %161 = vector.load %arg8[%c168_93, %c0_94] : memref<200x16xf32, #tpu.memory_space<vmem>>, vector<14x16xf32>
    tpu.vector_store %arg8[%c168_93, %c0_94], %160 {strides = array<i32>} : memref<200x16xf32, #tpu.memory_space<vmem>>, vector<14x16xf32>,
    %c728 = arith.constant 728 : index
    %c0_95 = arith.constant 0 : index
    %162 = tpu.strided_load %arg7[%c728, %c0_95] {strides = array<i32: 2, 1>} : memref<784x16xf32, #tpu.memory_space<vmem>>, vector<14x16xf32>
    %c729 = arith.constant 729 : index
    %c0_96 = arith.constant 0 : index
    %163 = tpu.strided_load %arg7[%c729, %c0_96] {strides = array<i32: 2, 1>} : memref<784x16xf32, #tpu.memory_space<vmem>>, vector<14x16xf32>
    %164 = arith.maximumf %162, %163 : vector<14x16xf32>
    %c756 = arith.constant 756 : index
    %c0_97 = arith.constant 0 : index
    %165 = tpu.strided_load %arg7[%c756, %c0_97] {strides = array<i32: 2, 1>} : memref<784x16xf32, #tpu.memory_space<vmem>>, vector<14x16xf32>
    %c757 = arith.constant 757 : index
    %c0_98 = arith.constant 0 : index
    %166 = tpu.strided_load %arg7[%c757, %c0_98] {strides = array<i32: 2, 1>} : memref<784x16xf32, #tpu.memory_space<vmem>>, vector<14x16xf32>
    %167 = arith.maximumf %165, %166 : vector<14x16xf32>
    %168 = arith.maximumf %164, %167 : vector<14x16xf32>
    %169 = vector.broadcast %0 : vector<1x16xf32> to vector<14x16xf32>
    %170 = arith.addf %168, %169 : vector<14x16xf32>
    %cst_99 = arith.constant 0.000000e+00 : f32
    %171 = vector.broadcast %cst_99 : f32 to vector<14x16xf32>
    %172 = arith.maximumf %170, %171 : vector<14x16xf32>
    %c182 = arith.constant 182 : index
    %c0_100 = arith.constant 0 : index
    %173 = vector.load %arg8[%c182, %c0_100] : memref<200x16xf32, #tpu.memory_space<vmem>>, vector<14x16xf32>
    tpu.vector_store %arg8[%c182, %c0_100], %172 {strides = array<i32>} : memref<200x16xf32, #tpu.memory_space<vmem>>, vector<14x16xf32>,
    %cst_101 = arith.constant 0.000000e+00 : f32
    %174 = vector.broadcast %cst_101 : f32 to vector<4x16xf32>
    %c196_102 = arith.constant 196 : index
    %c0_103 = arith.constant 0 : index
    %175 = vector.load %arg8[%c196_102, %c0_103] : memref<200x16xf32, #tpu.memory_space<vmem>>, vector<4x16xf32>
    tpu.vector_store %arg8[%c196_102, %c0_103], %174 {strides = array<i32>} : memref<200x16xf32, #tpu.memory_space<vmem>>, vector<4x16xf32>,
    %c0_104 = arith.constant 0 : index
    %c0_105 = arith.constant 0 : index
    %176 = vector.load %arg8[%c0_104, %c0_105] : memref<200x16xf32, #tpu.memory_space<vmem>>, vector<168x16xf32>
    %c0_106 = arith.constant 0 : index
    %c0_107 = arith.constant 0 : index
    %177 = vector.load %arg9[%c0_106, %c0_107] : memref<168x144xf32, #tpu.memory_space<vmem>>, vector<168x16xf32>
    tpu.vector_store %arg9[%c0_106, %c0_107], %176 {strides = array<i32>} : memref<168x144xf32, #tpu.memory_space<vmem>>, vector<168x16xf32>,
    %c1_108 = arith.constant 1 : index
    %c0_109 = arith.constant 0 : index
    %178 = vector.load %arg8[%c1_108, %c0_109] : memref<200x16xf32, #tpu.memory_space<vmem>>, vector<168x16xf32>
    %c0_110 = arith.constant 0 : index
    %c16 = arith.constant 16 : index
    %179 = vector.load %arg9[%c0_110, %c16] : memref<168x144xf32, #tpu.memory_space<vmem>>, vector<168x16xf32>
    tpu.vector_store %arg9[%c0_110, %c16], %178 {strides = array<i32>} : memref<168x144xf32, #tpu.memory_space<vmem>>, vector<168x16xf32>,
    %c2 = arith.constant 2 : index
    %c0_111 = arith.constant 0 : index
    %180 = vector.load %arg8[%c2, %c0_111] : memref<200x16xf32, #tpu.memory_space<vmem>>, vector<168x16xf32>
    %c0_112 = arith.constant 0 : index
    %c32 = arith.constant 32 : index
    %181 = vector.load %arg9[%c0_112, %c32] : memref<168x144xf32, #tpu.memory_space<vmem>>, vector<168x16xf32>
    tpu.vector_store %arg9[%c0_112, %c32], %180 {strides = array<i32>} : memref<168x144xf32, #tpu.memory_space<vmem>>, vector<168x16xf32>,
    %c14_113 = arith.constant 14 : index
    %c0_114 = arith.constant 0 : index
    %182 = vector.load %arg8[%c14_113, %c0_114] : memref<200x16xf32, #tpu.memory_space<vmem>>, vector<168x16xf32>
    %c0_115 = arith.constant 0 : index
    %c48 = arith.constant 48 : index
    %183 = vector.load %arg9[%c0_115, %c48] : memref<168x144xf32, #tpu.memory_space<vmem>>, vector<168x16xf32>
    tpu.vector_store %arg9[%c0_115, %c48], %182 {strides = array<i32>} : memref<168x144xf32, #tpu.memory_space<vmem>>, vector<168x16xf32>,
    %c15 = arith.constant 15 : index
    %c0_116 = arith.constant 0 : index
    %184 = vector.load %arg8[%c15, %c0_116] : memref<200x16xf32, #tpu.memory_space<vmem>>, vector<168x16xf32>
    %c0_117 = arith.constant 0 : index
    %c64 = arith.constant 64 : index
    %185 = vector.load %arg9[%c0_117, %c64] : memref<168x144xf32, #tpu.memory_space<vmem>>, vector<168x16xf32>
    tpu.vector_store %arg9[%c0_117, %c64], %184 {strides = array<i32>} : memref<168x144xf32, #tpu.memory_space<vmem>>, vector<168x16xf32>,
    %c16_118 = arith.constant 16 : index
    %c0_119 = arith.constant 0 : index
    %186 = vector.load %arg8[%c16_118, %c0_119] : memref<200x16xf32, #tpu.memory_space<vmem>>, vector<168x16xf32>
    %c0_120 = arith.constant 0 : index
    %c80 = arith.constant 80 : index
    %187 = vector.load %arg9[%c0_120, %c80] : memref<168x144xf32, #tpu.memory_space<vmem>>, vector<168x16xf32>
    tpu.vector_store %arg9[%c0_120, %c80], %186 {strides = array<i32>} : memref<168x144xf32, #tpu.memory_space<vmem>>, vector<168x16xf32>,
    %c28_121 = arith.constant 28 : index
    %c0_122 = arith.constant 0 : index
    %188 = vector.load %arg8[%c28_121, %c0_122] : memref<200x16xf32, #tpu.memory_space<vmem>>, vector<168x16xf32>
    %c0_123 = arith.constant 0 : index
    %c96 = arith.constant 96 : index
    %189 = vector.load %arg9[%c0_123, %c96] : memref<168x144xf32, #tpu.memory_space<vmem>>, vector<168x16xf32>
    tpu.vector_store %arg9[%c0_123, %c96], %188 {strides = array<i32>} : memref<168x144xf32, #tpu.memory_space<vmem>>, vector<168x16xf32>,
    %c29_124 = arith.constant 29 : index
    %c0_125 = arith.constant 0 : index
    %190 = vector.load %arg8[%c29_124, %c0_125] : memref<200x16xf32, #tpu.memory_space<vmem>>, vector<168x16xf32>
    %c0_126 = arith.constant 0 : index
    %c112_127 = arith.constant 112 : index
    %191 = vector.load %arg9[%c0_126, %c112_127] : memref<168x144xf32, #tpu.memory_space<vmem>>, vector<168x16xf32>
    tpu.vector_store %arg9[%c0_126, %c112_127], %190 {strides = array<i32>} : memref<168x144xf32, #tpu.memory_space<vmem>>, vector<168x16xf32>,
    %c30 = arith.constant 30 : index
    %c0_128 = arith.constant 0 : index
    %192 = vector.load %arg8[%c30, %c0_128] : memref<200x16xf32, #tpu.memory_space<vmem>>, vector<168x16xf32>
    %c0_129 = arith.constant 0 : index
    %c128 = arith.constant 128 : index
    %193 = vector.load %arg9[%c0_129, %c128] : memref<168x144xf32, #tpu.memory_space<vmem>>, vector<168x16xf32>
    tpu.vector_store %arg9[%c0_129, %c128], %192 {strides = array<i32>} : memref<168x144xf32, #tpu.memory_space<vmem>>, vector<168x16xf32>,
    %c0_130 = arith.constant 0 : index
    %c0_131 = arith.constant 0 : index
    %194 = vector.load %arg9[%c0_130, %c0_131] : memref<168x144xf32, #tpu.memory_space<vmem>>, vector<168x144xf32>
    %c0_132 = arith.constant 0 : index
    %c0_133 = arith.constant 0 : index
    %195 = vector.load %arg4[%c0_132, %c0_133] : memref<144x36xf32, #tpu.memory_space<vmem>>, vector<144x36xf32>
    %cst_134 = arith.constant dense<0.000000e+00> : vector<168x36xf32>
    %196 = tpu.matmul %194, %195, %cst_134 {dimension_numbers = #tpu.dot_dimension_numbers<[1], [0], [0], [1], [0, 0, 1, 1], [], []>} : vector<168x144xf32>, vector<144x36xf32>, vector<168x36xf32> -> vector<168x36xf32>
    %c0_135 = arith.constant 0 : index
    %c0_136 = arith.constant 0 : index
    %197 = vector.load %arg10[%c0_135, %c0_136] : memref<168x36xf32, #tpu.memory_space<vmem>>, vector<168x36xf32>
    tpu.vector_store %arg10[%c0_135, %c0_136], %196 {strides = array<i32>} : memref<168x36xf32, #tpu.memory_space<vmem>>, vector<168x36xf32>,
    %c0_137 = arith.constant 0 : index
    %c0_138 = arith.constant 0 : index
    %198 = tpu.strided_load %arg10[%c0_137, %c0_138] {strides = array<i32: 2, 1>} : memref<168x36xf32, #tpu.memory_space<vmem>>, vector<6x36xf32>
    %c1_139 = arith.constant 1 : index
    %c0_140 = arith.constant 0 : index
    %199 = tpu.strided_load %arg10[%c1_139, %c0_140] {strides = array<i32: 2, 1>} : memref<168x36xf32, #tpu.memory_space<vmem>>, vector<6x36xf32>
    %200 = arith.maximumf %198, %199 : vector<6x36xf32>
    %c14_141 = arith.constant 14 : index
    %c0_142 = arith.constant 0 : index
    %201 = tpu.strided_load %arg10[%c14_141, %c0_142] {strides = array<i32: 2, 1>} : memref<168x36xf32, #tpu.memory_space<vmem>>, vector<6x36xf32>
    %c15_143 = arith.constant 15 : index
    %c0_144 = arith.constant 0 : index
    %202 = tpu.strided_load %arg10[%c15_143, %c0_144] {strides = array<i32: 2, 1>} : memref<168x36xf32, #tpu.memory_space<vmem>>, vector<6x36xf32>
    %203 = arith.maximumf %201, %202 : vector<6x36xf32>
    %204 = arith.maximumf %200, %203 : vector<6x36xf32>
    %205 = vector.broadcast %1 : vector<1x36xf32> to vector<6x36xf32>
    %206 = arith.addf %204, %205 : vector<6x36xf32>
    %cst_145 = arith.constant 0.000000e+00 : f32
    %207 = vector.broadcast %cst_145 : f32 to vector<6x36xf32>
    %208 = arith.maximumf %206, %207 : vector<6x36xf32>
    %c0_146 = arith.constant 0 : index
    %c0_147 = arith.constant 0 : index
    %209 = vector.load %arg6[%c0_146, %c0_147] : memref<72x36xf32, #tpu.memory_space<vmem>>, vector<6x36xf32>
    tpu.vector_store %arg6[%c0_146, %c0_147], %208 {strides = array<i32>} : memref<72x36xf32, #tpu.memory_space<vmem>>, vector<6x36xf32>,
    %c28_148 = arith.constant 28 : index
    %c0_149 = arith.constant 0 : index
    %210 = tpu.strided_load %arg10[%c28_148, %c0_149] {strides = array<i32: 2, 1>} : memref<168x36xf32, #tpu.memory_space<vmem>>, vector<6x36xf32>
    %c29_150 = arith.constant 29 : index
    %c0_151 = arith.constant 0 : index
    %211 = tpu.strided_load %arg10[%c29_150, %c0_151] {strides = array<i32: 2, 1>} : memref<168x36xf32, #tpu.memory_space<vmem>>, vector<6x36xf32>
    %212 = arith.maximumf %210, %211 : vector<6x36xf32>
    %c42_152 = arith.constant 42 : index
    %c0_153 = arith.constant 0 : index
    %213 = tpu.strided_load %arg10[%c42_152, %c0_153] {strides = array<i32: 2, 1>} : memref<168x36xf32, #tpu.memory_space<vmem>>, vector<6x36xf32>
    %c43 = arith.constant 43 : index
    %c0_154 = arith.constant 0 : index
    %214 = tpu.strided_load %arg10[%c43, %c0_154] {strides = array<i32: 2, 1>} : memref<168x36xf32, #tpu.memory_space<vmem>>, vector<6x36xf32>
    %215 = arith.maximumf %213, %214 : vector<6x36xf32>
    %216 = arith.maximumf %212, %215 : vector<6x36xf32>
    %217 = vector.broadcast %1 : vector<1x36xf32> to vector<6x36xf32>
    %218 = arith.addf %216, %217 : vector<6x36xf32>
    %cst_155 = arith.constant 0.000000e+00 : f32
    %219 = vector.broadcast %cst_155 : f32 to vector<6x36xf32>
    %220 = arith.maximumf %218, %219 : vector<6x36xf32>
    %c6 = arith.constant 6 : index
    %c0_156 = arith.constant 0 : index
    %221 = vector.load %arg6[%c6, %c0_156] : memref<72x36xf32, #tpu.memory_space<vmem>>, vector<6x36xf32>
    tpu.vector_store %arg6[%c6, %c0_156], %220 {strides = array<i32>} : memref<72x36xf32, #tpu.memory_space<vmem>>, vector<6x36xf32>,
    %c56_157 = arith.constant 56 : index
    %c0_158 = arith.constant 0 : index
    %222 = tpu.strided_load %arg10[%c56_157, %c0_158] {strides = array<i32: 2, 1>} : memref<168x36xf32, #tpu.memory_space<vmem>>, vector<6x36xf32>
    %c57_159 = arith.constant 57 : index
    %c0_160 = arith.constant 0 : index
    %223 = tpu.strided_load %arg10[%c57_159, %c0_160] {strides = array<i32: 2, 1>} : memref<168x36xf32, #tpu.memory_space<vmem>>, vector<6x36xf32>
    %224 = arith.maximumf %222, %223 : vector<6x36xf32>
    %c70_161 = arith.constant 70 : index
    %c0_162 = arith.constant 0 : index
    %225 = tpu.strided_load %arg10[%c70_161, %c0_162] {strides = array<i32: 2, 1>} : memref<168x36xf32, #tpu.memory_space<vmem>>, vector<6x36xf32>
    %c71 = arith.constant 71 : index
    %c0_163 = arith.constant 0 : index
    %226 = tpu.strided_load %arg10[%c71, %c0_163] {strides = array<i32: 2, 1>} : memref<168x36xf32, #tpu.memory_space<vmem>>, vector<6x36xf32>
    %227 = arith.maximumf %225, %226 : vector<6x36xf32>
    %228 = arith.maximumf %224, %227 : vector<6x36xf32>
    %229 = vector.broadcast %1 : vector<1x36xf32> to vector<6x36xf32>
    %230 = arith.addf %228, %229 : vector<6x36xf32>
    %cst_164 = arith.constant 0.000000e+00 : f32
    %231 = vector.broadcast %cst_164 : f32 to vector<6x36xf32>
    %232 = arith.maximumf %230, %231 : vector<6x36xf32>
    %c12 = arith.constant 12 : index
    %c0_165 = arith.constant 0 : index
    %233 = vector.load %arg6[%c12, %c0_165] : memref<72x36xf32, #tpu.memory_space<vmem>>, vector<6x36xf32>
    tpu.vector_store %arg6[%c12, %c0_165], %232 {strides = array<i32>} : memref<72x36xf32, #tpu.memory_space<vmem>>, vector<6x36xf32>,
    %c84_166 = arith.constant 84 : index
    %c0_167 = arith.constant 0 : index
    %234 = tpu.strided_load %arg10[%c84_166, %c0_167] {strides = array<i32: 2, 1>} : memref<168x36xf32, #tpu.memory_space<vmem>>, vector<6x36xf32>
    %c85_168 = arith.constant 85 : index
    %c0_169 = arith.constant 0 : index
    %235 = tpu.strided_load %arg10[%c85_168, %c0_169] {strides = array<i32: 2, 1>} : memref<168x36xf32, #tpu.memory_space<vmem>>, vector<6x36xf32>
    %236 = arith.maximumf %234, %235 : vector<6x36xf32>
    %c98_170 = arith.constant 98 : index
    %c0_171 = arith.constant 0 : index
    %237 = tpu.strided_load %arg10[%c98_170, %c0_171] {strides = array<i32: 2, 1>} : memref<168x36xf32, #tpu.memory_space<vmem>>, vector<6x36xf32>
    %c99 = arith.constant 99 : index
    %c0_172 = arith.constant 0 : index
    %238 = tpu.strided_load %arg10[%c99, %c0_172] {strides = array<i32: 2, 1>} : memref<168x36xf32, #tpu.memory_space<vmem>>, vector<6x36xf32>
    %239 = arith.maximumf %237, %238 : vector<6x36xf32>
    %240 = arith.maximumf %236, %239 : vector<6x36xf32>
    %241 = vector.broadcast %1 : vector<1x36xf32> to vector<6x36xf32>
    %242 = arith.addf %240, %241 : vector<6x36xf32>
    %cst_173 = arith.constant 0.000000e+00 : f32
    %243 = vector.broadcast %cst_173 : f32 to vector<6x36xf32>
    %244 = arith.maximumf %242, %243 : vector<6x36xf32>
    %c18 = arith.constant 18 : index
    %c0_174 = arith.constant 0 : index
    %245 = vector.load %arg6[%c18, %c0_174] : memref<72x36xf32, #tpu.memory_space<vmem>>, vector<6x36xf32>
    tpu.vector_store %arg6[%c18, %c0_174], %244 {strides = array<i32>} : memref<72x36xf32, #tpu.memory_space<vmem>>, vector<6x36xf32>,
    %c112_175 = arith.constant 112 : index
    %c0_176 = arith.constant 0 : index
    %246 = tpu.strided_load %arg10[%c112_175, %c0_176] {strides = array<i32: 2, 1>} : memref<168x36xf32, #tpu.memory_space<vmem>>, vector<6x36xf32>
    %c113_177 = arith.constant 113 : index
    %c0_178 = arith.constant 0 : index
    %247 = tpu.strided_load %arg10[%c113_177, %c0_178] {strides = array<i32: 2, 1>} : memref<168x36xf32, #tpu.memory_space<vmem>>, vector<6x36xf32>
    %248 = arith.maximumf %246, %247 : vector<6x36xf32>
    %c126_179 = arith.constant 126 : index
    %c0_180 = arith.constant 0 : index
    %249 = tpu.strided_load %arg10[%c126_179, %c0_180] {strides = array<i32: 2, 1>} : memref<168x36xf32, #tpu.memory_space<vmem>>, vector<6x36xf32>
    %c127 = arith.constant 127 : index
    %c0_181 = arith.constant 0 : index
    %250 = tpu.strided_load %arg10[%c127, %c0_181] {strides = array<i32: 2, 1>} : memref<168x36xf32, #tpu.memory_space<vmem>>, vector<6x36xf32>
    %251 = arith.maximumf %249, %250 : vector<6x36xf32>
    %252 = arith.maximumf %248, %251 : vector<6x36xf32>
    %253 = vector.broadcast %1 : vector<1x36xf32> to vector<6x36xf32>
    %254 = arith.addf %252, %253 : vector<6x36xf32>
    %cst_182 = arith.constant 0.000000e+00 : f32
    %255 = vector.broadcast %cst_182 : f32 to vector<6x36xf32>
    %256 = arith.maximumf %254, %255 : vector<6x36xf32>
    %c24 = arith.constant 24 : index
    %c0_183 = arith.constant 0 : index
    %257 = vector.load %arg6[%c24, %c0_183] : memref<72x36xf32, #tpu.memory_space<vmem>>, vector<6x36xf32>
    tpu.vector_store %arg6[%c24, %c0_183], %256 {strides = array<i32>} : memref<72x36xf32, #tpu.memory_space<vmem>>, vector<6x36xf32>,
    %c140_184 = arith.constant 140 : index
    %c0_185 = arith.constant 0 : index
    %258 = tpu.strided_load %arg10[%c140_184, %c0_185] {strides = array<i32: 2, 1>} : memref<168x36xf32, #tpu.memory_space<vmem>>, vector<6x36xf32>
    %c141_186 = arith.constant 141 : index
    %c0_187 = arith.constant 0 : index
    %259 = tpu.strided_load %arg10[%c141_186, %c0_187] {strides = array<i32: 2, 1>} : memref<168x36xf32, #tpu.memory_space<vmem>>, vector<6x36xf32>
    %260 = arith.maximumf %258, %259 : vector<6x36xf32>
    %c154_188 = arith.constant 154 : index
    %c0_189 = arith.constant 0 : index
    %261 = tpu.strided_load %arg10[%c154_188, %c0_189] {strides = array<i32: 2, 1>} : memref<168x36xf32, #tpu.memory_space<vmem>>, vector<6x36xf32>
    %c155 = arith.constant 155 : index
    %c0_190 = arith.constant 0 : index
    %262 = tpu.strided_load %arg10[%c155, %c0_190] {strides = array<i32: 2, 1>} : memref<168x36xf32, #tpu.memory_space<vmem>>, vector<6x36xf32>
    %263 = arith.maximumf %261, %262 : vector<6x36xf32>
    %264 = arith.maximumf %260, %263 : vector<6x36xf32>
    %265 = vector.broadcast %1 : vector<1x36xf32> to vector<6x36xf32>
    %266 = arith.addf %264, %265 : vector<6x36xf32>
    %cst_191 = arith.constant 0.000000e+00 : f32
    %267 = vector.broadcast %cst_191 : f32 to vector<6x36xf32>
    %268 = arith.maximumf %266, %267 : vector<6x36xf32>
    %c30_192 = arith.constant 30 : index
    %c0_193 = arith.constant 0 : index
    %269 = vector.load %arg6[%c30_192, %c0_193] : memref<72x36xf32, #tpu.memory_space<vmem>>, vector<6x36xf32>
    tpu.vector_store %arg6[%c30_192, %c0_193], %268 {strides = array<i32>} : memref<72x36xf32, #tpu.memory_space<vmem>>, vector<6x36xf32>,
    %c784 = arith.constant 784 : index
    %c0_194 = arith.constant 0 : index
    %270 = vector.load %arg1[%c784, %c0_194] : memref<1568x75xf32, #tpu.memory_space<vmem>>, vector<784x75xf32>
    %c0_195 = arith.constant 0 : index
    %c0_196 = arith.constant 0 : index
    %271 = vector.load %arg2[%c0_195, %c0_196] : memref<75x16xf32, #tpu.memory_space<vmem>>, vector<75x16xf32>
    %cst_197 = arith.constant dense<0.000000e+00> : vector<784x16xf32>
    %272 = tpu.matmul %270, %271, %cst_197 {dimension_numbers = #tpu.dot_dimension_numbers<[1], [0], [0], [1], [0, 0, 1, 1], [], []>} : vector<784x75xf32>, vector<75x16xf32>, vector<784x16xf32> -> vector<784x16xf32>
    %c0_198 = arith.constant 0 : index
    %c0_199 = arith.constant 0 : index
    %273 = vector.load %arg7[%c0_198, %c0_199] : memref<784x16xf32, #tpu.memory_space<vmem>>, vector<784x16xf32>
    tpu.vector_store %arg7[%c0_198, %c0_199], %272 {strides = array<i32>} : memref<784x16xf32, #tpu.memory_space<vmem>>, vector<784x16xf32>,
    %c0_200 = arith.constant 0 : index
    %c0_201 = arith.constant 0 : index
    %274 = tpu.strided_load %arg7[%c0_200, %c0_201] {strides = array<i32: 2, 1>} : memref<784x16xf32, #tpu.memory_space<vmem>>, vector<14x16xf32>
    %c1_202 = arith.constant 1 : index
    %c0_203 = arith.constant 0 : index
    %275 = tpu.strided_load %arg7[%c1_202, %c0_203] {strides = array<i32: 2, 1>} : memref<784x16xf32, #tpu.memory_space<vmem>>, vector<14x16xf32>
    %276 = arith.maximumf %274, %275 : vector<14x16xf32>
    %c28_204 = arith.constant 28 : index
    %c0_205 = arith.constant 0 : index
    %277 = tpu.strided_load %arg7[%c28_204, %c0_205] {strides = array<i32: 2, 1>} : memref<784x16xf32, #tpu.memory_space<vmem>>, vector<14x16xf32>
    %c29_206 = arith.constant 29 : index
    %c0_207 = arith.constant 0 : index
    %278 = tpu.strided_load %arg7[%c29_206, %c0_207] {strides = array<i32: 2, 1>} : memref<784x16xf32, #tpu.memory_space<vmem>>, vector<14x16xf32>
    %279 = arith.maximumf %277, %278 : vector<14x16xf32>
    %280 = arith.maximumf %276, %279 : vector<14x16xf32>
    %281 = vector.broadcast %0 : vector<1x16xf32> to vector<14x16xf32>
    %282 = arith.addf %280, %281 : vector<14x16xf32>
    %cst_208 = arith.constant 0.000000e+00 : f32
    %283 = vector.broadcast %cst_208 : f32 to vector<14x16xf32>
    %284 = arith.maximumf %282, %283 : vector<14x16xf32>
    %c0_209 = arith.constant 0 : index
    %c0_210 = arith.constant 0 : index
    %285 = vector.load %arg8[%c0_209, %c0_210] : memref<200x16xf32, #tpu.memory_space<vmem>>, vector<14x16xf32>
    tpu.vector_store %arg8[%c0_209, %c0_210], %284 {strides = array<i32>} : memref<200x16xf32, #tpu.memory_space<vmem>>, vector<14x16xf32>,
    %c56_211 = arith.constant 56 : index
    %c0_212 = arith.constant 0 : index
    %286 = tpu.strided_load %arg7[%c56_211, %c0_212] {strides = array<i32: 2, 1>} : memref<784x16xf32, #tpu.memory_space<vmem>>, vector<14x16xf32>
    %c57_213 = arith.constant 57 : index
    %c0_214 = arith.constant 0 : index
    %287 = tpu.strided_load %arg7[%c57_213, %c0_214] {strides = array<i32: 2, 1>} : memref<784x16xf32, #tpu.memory_space<vmem>>, vector<14x16xf32>
    %288 = arith.maximumf %286, %287 : vector<14x16xf32>
    %c84_215 = arith.constant 84 : index
    %c0_216 = arith.constant 0 : index
    %289 = tpu.strided_load %arg7[%c84_215, %c0_216] {strides = array<i32: 2, 1>} : memref<784x16xf32, #tpu.memory_space<vmem>>, vector<14x16xf32>
    %c85_217 = arith.constant 85 : index
    %c0_218 = arith.constant 0 : index
    %290 = tpu.strided_load %arg7[%c85_217, %c0_218] {strides = array<i32: 2, 1>} : memref<784x16xf32, #tpu.memory_space<vmem>>, vector<14x16xf32>
    %291 = arith.maximumf %289, %290 : vector<14x16xf32>
    %292 = arith.maximumf %288, %291 : vector<14x16xf32>
    %293 = vector.broadcast %0 : vector<1x16xf32> to vector<14x16xf32>
    %294 = arith.addf %292, %293 : vector<14x16xf32>
    %cst_219 = arith.constant 0.000000e+00 : f32
    %295 = vector.broadcast %cst_219 : f32 to vector<14x16xf32>
    %296 = arith.maximumf %294, %295 : vector<14x16xf32>
    %c14_220 = arith.constant 14 : index
    %c0_221 = arith.constant 0 : index
    %297 = vector.load %arg8[%c14_220, %c0_221] : memref<200x16xf32, #tpu.memory_space<vmem>>, vector<14x16xf32>
    tpu.vector_store %arg8[%c14_220, %c0_221], %296 {strides = array<i32>} : memref<200x16xf32, #tpu.memory_space<vmem>>, vector<14x16xf32>,
    %c112_222 = arith.constant 112 : index
    %c0_223 = arith.constant 0 : index
    %298 = tpu.strided_load %arg7[%c112_222, %c0_223] {strides = array<i32: 2, 1>} : memref<784x16xf32, #tpu.memory_space<vmem>>, vector<14x16xf32>
    %c113_224 = arith.constant 113 : index
    %c0_225 = arith.constant 0 : index
    %299 = tpu.strided_load %arg7[%c113_224, %c0_225] {strides = array<i32: 2, 1>} : memref<784x16xf32, #tpu.memory_space<vmem>>, vector<14x16xf32>
    %300 = arith.maximumf %298, %299 : vector<14x16xf32>
    %c140_226 = arith.constant 140 : index
    %c0_227 = arith.constant 0 : index
    %301 = tpu.strided_load %arg7[%c140_226, %c0_227] {strides = array<i32: 2, 1>} : memref<784x16xf32, #tpu.memory_space<vmem>>, vector<14x16xf32>
    %c141_228 = arith.constant 141 : index
    %c0_229 = arith.constant 0 : index
    %302 = tpu.strided_load %arg7[%c141_228, %c0_229] {strides = array<i32: 2, 1>} : memref<784x16xf32, #tpu.memory_space<vmem>>, vector<14x16xf32>
    %303 = arith.maximumf %301, %302 : vector<14x16xf32>
    %304 = arith.maximumf %300, %303 : vector<14x16xf32>
    %305 = vector.broadcast %0 : vector<1x16xf32> to vector<14x16xf32>
    %306 = arith.addf %304, %305 : vector<14x16xf32>
    %cst_230 = arith.constant 0.000000e+00 : f32
    %307 = vector.broadcast %cst_230 : f32 to vector<14x16xf32>
    %308 = arith.maximumf %306, %307 : vector<14x16xf32>
    %c28_231 = arith.constant 28 : index
    %c0_232 = arith.constant 0 : index
    %309 = vector.load %arg8[%c28_231, %c0_232] : memref<200x16xf32, #tpu.memory_space<vmem>>, vector<14x16xf32>
    tpu.vector_store %arg8[%c28_231, %c0_232], %308 {strides = array<i32>} : memref<200x16xf32, #tpu.memory_space<vmem>>, vector<14x16xf32>,
    %c168_233 = arith.constant 168 : index
    %c0_234 = arith.constant 0 : index
    %310 = tpu.strided_load %arg7[%c168_233, %c0_234] {strides = array<i32: 2, 1>} : memref<784x16xf32, #tpu.memory_space<vmem>>, vector<14x16xf32>
    %c169_235 = arith.constant 169 : index
    %c0_236 = arith.constant 0 : index
    %311 = tpu.strided_load %arg7[%c169_235, %c0_236] {strides = array<i32: 2, 1>} : memref<784x16xf32, #tpu.memory_space<vmem>>, vector<14x16xf32>
    %312 = arith.maximumf %310, %311 : vector<14x16xf32>
    %c196_237 = arith.constant 196 : index
    %c0_238 = arith.constant 0 : index
    %313 = tpu.strided_load %arg7[%c196_237, %c0_238] {strides = array<i32: 2, 1>} : memref<784x16xf32, #tpu.memory_space<vmem>>, vector<14x16xf32>
    %c197_239 = arith.constant 197 : index
    %c0_240 = arith.constant 0 : index
    %314 = tpu.strided_load %arg7[%c197_239, %c0_240] {strides = array<i32: 2, 1>} : memref<784x16xf32, #tpu.memory_space<vmem>>, vector<14x16xf32>
    %315 = arith.maximumf %313, %314 : vector<14x16xf32>
    %316 = arith.maximumf %312, %315 : vector<14x16xf32>
    %317 = vector.broadcast %0 : vector<1x16xf32> to vector<14x16xf32>
    %318 = arith.addf %316, %317 : vector<14x16xf32>
    %cst_241 = arith.constant 0.000000e+00 : f32
    %319 = vector.broadcast %cst_241 : f32 to vector<14x16xf32>
    %320 = arith.maximumf %318, %319 : vector<14x16xf32>
    %c42_242 = arith.constant 42 : index
    %c0_243 = arith.constant 0 : index
    %321 = vector.load %arg8[%c42_242, %c0_243] : memref<200x16xf32, #tpu.memory_space<vmem>>, vector<14x16xf32>
    tpu.vector_store %arg8[%c42_242, %c0_243], %320 {strides = array<i32>} : memref<200x16xf32, #tpu.memory_space<vmem>>, vector<14x16xf32>,
    %c224_244 = arith.constant 224 : index
    %c0_245 = arith.constant 0 : index
    %322 = tpu.strided_load %arg7[%c224_244, %c0_245] {strides = array<i32: 2, 1>} : memref<784x16xf32, #tpu.memory_space<vmem>>, vector<14x16xf32>
    %c225_246 = arith.constant 225 : index
    %c0_247 = arith.constant 0 : index
    %323 = tpu.strided_load %arg7[%c225_246, %c0_247] {strides = array<i32: 2, 1>} : memref<784x16xf32, #tpu.memory_space<vmem>>, vector<14x16xf32>
    %324 = arith.maximumf %322, %323 : vector<14x16xf32>
    %c252_248 = arith.constant 252 : index
    %c0_249 = arith.constant 0 : index
    %325 = tpu.strided_load %arg7[%c252_248, %c0_249] {strides = array<i32: 2, 1>} : memref<784x16xf32, #tpu.memory_space<vmem>>, vector<14x16xf32>
    %c253_250 = arith.constant 253 : index
    %c0_251 = arith.constant 0 : index
    %326 = tpu.strided_load %arg7[%c253_250, %c0_251] {strides = array<i32: 2, 1>} : memref<784x16xf32, #tpu.memory_space<vmem>>, vector<14x16xf32>
    %327 = arith.maximumf %325, %326 : vector<14x16xf32>
    %328 = arith.maximumf %324, %327 : vector<14x16xf32>
    %329 = vector.broadcast %0 : vector<1x16xf32> to vector<14x16xf32>
    %330 = arith.addf %328, %329 : vector<14x16xf32>
    %cst_252 = arith.constant 0.000000e+00 : f32
    %331 = vector.broadcast %cst_252 : f32 to vector<14x16xf32>
    %332 = arith.maximumf %330, %331 : vector<14x16xf32>
    %c56_253 = arith.constant 56 : index
    %c0_254 = arith.constant 0 : index
    %333 = vector.load %arg8[%c56_253, %c0_254] : memref<200x16xf32, #tpu.memory_space<vmem>>, vector<14x16xf32>
    tpu.vector_store %arg8[%c56_253, %c0_254], %332 {strides = array<i32>} : memref<200x16xf32, #tpu.memory_space<vmem>>, vector<14x16xf32>,
    %c280_255 = arith.constant 280 : index
    %c0_256 = arith.constant 0 : index
    %334 = tpu.strided_load %arg7[%c280_255, %c0_256] {strides = array<i32: 2, 1>} : memref<784x16xf32, #tpu.memory_space<vmem>>, vector<14x16xf32>
    %c281_257 = arith.constant 281 : index
    %c0_258 = arith.constant 0 : index
    %335 = tpu.strided_load %arg7[%c281_257, %c0_258] {strides = array<i32: 2, 1>} : memref<784x16xf32, #tpu.memory_space<vmem>>, vector<14x16xf32>
    %336 = arith.maximumf %334, %335 : vector<14x16xf32>
    %c308_259 = arith.constant 308 : index
    %c0_260 = arith.constant 0 : index
    %337 = tpu.strided_load %arg7[%c308_259, %c0_260] {strides = array<i32: 2, 1>} : memref<784x16xf32, #tpu.memory_space<vmem>>, vector<14x16xf32>
    %c309_261 = arith.constant 309 : index
    %c0_262 = arith.constant 0 : index
    %338 = tpu.strided_load %arg7[%c309_261, %c0_262] {strides = array<i32: 2, 1>} : memref<784x16xf32, #tpu.memory_space<vmem>>, vector<14x16xf32>
    %339 = arith.maximumf %337, %338 : vector<14x16xf32>
    %340 = arith.maximumf %336, %339 : vector<14x16xf32>
    %341 = vector.broadcast %0 : vector<1x16xf32> to vector<14x16xf32>
    %342 = arith.addf %340, %341 : vector<14x16xf32>
    %cst_263 = arith.constant 0.000000e+00 : f32
    %343 = vector.broadcast %cst_263 : f32 to vector<14x16xf32>
    %344 = arith.maximumf %342, %343 : vector<14x16xf32>
    %c70_264 = arith.constant 70 : index
    %c0_265 = arith.constant 0 : index
    %345 = vector.load %arg8[%c70_264, %c0_265] : memref<200x16xf32, #tpu.memory_space<vmem>>, vector<14x16xf32>
    tpu.vector_store %arg8[%c70_264, %c0_265], %344 {strides = array<i32>} : memref<200x16xf32, #tpu.memory_space<vmem>>, vector<14x16xf32>,
    %c336_266 = arith.constant 336 : index
    %c0_267 = arith.constant 0 : index
    %346 = tpu.strided_load %arg7[%c336_266, %c0_267] {strides = array<i32: 2, 1>} : memref<784x16xf32, #tpu.memory_space<vmem>>, vector<14x16xf32>
    %c337_268 = arith.constant 337 : index
    %c0_269 = arith.constant 0 : index
    %347 = tpu.strided_load %arg7[%c337_268, %c0_269] {strides = array<i32: 2, 1>} : memref<784x16xf32, #tpu.memory_space<vmem>>, vector<14x16xf32>
    %348 = arith.maximumf %346, %347 : vector<14x16xf32>
    %c364_270 = arith.constant 364 : index
    %c0_271 = arith.constant 0 : index
    %349 = tpu.strided_load %arg7[%c364_270, %c0_271] {strides = array<i32: 2, 1>} : memref<784x16xf32, #tpu.memory_space<vmem>>, vector<14x16xf32>
    %c365_272 = arith.constant 365 : index
    %c0_273 = arith.constant 0 : index
    %350 = tpu.strided_load %arg7[%c365_272, %c0_273] {strides = array<i32: 2, 1>} : memref<784x16xf32, #tpu.memory_space<vmem>>, vector<14x16xf32>
    %351 = arith.maximumf %349, %350 : vector<14x16xf32>
    %352 = arith.maximumf %348, %351 : vector<14x16xf32>
    %353 = vector.broadcast %0 : vector<1x16xf32> to vector<14x16xf32>
    %354 = arith.addf %352, %353 : vector<14x16xf32>
    %cst_274 = arith.constant 0.000000e+00 : f32
    %355 = vector.broadcast %cst_274 : f32 to vector<14x16xf32>
    %356 = arith.maximumf %354, %355 : vector<14x16xf32>
    %c84_275 = arith.constant 84 : index
    %c0_276 = arith.constant 0 : index
    %357 = vector.load %arg8[%c84_275, %c0_276] : memref<200x16xf32, #tpu.memory_space<vmem>>, vector<14x16xf32>
    tpu.vector_store %arg8[%c84_275, %c0_276], %356 {strides = array<i32>} : memref<200x16xf32, #tpu.memory_space<vmem>>, vector<14x16xf32>,
    %c392_277 = arith.constant 392 : index
    %c0_278 = arith.constant 0 : index
    %358 = tpu.strided_load %arg7[%c392_277, %c0_278] {strides = array<i32: 2, 1>} : memref<784x16xf32, #tpu.memory_space<vmem>>, vector<14x16xf32>
    %c393_279 = arith.constant 393 : index
    %c0_280 = arith.constant 0 : index
    %359 = tpu.strided_load %arg7[%c393_279, %c0_280] {strides = array<i32: 2, 1>} : memref<784x16xf32, #tpu.memory_space<vmem>>, vector<14x16xf32>
    %360 = arith.maximumf %358, %359 : vector<14x16xf32>
    %c420_281 = arith.constant 420 : index
    %c0_282 = arith.constant 0 : index
    %361 = tpu.strided_load %arg7[%c420_281, %c0_282] {strides = array<i32: 2, 1>} : memref<784x16xf32, #tpu.memory_space<vmem>>, vector<14x16xf32>
    %c421_283 = arith.constant 421 : index
    %c0_284 = arith.constant 0 : index
    %362 = tpu.strided_load %arg7[%c421_283, %c0_284] {strides = array<i32: 2, 1>} : memref<784x16xf32, #tpu.memory_space<vmem>>, vector<14x16xf32>
    %363 = arith.maximumf %361, %362 : vector<14x16xf32>
    %364 = arith.maximumf %360, %363 : vector<14x16xf32>
    %365 = vector.broadcast %0 : vector<1x16xf32> to vector<14x16xf32>
    %366 = arith.addf %364, %365 : vector<14x16xf32>
    %cst_285 = arith.constant 0.000000e+00 : f32
    %367 = vector.broadcast %cst_285 : f32 to vector<14x16xf32>
    %368 = arith.maximumf %366, %367 : vector<14x16xf32>
    %c98_286 = arith.constant 98 : index
    %c0_287 = arith.constant 0 : index
    %369 = vector.load %arg8[%c98_286, %c0_287] : memref<200x16xf32, #tpu.memory_space<vmem>>, vector<14x16xf32>
    tpu.vector_store %arg8[%c98_286, %c0_287], %368 {strides = array<i32>} : memref<200x16xf32, #tpu.memory_space<vmem>>, vector<14x16xf32>,
    %c448_288 = arith.constant 448 : index
    %c0_289 = arith.constant 0 : index
    %370 = tpu.strided_load %arg7[%c448_288, %c0_289] {strides = array<i32: 2, 1>} : memref<784x16xf32, #tpu.memory_space<vmem>>, vector<14x16xf32>
    %c449_290 = arith.constant 449 : index
    %c0_291 = arith.constant 0 : index
    %371 = tpu.strided_load %arg7[%c449_290, %c0_291] {strides = array<i32: 2, 1>} : memref<784x16xf32, #tpu.memory_space<vmem>>, vector<14x16xf32>
    %372 = arith.maximumf %370, %371 : vector<14x16xf32>
    %c476_292 = arith.constant 476 : index
    %c0_293 = arith.constant 0 : index
    %373 = tpu.strided_load %arg7[%c476_292, %c0_293] {strides = array<i32: 2, 1>} : memref<784x16xf32, #tpu.memory_space<vmem>>, vector<14x16xf32>
    %c477_294 = arith.constant 477 : index
    %c0_295 = arith.constant 0 : index
    %374 = tpu.strided_load %arg7[%c477_294, %c0_295] {strides = array<i32: 2, 1>} : memref<784x16xf32, #tpu.memory_space<vmem>>, vector<14x16xf32>
    %375 = arith.maximumf %373, %374 : vector<14x16xf32>
    %376 = arith.maximumf %372, %375 : vector<14x16xf32>
    %377 = vector.broadcast %0 : vector<1x16xf32> to vector<14x16xf32>
    %378 = arith.addf %376, %377 : vector<14x16xf32>
    %cst_296 = arith.constant 0.000000e+00 : f32
    %379 = vector.broadcast %cst_296 : f32 to vector<14x16xf32>
    %380 = arith.maximumf %378, %379 : vector<14x16xf32>
    %c112_297 = arith.constant 112 : index
    %c0_298 = arith.constant 0 : index
    %381 = vector.load %arg8[%c112_297, %c0_298] : memref<200x16xf32, #tpu.memory_space<vmem>>, vector<14x16xf32>
    tpu.vector_store %arg8[%c112_297, %c0_298], %380 {strides = array<i32>} : memref<200x16xf32, #tpu.memory_space<vmem>>, vector<14x16xf32>,
    %c504_299 = arith.constant 504 : index
    %c0_300 = arith.constant 0 : index
    %382 = tpu.strided_load %arg7[%c504_299, %c0_300] {strides = array<i32: 2, 1>} : memref<784x16xf32, #tpu.memory_space<vmem>>, vector<14x16xf32>
    %c505_301 = arith.constant 505 : index
    %c0_302 = arith.constant 0 : index
    %383 = tpu.strided_load %arg7[%c505_301, %c0_302] {strides = array<i32: 2, 1>} : memref<784x16xf32, #tpu.memory_space<vmem>>, vector<14x16xf32>
    %384 = arith.maximumf %382, %383 : vector<14x16xf32>
    %c532_303 = arith.constant 532 : index
    %c0_304 = arith.constant 0 : index
    %385 = tpu.strided_load %arg7[%c532_303, %c0_304] {strides = array<i32: 2, 1>} : memref<784x16xf32, #tpu.memory_space<vmem>>, vector<14x16xf32>
    %c533_305 = arith.constant 533 : index
    %c0_306 = arith.constant 0 : index
    %386 = tpu.strided_load %arg7[%c533_305, %c0_306] {strides = array<i32: 2, 1>} : memref<784x16xf32, #tpu.memory_space<vmem>>, vector<14x16xf32>
    %387 = arith.maximumf %385, %386 : vector<14x16xf32>
    %388 = arith.maximumf %384, %387 : vector<14x16xf32>
    %389 = vector.broadcast %0 : vector<1x16xf32> to vector<14x16xf32>
    %390 = arith.addf %388, %389 : vector<14x16xf32>
    %cst_307 = arith.constant 0.000000e+00 : f32
    %391 = vector.broadcast %cst_307 : f32 to vector<14x16xf32>
    %392 = arith.maximumf %390, %391 : vector<14x16xf32>
    %c126_308 = arith.constant 126 : index
    %c0_309 = arith.constant 0 : index
    %393 = vector.load %arg8[%c126_308, %c0_309] : memref<200x16xf32, #tpu.memory_space<vmem>>, vector<14x16xf32>
    tpu.vector_store %arg8[%c126_308, %c0_309], %392 {strides = array<i32>} : memref<200x16xf32, #tpu.memory_space<vmem>>, vector<14x16xf32>,
    %c560_310 = arith.constant 560 : index
    %c0_311 = arith.constant 0 : index
    %394 = tpu.strided_load %arg7[%c560_310, %c0_311] {strides = array<i32: 2, 1>} : memref<784x16xf32, #tpu.memory_space<vmem>>, vector<14x16xf32>
    %c561_312 = arith.constant 561 : index
    %c0_313 = arith.constant 0 : index
    %395 = tpu.strided_load %arg7[%c561_312, %c0_313] {strides = array<i32: 2, 1>} : memref<784x16xf32, #tpu.memory_space<vmem>>, vector<14x16xf32>
    %396 = arith.maximumf %394, %395 : vector<14x16xf32>
    %c588_314 = arith.constant 588 : index
    %c0_315 = arith.constant 0 : index
    %397 = tpu.strided_load %arg7[%c588_314, %c0_315] {strides = array<i32: 2, 1>} : memref<784x16xf32, #tpu.memory_space<vmem>>, vector<14x16xf32>
    %c589_316 = arith.constant 589 : index
    %c0_317 = arith.constant 0 : index
    %398 = tpu.strided_load %arg7[%c589_316, %c0_317] {strides = array<i32: 2, 1>} : memref<784x16xf32, #tpu.memory_space<vmem>>, vector<14x16xf32>
    %399 = arith.maximumf %397, %398 : vector<14x16xf32>
    %400 = arith.maximumf %396, %399 : vector<14x16xf32>
    %401 = vector.broadcast %0 : vector<1x16xf32> to vector<14x16xf32>
    %402 = arith.addf %400, %401 : vector<14x16xf32>
    %cst_318 = arith.constant 0.000000e+00 : f32
    %403 = vector.broadcast %cst_318 : f32 to vector<14x16xf32>
    %404 = arith.maximumf %402, %403 : vector<14x16xf32>
    %c140_319 = arith.constant 140 : index
    %c0_320 = arith.constant 0 : index
    %405 = vector.load %arg8[%c140_319, %c0_320] : memref<200x16xf32, #tpu.memory_space<vmem>>, vector<14x16xf32>
    tpu.vector_store %arg8[%c140_319, %c0_320], %404 {strides = array<i32>} : memref<200x16xf32, #tpu.memory_space<vmem>>, vector<14x16xf32>,
    %c616_321 = arith.constant 616 : index
    %c0_322 = arith.constant 0 : index
    %406 = tpu.strided_load %arg7[%c616_321, %c0_322] {strides = array<i32: 2, 1>} : memref<784x16xf32, #tpu.memory_space<vmem>>, vector<14x16xf32>
    %c617_323 = arith.constant 617 : index
    %c0_324 = arith.constant 0 : index
    %407 = tpu.strided_load %arg7[%c617_323, %c0_324] {strides = array<i32: 2, 1>} : memref<784x16xf32, #tpu.memory_space<vmem>>, vector<14x16xf32>
    %408 = arith.maximumf %406, %407 : vector<14x16xf32>
    %c644_325 = arith.constant 644 : index
    %c0_326 = arith.constant 0 : index
    %409 = tpu.strided_load %arg7[%c644_325, %c0_326] {strides = array<i32: 2, 1>} : memref<784x16xf32, #tpu.memory_space<vmem>>, vector<14x16xf32>
    %c645_327 = arith.constant 645 : index
    %c0_328 = arith.constant 0 : index
    %410 = tpu.strided_load %arg7[%c645_327, %c0_328] {strides = array<i32: 2, 1>} : memref<784x16xf32, #tpu.memory_space<vmem>>, vector<14x16xf32>
    %411 = arith.maximumf %409, %410 : vector<14x16xf32>
    %412 = arith.maximumf %408, %411 : vector<14x16xf32>
    %413 = vector.broadcast %0 : vector<1x16xf32> to vector<14x16xf32>
    %414 = arith.addf %412, %413 : vector<14x16xf32>
    %cst_329 = arith.constant 0.000000e+00 : f32
    %415 = vector.broadcast %cst_329 : f32 to vector<14x16xf32>
    %416 = arith.maximumf %414, %415 : vector<14x16xf32>
    %c154_330 = arith.constant 154 : index
    %c0_331 = arith.constant 0 : index
    %417 = vector.load %arg8[%c154_330, %c0_331] : memref<200x16xf32, #tpu.memory_space<vmem>>, vector<14x16xf32>
    tpu.vector_store %arg8[%c154_330, %c0_331], %416 {strides = array<i32>} : memref<200x16xf32, #tpu.memory_space<vmem>>, vector<14x16xf32>,
    %c672_332 = arith.constant 672 : index
    %c0_333 = arith.constant 0 : index
    %418 = tpu.strided_load %arg7[%c672_332, %c0_333] {strides = array<i32: 2, 1>} : memref<784x16xf32, #tpu.memory_space<vmem>>, vector<14x16xf32>
    %c673_334 = arith.constant 673 : index
    %c0_335 = arith.constant 0 : index
    %419 = tpu.strided_load %arg7[%c673_334, %c0_335] {strides = array<i32: 2, 1>} : memref<784x16xf32, #tpu.memory_space<vmem>>, vector<14x16xf32>
    %420 = arith.maximumf %418, %419 : vector<14x16xf32>
    %c700_336 = arith.constant 700 : index
    %c0_337 = arith.constant 0 : index
    %421 = tpu.strided_load %arg7[%c700_336, %c0_337] {strides = array<i32: 2, 1>} : memref<784x16xf32, #tpu.memory_space<vmem>>, vector<14x16xf32>
    %c701_338 = arith.constant 701 : index
    %c0_339 = arith.constant 0 : index
    %422 = tpu.strided_load %arg7[%c701_338, %c0_339] {strides = array<i32: 2, 1>} : memref<784x16xf32, #tpu.memory_space<vmem>>, vector<14x16xf32>
    %423 = arith.maximumf %421, %422 : vector<14x16xf32>
    %424 = arith.maximumf %420, %423 : vector<14x16xf32>
    %425 = vector.broadcast %0 : vector<1x16xf32> to vector<14x16xf32>
    %426 = arith.addf %424, %425 : vector<14x16xf32>
    %cst_340 = arith.constant 0.000000e+00 : f32
    %427 = vector.broadcast %cst_340 : f32 to vector<14x16xf32>
    %428 = arith.maximumf %426, %427 : vector<14x16xf32>
    %c168_341 = arith.constant 168 : index
    %c0_342 = arith.constant 0 : index
    %429 = vector.load %arg8[%c168_341, %c0_342] : memref<200x16xf32, #tpu.memory_space<vmem>>, vector<14x16xf32>
    tpu.vector_store %arg8[%c168_341, %c0_342], %428 {strides = array<i32>} : memref<200x16xf32, #tpu.memory_space<vmem>>, vector<14x16xf32>,
    %c728_343 = arith.constant 728 : index
    %c0_344 = arith.constant 0 : index
    %430 = tpu.strided_load %arg7[%c728_343, %c0_344] {strides = array<i32: 2, 1>} : memref<784x16xf32, #tpu.memory_space<vmem>>, vector<14x16xf32>
    %c729_345 = arith.constant 729 : index
    %c0_346 = arith.constant 0 : index
    %431 = tpu.strided_load %arg7[%c729_345, %c0_346] {strides = array<i32: 2, 1>} : memref<784x16xf32, #tpu.memory_space<vmem>>, vector<14x16xf32>
    %432 = arith.maximumf %430, %431 : vector<14x16xf32>
    %c756_347 = arith.constant 756 : index
    %c0_348 = arith.constant 0 : index
    %433 = tpu.strided_load %arg7[%c756_347, %c0_348] {strides = array<i32: 2, 1>} : memref<784x16xf32, #tpu.memory_space<vmem>>, vector<14x16xf32>
    %c757_349 = arith.constant 757 : index
    %c0_350 = arith.constant 0 : index
    %434 = tpu.strided_load %arg7[%c757_349, %c0_350] {strides = array<i32: 2, 1>} : memref<784x16xf32, #tpu.memory_space<vmem>>, vector<14x16xf32>
    %435 = arith.maximumf %433, %434 : vector<14x16xf32>
    %436 = arith.maximumf %432, %435 : vector<14x16xf32>
    %437 = vector.broadcast %0 : vector<1x16xf32> to vector<14x16xf32>
    %438 = arith.addf %436, %437 : vector<14x16xf32>
    %cst_351 = arith.constant 0.000000e+00 : f32
    %439 = vector.broadcast %cst_351 : f32 to vector<14x16xf32>
    %440 = arith.maximumf %438, %439 : vector<14x16xf32>
    %c182_352 = arith.constant 182 : index
    %c0_353 = arith.constant 0 : index
    %441 = vector.load %arg8[%c182_352, %c0_353] : memref<200x16xf32, #tpu.memory_space<vmem>>, vector<14x16xf32>
    tpu.vector_store %arg8[%c182_352, %c0_353], %440 {strides = array<i32>} : memref<200x16xf32, #tpu.memory_space<vmem>>, vector<14x16xf32>,
    %cst_354 = arith.constant 0.000000e+00 : f32
    %442 = vector.broadcast %cst_354 : f32 to vector<4x16xf32>
    %c196_355 = arith.constant 196 : index
    %c0_356 = arith.constant 0 : index
    %443 = vector.load %arg8[%c196_355, %c0_356] : memref<200x16xf32, #tpu.memory_space<vmem>>, vector<4x16xf32>
    tpu.vector_store %arg8[%c196_355, %c0_356], %442 {strides = array<i32>} : memref<200x16xf32, #tpu.memory_space<vmem>>, vector<4x16xf32>,
    %c0_357 = arith.constant 0 : index
    %c0_358 = arith.constant 0 : index
    %444 = vector.load %arg8[%c0_357, %c0_358] : memref<200x16xf32, #tpu.memory_space<vmem>>, vector<168x16xf32>
    %c0_359 = arith.constant 0 : index
    %c0_360 = arith.constant 0 : index
    %445 = vector.load %arg9[%c0_359, %c0_360] : memref<168x144xf32, #tpu.memory_space<vmem>>, vector<168x16xf32>
    tpu.vector_store %arg9[%c0_359, %c0_360], %444 {strides = array<i32>} : memref<168x144xf32, #tpu.memory_space<vmem>>, vector<168x16xf32>,
    %c1_361 = arith.constant 1 : index
    %c0_362 = arith.constant 0 : index
    %446 = vector.load %arg8[%c1_361, %c0_362] : memref<200x16xf32, #tpu.memory_space<vmem>>, vector<168x16xf32>
    %c0_363 = arith.constant 0 : index
    %c16_364 = arith.constant 16 : index
    %447 = vector.load %arg9[%c0_363, %c16_364] : memref<168x144xf32, #tpu.memory_space<vmem>>, vector<168x16xf32>
    tpu.vector_store %arg9[%c0_363, %c16_364], %446 {strides = array<i32>} : memref<168x144xf32, #tpu.memory_space<vmem>>, vector<168x16xf32>,
    %c2_365 = arith.constant 2 : index
    %c0_366 = arith.constant 0 : index
    %448 = vector.load %arg8[%c2_365, %c0_366] : memref<200x16xf32, #tpu.memory_space<vmem>>, vector<168x16xf32>
    %c0_367 = arith.constant 0 : index
    %c32_368 = arith.constant 32 : index
    %449 = vector.load %arg9[%c0_367, %c32_368] : memref<168x144xf32, #tpu.memory_space<vmem>>, vector<168x16xf32>
    tpu.vector_store %arg9[%c0_367, %c32_368], %448 {strides = array<i32>} : memref<168x144xf32, #tpu.memory_space<vmem>>, vector<168x16xf32>,
    %c14_369 = arith.constant 14 : index
    %c0_370 = arith.constant 0 : index
    %450 = vector.load %arg8[%c14_369, %c0_370] : memref<200x16xf32, #tpu.memory_space<vmem>>, vector<168x16xf32>
    %c0_371 = arith.constant 0 : index
    %c48_372 = arith.constant 48 : index
    %451 = vector.load %arg9[%c0_371, %c48_372] : memref<168x144xf32, #tpu.memory_space<vmem>>, vector<168x16xf32>
    tpu.vector_store %arg9[%c0_371, %c48_372], %450 {strides = array<i32>} : memref<168x144xf32, #tpu.memory_space<vmem>>, vector<168x16xf32>,
    %c15_373 = arith.constant 15 : index
    %c0_374 = arith.constant 0 : index
    %452 = vector.load %arg8[%c15_373, %c0_374] : memref<200x16xf32, #tpu.memory_space<vmem>>, vector<168x16xf32>
    %c0_375 = arith.constant 0 : index
    %c64_376 = arith.constant 64 : index
    %453 = vector.load %arg9[%c0_375, %c64_376] : memref<168x144xf32, #tpu.memory_space<vmem>>, vector<168x16xf32>
    tpu.vector_store %arg9[%c0_375, %c64_376], %452 {strides = array<i32>} : memref<168x144xf32, #tpu.memory_space<vmem>>, vector<168x16xf32>,
    %c16_377 = arith.constant 16 : index
    %c0_378 = arith.constant 0 : index
    %454 = vector.load %arg8[%c16_377, %c0_378] : memref<200x16xf32, #tpu.memory_space<vmem>>, vector<168x16xf32>
    %c0_379 = arith.constant 0 : index
    %c80_380 = arith.constant 80 : index
    %455 = vector.load %arg9[%c0_379, %c80_380] : memref<168x144xf32, #tpu.memory_space<vmem>>, vector<168x16xf32>
    tpu.vector_store %arg9[%c0_379, %c80_380], %454 {strides = array<i32>} : memref<168x144xf32, #tpu.memory_space<vmem>>, vector<168x16xf32>,
    %c28_381 = arith.constant 28 : index
    %c0_382 = arith.constant 0 : index
    %456 = vector.load %arg8[%c28_381, %c0_382] : memref<200x16xf32, #tpu.memory_space<vmem>>, vector<168x16xf32>
    %c0_383 = arith.constant 0 : index
    %c96_384 = arith.constant 96 : index
    %457 = vector.load %arg9[%c0_383, %c96_384] : memref<168x144xf32, #tpu.memory_space<vmem>>, vector<168x16xf32>
    tpu.vector_store %arg9[%c0_383, %c96_384], %456 {strides = array<i32>} : memref<168x144xf32, #tpu.memory_space<vmem>>, vector<168x16xf32>,
    %c29_385 = arith.constant 29 : index
    %c0_386 = arith.constant 0 : index
    %458 = vector.load %arg8[%c29_385, %c0_386] : memref<200x16xf32, #tpu.memory_space<vmem>>, vector<168x16xf32>
    %c0_387 = arith.constant 0 : index
    %c112_388 = arith.constant 112 : index
    %459 = vector.load %arg9[%c0_387, %c112_388] : memref<168x144xf32, #tpu.memory_space<vmem>>, vector<168x16xf32>
    tpu.vector_store %arg9[%c0_387, %c112_388], %458 {strides = array<i32>} : memref<168x144xf32, #tpu.memory_space<vmem>>, vector<168x16xf32>,
    %c30_389 = arith.constant 30 : index
    %c0_390 = arith.constant 0 : index
    %460 = vector.load %arg8[%c30_389, %c0_390] : memref<200x16xf32, #tpu.memory_space<vmem>>, vector<168x16xf32>
    %c0_391 = arith.constant 0 : index
    %c128_392 = arith.constant 128 : index
    %461 = vector.load %arg9[%c0_391, %c128_392] : memref<168x144xf32, #tpu.memory_space<vmem>>, vector<168x16xf32>
    tpu.vector_store %arg9[%c0_391, %c128_392], %460 {strides = array<i32>} : memref<168x144xf32, #tpu.memory_space<vmem>>, vector<168x16xf32>,
    %c0_393 = arith.constant 0 : index
    %c0_394 = arith.constant 0 : index
    %462 = vector.load %arg9[%c0_393, %c0_394] : memref<168x144xf32, #tpu.memory_space<vmem>>, vector<168x144xf32>
    %c0_395 = arith.constant 0 : index
    %c0_396 = arith.constant 0 : index
    %463 = vector.load %arg4[%c0_395, %c0_396] : memref<144x36xf32, #tpu.memory_space<vmem>>, vector<144x36xf32>
    %cst_397 = arith.constant dense<0.000000e+00> : vector<168x36xf32>
    %464 = tpu.matmul %462, %463, %cst_397 {dimension_numbers = #tpu.dot_dimension_numbers<[1], [0], [0], [1], [0, 0, 1, 1], [], []>} : vector<168x144xf32>, vector<144x36xf32>, vector<168x36xf32> -> vector<168x36xf32>
    %c0_398 = arith.constant 0 : index
    %c0_399 = arith.constant 0 : index
    %465 = vector.load %arg10[%c0_398, %c0_399] : memref<168x36xf32, #tpu.memory_space<vmem>>, vector<168x36xf32>
    tpu.vector_store %arg10[%c0_398, %c0_399], %464 {strides = array<i32>} : memref<168x36xf32, #tpu.memory_space<vmem>>, vector<168x36xf32>,
    %c0_400 = arith.constant 0 : index
    %c0_401 = arith.constant 0 : index
    %466 = tpu.strided_load %arg10[%c0_400, %c0_401] {strides = array<i32: 2, 1>} : memref<168x36xf32, #tpu.memory_space<vmem>>, vector<6x36xf32>
    %c1_402 = arith.constant 1 : index
    %c0_403 = arith.constant 0 : index
    %467 = tpu.strided_load %arg10[%c1_402, %c0_403] {strides = array<i32: 2, 1>} : memref<168x36xf32, #tpu.memory_space<vmem>>, vector<6x36xf32>
    %468 = arith.maximumf %466, %467 : vector<6x36xf32>
    %c14_404 = arith.constant 14 : index
    %c0_405 = arith.constant 0 : index
    %469 = tpu.strided_load %arg10[%c14_404, %c0_405] {strides = array<i32: 2, 1>} : memref<168x36xf32, #tpu.memory_space<vmem>>, vector<6x36xf32>
    %c15_406 = arith.constant 15 : index
    %c0_407 = arith.constant 0 : index
    %470 = tpu.strided_load %arg10[%c15_406, %c0_407] {strides = array<i32: 2, 1>} : memref<168x36xf32, #tpu.memory_space<vmem>>, vector<6x36xf32>
    %471 = arith.maximumf %469, %470 : vector<6x36xf32>
    %472 = arith.maximumf %468, %471 : vector<6x36xf32>
    %473 = vector.broadcast %1 : vector<1x36xf32> to vector<6x36xf32>
    %474 = arith.addf %472, %473 : vector<6x36xf32>
    %cst_408 = arith.constant 0.000000e+00 : f32
    %475 = vector.broadcast %cst_408 : f32 to vector<6x36xf32>
    %476 = arith.maximumf %474, %475 : vector<6x36xf32>
    %c36 = arith.constant 36 : index
    %c0_409 = arith.constant 0 : index
    %477 = vector.load %arg6[%c36, %c0_409] : memref<72x36xf32, #tpu.memory_space<vmem>>, vector<6x36xf32>
    tpu.vector_store %arg6[%c36, %c0_409], %476 {strides = array<i32>} : memref<72x36xf32, #tpu.memory_space<vmem>>, vector<6x36xf32>,
    %c28_410 = arith.constant 28 : index
    %c0_411 = arith.constant 0 : index
    %478 = tpu.strided_load %arg10[%c28_410, %c0_411] {strides = array<i32: 2, 1>} : memref<168x36xf32, #tpu.memory_space<vmem>>, vector<6x36xf32>
    %c29_412 = arith.constant 29 : index
    %c0_413 = arith.constant 0 : index
    %479 = tpu.strided_load %arg10[%c29_412, %c0_413] {strides = array<i32: 2, 1>} : memref<168x36xf32, #tpu.memory_space<vmem>>, vector<6x36xf32>
    %480 = arith.maximumf %478, %479 : vector<6x36xf32>
    %c42_414 = arith.constant 42 : index
    %c0_415 = arith.constant 0 : index
    %481 = tpu.strided_load %arg10[%c42_414, %c0_415] {strides = array<i32: 2, 1>} : memref<168x36xf32, #tpu.memory_space<vmem>>, vector<6x36xf32>
    %c43_416 = arith.constant 43 : index
    %c0_417 = arith.constant 0 : index
    %482 = tpu.strided_load %arg10[%c43_416, %c0_417] {strides = array<i32: 2, 1>} : memref<168x36xf32, #tpu.memory_space<vmem>>, vector<6x36xf32>
    %483 = arith.maximumf %481, %482 : vector<6x36xf32>
    %484 = arith.maximumf %480, %483 : vector<6x36xf32>
    %485 = vector.broadcast %1 : vector<1x36xf32> to vector<6x36xf32>
    %486 = arith.addf %484, %485 : vector<6x36xf32>
    %cst_418 = arith.constant 0.000000e+00 : f32
    %487 = vector.broadcast %cst_418 : f32 to vector<6x36xf32>
    %488 = arith.maximumf %486, %487 : vector<6x36xf32>
    %c42_419 = arith.constant 42 : index
    %c0_420 = arith.constant 0 : index
    %489 = vector.load %arg6[%c42_419, %c0_420] : memref<72x36xf32, #tpu.memory_space<vmem>>, vector<6x36xf32>
    tpu.vector_store %arg6[%c42_419, %c0_420], %488 {strides = array<i32>} : memref<72x36xf32, #tpu.memory_space<vmem>>, vector<6x36xf32>,
    %c56_421 = arith.constant 56 : index
    %c0_422 = arith.constant 0 : index
    %490 = tpu.strided_load %arg10[%c56_421, %c0_422] {strides = array<i32: 2, 1>} : memref<168x36xf32, #tpu.memory_space<vmem>>, vector<6x36xf32>
    %c57_423 = arith.constant 57 : index
    %c0_424 = arith.constant 0 : index
    %491 = tpu.strided_load %arg10[%c57_423, %c0_424] {strides = array<i32: 2, 1>} : memref<168x36xf32, #tpu.memory_space<vmem>>, vector<6x36xf32>
    %492 = arith.maximumf %490, %491 : vector<6x36xf32>
    %c70_425 = arith.constant 70 : index
    %c0_426 = arith.constant 0 : index
    %493 = tpu.strided_load %arg10[%c70_425, %c0_426] {strides = array<i32: 2, 1>} : memref<168x36xf32, #tpu.memory_space<vmem>>, vector<6x36xf32>
    %c71_427 = arith.constant 71 : index
    %c0_428 = arith.constant 0 : index
    %494 = tpu.strided_load %arg10[%c71_427, %c0_428] {strides = array<i32: 2, 1>} : memref<168x36xf32, #tpu.memory_space<vmem>>, vector<6x36xf32>
    %495 = arith.maximumf %493, %494 : vector<6x36xf32>
    %496 = arith.maximumf %492, %495 : vector<6x36xf32>
    %497 = vector.broadcast %1 : vector<1x36xf32> to vector<6x36xf32>
    %498 = arith.addf %496, %497 : vector<6x36xf32>
    %cst_429 = arith.constant 0.000000e+00 : f32
    %499 = vector.broadcast %cst_429 : f32 to vector<6x36xf32>
    %500 = arith.maximumf %498, %499 : vector<6x36xf32>
    %c48_430 = arith.constant 48 : index
    %c0_431 = arith.constant 0 : index
    %501 = vector.load %arg6[%c48_430, %c0_431] : memref<72x36xf32, #tpu.memory_space<vmem>>, vector<6x36xf32>
    tpu.vector_store %arg6[%c48_430, %c0_431], %500 {strides = array<i32>} : memref<72x36xf32, #tpu.memory_space<vmem>>, vector<6x36xf32>,
    %c84_432 = arith.constant 84 : index
    %c0_433 = arith.constant 0 : index
    %502 = tpu.strided_load %arg10[%c84_432, %c0_433] {strides = array<i32: 2, 1>} : memref<168x36xf32, #tpu.memory_space<vmem>>, vector<6x36xf32>
    %c85_434 = arith.constant 85 : index
    %c0_435 = arith.constant 0 : index
    %503 = tpu.strided_load %arg10[%c85_434, %c0_435] {strides = array<i32: 2, 1>} : memref<168x36xf32, #tpu.memory_space<vmem>>, vector<6x36xf32>
    %504 = arith.maximumf %502, %503 : vector<6x36xf32>
    %c98_436 = arith.constant 98 : index
    %c0_437 = arith.constant 0 : index
    %505 = tpu.strided_load %arg10[%c98_436, %c0_437] {strides = array<i32: 2, 1>} : memref<168x36xf32, #tpu.memory_space<vmem>>, vector<6x36xf32>
    %c99_438 = arith.constant 99 : index
    %c0_439 = arith.constant 0 : index
    %506 = tpu.strided_load %arg10[%c99_438, %c0_439] {strides = array<i32: 2, 1>} : memref<168x36xf32, #tpu.memory_space<vmem>>, vector<6x36xf32>
    %507 = arith.maximumf %505, %506 : vector<6x36xf32>
    %508 = arith.maximumf %504, %507 : vector<6x36xf32>
    %509 = vector.broadcast %1 : vector<1x36xf32> to vector<6x36xf32>
    %510 = arith.addf %508, %509 : vector<6x36xf32>
    %cst_440 = arith.constant 0.000000e+00 : f32
    %511 = vector.broadcast %cst_440 : f32 to vector<6x36xf32>
    %512 = arith.maximumf %510, %511 : vector<6x36xf32>
    %c54 = arith.constant 54 : index
    %c0_441 = arith.constant 0 : index
    %513 = vector.load %arg6[%c54, %c0_441] : memref<72x36xf32, #tpu.memory_space<vmem>>, vector<6x36xf32>
    tpu.vector_store %arg6[%c54, %c0_441], %512 {strides = array<i32>} : memref<72x36xf32, #tpu.memory_space<vmem>>, vector<6x36xf32>,
    %c112_442 = arith.constant 112 : index
    %c0_443 = arith.constant 0 : index
    %514 = tpu.strided_load %arg10[%c112_442, %c0_443] {strides = array<i32: 2, 1>} : memref<168x36xf32, #tpu.memory_space<vmem>>, vector<6x36xf32>
    %c113_444 = arith.constant 113 : index
    %c0_445 = arith.constant 0 : index
    %515 = tpu.strided_load %arg10[%c113_444, %c0_445] {strides = array<i32: 2, 1>} : memref<168x36xf32, #tpu.memory_space<vmem>>, vector<6x36xf32>
    %516 = arith.maximumf %514, %515 : vector<6x36xf32>
    %c126_446 = arith.constant 126 : index
    %c0_447 = arith.constant 0 : index
    %517 = tpu.strided_load %arg10[%c126_446, %c0_447] {strides = array<i32: 2, 1>} : memref<168x36xf32, #tpu.memory_space<vmem>>, vector<6x36xf32>
    %c127_448 = arith.constant 127 : index
    %c0_449 = arith.constant 0 : index
    %518 = tpu.strided_load %arg10[%c127_448, %c0_449] {strides = array<i32: 2, 1>} : memref<168x36xf32, #tpu.memory_space<vmem>>, vector<6x36xf32>
    %519 = arith.maximumf %517, %518 : vector<6x36xf32>
    %520 = arith.maximumf %516, %519 : vector<6x36xf32>
    %521 = vector.broadcast %1 : vector<1x36xf32> to vector<6x36xf32>
    %522 = arith.addf %520, %521 : vector<6x36xf32>
    %cst_450 = arith.constant 0.000000e+00 : f32
    %523 = vector.broadcast %cst_450 : f32 to vector<6x36xf32>
    %524 = arith.maximumf %522, %523 : vector<6x36xf32>
    %c60 = arith.constant 60 : index
    %c0_451 = arith.constant 0 : index
    %525 = vector.load %arg6[%c60, %c0_451] : memref<72x36xf32, #tpu.memory_space<vmem>>, vector<6x36xf32>
    tpu.vector_store %arg6[%c60, %c0_451], %524 {strides = array<i32>} : memref<72x36xf32, #tpu.memory_space<vmem>>, vector<6x36xf32>,
    %c140_452 = arith.constant 140 : index
    %c0_453 = arith.constant 0 : index
    %526 = tpu.strided_load %arg10[%c140_452, %c0_453] {strides = array<i32: 2, 1>} : memref<168x36xf32, #tpu.memory_space<vmem>>, vector<6x36xf32>
    %c141_454 = arith.constant 141 : index
    %c0_455 = arith.constant 0 : index
    %527 = tpu.strided_load %arg10[%c141_454, %c0_455] {strides = array<i32: 2, 1>} : memref<168x36xf32, #tpu.memory_space<vmem>>, vector<6x36xf32>
    %528 = arith.maximumf %526, %527 : vector<6x36xf32>
    %c154_456 = arith.constant 154 : index
    %c0_457 = arith.constant 0 : index
    %529 = tpu.strided_load %arg10[%c154_456, %c0_457] {strides = array<i32: 2, 1>} : memref<168x36xf32, #tpu.memory_space<vmem>>, vector<6x36xf32>
    %c155_458 = arith.constant 155 : index
    %c0_459 = arith.constant 0 : index
    %530 = tpu.strided_load %arg10[%c155_458, %c0_459] {strides = array<i32: 2, 1>} : memref<168x36xf32, #tpu.memory_space<vmem>>, vector<6x36xf32>
    %531 = arith.maximumf %529, %530 : vector<6x36xf32>
    %532 = arith.maximumf %528, %531 : vector<6x36xf32>
    %533 = vector.broadcast %1 : vector<1x36xf32> to vector<6x36xf32>
    %534 = arith.addf %532, %533 : vector<6x36xf32>
    %cst_460 = arith.constant 0.000000e+00 : f32
    %535 = vector.broadcast %cst_460 : f32 to vector<6x36xf32>
    %536 = arith.maximumf %534, %535 : vector<6x36xf32>
    %c66 = arith.constant 66 : index
    %c0_461 = arith.constant 0 : index
    %537 = vector.load %arg6[%c66, %c0_461] : memref<72x36xf32, #tpu.memory_space<vmem>>, vector<6x36xf32>
    tpu.vector_store %arg6[%c66, %c0_461], %536 {strides = array<i32>} : memref<72x36xf32, #tpu.memory_space<vmem>>, vector<6x36xf32>,
    return
  }
  func.func @transform_0(%arg0: i32) -> (i32, i32) {
    %c0_i32 = arith.constant 0 : i32
    %c0_i32_0 = arith.constant 0 : i32
    return %arg0, %c0_i32 : i32, i32
  }
  func.func @transform_1(%arg0: i32) -> (i32, i32) {
    %c0_i32 = arith.constant 0 : i32
    %c0_i32_0 = arith.constant 0 : i32
    %c0_i32_1 = arith.constant 0 : i32
    return %c0_i32, %c0_i32_0 : i32, i32
  }
  func.func @transform_2(%arg0: i32) -> (i32, i32) {
    %c0_i32 = arith.constant 0 : i32
    %c0_i32_0 = arith.constant 0 : i32
    %c0_i32_1 = arith.constant 0 : i32
    return %c0_i32, %c0_i32_0 : i32, i32
  }
  func.func @transform_3(%arg0: i32) -> (i32, i32) {
    %c0_i32 = arith.constant 0 : i32
    %c0_i32_0 = arith.constant 0 : i32
    %c0_i32_1 = arith.constant 0 : i32
    return %c0_i32, %c0_i32_0 : i32, i32
  }
  func.func @transform_4(%arg0: i32) -> (i32, i32) {
    %c0_i32 = arith.constant 0 : i32
    %c0_i32_0 = arith.constant 0 : i32
    %c0_i32_1 = arith.constant 0 : i32
    return %c0_i32, %c0_i32_0 : i32, i32
  }
  func.func @transform_5(%arg0: i32) -> (i32, i32) {
    %c0_i32 = arith.constant 0 : i32
    %c0_i32_0 = arith.constant 0 : i32
    return %arg0, %c0_i32 : i32, i32
  }
}

module attributes {stable_mosaic.version = 11 : i64} {
  func.func @_fc_head_kernel(%arg0: i32, %arg1: memref<2x1296xf32, #tpu.memory_space<vmem>>, %arg2: memref<1296x128xf32, #tpu.memory_space<vmem>>, %arg3: memref<1x128xf32, #tpu.memory_space<vmem>>, %arg4: memref<128x128xf32, #tpu.memory_space<vmem>>, %arg5: memref<1x128xf32, #tpu.memory_space<vmem>>, %arg6: memref<2x128xf32, #tpu.memory_space<vmem>>) attributes {dimension_semantics = [#tpu.dimension_semantics<parallel>], iteration_bounds = array<i64: 1>, scalar_prefetch = 0 : i64, scratch_operands = 0 : i64, tpu.core_type = #tpu.core_type<tc>, window_params = [{transform_indices = @transform_0, window_bounds = array<i64: 2, 1296>}, {pipeline_mode = #tpu.pipeline_mode<synchronous>, transform_indices = @transform_1, window_bounds = array<i64: 1296, 128>}, {pipeline_mode = #tpu.pipeline_mode<synchronous>, transform_indices = @transform_2, window_bounds = array<i64: 1, 128>}, {pipeline_mode = #tpu.pipeline_mode<synchronous>, transform_indices = @transform_3, window_bounds = array<i64: 128, 128>}, {pipeline_mode = #tpu.pipeline_mode<synchronous>, transform_indices = @transform_4, window_bounds = array<i64: 1, 128>}, {transform_indices = @transform_5, window_bounds = array<i64: 2, 128>}]} {
    %c0 = arith.constant 0 : index
    %c0_0 = arith.constant 0 : index
    %0 = vector.load %arg1[%c0, %c0_0] : memref<2x1296xf32, #tpu.memory_space<vmem>>, vector<2x1296xf32>
    %c0_1 = arith.constant 0 : index
    %c0_2 = arith.constant 0 : index
    %1 = vector.load %arg2[%c0_1, %c0_2] : memref<1296x128xf32, #tpu.memory_space<vmem>>, vector<1296x128xf32>
    %cst = arith.constant dense<0.000000e+00> : vector<2x128xf32>
    %2 = tpu.matmul %0, %1, %cst {dimension_numbers = #tpu.dot_dimension_numbers<[1], [0], [0], [1], [0, 0, 1, 1], [], []>} : vector<2x1296xf32>, vector<1296x128xf32>, vector<2x128xf32> -> vector<2x128xf32>
    %c0_3 = arith.constant 0 : index
    %c0_4 = arith.constant 0 : index
    %3 = vector.load %arg3[%c0_3, %c0_4] : memref<1x128xf32, #tpu.memory_space<vmem>>, vector<1x128xf32>
    %4 = vector.broadcast %3 : vector<1x128xf32> to vector<2x128xf32>
    %5 = arith.addf %2, %4 : vector<2x128xf32>
    %cst_5 = arith.constant 0.000000e+00 : f32
    %6 = vector.broadcast %cst_5 : f32 to vector<2x128xf32>
    %7 = arith.maximumf %5, %6 : vector<2x128xf32>
    %c0_6 = arith.constant 0 : index
    %c0_7 = arith.constant 0 : index
    %8 = vector.load %arg4[%c0_6, %c0_7] : memref<128x128xf32, #tpu.memory_space<vmem>>, vector<128x128xf32>
    %cst_8 = arith.constant dense<0.000000e+00> : vector<2x128xf32>
    %9 = tpu.matmul %7, %8, %cst_8 {dimension_numbers = #tpu.dot_dimension_numbers<[1], [0], [0], [1], [0, 0, 1, 1], [], []>} : vector<2x128xf32>, vector<128x128xf32>, vector<2x128xf32> -> vector<2x128xf32>
    %c0_9 = arith.constant 0 : index
    %c0_10 = arith.constant 0 : index
    %10 = vector.load %arg5[%c0_9, %c0_10] : memref<1x128xf32, #tpu.memory_space<vmem>>, vector<1x128xf32>
    %11 = vector.broadcast %10 : vector<1x128xf32> to vector<2x128xf32>
    %12 = arith.addf %9, %11 : vector<2x128xf32>
    %cst_11 = arith.constant 0.000000e+00 : f32
    %13 = vector.broadcast %cst_11 : f32 to vector<2x128xf32>
    %14 = arith.maximumf %12, %13 : vector<2x128xf32>
    %c0_12 = arith.constant 0 : index
    %c0_13 = arith.constant 0 : index
    %15 = vector.load %arg6[%c0_12, %c0_13] : memref<2x128xf32, #tpu.memory_space<vmem>>, vector<2x128xf32>
    tpu.vector_store %arg6[%c0_12, %c0_13], %14 {strides = array<i32>} : memref<2x128xf32, #tpu.memory_space<vmem>>, vector<2x128xf32>,
    return
  }
  func.func @transform_0(%arg0: i32) -> (i32, i32) {
    %c0_i32 = arith.constant 0 : i32
    %c0_i32_0 = arith.constant 0 : i32
    return %arg0, %c0_i32 : i32, i32
  }
  func.func @transform_1(%arg0: i32) -> (i32, i32) {
    %c0_i32 = arith.constant 0 : i32
    %c0_i32_0 = arith.constant 0 : i32
    %c0_i32_1 = arith.constant 0 : i32
    return %c0_i32, %c0_i32_0 : i32, i32
  }
  func.func @transform_2(%arg0: i32) -> (i32, i32) {
    %c0_i32 = arith.constant 0 : i32
    %c0_i32_0 = arith.constant 0 : i32
    %c0_i32_1 = arith.constant 0 : i32
    return %c0_i32, %c0_i32_0 : i32, i32
  }
  func.func @transform_3(%arg0: i32) -> (i32, i32) {
    %c0_i32 = arith.constant 0 : i32
    %c0_i32_0 = arith.constant 0 : i32
    %c0_i32_1 = arith.constant 0 : i32
    return %c0_i32, %c0_i32_0 : i32, i32
  }
  func.func @transform_4(%arg0: i32) -> (i32, i32) {
    %c0_i32 = arith.constant 0 : i32
    %c0_i32_0 = arith.constant 0 : i32
    %c0_i32_1 = arith.constant 0 : i32
    return %c0_i32, %c0_i32_0 : i32, i32
  }
  func.func @transform_5(%arg0: i32) -> (i32, i32) {
    %c0_i32 = arith.constant 0 : i32
    %c0_i32_0 = arith.constant 0 : i32
    return %arg0, %c0_i32 : i32, i32
  }
}

</mosaic_0001>

<bundles_post_ra>
// kernel: cnn_forward.3
= control target key start
LH: loop header
LB: loop body
LE: loop exit
PB: predicated region body
PF: predicated region fallthrough
CT: control target
= control target key end

     0   :  { %v1058_v27 = vmov 1983009808   ;;  %v200_v29 = vlaneseq  ;;  %s1677_s0 = inlined_call_operand.vmem [shape: f32[2,1296], index: 0, kind: input, shape index: {}]   ;;  %s1678_s1 = inlined_call_operand.vmem [shape: f32[1296,128], index: 1, kind: input, shape index: {}]   ;;  %s1679_s2 = inlined_call_operand.vmem [shape: f32[1,128], index: 2, kind: input, shape index: {}]   ;;  %s1680_s3 = inlined_call_operand.vmem [shape: f32[128,128], index: 3, kind: input, shape index: {}]   ;;  %s1681_s4 = inlined_call_operand.vmem [shape: f32[1,128], index: 4, kind: input, shape index: {}]   ;;  %s1682_s5 = inlined_call_operand.hbm [shape: f32[2,128], index: 5, kind: output, shape index: {}]  }
   0x1   :  { %v55_v0 = vld [vmem:[%s1678_s1 + $0xf8] sm:$0xff]  ;;  %v54_v2 = vld [vmem:[%s1678_s1 + $0xf0] sm:$0xff]  ;;  %v53_v6 = vld [vmem:[%s1678_s1 + $0xe8] sm:$0xff]  ;;  %v198_v28 = vunpack.c.l.s4 %v1058_v27 }
   0x2   :  { %v39_v1 = vld [vmem:[%s1678_s1 + $0x78] sm:$0xff]  ;;  %792 = vmatprep.subr.mxu0 %v55_v0  ;;  %v38_v4 = vld [vmem:[%s1678_s1 + $0x70] sm:$0xff]  ;;  %v37_v8 = vld [vmem:[%s1678_s1 + $0x68] sm:$0xff]  ;;  %v201_v39 = vshrl.u32 %v200_v29, 7 }
   0x3   :  { %v87_v3 = vld [vmem:[%s1678_s1 + $0x1f8] sm:$0xff]  ;;  %793 = vmatpush3.msra.mxu0 %v39_v1  ;;  %v86_v7 = vld [vmem:[%s1678_s1 + $0x1f0] sm:$0xff]  ;;  %v85_v10 = vld [vmem:[%s1678_s1 + $0x1e8] sm:$0xff]  ;;  %v199_v38 = vunpack.c.0.s8 %v198_v28 }
   0x4   :  { %v71_v5 = vld [vmem:[%s1678_s1 + $0x178] sm:$0xff]  ;;  %827 = vmatprep.subr.mxu1 %v87_v3  ;;  %794 = vmatprep.subr.mxu0 %v54_v2  ;;  %v70_v9 = vld [vmem:[%s1678_s1 + $0x170] sm:$0xff]  ;;  %v52_v11 = vld [vmem:[%s1678_s1 + $0xe0] sm:$0xff] }
   0x5   :  { %828 = vmatpush3.msra.mxu1 %v71_v5  ;;  %795 = vmatpush3.msra.mxu0 %v38_v4  ;;  %v69_v12 = vld [vmem:[%s1678_s1 + $0x168] sm:$0xff]  ;;  %v36_v13 = vld [vmem:[%s1678_s1 + $0x60] sm:$0xff]  ;;  %v51_v15 = vld [vmem:[%s1678_s1 + $0xd8] sm:$0xff]  ;;  %v1221_v48 = vsub.s32 %v199_v38, %v201_v39 }
   0x6   :  { %829 = vmatprep.subr.mxu1 %v86_v7  ;;  %796 = vmatprep.subr.mxu0 %v53_v6  ;;  %v84_v14 = vld [vmem:[%s1678_s1 + $0x1e0] sm:$0xff]  ;;  %v35_v17 = vld [vmem:[%s1678_s1 + $0x58] sm:$0xff]  ;;  %v50_v19 = vld [vmem:[%s1678_s1 + $0xd0] sm:$0xff] }
   0x7   :  { %830 = vmatpush3.msra.mxu1 %v70_v9  ;;  %797 = vmatpush3.msra.mxu0 %v37_v8  ;;  %v68_v16 = vld [vmem:[%s1678_s1 + $0x160] sm:$0xff]  ;;  %v83_v18 = vld [vmem:[%s1678_s1 + $0x1d8] sm:$0xff]  ;;  %v34_v21 = vld [vmem:[%s1678_s1 + $0x50] sm:$0xff] }
   0x8   :  { %831 = vmatprep.subr.mxu1 %v85_v10  ;;  %798 = vmatprep.subr.mxu0 %v52_v11  ;;  %v67_v20 = vld [vmem:[%s1678_s1 + $0x158] sm:$0xff]  ;;  %v82_v22 = vld [vmem:[%s1678_s1 + $0x1d0] sm:$0xff]  ;;  %v49_v23 = vld [vmem:[%s1678_s1 + $0xc8] sm:$0xff] }
   0x9   :  { %832 = vmatpush3.msra.mxu1 %v69_v12  ;;  %799 = vmatpush3.msra.mxu0 %v36_v13  ;;  %v66_v24 = vld [vmem:[%s1678_s1 + $0x150] sm:$0xff]  ;;  %v33_v25 = vld [vmem:[%s1678_s1 + $0x48] sm:$0xff]  ;;  %v48_v30 = vld [vmem:[%s1678_s1 + $0xc0] sm:$0xff] }
   0xa   :  { %833 = vmatprep.subr.mxu1 %v84_v14  ;;  %800 = vmatprep.subr.mxu0 %v51_v15  ;;  %v81_v26 = vld [vmem:[%s1678_s1 + $0x1c8] sm:$0xff]  ;;  %v32_v32 = vld [vmem:[%s1678_s1 + $0x40] sm:$0xff]  ;;  %v47_v34 = vld [vmem:[%s1678_s1 + $0xb8] sm:$0xff] }
   0xb   :  { %834 = vmatpush3.msra.mxu1 %v68_v16  ;;  %801 = vmatpush3.msra.mxu0 %v35_v17  ;;  %v65_v31 = vld [vmem:[%s1678_s1 + $0x148] sm:$0xff]  ;;  %v80_v33 = vld [vmem:[%s1678_s1 + $0x1c0] sm:$0xff]  ;;  %v31_v36 = vld [vmem:[%s1678_s1 + $0x38] sm:$0xff] }
   0xc   :  { %835 = vmatprep.subr.mxu1 %v83_v18  ;;  %802 = vmatprep.subr.mxu0 %v50_v19  ;;  %v64_v35 = vld [vmem:[%s1678_s1 + $0x140] sm:$0xff]  ;;  %v79_v37 = vld [vmem:[%s1678_s1 + $0x1b8] sm:$0xff]  ;;  %v46_v40 = vld [vmem:[%s1678_s1 + $0xb0] sm:$0xff] }
   0xd   :  { %836 = vmatpush3.msra.mxu1 %v67_v20  ;;  %803 = vmatpush3.msra.mxu0 %v34_v21  ;;  %v63_v41 = vld [vmem:[%s1678_s1 + $0x138] sm:$0xff]  ;;  %v30_v42 = vld [vmem:[%s1678_s1 + $0x30] sm:$0xff]  ;;  %v45_v44 = vld [vmem:[%s1678_s1 + $0xa8] sm:$0xff] }
   0xe   :  { %837 = vmatprep.subr.mxu1 %v82_v22  ;;  %804 = vmatprep.subr.mxu0 %v49_v23  ;;  %v78_v43 = vld [vmem:[%s1678_s1 + $0x1b0] sm:$0xff]  ;;  %v29_v46 = vld [vmem:[%s1678_s1 + $0x28] sm:$0xff]  ;;  %v44_v49 = vld [vmem:[%s1678_s1 + $0xa0] sm:$0xff] }
   0xf   :  { %838 = vmatpush3.msra.mxu1 %v66_v24  ;;  %805 = vmatpush3.msra.mxu0 %v33_v25  ;;  %v62_v45 = vld [vmem:[%s1678_s1 + $0x130] sm:$0xff]  ;;  %v77_v47 = vld [vmem:[%s1678_s1 + $0x1a8] sm:$0xff]  ;;  %v21_v51 = vld [vmem:[%s1677_s0] sm:$0xff] }
  0x10   :  { %839 = vmatprep.subr.mxu1 %v81_v26  ;;  %806 = vmatprep.subr.mxu0 %v48_v30  ;;  %v61_v50 = vld [vmem:[%s1678_s1 + $0x128] sm:$0xff]  ;;  %v28_v52 = vld [vmem:[%s1678_s1 + $0x20] sm:$0xff]  ;;  %v43_v54 = vld [vmem:[%s1678_s1 + $0x98] sm:$0xff]  ;;  %v203_v58 = vrot.slane %v21_v51, %v1221_v48  ;;  %v196_v59 = vcombine.high %v21_v51, %v21_v51 }
  0x11   :  { %840 = vmatpush3.msra.mxu1 %v65_v31  ;;  %807 = vmatpush3.msra.mxu0 %v32_v32  ;;  %v76_v53 = vld [vmem:[%s1678_s1 + $0x1a0] sm:$0xff]  ;;  %v27_v56 = vld [vmem:[%s1678_s1 + $0x18] sm:$0xff]  ;;  %v42_v60 = vld [vmem:[%s1678_s1 + $0x90] sm:$0xff] }
  0x12   :  { %841 = vmatprep.subr.mxu1 %v80_v33  ;;  %808 = vmatprep.subr.mxu0 %v47_v34  ;;  %v60_v55 = vld [vmem:[%s1678_s1 + $0x120] sm:$0xff]  ;;  %v75_v57 = vld [vmem:[%s1678_s1 + $0x198] sm:$0xff]  ;;  %v26_v62 = vld [vmem:[%s1678_s1 + $0x10] sm:$0xff]  ;;  %v211_v4 = vcombine.high %v203_v58, %v203_v58  ;;  %v210_v5 = vrot.slane %v196_v59, %v1221_v48 }
  0x13   :  { %842 = vmatpush3.msra.mxu1 %v64_v35  ;;  %809 = vmatpush3.msra.mxu0 %v31_v36  ;;  %v59_v61 = vld [vmem:[%s1678_s1 + $0x118] sm:$0xff]  ;;  %v74_v63 = vld [vmem:[%s1678_s1 + $0x190] sm:$0xff]  ;;  %v41_v0 = vld [vmem:[%s1678_s1 + $0x88] sm:$0xff] }
  0x14   :  { %843 = vmatprep.subr.mxu1 %v79_v37  ;;  %810 = vmatprep.subr.mxu0 %v46_v40  ;;  %v58_v1 = vld [vmem:[%s1678_s1 + $0x110] sm:$0xff]  ;;  %v25_v2 = vld [vmem:[%s1678_s1 + $0x8] sm:$0xff]  ;;  %v40_v6 = vld [vmem:[%s1678_s1 + $0x80] sm:$0xff]  ;;  %v212_v12 = vcombine.high %v210_v5, %v210_v5 }
  0x15   :  { %844 = vmatpush3.msra.mxu1 %v63_v41  ;;  %811 = vmatpush3.msra.mxu0 %v30_v42  ;;  %v73_v3 = vld [vmem:[%s1678_s1 + $0x188] sm:$0xff]  ;;  %v24_v7 = vld [vmem:[%s1678_s1] sm:$0xff]  ;;  %v119_v10 = vld [vmem:[%s1678_s1 + $0x2f8] sm:$0xff] }
  0x16   :  { %845 = vmatprep.subr.mxu1 %v78_v43  ;;  %812 = vmatprep.subr.mxu0 %v45_v44  ;;  %v57_v8 = vld [vmem:[%s1678_s1 + $0x108] sm:$0xff]  ;;  %v72_v9 = vld [vmem:[%s1678_s1 + $0x180] sm:$0xff]  ;;  %v103_v13 = vld [vmem:[%s1678_s1 + $0x278] sm:$0xff] }
  0x17   :  { %846 = vmatpush3.msra.mxu1 %v62_v45  ;;  %813 = vmatpush3.msra.mxu0 %v29_v46  ;;  %v56_v11 = vld [vmem:[%s1678_s1 + $0x100] sm:$0xff]  ;;  %v118_v14 = vld [vmem:[%s1678_s1 + $0x2f0] sm:$0xff]  ;;  %v151_v15 = vld [vmem:[%s1678_s1 + $0x3f8] sm:$0xff] }
  0x18   :  { %847 = vmatprep.subr.mxu1 %v77_v47  ;;  %814 = vmatprep.subr.mxu0 %v44_v49  ;;  %v102_v16 = vld [vmem:[%s1678_s1 + $0x270] sm:$0xff]  ;;  %v135_v17 = vld [vmem:[%s1678_s1 + $0x378] sm:$0xff]  ;;  %v117_v18 = vld [vmem:[%s1678_s1 + $0x2e8] sm:$0xff] }
  0x19   :  { %848 = vmatpush3.msra.mxu1 %v61_v50  ;;  %815 = vmatpush3.msra.mxu0 %v28_v52  ;;  %v150_v19 = vld [vmem:[%s1678_s1 + $0x3f0] sm:$0xff]  ;;  %v101_v20 = vld [vmem:[%s1678_s1 + $0x268] sm:$0xff]  ;;  %v116_v22 = vld [vmem:[%s1678_s1 + $0x2e0] sm:$0xff] }
  0x1a   :  { %849 = vmatprep.subr.mxu1 %v76_v53  ;;  %816 = vmatprep.subr.mxu0 %v43_v54  ;;  %v134_v21 = vld [vmem:[%s1678_s1 + $0x370] sm:$0xff]  ;;  %v149_v23 = vld [vmem:[%s1678_s1 + $0x3e8] sm:$0xff]  ;;  %v100_v24 = vld [vmem:[%s1678_s1 + $0x260] sm:$0xff] }
  0x1b   :  { %850 = vmatpush3.msra.mxu1 %v60_v55  ;;  %817 = vmatpush3.msra.mxu0 %v27_v56  ;;  %v133_v25 = vld [vmem:[%s1678_s1 + $0x368] sm:$0xff]  ;;  %v115_v26 = vld [vmem:[%s1678_s1 + $0x2d8] sm:$0xff]  ;;  %v148_v27 = vld [vmem:[%s1678_s1 + $0x3e0] sm:$0xff] }
  0x1c   :  { %851 = vmatprep.subr.mxu1 %v75_v57  ;;  %818 = vmatprep.subr.mxu0 %v42_v60  ;;  %v99_v28 = vld [vmem:[%s1678_s1 + $0x258] sm:$0xff]  ;;  %v132_v29 = vld [vmem:[%s1678_s1 + $0x360] sm:$0xff]  ;;  %v114_v30 = vld [vmem:[%s1678_s1 + $0x2d0] sm:$0xff] }
  0x1d   :  { %852 = vmatpush3.msra.mxu1 %v59_v61  ;;  %819 = vmatpush3.msra.mxu0 %v26_v62  ;;  %v147_v31 = vld [vmem:[%s1678_s1 + $0x3d8] sm:$0xff]  ;;  %v98_v32 = vld [vmem:[%s1678_s1 + $0x250] sm:$0xff]  ;;  %v113_v34 = vld [vmem:[%s1678_s1 + $0x2c8] sm:$0xff] }
  0x1e   :  { %853 = vmatprep.subr.mxu1 %v74_v63  ;;  %820 = vmatprep.subr.mxu0 %v41_v0  ;;  %v131_v33 = vld [vmem:[%s1678_s1 + $0x358] sm:$0xff]  ;;  %v146_v35 = vld [vmem:[%s1678_s1 + $0x3d0] sm:$0xff]  ;;  %v97_v36 = vld [vmem:[%s1678_s1 + $0x248] sm:$0xff] }
  0x1f   :  { %854 = vmatpush3.msra.mxu1 %v58_v1  ;;  %821 = vmatpush3.msra.mxu0 %v25_v2  ;;  %v130_v37 = vld [vmem:[%s1678_s1 + $0x350] sm:$0xff]  ;;  %v112_v38 = vld [vmem:[%s1678_s1 + $0x2c0] sm:$0xff]  ;;  %v145_v39 = vld [vmem:[%s1678_s1 + $0x3c8] sm:$0xff] }
  0x20   :  { %855 = vmatprep.subr.mxu1 %v73_v3  ;;  %822 = vmatprep.subr.mxu0 %v40_v6  ;;  %v96_v40 = vld [vmem:[%s1678_s1 + $0x240] sm:$0xff]  ;;  %v129_v41 = vld [vmem:[%s1678_s1 + $0x348] sm:$0xff]  ;;  %v111_v42 = vld [vmem:[%s1678_s1 + $0x2b8] sm:$0xff] }
  0x21   :  { %323 = vmatprep.mubr.f32.mxu0 %v211_v4  ;;  %823 = vmatpush3.msra.mxu0 %v24_v7  ;;  %v144_v43 = vld [vmem:[%s1678_s1 + $0x3c0] sm:$0xff]  ;;  %v95_v44 = vld [vmem:[%s1678_s1 + $0x238] sm:$0xff]  ;;  %v110_v46 = vld [vmem:[%s1678_s1 + $0x2b0] sm:$0xff] }
  0x22   :  { %856 = vmatpush3.msra.mxu1 %v57_v8  ;;  %324 = vmatmul.mubr.f32.vlgmr.msra.gmra.mxu0 %v203_v58  ;;  %v128_v45 = vld [vmem:[%s1678_s1 + $0x340] sm:$0xff]  ;;  %v143_v47 = vld [vmem:[%s1678_s1 + $0x3b8] sm:$0xff]  ;;  %v94_v49 = vld [vmem:[%s1678_s1 + $0x230] sm:$0xff] }
  0x23   :  { %857 = vmatprep.subr.mxu1 %v72_v9  ;;  %862 = vmatprep.subr.mxu0 %v119_v10  ;;  %v127_v50 = vld [vmem:[%s1678_s1 + $0x338] sm:$0xff]  ;;  %v109_v51 = vld [vmem:[%s1678_s1 + $0x2a8] sm:$0xff]  ;;  %v142_v52 = vld [vmem:[%s1678_s1 + $0x3b0] sm:$0xff] }
  0x24   :  { %858 = vmatpush3.msra.mxu1 %v56_v11  ;;  %393 = vmatprep.mubr.f32.mxu1 %v212_v12  ;;  %v93_v53 = vld [vmem:[%s1678_s1 + $0x228] sm:$0xff]  ;;  %v126_v54 = vld [vmem:[%s1678_s1 + $0x330] sm:$0xff]  ;;  %v108_v55 = vld [vmem:[%s1678_s1 + $0x2a0] sm:$0xff] }
  0x25   :  { %863 = vmatpush3.msra.mxu0 %v103_v13  ;;  %394 = vmatmul.mubr.f32.vlgmr.msra.gmra.mxu1 %v210_v5  ;;  %v141_v56 = vld [vmem:[%s1678_s1 + $0x3a8] sm:$0xff]  ;;  %v92_v57 = vld [vmem:[%s1678_s1 + $0x220] sm:$0xff]  ;;  %v107_v60 = vld [vmem:[%s1678_s1 + $0x298] sm:$0xff] }
  0x26   :  { %864 = vmatprep.subr.mxu0 %v118_v14  ;;  %897 = vmatprep.subr.mxu1 %v151_v15  ;;  %v22_v58 = vld [vmem:[%s1677_s0 + $0x8] sm:$0xff] }
  0x27   :  { %865 = vmatpush3.msra.mxu0 %v102_v16  ;;  %898 = vmatpush3.msra.mxu1 %v135_v17  ;;  %v125_v59 = vld [vmem:[%s1678_s1 + $0x328] sm:$0xff] }
  0x28   :  { %866 = vmatprep.subr.mxu0 %v117_v18  ;;  %899 = vmatprep.subr.mxu1 %v150_v19 }
  0x29   :  { %867 = vmatpush3.msra.mxu0 %v101_v20  ;;  %900 = vmatpush3.msra.mxu1 %v134_v21 }
  0x2a   :  { %868 = vmatprep.subr.mxu0 %v116_v22  ;;  %901 = vmatprep.subr.mxu1 %v149_v23 }
  0x2b   :  { %869 = vmatpush3.msra.mxu0 %v100_v24  ;;  %902 = vmatpush3.msra.mxu1 %v133_v25 }
  0x2c   :  { %870 = vmatprep.subr.mxu0 %v115_v26  ;;  %903 = vmatprep.subr.mxu1 %v148_v27 }
  0x2d   :  { %871 = vmatpush3.msra.mxu0 %v99_v28  ;;  %904 = vmatpush3.msra.mxu1 %v132_v29 }
  0x2e   :  { %872 = vmatprep.subr.mxu0 %v114_v30  ;;  %905 = vmatprep.subr.mxu1 %v147_v31 }
  0x2f   :  { %873 = vmatpush3.msra.mxu0 %v98_v32  ;;  %906 = vmatpush3.msra.mxu1 %v131_v33 }
  0x30   :  { %874 = vmatprep.subr.mxu0 %v113_v34  ;;  %907 = vmatprep.subr.mxu1 %v146_v35 }
  0x31   :  { %875 = vmatpush3.msra.mxu0 %v97_v36  ;;  %908 = vmatpush3.msra.mxu1 %v130_v37 }
  0x32   :  { %876 = vmatprep.subr.mxu0 %v112_v38  ;;  %909 = vmatprep.subr.mxu1 %v145_v39 }
  0x33   :  { %877 = vmatpush3.msra.mxu0 %v96_v40  ;;  %910 = vmatpush3.msra.mxu1 %v129_v41 }
  0x34   :  { %878 = vmatprep.subr.mxu0 %v111_v42  ;;  %911 = vmatprep.subr.mxu1 %v144_v43 }
  0x35   :  { %879 = vmatpush3.msra.mxu0 %v95_v44  ;;  %912 = vmatpush3.msra.mxu1 %v128_v45 }
  0x36   :  { %880 = vmatprep.subr.mxu0 %v110_v46  ;;  %913 = vmatprep.subr.mxu1 %v143_v47 }
  0x37   :  { %881 = vmatpush3.msra.mxu0 %v94_v49  ;;  %914 = vmatpush3.msra.mxu1 %v127_v50 }
  0x38   :  { %882 = vmatprep.subr.mxu0 %v109_v51  ;;  %915 = vmatprep.subr.mxu1 %v142_v52 }
  0x39   :  { %883 = vmatpush3.msra.mxu0 %v93_v53 }
  0x3a   :  { %10 = vsyncpa [#allocation3], 0  ;;  %916 = vmatpush3.msra.mxu1 %v126_v54  ;;  %884 = vmatprep.subr.mxu0 %v108_v55  ;;  %v140_v61 = vld [vmem:[%s1678_s1 + $0x3a0] sm:$0xff]  ;;  %v91_v62 = vld [vmem:[%s1678_s1 + $0x218] sm:$0xff]  ;;  %v213_v1 = vcombine.high %v22_v58, %v22_v58  ;;  %v220_v4 = vrot.slane %v22_v58, %v1221_v48  ;;  %v1059_v32 = vmov 0.0   ;;  %vm256_vm0 = vcmask 130048  }
  0x3b   :  { %917 = vmatprep.subr.mxu1 %v141_v56  ;;  %885 = vmatpush3.msra.mxu0 %v92_v57  ;;  %v124_v63 = vld [vmem:[%s1678_s1 + $0x320] sm:$0xff]  ;;  %v106_v0 = vld [vmem:[%s1678_s1 + $0x290] sm:$0xff]  ;;  %v139_v2 = vld [vmem:[%s1678_s1 + $0x398] sm:$0xff]  ;;  %vm1060_vm1 = vmmov 0  }
  0x3c   :  { %918 = vmatpush3.msra.mxu1 %v125_v59  ;;  %886 = vmatprep.subr.mxu0 %v107_v60  ;;  %v90_v3 = vld [vmem:[%s1678_s1 + $0x210] sm:$0xff]  ;;  %v123_v5 = vld [vmem:[%s1678_s1 + $0x318] sm:$0xff]  ;;  %v105_v6 = vld [vmem:[%s1678_s1 + $0x288] sm:$0xff]  ;;  %v227_v12 = vrot.slane %v213_v1, %v1221_v48  ;;  %v228_v15 = vcombine.high %v220_v4, %v220_v4 }
  0x3d   :  { %919 = vmatprep.subr.mxu1 %v140_v61  ;;  %887 = vmatpush3.msra.mxu0 %v91_v62  ;;  %v138_v7 = vld [vmem:[%s1678_s1 + $0x390] sm:$0xff]  ;;  %v89_v8 = vld [vmem:[%s1678_s1 + $0x208] sm:$0xff]  ;;  %v104_v11 = vld [vmem:[%s1678_s1 + $0x280] sm:$0xff] }
  0x3e   :  { %920 = vmatpush3.msra.mxu1 %v124_v63  ;;  %888 = vmatprep.subr.mxu0 %v106_v0  ;;  %v23_v9 = vld [vmem:[%s1677_s0 + $0x10] sm:$0x3f]  ;;  %v137_v13 = vld [vmem:[%s1678_s1 + $0x388] sm:$0xff]  ;;  %v88_v14 = vld [vmem:[%s1678_s1 + $0x200] sm:$0xff]  ;;  %v229_v21 = vcombine.high %v227_v12, %v227_v12 }
  0x3f   :  { %921 = vmatprep.subr.mxu1 %v139_v2  ;;  %889 = vmatpush3.msra.mxu0 %v90_v3  ;;  %v122_v10 = vld [vmem:[%s1678_s1 + $0x310] sm:$0xff]  ;;  %v121_v16 = vld [vmem:[%s1678_s1 + $0x308] sm:$0xff]  ;;  %v1486_v17 = vrot.slane %v23_v9, %v1221_v48  ;;  %v136_v18 = vld [vmem:[%s1678_s1 + $0x380] sm:$0xff]  ;;  %v230_v27 = vcombine.high %v23_v9, %v23_v9 }
  0x40   :  { %922 = vmatpush3.msra.mxu1 %v123_v5  ;;  %890 = vmatprep.subr.mxu0 %v105_v6  ;;  %v183_v19 = vld [vmem:[%s1678_s1 + $0x4f8] sm:$0xff]  ;;  %v120_v20 = vld [vmem:[%s1678_s1 + $0x300] sm:$0xff]  ;;  %v182_v23 = vld [vmem:[%s1678_s1 + $0x4f0] sm:$0xff] }
  0x41   :  { %923 = vmatprep.subr.mxu1 %v138_v7  ;;  %891 = vmatpush3.msra.mxu0 %v89_v8  ;;  %v167_v22 = vld [vmem:[%s1678_s1 + $0x478] sm:$0xff]  ;;  %v245_v24 = vcombine.high %v1486_v17, %v1486_v17  ;;  %v166_v25 = vld [vmem:[%s1678_s1 + $0x470] sm:$0xff]  ;;  %v181_v26 = vld [vmem:[%s1678_s1 + $0x4e8] sm:$0xff]  ;;  %v244_v35 = vrot.slane %v230_v27, %v1221_v48 }
  0x42   :  { %924 = vmatpush3.msra.mxu1 %v122_v10  ;;  %892 = vmatprep.subr.mxu0 %v104_v11  ;;  %v165_v28 = vld [vmem:[%s1678_s1 + $0x468] sm:$0xff]  ;;  %v180_v30 = vld [vmem:[%s1678_s1 + $0x4e0] sm:$0xff]  ;;  %v179_v34 = vld [vmem:[%s1678_s1 + $0x4d8] sm:$0xff] }
  0x43   :  { %925 = vmatprep.subr.mxu1 %v137_v13  ;;  %893 = vmatpush3.msra.mxu0 %v88_v14  ;;  %v185_v29 = vld [vmem:[%s1678_s1 + $0x508] sm:$0xff]  ;;  %v164_v31 = vld [vmem:[%s1678_s1 + $0x460] sm:$0xff]  ;;  %v163_v36 = vld [vmem:[%s1678_s1 + $0x458] sm:$0xff] }
  0x44   :  { %463 = vmatprep.mubr.f32.mxu0 %v228_v15  ;;  %926 = vmatpush3.msra.mxu1 %v121_v16  ;;  %v184_v33 = vld [vmem:[%s1678_s1 + $0x500] sm:$0xff]  ;;  %v178_v37 = vld [vmem:[%s1678_s1 + $0x4d0] sm:$0xff]  ;;  %v177_v38 = vld [vmem:[%s1678_s1 + $0x4c8] sm:$0xff] }
  0x45   :  { %464 = vmatmul.mubr.f32.vlgmr.msra.gmra.mxu0 %v220_v4  ;;  %927 = vmatprep.subr.mxu1 %v136_v18  ;;  %v162_v48 = vld [vmem:[%s1678_s1 + $0x450] sm:$0xff]  ;;  %v161_v39 = vld [vmem:[%s1678_s1 + $0x448] sm:$0xff]  ;;  %v176_v40 = vld [vmem:[%s1678_s1 + $0x4c0] sm:$0xff] }
  0x46   :  { %932 = vmatprep.subr.mxu0 %v183_v19  ;;  %928 = vmatpush3.msra.mxu1 %v120_v20  ;;  %v160_v41 = vld [vmem:[%s1678_s1 + $0x440] sm:$0xff]  ;;  %v175_v42 = vld [vmem:[%s1678_s1 + $0x4b8] sm:$0xff]  ;;  %v174_v44 = vld [vmem:[%s1678_s1 + $0x4b0] sm:$0xff] }
  0x47   :  { %533 = vmatprep.mubr.f32.mxu1 %v229_v21  ;;  %933 = vmatpush3.msra.mxu0 %v167_v22  ;;  %v159_v43 = vld [vmem:[%s1678_s1 + $0x438] sm:$0xff]  ;;  %v158_v45 = vld [vmem:[%s1678_s1 + $0x430] sm:$0xff]  ;;  %v173_v46 = vld [vmem:[%s1678_s1 + $0x4a8] sm:$0xff] }
  0x48   :  { %534 = vmatmul.mubr.f32.vlgmr.msra.gmra.mxu1 %v227_v12  ;;  %934 = vmatprep.subr.mxu0 %v182_v23  ;;  %v157_v47 = vld [vmem:[%s1678_s1 + $0x428] sm:$0xff]  ;;  %v172_v49 = vld [vmem:[%s1678_s1 + $0x4a0] sm:$0xff]  ;;  %v171_v51 = vld [vmem:[%s1678_s1 + $0x498] sm:$0xff] }
  0x49   :  { %935 = vmatpush3.msra.mxu0 %v166_v25  ;;  %603 = vmatprep.mubr.f32.mxu0 %v245_v24  ;;  %v156_v50 = vld [vmem:[%s1678_s1 + $0x420] sm:$0xff]  ;;  %v155_v52 = vld [vmem:[%s1678_s1 + $0x418] sm:$0xff]  ;;  %v170_v53 = vld [vmem:[%s1678_s1 + $0x490] sm:$0xff] }
  0x4a   :  { %936 = vmatprep.subr.mxu0 %v181_v26  ;;  %987 = vmatprep.subr.mxu1 %v1059_v32  ;;  %v154_v54 = vld [vmem:[%s1678_s1 + $0x410] sm:$0xff]  ;;  %v169_v55 = vld [vmem:[%s1678_s1 + $0x488] sm:$0xff]  ;;  %v168_v57 = vld [vmem:[%s1678_s1 + $0x480] sm:$0xff] }
  0x4b   :  { %937 = vmatpush3.msra.mxu0 %v165_v28  ;;  %988 = vmatpush3.msra.mxu1 %v185_v29  ;;  %v153_v56 = vld [vmem:[%s1678_s1 + $0x408] sm:$0xff]  ;;  %v152_v58 = vld [vmem:[%s1678_s1 + $0x400] sm:$0xff]  ;;  %v695_v59 = vld [vmem:[%s1680_s3 + $0x78] sm:$0xff] }
  0x4c   :  { %938 = vmatprep.subr.mxu0 %v180_v30  ;;  %989 = vmatprep.subr.mxu1 %v1059_v32  ;;  %v694_v60 = vld [vmem:[%s1680_s3 + $0x70] sm:$0xff]  ;;  %v693_v61 = vld [vmem:[%s1680_s3 + $0x68] sm:$0xff]  ;;  %v692_v62 = vld [vmem:[%s1680_s3 + $0x60] sm:$0xff] }
  0x4d   :  { %939 = vmatpush3.msra.mxu0 %v164_v31  ;;  %990 = vmatpush3.msra.mxu1 %v184_v33  ;;  %v691_v63 = vld [vmem:[%s1680_s3 + $0x58] sm:$0xff]  ;;  %v690_v0 = vld [vmem:[%s1680_s3 + $0x50] sm:$0xff]  ;;  %v689_v1 = vld [vmem:[%s1680_s3 + $0x48] sm:$0xff] }
  0x4e   :  { %940 = vmatprep.subr.mxu0 %v179_v34  ;;  %991 = vmatprep.mubr.msk.f32.mxu1 %vm1060_vm1, %v1059_v32  ;;  %v688_v2 = vld [vmem:[%s1680_s3 + $0x40] sm:$0xff]  ;;  %v687_v3 = vld [vmem:[%s1680_s3 + $0x38] sm:$0xff]  ;;  %v686_v4 = vld [vmem:[%s1680_s3 + $0x30] sm:$0xff] }
  0x4f   :  { %941 = vmatpush3.msra.mxu0 %v163_v36  ;;  %992 = vmatmul.mubr.msk.f32.vlgmr.msra.gmra.mxu1 %vm256_vm0, %v244_v35  ;;  %v685_v5 = vld [vmem:[%s1680_s3 + $0x28] sm:$0xff]  ;;  %v684_v6 = vld [vmem:[%s1680_s3 + $0x20] sm:$0xff]  ;;  %v683_v7 = vld [vmem:[%s1680_s3 + $0x18] sm:$0xff] }
  0x50   :  { %942 = vmatprep.subr.mxu0 %v178_v37  ;;  %994 = vmatprep.subr.mxu1 %v1059_v32  ;;  %v682_v8 = vld [vmem:[%s1680_s3 + $0x10] sm:$0xff]  ;;  %v681_v9 = vld [vmem:[%s1680_s3 + $0x8] sm:$0xff]  ;;  %v680_v10 = vld [vmem:[%s1680_s3] sm:$0xff] }
  0x51   :  { %943 = vmatpush3.msra.mxu0 %v162_v48  ;;  %1026 = vmatprep.mubr.msk.f32.mxu1 %vm1060_vm1, %v1059_v32  ;;  %v789_v21 = vld [vmem:[%s1679_s2] ss:$0 sm:$0xff]  ;;  %s1061_s2 = smov [#allocation2]  }
  0x52   :  { %944 = vmatprep.subr.mxu0 %v177_v38  ;;  %995 = vmatpush3.msra.mxu1 %v695_v59  ;;  %v791_v36 = vld [vmem:[%s1681_s4] ss:$0 sm:$0xff]  ;;  %s781_s26 = sshll.u32 %s1061_s2, 4  ;;  %s782_s26 = int_to_ptr.vmem [resolvable:$true] %s781_s26 }
  0x53   :  { %945 = vmatpush3.msra.mxu0 %v161_v39  ;;  %996 = vmatprep.subr.mxu1 %v1059_v32  ;;  %s1036_s27 = scalar_lea.vmem %s782_s26, 32  ;;  %p1041_p1 = scmp.lt.s32.totalorder %s782_s26, %s782_s26 }
  0x54   :  { %946 = vmatprep.subr.mxu0 %v176_v40  ;;  %997 = vmatpush3.msra.mxu1 %v694_v60  ;;  %p1037_p0 = scmp.ne.s32.totalorder %s782_s26, %s1036_s27  ;;  %p1042_p2 = scmp.lt.s32.totalorder %s1036_s27, %s1036_s27 }
  0x55   :  { %947 = vmatpush3.msra.mxu0 %v160_v41  ;;  %998 = vmatprep.subr.mxu1 %v1059_v32 }
  0x56   :  { %948 = vmatprep.subr.mxu0 %v175_v42  ;;  %999 = vmatpush3.msra.mxu1 %v693_v61  ;;  %p1043_p3 = por %p1042_p2, %p1041_p1 }
  0x57   :  { %949 = vmatpush3.msra.mxu0 %v159_v43  ;;  %1000 = vmatprep.subr.mxu1 %v1059_v32 }
  0x58   :  { %950 = vmatprep.subr.mxu0 %v174_v44  ;;  %1001 = vmatpush3.msra.mxu1 %v692_v62  ;;  %p1044_p4 = pnand %p1043_p3, %p1037_p0 }
  0x59   :  { %951 = vmatpush3.msra.mxu0 %v158_v45  ;;  %1002 = vmatprep.subr.mxu1 %v1059_v32 }
  0x5a   :  { %952 = vmatprep.subr.mxu0 %v173_v46  ;;  %1003 = vmatpush3.msra.mxu1 %v691_v63 }
  0x5b   :  { %953 = vmatpush3.msra.mxu0 %v157_v47  ;;  %1004 = vmatprep.subr.mxu1 %v1059_v32 }
  0x5c   :  { %954 = vmatprep.subr.mxu0 %v172_v49  ;;  %1005 = vmatpush3.msra.mxu1 %v690_v0 }
  0x5d   :  { %955 = vmatpush3.msra.mxu0 %v156_v50  ;;  %1006 = vmatprep.subr.mxu1 %v1059_v32 }
  0x5e   :  { %956 = vmatprep.subr.mxu0 %v171_v51  ;;  %1007 = vmatpush3.msra.mxu1 %v689_v1 }
  0x5f   :  { %957 = vmatpush3.msra.mxu0 %v155_v52  ;;  %1008 = vmatprep.subr.mxu1 %v1059_v32 }
  0x60   :  { %958 = vmatprep.subr.mxu0 %v170_v53  ;;  %1009 = vmatpush3.msra.mxu1 %v688_v2 }
  0x61   :  { %959 = vmatpush3.msra.mxu0 %v154_v54  ;;  %1010 = vmatprep.subr.mxu1 %v1059_v32 }
  0x62   :  { %960 = vmatprep.subr.mxu0 %v169_v55  ;;  %1011 = vmatpush3.msra.mxu1 %v687_v3 }
  0x63   :  { %961 = vmatpush3.msra.mxu0 %v153_v56  ;;  %1012 = vmatprep.subr.mxu1 %v1059_v32 }
  0x64   :  { %962 = vmatprep.subr.mxu0 %v168_v57  ;;  %1013 = vmatpush3.msra.mxu1 %v686_v4 }
  0x65   :  { %963 = vmatpush3.msra.mxu0 %v152_v58  ;;  %1014 = vmatprep.subr.mxu1 %v1059_v32 }
  0x66   :  { %604 = vmatmul.mubr.f32.vlgmr.msra.gmra.mxu0 %v1486_v17  ;;  %1015 = vmatpush3.msra.mxu1 %v685_v5 }
  0x67   :  { %1016 = vmatprep.subr.mxu1 %v1059_v32 }
  0x68   :  { %1017 = vmatpush3.msra.mxu1 %v684_v6 }
  0x69   :  { %1018 = vmatprep.subr.mxu1 %v1059_v32 }
  0x6a   :  { %1019 = vmatpush3.msra.mxu1 %v683_v7 }
  0x6b   :  { %1020 = vmatprep.subr.mxu1 %v1059_v32 }
  0x6c   :  { %1021 = vmatpush3.msra.mxu1 %v682_v8 }
  0x6d   :  { %1022 = vmatprep.subr.mxu1 %v1059_v32 }
  0x6e   :  { %1023 = vmatpush3.msra.mxu1 %v681_v9 }
  0x6f   :  { %1024 = vmatprep.subr.mxu1 %v1059_v32 }
  0x70   :  { %1025 = vmatpush3.msra.mxu1 %v680_v10 }
  0xe2   :  { %v824_v17 = vpop.f32.mrf.mxu0 }
  0xe4   :  { %v825_v18 = vpop.f32.mrf.mxu0 }
  0xe5   :  { %v859_v11 = vpop.f32.mrf.mxu1  ;;  %v826_v20 = vadd.f32 %v825_v18, %v824_v17 }
  0xe7   :  { %v860_v12 = vpop.f32.mrf.mxu1  ;;  %v326_v23 = vadd.f32 %v826_v20, %v789_v21 }
  0xe8   :  { %v861_v24 = vadd.f32 %v860_v12, %v859_v11 }
  0xea   :  { %v396_v26 = vadd.f32 %v861_v24, %v326_v23 }
 0x105   :  { %v894_v19 = vpop.f32.mrf.mxu0 }
 0x107   :  { %v895_v22 = vpop.f32.mrf.mxu0 }
 0x108   :  { %v929_v13 = vpop.f32.mrf.mxu1  ;;  %v896_v25 = vadd.f32 %v895_v22, %v894_v19 }
 0x10a   :  { %v930_v14 = vpop.f32.mrf.mxu1  ;;  %v466_v27 = vadd.f32 %v896_v25, %v396_v26 }
 0x10b   :  { %v931_v28 = vadd.f32 %v930_v14, %v929_v13 }
 0x10d   :  { %v536_v31 = vadd.f32 %v931_v28, %v466_v27 }
 0x10f   :  { %v675_v15 = vpop.f32.mrf.mxu1 }
 0x111   :  { %v993_v16 = vpop.f32.mrf.mxu1 }
 0x126   :  { %v964_v29 = vpop.f32.mrf.mxu0 }
 0x128   :  { %v965_v30 = vpop.f32.mrf.mxu0 }
 0x129   :  { %v966_v32 = vadd.f32 %v965_v30, %v964_v29 }
 0x12b   :  { %v606_v33 = vadd.f32 %v966_v32, %v536_v31 }
 0x12d   :  { %v676_v34 = vadd.f32 %v675_v15, %v606_v33 }
 0x12f   :  { %v679_v35 = vmax.f32 %v676_v34, 0.0 }
 0x131   :  { %1027 = vmatmul.mubr.f32.vlgmr.msra.gmra.mxu1 %v679_v35 }
 0x1f1   :  { %v769_v37 = vpop.f32.mrf.mxu1 }
 0x1f2   :  { %v770_v48 = vadd.f32 %v791_v36, %v769_v37 }
 0x1f3   :  { %v1028_v38 = vpop.f32.mrf.mxu1 }
 0x1f4   :  { %v773_v39 = vmax.f32 %v770_v48, 0.0 }
 0x1f6   :  { %774 = vst [vmem:[#allocation2] sm:$0x3] %v773_v39 }
 0x1f7   :  { %1047 = shalt.err (!%p1044_p4)
}
 0x1f8   :  { %784 = dma.vmem_to_hbm [thread:$0]  %s782_s26, 32, %s1682_s5, [#allocation3]  }
 0x1f9   :  { %1056 = dma.done.wait [#allocation3], 32  }
 0x1fa   :  { %1057 = vsyncadd [#allocation3], 4294967264 }
 0x1fb   :  { %788 = vsyncpa [#allocation3], 1 }

// kernel: cnn_forward.2
= control target key start
LH: loop header
LB: loop body
LE: loop exit
PB: predicated region body
PF: predicated region fallthrough
CT: control target
= control target key end

     0   :  { %vm425_vm0 = vcmask 1042432   ;;  %vm130_vm1 = vcmask 613376   ;;  %vm984_vm2 = vcmask 130048   ;;  %vm1115_vm3 = vcmask 128000   ;;  %s6349_s15 = smov 16   ;;  %s6350_s20 = smov 32   ;;  %s8811_s1 = inlined_call_operand.vmem [shape: f32[75,16], index: 1, kind: input, shape index: {}]   ;;  %s8812_s0 = inlined_call_operand.vmem [shape: f32[1568,75], index: 0, kind: input, shape index: {}]   ;;  %s8813_s2 = inlined_call_operand.vmem [shape: f32[1,16], index: 2, kind: input, shape index: {}]   ;;  %s8814_s3 = inlined_call_operand.vmem [shape: f32[144,36], index: 3, kind: input, shape index: {}]   ;;  %s8815_s4 = inlined_call_operand.vmem [shape: f32[1,36], index: 4, kind: input, shape index: {}]   ;;  %s8816_s5 = inlined_call_operand.vmem [shape: f32[72,36], index: 5, kind: output, shape index: {}]  }
   0x1   :  { %v129_v0 = vld [vmem:[%s8811_s1 + $0x48] sm:$0x7]  ;;  %v128_v1 = vld [vmem:[%s8811_s1 + $0x40] sm:$0xff]  ;;  %v127_v2 = vld [vmem:[%s8811_s1 + $0x38] sm:$0xff]  ;;  %s6351_s29 = smov 48   ;;  %s6352_s9 = smov 64  }
   0x2   :  { %6002 = vmatprep.subr.msk.mxu0 %vm425_vm0, %v129_v0  ;;  %v22_v3 = vld [vmem:[%s8812_s0] sm:$0xff]  ;;  %v126_v4 = vld [vmem:[%s8811_s1 + $0x30] sm:$0xff]  ;;  %v125_v5 = vld [vmem:[%s8811_s1 + $0x28] sm:$0xff]  ;;  %s6353_s14 = smov 80   ;;  %s6354_s30 = smov 96   ;;  %vm1630_vm4 = vcmask 261248  }
   0x3   :  { %6003 = vmatpush3.msk.msra.mxu0 %vm425_vm0, %v129_v0  ;;  %6022 = vmatprep.mubr.msk.f32.mxu0 %vm130_vm1, %v22_v3  ;;  %v124_v6 = vld [vmem:[%s8811_s1 + $0x20] sm:$0xff]  ;;  %v123_v7 = vld [vmem:[%s8811_s1 + $0x18] sm:$0xff]  ;;  %v122_v8 = vld [vmem:[%s8811_s1 + $0x10] sm:$0xff]  ;;  %s6355_s6 = smov 112   ;;  %vm1757_vm5 = vcmask 392448   ;;  %vm1884_vm6 = vcmask 523648  }
   0x4   :  { %6004 = vmatprep.subr.mxu0 %v128_v1  ;;  %v121_v9 = vld [vmem:[%s8811_s1 + $0x8] sm:$0xff]  ;;  %v120_v10 = vld [vmem:[%s8811_s1] sm:$0xff]  ;;  %v24_v12 = vld [vmem:[%s8812_s0 + $0x10] sm:$0xff]  ;;  %vm2011_vm7 = vcmask 654848   ;;  %vm2138_vm8 = vcmask 786048   ;;  %vm2265_vm9 = vcmask 917248  }
   0x5   :  { %6005 = vmatpush3.msra.mxu0 %v128_v1  ;;  %v23_v11 = vld [vmem:[%s8812_s0 + $0x8] sm:$0xff]  ;;  %v25_v13 = vld [vmem:[%s8812_s0 + $0x18] sm:$0xff]  ;;  %v26_v14 = vld [vmem:[%s8812_s0 + $0x20] sm:$0xff]  ;;  %vm1481_vm10 = vcmask 125952   ;;  %vm2392_vm11 = vcmask 1048448   ;;  %vm2749_vm12 = vcmask 293888  }
   0x6   :  { %6006 = vmatprep.subr.mxu0 %v127_v2  ;;  %v27_v15 = vld [vmem:[%s8812_s0 + $0x28] sm:$0xff]  ;;  %v28_v16 = vld [vmem:[%s8812_s0 + $0x30] sm:$0xff]  ;;  %v29_v17 = vld [vmem:[%s8812_s0 + $0x38] sm:$0xff]  ;;  %vm2789_vm13 = vcmask 291840  }
   0x7   :  { %6007 = vmatpush3.msra.mxu0 %v127_v2  ;;  %v30_v18 = vld [vmem:[%s8812_s0 + $0x40] sm:$0xff]  ;;  %v31_v19 = vld [vmem:[%s8812_s0 + $0x48] sm:$0xff]  ;;  %v32_v20 = vld [vmem:[%s8812_s0 + $0x50] sm:$0xff] }
   0x8   :  { %6008 = vmatprep.subr.mxu0 %v126_v4  ;;  %v33_v21 = vld [vmem:[%s8812_s0 + $0x58] sm:$0xff]  ;;  %v34_v22 = vld [vmem:[%s8812_s0 + $0x60] sm:$0xff]  ;;  %v35_v23 = vld [vmem:[%s8812_s0 + $0x68] sm:$0xff] }
   0x9   :  { %6009 = vmatpush3.msra.mxu0 %v126_v4  ;;  %v36_v24 = vld [vmem:[%s8812_s0 + $0x70] sm:$0xff]  ;;  %v37_v25 = vld [vmem:[%s8812_s0 + $0x78] sm:$0xff]  ;;  %v38_v26 = vld [vmem:[%s8812_s0 + $0x80] sm:$0xff] }
   0xa   :  { %6010 = vmatprep.subr.mxu0 %v125_v5  ;;  %v39_v27 = vld [vmem:[%s8812_s0 + $0x88] sm:$0xff]  ;;  %v40_v28 = vld [vmem:[%s8812_s0 + $0x90] sm:$0xff]  ;;  %v41_v29 = vld [vmem:[%s8812_s0 + $0x98] sm:$0xff] }
   0xb   :  { %6011 = vmatpush3.msra.mxu0 %v125_v5  ;;  %v42_v30 = vld [vmem:[%s8812_s0 + $0xa0] sm:$0xff]  ;;  %v43_v31 = vld [vmem:[%s8812_s0 + $0xa8] sm:$0xff]  ;;  %v44_v32 = vld [vmem:[%s8812_s0 + $0xb0] sm:$0xff] }
   0xc   :  { %6012 = vmatprep.subr.mxu0 %v124_v6  ;;  %v45_v33 = vld [vmem:[%s8812_s0 + $0xb8] sm:$0xff]  ;;  %v46_v34 = vld [vmem:[%s8812_s0 + $0xc0] sm:$0xff]  ;;  %v47_v35 = vld [vmem:[%s8812_s0 + $0xc8] sm:$0xff] }
   0xd   :  { %6013 = vmatpush3.msra.mxu0 %v124_v6  ;;  %v48_v36 = vld [vmem:[%s8812_s0 + $0xd0] sm:$0xff]  ;;  %v49_v37 = vld [vmem:[%s8812_s0 + $0xd8] sm:$0xff]  ;;  %v50_v38 = vld [vmem:[%s8812_s0 + $0xe0] sm:$0xff] }
   0xe   :  { %6014 = vmatprep.subr.mxu0 %v123_v7  ;;  %v51_v39 = vld [vmem:[%s8812_s0 + $0xe8] sm:$0xff]  ;;  %v52_v40 = vld [vmem:[%s8812_s0 + $0xf0] sm:$0xff]  ;;  %v53_v41 = vld [vmem:[%s8812_s0 + $0xf8] sm:$0xff] }
   0xf   :  { %6015 = vmatpush3.msra.mxu0 %v123_v7  ;;  %v54_v42 = vld [vmem:[%s8812_s0 + $0x100] sm:$0xff]  ;;  %v55_v43 = vld [vmem:[%s8812_s0 + $0x108] sm:$0xff]  ;;  %v56_v44 = vld [vmem:[%s8812_s0 + $0x110] sm:$0xff] }
  0x10   :  { %6016 = vmatprep.subr.mxu0 %v122_v8  ;;  %v57_v45 = vld [vmem:[%s8812_s0 + $0x118] sm:$0xff]  ;;  %v58_v46 = vld [vmem:[%s8812_s0 + $0x120] sm:$0xff]  ;;  %v59_v47 = vld [vmem:[%s8812_s0 + $0x128] sm:$0xff] }
  0x11   :  { %6017 = vmatpush3.msra.mxu0 %v122_v8  ;;  %v60_v48 = vld [vmem:[%s8812_s0 + $0x130] sm:$0xff]  ;;  %v61_v49 = vld [vmem:[%s8812_s0 + $0x138] sm:$0xff]  ;;  %v62_v50 = vld [vmem:[%s8812_s0 + $0x140] sm:$0xff] }
  0x12   :  { %6018 = vmatprep.subr.mxu0 %v121_v9  ;;  %v63_v51 = vld [vmem:[%s8812_s0 + $0x148] sm:$0xff]  ;;  %v64_v52 = vld [vmem:[%s8812_s0 + $0x150] sm:$0xff]  ;;  %v65_v53 = vld [vmem:[%s8812_s0 + $0x158] sm:$0xff] }
  0x13   :  { %6019 = vmatpush3.msra.mxu0 %v121_v9  ;;  %v66_v54 = vld [vmem:[%s8812_s0 + $0x160] sm:$0xff]  ;;  %v67_v55 = vld [vmem:[%s8812_s0 + $0x168] sm:$0xff]  ;;  %v68_v56 = vld [vmem:[%s8812_s0 + $0x170] sm:$0xff] }
  0x14   :  { %6020 = vmatprep.subr.mxu0 %v120_v10  ;;  %v69_v57 = vld [vmem:[%s8812_s0 + $0x178] sm:$0xff]  ;;  %v70_v58 = vld [vmem:[%s8812_s0 + $0x180] sm:$0xff]  ;;  %v71_v59 = vld [vmem:[%s8812_s0 + $0x188] sm:$0xff] }
  0x15   :  { %6021 = vmatpush3.msra.mxu0 %v120_v10  ;;  %v72_v60 = vld [vmem:[%s8812_s0 + $0x190] sm:$0xff]  ;;  %v73_v61 = vld [vmem:[%s8812_s0 + $0x198] sm:$0xff]  ;;  %v74_v62 = vld [vmem:[%s8812_s0 + $0x1a0] sm:$0xff] }
  0x16   :  { %6023 = vmatmul.mubr.msk.f32.vlgmr.msra.gmra.mxu0 %vm130_vm1, %v23_v11  ;;  %v75_v63 = vld [vmem:[%s8812_s0 + $0x1a8] sm:$0xff]  ;;  %v76_v0 = vld [vmem:[%s8812_s0 + $0x1b0] sm:$0xff]  ;;  %v77_v1 = vld [vmem:[%s8812_s0 + $0x1b8] sm:$0xff] }
  0x17   :  { %6025 = vmatprep.mubr.msk.f32.mxu0 %vm130_vm1, %v24_v12  ;;  %v78_v2 = vld [vmem:[%s8812_s0 + $0x1c0] sm:$0xff]  ;;  %v79_v3 = vld [vmem:[%s8812_s0 + $0x1c8] sm:$0xff]  ;;  %v80_v4 = vld [vmem:[%s8812_s0 + $0x1d0] sm:$0xff] }
  0x18   :  { %v81_v5 = vld [vmem:[%s8812_s0 + $0x1d8] sm:$0xff]  ;;  %v82_v6 = vld [vmem:[%s8812_s0 + $0x1e0] sm:$0xff]  ;;  %v83_v7 = vld [vmem:[%s8812_s0 + $0x1e8] sm:$0xff] }
  0x19   :  { %v84_v8 = vld [vmem:[%s8812_s0 + $0x1f0] sm:$0xff]  ;;  %v85_v9 = vld [vmem:[%s8812_s0 + $0x1f8] sm:$0xff]  ;;  %v86_v10 = vld [vmem:[%s8812_s0 + $0x200] sm:$0xff] }
  0x1a   :  { %6026 = vmatmul.mubr.msk.f32.gmra.mxu0 %vm130_vm1, %v25_v13  ;;  %v87_v11 = vld [vmem:[%s8812_s0 + $0x208] sm:$0xff]  ;;  %v88_v12 = vld [vmem:[%s8812_s0 + $0x210] sm:$0xff]  ;;  %v89_v13 = vld [vmem:[%s8812_s0 + $0x218] sm:$0xff] }
  0x1b   :  { %6028 = vmatprep.mubr.msk.f32.mxu0 %vm130_vm1, %v26_v14  ;;  %v90_v14 = vld [vmem:[%s8812_s0 + $0x220] sm:$0xff] }
  0x1e   :  { %6029 = vmatmul.mubr.msk.f32.gmra.mxu0 %vm130_vm1, %v27_v15  ;;  %v91_v15 = vld [vmem:[%s8812_s0 + $0x228] sm:$0xff] }
  0x1f   :  { %6031 = vmatprep.mubr.msk.f32.mxu0 %vm130_vm1, %v28_v16  ;;  %v92_v16 = vld [vmem:[%s8812_s0 + $0x230] sm:$0xff] }
  0x22   :  { %6032 = vmatmul.mubr.msk.f32.gmra.mxu0 %vm130_vm1, %v29_v17  ;;  %v93_v17 = vld [vmem:[%s8812_s0 + $0x238] sm:$0xff] }
  0x23   :  { %6034 = vmatprep.mubr.msk.f32.mxu0 %vm130_vm1, %v30_v18  ;;  %v94_v18 = vld [vmem:[%s8812_s0 + $0x240] sm:$0xff] }
  0x26   :  { %6035 = vmatmul.mubr.msk.f32.gmra.mxu0 %vm130_vm1, %v31_v19  ;;  %v95_v19 = vld [vmem:[%s8812_s0 + $0x248] sm:$0xff] }
  0x27   :  { %6037 = vmatprep.mubr.msk.f32.mxu0 %vm130_vm1, %v32_v20  ;;  %v96_v20 = vld [vmem:[%s8812_s0 + $0x250] sm:$0xff] }
  0x2a   :  { %6038 = vmatmul.mubr.msk.f32.gmra.mxu0 %vm130_vm1, %v33_v21  ;;  %v97_v21 = vld [vmem:[%s8812_s0 + $0x258] sm:$0xff] }
  0x2b   :  { %6040 = vmatprep.mubr.msk.f32.mxu0 %vm130_vm1, %v34_v22  ;;  %v98_v22 = vld [vmem:[%s8812_s0 + $0x260] sm:$0xff] }
  0x2e   :  { %6041 = vmatmul.mubr.msk.f32.gmra.mxu0 %vm130_vm1, %v35_v23  ;;  %v99_v23 = vld [vmem:[%s8812_s0 + $0x268] sm:$0xff] }
  0x2f   :  { %6043 = vmatprep.mubr.msk.f32.mxu0 %vm130_vm1, %v36_v24  ;;  %v100_v24 = vld [vmem:[%s8812_s0 + $0x270] sm:$0xff] }
  0x32   :  { %6044 = vmatmul.mubr.msk.f32.gmra.mxu0 %vm130_vm1, %v37_v25  ;;  %v101_v25 = vld [vmem:[%s8812_s0 + $0x278] sm:$0xff] }
  0x33   :  { %6046 = vmatprep.mubr.msk.f32.mxu0 %vm130_vm1, %v38_v26  ;;  %v102_v26 = vld [vmem:[%s8812_s0 + $0x280] sm:$0xff] }
  0x36   :  { %6047 = vmatmul.mubr.msk.f32.gmra.mxu0 %vm130_vm1, %v39_v27  ;;  %v103_v27 = vld [vmem:[%s8812_s0 + $0x288] sm:$0xff] }
  0x37   :  { %6049 = vmatprep.mubr.msk.f32.mxu0 %vm130_vm1, %v40_v28  ;;  %v104_v28 = vld [vmem:[%s8812_s0 + $0x290] sm:$0xff] }
  0x3a   :  { %6050 = vmatmul.mubr.msk.f32.gmra.mxu0 %vm130_vm1, %v41_v29  ;;  %v105_v29 = vld [vmem:[%s8812_s0 + $0x298] sm:$0xff] }
  0x3b   :  { %6052 = vmatprep.mubr.msk.f32.mxu0 %vm130_vm1, %v42_v30  ;;  %v106_v30 = vld [vmem:[%s8812_s0 + $0x2a0] sm:$0xff] }
  0x3e   :  { %6053 = vmatmul.mubr.msk.f32.gmra.mxu0 %vm130_vm1, %v43_v31  ;;  %v107_v31 = vld [vmem:[%s8812_s0 + $0x2a8] sm:$0xff] }
  0x3f   :  { %6055 = vmatprep.mubr.msk.f32.mxu0 %vm130_vm1, %v44_v32  ;;  %v108_v32 = vld [vmem:[%s8812_s0 + $0x2b0] sm:$0xff] }
  0x42   :  { %6056 = vmatmul.mubr.msk.f32.gmra.mxu0 %vm130_vm1, %v45_v33  ;;  %v109_v33 = vld [vmem:[%s8812_s0 + $0x2b8] sm:$0xff] }
  0x43   :  { %6058 = vmatprep.mubr.msk.f32.mxu0 %vm130_vm1, %v46_v34  ;;  %v110_v34 = vld [vmem:[%s8812_s0 + $0x2c0] sm:$0xff] }
  0x46   :  { %6059 = vmatmul.mubr.msk.f32.gmra.mxu0 %vm130_vm1, %v47_v35  ;;  %v111_v35 = vld [vmem:[%s8812_s0 + $0x2c8] sm:$0xff] }
  0x47   :  { %6061 = vmatprep.mubr.msk.f32.mxu0 %vm130_vm1, %v48_v36  ;;  %v112_v36 = vld [vmem:[%s8812_s0 + $0x2d0] sm:$0xff] }
  0x4a   :  { %6062 = vmatmul.mubr.msk.f32.gmra.mxu0 %vm130_vm1, %v49_v37  ;;  %v113_v37 = vld [vmem:[%s8812_s0 + $0x2d8] sm:$0xff] }
  0x4b   :  { %6064 = vmatprep.mubr.msk.f32.mxu0 %vm130_vm1, %v50_v38  ;;  %v114_v38 = vld [vmem:[%s8812_s0 + $0x2e0] sm:$0xff] }
  0x4e   :  { %6065 = vmatmul.mubr.msk.f32.gmra.mxu0 %vm130_vm1, %v51_v39  ;;  %v115_v39 = vld [vmem:[%s8812_s0 + $0x2e8] sm:$0xff] }
  0x4f   :  { %6067 = vmatprep.mubr.msk.f32.mxu0 %vm130_vm1, %v52_v40  ;;  %v116_v40 = vld [vmem:[%s8812_s0 + $0x2f0] sm:$0xff] }
  0x52   :  { %6068 = vmatmul.mubr.msk.f32.gmra.mxu0 %vm130_vm1, %v53_v41  ;;  %v117_v41 = vld [vmem:[%s8812_s0 + $0x2f8] sm:$0xff] }
  0x53   :  { %6070 = vmatprep.mubr.msk.f32.mxu0 %vm130_vm1, %v54_v42  ;;  %v118_v42 = vld [vmem:[%s8812_s0 + $0x300] sm:$0xff] }
  0x56   :  { %6071 = vmatmul.mubr.msk.f32.gmra.mxu0 %vm130_vm1, %v55_v43  ;;  %v119_v43 = vld [vmem:[%s8812_s0 + $0x308] sm:$0xff] }
  0x57   :  { %6073 = vmatprep.mubr.msk.f32.mxu0 %vm130_vm1, %v56_v44 }
  0x5a   :  { %6074 = vmatmul.mubr.msk.f32.gmra.mxu0 %vm130_vm1, %v57_v45 }
  0x5b   :  { %6076 = vmatprep.mubr.msk.f32.mxu0 %vm130_vm1, %v58_v46 }
  0x5e   :  { %6077 = vmatmul.mubr.msk.f32.gmra.mxu0 %vm130_vm1, %v59_v47 }
  0x5f   :  { %6079 = vmatprep.mubr.msk.f32.mxu0 %vm130_vm1, %v60_v48 }
  0x62   :  { %6080 = vmatmul.mubr.msk.f32.gmra.mxu0 %vm130_vm1, %v61_v49 }
  0x63   :  { %6082 = vmatprep.mubr.msk.f32.mxu0 %vm130_vm1, %v62_v50 }
  0x66   :  { %6083 = vmatmul.mubr.msk.f32.gmra.mxu0 %vm130_vm1, %v63_v51 }
  0x67   :  { %6085 = vmatprep.mubr.msk.f32.mxu0 %vm130_vm1, %v64_v52 }
  0x6a   :  { %6086 = vmatmul.mubr.msk.f32.gmra.mxu0 %vm130_vm1, %v65_v53 }
  0x6b   :  { %6088 = vmatprep.mubr.msk.f32.mxu0 %vm130_vm1, %v66_v54 }
  0x6e   :  { %6089 = vmatmul.mubr.msk.f32.gmra.mxu0 %vm130_vm1, %v67_v55 }
  0x6f   :  { %6091 = vmatprep.mubr.msk.f32.mxu0 %vm130_vm1, %v68_v56 }
  0x72   :  { %6092 = vmatmul.mubr.msk.f32.gmra.mxu0 %vm130_vm1, %v69_v57 }
  0x73   :  { %6094 = vmatprep.mubr.msk.f32.mxu0 %vm130_vm1, %v70_v58 }
  0x76   :  { %6095 = vmatmul.mubr.msk.f32.gmra.mxu0 %vm130_vm1, %v71_v59 }
  0x77   :  { %6097 = vmatprep.mubr.msk.f32.mxu0 %vm130_vm1, %v72_v60  ;;  %v6823_v60 = vld [vmem:[%s8813_s2] ss:$0 sm:$0xff] }
  0x7a   :  { %6098 = vmatmul.mubr.msk.f32.gmra.mxu0 %vm130_vm1, %v73_v61 }
  0x7b   :  { %6100 = vmatprep.mubr.msk.f32.mxu0 %vm130_vm1, %v74_v62 }
  0x7e   :  { %6101 = vmatmul.mubr.msk.f32.gmra.mxu0 %vm130_vm1, %v75_v63 }
  0x7f   :  { %6103 = vmatprep.mubr.msk.f32.mxu0 %vm130_vm1, %v76_v0 }
  0x82   :  { %6104 = vmatmul.mubr.msk.f32.gmra.mxu0 %vm130_vm1, %v77_v1 }
  0x83   :  { %6106 = vmatprep.mubr.msk.f32.mxu0 %vm130_vm1, %v78_v2 }
  0x86   :  { %6107 = vmatmul.mubr.msk.f32.gmra.mxu0 %vm130_vm1, %v79_v3 }
  0x87   :  { %6109 = vmatprep.mubr.msk.f32.mxu0 %vm130_vm1, %v80_v4 }
  0x8a   :  { %6110 = vmatmul.mubr.msk.f32.gmra.mxu0 %vm130_vm1, %v81_v5 }
  0x8b   :  { %6112 = vmatprep.mubr.msk.f32.mxu0 %vm130_vm1, %v82_v6 }
  0x8e   :  { %6113 = vmatmul.mubr.msk.f32.gmra.mxu0 %vm130_vm1, %v83_v7 }
  0x8f   :  { %6115 = vmatprep.mubr.msk.f32.mxu0 %vm130_vm1, %v84_v8 }
  0x92   :  { %6116 = vmatmul.mubr.msk.f32.gmra.mxu0 %vm130_vm1, %v85_v9 }
  0x93   :  { %6118 = vmatprep.mubr.msk.f32.mxu0 %vm130_vm1, %v86_v10 }
  0x96   :  { %6119 = vmatmul.mubr.msk.f32.gmra.mxu0 %vm130_vm1, %v87_v11 }
  0x97   :  { %6121 = vmatprep.mubr.msk.f32.mxu0 %vm130_vm1, %v88_v12 }
  0x9a   :  { %6122 = vmatmul.mubr.msk.f32.gmra.mxu0 %vm130_vm1, %v89_v13 }
  0x9b   :  { %6124 = vmatprep.mubr.msk.f32.mxu0 %vm130_vm1, %v90_v14 }
  0x9e   :  { %6125 = vmatmul.mubr.msk.f32.gmra.mxu0 %vm130_vm1, %v91_v15 }
  0x9f   :  { %6127 = vmatprep.mubr.msk.f32.mxu0 %vm130_vm1, %v92_v16 }
  0xa2   :  { %6128 = vmatmul.mubr.msk.f32.gmra.mxu0 %vm130_vm1, %v93_v17 }
  0xa3   :  { %6130 = vmatprep.mubr.msk.f32.mxu0 %vm130_vm1, %v94_v18 }
  0xa6   :  { %6131 = vmatmul.mubr.msk.f32.gmra.mxu0 %vm130_vm1, %v95_v19 }
  0xa7   :  { %6133 = vmatprep.mubr.msk.f32.mxu0 %vm130_vm1, %v96_v20 }
  0xaa   :  { %6134 = vmatmul.mubr.msk.f32.gmra.mxu0 %vm130_vm1, %v97_v21 }
  0xab   :  { %6136 = vmatprep.mubr.msk.f32.mxu0 %vm130_vm1, %v98_v22 }
  0xae   :  { %6137 = vmatmul.mubr.msk.f32.gmra.mxu0 %vm130_vm1, %v99_v23 }
  0xaf   :  { %6139 = vmatprep.mubr.msk.f32.mxu0 %vm130_vm1, %v100_v24  ;;  %v6348_v24 = vmov 0.0  }
  0xb0   :  { %2579 = vmatprep.subr.mxu1 %v6348_v24  ;;  %5289 = vmatprep.subr.mxu0 %v6348_v24  ;;  %1482 = vst.msk [vmem:[#allocation3 + $0xc4] sm:$0xf] %vm1481_vm10, %v6348_v24 }
  0xb2   :  { %6140 = vmatmul.mubr.msk.f32.gmra.mxu0 %vm130_vm1, %v101_v25 }
  0xb3   :  { %6142 = vmatprep.mubr.msk.f32.mxu0 %vm130_vm1, %v102_v26 }
  0xb6   :  { %6143 = vmatmul.mubr.msk.f32.gmra.mxu0 %vm130_vm1, %v103_v27  ;;  %v2513_v27 = vld [vmem:[%s8814_s3 + $0x78] sm:$0xff] }
  0xb7   :  { %6145 = vmatprep.mubr.msk.f32.mxu0 %vm130_vm1, %v104_v28  ;;  %2580 = vmatpush1.msra.mxu1 %v2513_v27  ;;  %v2502_v27 = vld [vmem:[%s8814_s3 + $0x20] sm:$0xff] }
  0xb8   :  { %2581 = vmatprep.subr.mxu1 %v6348_v24 }
  0xba   :  { %6146 = vmatmul.mubr.msk.f32.gmra.mxu0 %vm130_vm1, %v105_v29 }
  0xbb   :  { %6148 = vmatprep.mubr.msk.f32.mxu0 %vm130_vm1, %v106_v30 }
  0xbe   :  { %6149 = vmatmul.mubr.msk.f32.gmra.mxu0 %vm130_vm1, %v107_v31 }
  0xbf   :  { %6151 = vmatprep.mubr.msk.f32.mxu0 %vm130_vm1, %v108_v32 }
  0xc2   :  { %6152 = vmatmul.mubr.msk.f32.gmra.mxu0 %vm130_vm1, %v109_v33  ;;  %v2512_v33 = vld [vmem:[%s8814_s3 + $0x70] sm:$0xff] }
  0xc3   :  { %6154 = vmatprep.mubr.msk.f32.mxu0 %vm130_vm1, %v110_v34  ;;  %2582 = vmatpush1.msra.mxu1 %v2512_v33 }
  0xc4   :  { %2583 = vmatprep.subr.mxu1 %v6348_v24 }
  0xc6   :  { %6155 = vmatmul.mubr.msk.f32.gmra.mxu0 %vm130_vm1, %v111_v35 }
  0xc7   :  { %6157 = vmatprep.mubr.msk.f32.mxu0 %vm130_vm1, %v112_v36 }
  0xca   :  { %6158 = vmatmul.mubr.msk.f32.gmra.mxu0 %vm130_vm1, %v113_v37 }
  0xcb   :  { %6160 = vmatprep.mubr.msk.f32.mxu0 %vm130_vm1, %v114_v38 }
  0xce   :  { %6161 = vmatmul.mubr.msk.f32.gmra.mxu0 %vm130_vm1, %v115_v39 }
  0xcf   :  { %6163 = vmatprep.mubr.msk.f32.mxu0 %vm130_vm1, %v116_v40 }
  0xd2   :  { %6164 = vmatmul.mubr.msk.f32.gmra.mxu0 %vm130_vm1, %v117_v41  ;;  %v2511_v41 = vld [vmem:[%s8814_s3 + $0x68] sm:$0xff] }
  0xd3   :  { %6166 = vmatprep.mubr.msk.f32.mxu0 %vm130_vm1, %v118_v42  ;;  %2584 = vmatpush1.msra.mxu1 %v2511_v41  ;;  %v2510_v42 = vld [vmem:[%s8814_s3 + $0x60] sm:$0xff] }
  0xd4   :  { %2585 = vmatprep.subr.mxu1 %v6348_v24 }
  0xd5   :  { %2586 = vmatpush1.msra.mxu1 %v2510_v42 }
  0xd6   :  { %v6024_v44 = vpop.f32.mrf.mxu0  ;;  %6167 = vmatmul.mubr.msk.f32.gmra.mxu0 %vm130_vm1, %v119_v43  ;;  %2587 = vmatprep.subr.mxu1 %v6348_v24 }
  0xd7   :  { %986 = vst.msk [vmem:[#allocation2 + $0x8] sm:$0xff] %vm984_vm2, %v6024_v44 }
  0xd8   :  { %v495_v45 = vpop.f32.mrf.mxu0 }
  0xd9   :  { %985 = vst.msk [vmem:[#allocation2] sm:$0xff] %vm984_vm2, %v495_v45 }
  0xda   :  { %v6027_v46 = vpop.f32.mrf.mxu0 }
  0xdb   :  { %988 = vst.msk [vmem:[#allocation2 + $0x18] sm:$0xff] %vm984_vm2, %v6027_v46 }
  0xdc   :  { %v505_v47 = vpop.f32.mrf.mxu0 }
  0xdd   :  { %987 = vst.msk [vmem:[#allocation2 + $0x10] sm:$0xff] %vm984_vm2, %v505_v47 }
  0xde   :  { %v6030_v48 = vpop.f32.mrf.mxu0 }
  0xdf   :  { %990 = vst.msk [vmem:[#allocation2 + $0x28] sm:$0xff] %vm984_vm2, %v6030_v48 }
  0xe0   :  { %v515_v49 = vpop.f32.mrf.mxu0  ;;  %v1083_v52 = vld [vmem:[#allocation2] ss:$2 sm:$0xff]  ;;  %v1087_v53 = vld [vmem:[#allocation2 + $0x1] ss:$2 sm:$0xff] }
  0xe1   :  { %989 = vst.msk [vmem:[#allocation2 + $0x20] sm:$0xff] %vm984_vm2, %v515_v49  ;;  %v1090_v58 = vmax.f32 %v1083_v52, %v1087_v53 }
  0xe2   :  { %v6033_v50 = vpop.f32.mrf.mxu0 }
  0xe3   :  { %992 = vst.msk [vmem:[#allocation2 + $0x38] sm:$0xff] %vm984_vm2, %v6033_v50  ;;  %v2509_v50 = vld [vmem:[%s8814_s3 + $0x58] sm:$0xff] }
  0xe4   :  { %v525_v51 = vpop.f32.mrf.mxu0  ;;  %v1085_v61 = vld [vmem:[#allocation2 + $0x10] ss:$2 sm:$0x3f]  ;;  %v1089_v62 = vld [vmem:[#allocation2 + $0x11] ss:$2 sm:$0x3f]  ;;  %2588 = vmatpush1.msra.mxu1 %v2509_v50 }
  0xe5   :  { %991 = vst.msk [vmem:[#allocation2 + $0x30] sm:$0xff] %vm984_vm2, %v525_v51  ;;  %v1091_v4 = vmax.f32 %v1085_v61, %v1089_v62  ;;  %v2508_v51 = vld [vmem:[%s8814_s3 + $0x50] sm:$0xff]  ;;  %2589 = vmatprep.subr.mxu1 %v6348_v24  ;;  %v2507_v61 = vld [vmem:[%s8814_s3 + $0x48] sm:$0xff] }
  0xe6   :  { %v6036_v54 = vpop.f32.mrf.mxu0  ;;  %2590 = vmatpush1.msra.mxu1 %v2508_v51  ;;  %v2499_v50 = vld [vmem:[%s8814_s3 + $0x8] sm:$0xff] }
  0xe7   :  { %994 = vst.msk [vmem:[#allocation2 + $0x48] sm:$0xff] %vm984_vm2, %v6036_v54  ;;  %2591 = vmatprep.subr.mxu1 %v6348_v24 }
  0xe8   :  { %v1093_v55 = vld [vmem:[#allocation2 + $0x1c] ss:$2 sm:$0xff]  ;;  %v1097_v56 = vld [vmem:[#allocation2 + $0x1d] ss:$2 sm:$0xff]  ;;  %v535_v57 = vpop.f32.mrf.mxu0  ;;  %2592 = vmatpush1.msra.mxu1 %v2507_v61 }
  0xe9   :  { %v1100_v59 = vmax.f32 %v1093_v55, %v1097_v56  ;;  %993 = vst.msk [vmem:[#allocation2 + $0x40] sm:$0xff] %vm984_vm2, %v535_v57  ;;  %2593 = vmatprep.subr.mxu1 %v6348_v24  ;;  %v2515_v61 = vld [vmem:[%s8814_s3 + $0x88] sm:$0xff] }
  0xea   :  { %v6039_v63 = vpop.f32.mrf.mxu0 }
  0xeb   :  { %996 = vst.msk [vmem:[#allocation2 + $0x58] sm:$0xff] %vm984_vm2, %v6039_v63  ;;  %v1102_v0 = vmax.f32 %v1090_v58, %v1100_v59  ;;  %v2506_v63 = vld [vmem:[%s8814_s3 + $0x40] sm:$0xff] }
  0xec   :  { %v1095_v1 = vld [vmem:[#allocation2 + $0x2c] ss:$2 sm:$0x3f]  ;;  %v1099_v2 = vld [vmem:[#allocation2 + $0x2d] ss:$2 sm:$0x3f]  ;;  %v545_v3 = vpop.f32.mrf.mxu0  ;;  %2594 = vmatpush1.msra.mxu1 %v2506_v63 }
  0xed   :  { %v1101_v5 = vmax.f32 %v1095_v1, %v1099_v2  ;;  %995 = vst.msk [vmem:[#allocation2 + $0x50] sm:$0xff] %vm984_vm2, %v545_v3  ;;  %v1110_v6 = vadd.f32 %v6823_v60, %v1102_v0  ;;  %2595 = vmatprep.subr.mxu1 %v6348_v24 }
  0xee   :  { %v6042_v7 = vpop.f32.mrf.mxu0 }
  0xef   :  { %v1103_v8 = vmax.f32 %v1091_v4, %v1101_v5  ;;  %998 = vst.msk [vmem:[#allocation2 + $0x68] sm:$0xff] %vm984_vm2, %v6042_v7  ;;  %v1112_v9 = vmax.f32 %v1110_v6, 0.0 }
  0xf0   :  { %v555_v10 = vpop.f32.mrf.mxu0  ;;  %v1118_v15 = vld [vmem:[#allocation2 + $0x38] ss:$2 sm:$0xff]  ;;  %v1122_v18 = vld [vmem:[#allocation2 + $0x39] ss:$2 sm:$0xff] }
  0xf1   :  { %997 = vst.msk [vmem:[#allocation2 + $0x60] sm:$0xff] %vm984_vm2, %v555_v10  ;;  %v1111_v11 = vadd.f32 %v6823_v60, %v1103_v8  ;;  %1114 = vst.msk [vmem:[#allocation3] sm:$0xff] %vm984_vm2, %v1112_v9  ;;  %v1125_v28 = vmax.f32 %v1118_v15, %v1122_v18  ;;  %v2505_v15 = vld [vmem:[%s8814_s3 + $0x38] sm:$0xff] }
  0xf2   :  { %v6045_v12 = vpop.f32.mrf.mxu0  ;;  %2596 = vmatpush1.msra.mxu1 %v2505_v15 }
  0xf3   :  { %1000 = vst.msk [vmem:[#allocation2 + $0x78] sm:$0xff] %vm984_vm2, %v6045_v12  ;;  %v1113_v13 = vmax.f32 %v1111_v11, 0.0  ;;  %2597 = vmatprep.subr.mxu1 %v6348_v24 }
  0xf4   :  { %v565_v14 = vpop.f32.mrf.mxu0  ;;  %v1120_v16 = vld [vmem:[#allocation2 + $0x48] ss:$2 sm:$0x3f]  ;;  %v1124_v19 = vld [vmem:[#allocation2 + $0x49] ss:$2 sm:$0x3f] }
  0xf5   :  { %999 = vst.msk [vmem:[#allocation2 + $0x70] sm:$0xff] %vm984_vm2, %v565_v14  ;;  %v1126_v29 = vmax.f32 %v1120_v16, %v1124_v19  ;;  %v2504_v19 = vld [vmem:[%s8814_s3 + $0x30] sm:$0xff] }
  0xf6   :  { %1116 = vst.msk [vmem:[#allocation3 + $0x8] sm:$0x3f] %vm1115_vm3, %v1113_v13  ;;  %v6048_v17 = vpop.f32.mrf.mxu0  ;;  %2598 = vmatpush1.msra.mxu1 %v2504_v19 }
  0xf7   :  { %1002 = vst.msk [vmem:[#allocation2 + $0x88] sm:$0xff] %vm984_vm2, %v6048_v17  ;;  %2599 = vmatprep.subr.mxu1 %v6348_v24 }
  0xf8   :  { %v1128_v20 = vld [vmem:[#allocation2 + $0x54] ss:$2 sm:$0xff]  ;;  %v1130_v21 = vld [vmem:[#allocation2 + $0x64] ss:$2 sm:$0x3f]  ;;  %v575_v22 = vpop.f32.mrf.mxu0 }
  0xf9   :  { %v1483_v23 = vld [vmem:[#allocation3] sm:$0xff]  ;;  %v1134_v26 = vld [vmem:[#allocation2 + $0x65] ss:$2 sm:$0x3f]  ;;  %1001 = vst.msk [vmem:[#allocation2 + $0x80] sm:$0xff] %vm984_vm2, %v575_v22 }
  0xfa   :  { %v1132_v25 = vld [vmem:[#allocation2 + $0x55] ss:$2 sm:$0xff]  ;;  %1504 = vst.msk [vmem:[#allocation4] sm:$0xff] %vm984_vm2, %v1483_v23  ;;  %v1136_v31 = vmax.f32 %v1130_v21, %v1134_v26  ;;  %v6051_v32 = vpop.f32.mrf.mxu0  ;;  %v2503_v22 = vld [vmem:[%s8814_s3 + $0x28] sm:$0xff] }
  0xfb   :  { %v1135_v30 = vmax.f32 %v1128_v20, %v1132_v25  ;;  %1004 = vst.msk [vmem:[#allocation2 + $0x98] sm:$0xff] %vm984_vm2, %v6051_v32  ;;  %2600 = vmatpush1.msra.mxu1 %v2503_v22 }
  0xfc   :  { %v1138_v34 = vmax.f32 %v1126_v29, %v1136_v31  ;;  %v585_v35 = vpop.f32.mrf.mxu0  ;;  %v1146_v47 = vld [vmem:[#allocation2 + $0x70] ss:$2 sm:$0xff]  ;;  %v1150_v48 = vld [vmem:[#allocation2 + $0x71] ss:$2 sm:$0xff]  ;;  %2601 = vmatprep.subr.mxu1 %v6348_v24 }
  0xfd   :  { %v1525_v36 = vld [vmem:[#allocation3 + $0x1] sm:$0xff]  ;;  %v1137_v37 = vmax.f32 %v1125_v28, %v1135_v30  ;;  %1003 = vst.msk [vmem:[#allocation2 + $0x90] sm:$0xff] %vm984_vm2, %v585_v35  ;;  %v1153_v55 = vmax.f32 %v1146_v47, %v1150_v48  ;;  %2602 = vmatpush1.msra.mxu1 %v2502_v27 }
  0xfe   :  { %1567 = vrot.lane.b32.xlu0 %v1525_v36, %s6349_s15  ;;  %v6054_v38 = vpop.f32.mrf.mxu0  ;;  %v1140_v40 = vadd.f32 %v6823_v60, %v1138_v34  ;;  %v1652_v44 = vld [vmem:[#allocation3 + $0x2] sm:$0xff]  ;;  %2603 = vmatprep.subr.mxu1 %v6348_v24 }
  0xff   :  { %v1139_v39 = vadd.f32 %v6823_v60, %v1137_v37  ;;  %1006 = vst.msk [vmem:[#allocation2 + $0xa8] sm:$0xff] %vm984_vm2, %v6054_v38  ;;  %v2501_v30 = vld [vmem:[%s8814_s3 + $0x18] sm:$0xff] }
 0x100   :  { %v595_v43 = vpop.f32.mrf.mxu0  ;;  %v1142_v46 = vmax.f32 %v1140_v40, 0.0  ;;  %v1148_v56 = vld [vmem:[#allocation2 + $0x80] ss:$2 sm:$0x3f]  ;;  %2604 = vmatpush1.msra.mxu1 %v2501_v30 }
 0x101   :  { %1005 = vst.msk [vmem:[#allocation2 + $0xa0] sm:$0xff] %vm984_vm2, %v595_v43  ;;  %v1141_v45 = vmax.f32 %v1139_v39, 0.0  ;;  %v1152_v58 = vld [vmem:[#allocation2 + $0x81] ss:$2 sm:$0x3f]  ;;  %2605 = vmatprep.subr.mxu1 %v6348_v24 }
 0x102   :  { %1694 = vrot.lane.b32.xlu0 %v1652_v44, %s6350_s20  ;;  %v6057_v49 = vpop.f32.mrf.mxu0  ;;  %1144 = vst.msk [vmem:[#allocation3 + $0x16] sm:$0x3f] %vm1115_vm3, %v1142_v46  ;;  %v1154_v3 = vmax.f32 %v1148_v56, %v1152_v58  ;;  %v2500_v44 = vld [vmem:[%s8814_s3 + $0x10] sm:$0xff]  ;;  %v2498_v56 = vld [vmem:[%s8814_s3] sm:$0xff] }
 0x103   :  { %1008 = vst.msk [vmem:[#allocation2 + $0xb8] sm:$0xff] %vm984_vm2, %v6057_v49  ;;  %1143 = vst.msk [vmem:[#allocation3 + $0xe] sm:$0xff] %vm984_vm2, %v1141_v45  ;;  %2606 = vmatpush1.msra.mxu1 %v2500_v44 }
 0x104   :  { %v1156_v52 = vld [vmem:[#allocation2 + $0x8c] ss:$2 sm:$0xff]  ;;  %v1160_v53 = vld [vmem:[#allocation2 + $0x8d] ss:$2 sm:$0xff]  ;;  %v605_v54 = vpop.f32.mrf.mxu0  ;;  %2607 = vmatprep.subr.mxu1 %v6348_v24 }
 0x105   :  { %v1163_v57 = vmax.f32 %v1156_v52, %v1160_v53  ;;  %1007 = vst.msk [vmem:[#allocation2 + $0xb0] sm:$0xff] %vm984_vm2, %v605_v54  ;;  %2608 = vmatpush1.msra.mxu1 %v2499_v50 }
 0x106   :  { %v6060_v59 = vpop.f32.mrf.mxu0  ;;  %2609 = vmatprep.subr.mxu1 %v6348_v24 }
 0x107   :  { %1010 = vst.msk [vmem:[#allocation2 + $0xc8] sm:$0xff] %vm984_vm2, %v6060_v59  ;;  %v1165_v62 = vmax.f32 %v1153_v55, %v1163_v57  ;;  %2610 = vmatpush1.msra.mxu1 %v2498_v56 }
 0x108   :  { %v1158_v0 = vld [vmem:[#allocation2 + $0x9c] ss:$2 sm:$0x3f]  ;;  %v1162_v1 = vld [vmem:[#allocation2 + $0x9d] ss:$2 sm:$0x3f]  ;;  %v615_v2 = vpop.f32.mrf.mxu0  ;;  %2639 = vmatprep.subr.mxu1 %v6348_v24 }
 0x109   :  { %v1164_v4 = vmax.f32 %v1158_v0, %v1162_v1  ;;  %1009 = vst.msk [vmem:[#allocation2 + $0xc0] sm:$0xff] %vm984_vm2, %v615_v2  ;;  %v1167_v5 = vadd.f32 %v6823_v60, %v1165_v62  ;;  %2640 = vmatpush2.msra.mxu1 %v2515_v61 }
 0x10a   :  { %v1779_v6 = vld [vmem:[#allocation3 + $0xe] sm:$0xff]  ;;  %v6063_v8 = vpop.f32.mrf.mxu0  ;;  %2641 = vmatprep.subr.mxu1 %v6348_v24 }
 0x10b   :  { %v1526_v7 = vld [vmem:[#allocation3 + $0x9] sm:$0xff]  ;;  %v1166_v9 = vmax.f32 %v1154_v3, %v1164_v4  ;;  %1821 = vrot.lane.b32.xlu1 %v1779_v6, %s6351_s29  ;;  %1012 = vst.msk [vmem:[#allocation2 + $0xd8] sm:$0xff] %vm984_vm2, %v6063_v8  ;;  %v1169_v11 = vmax.f32 %v1167_v5, 0.0  ;;  %v1527_v41 = vld [vmem:[#allocation3 + $0x11] sm:$0xff] }
 0x10c   :  { %1569 = vrot.lane.b32.xlu0 %v1526_v7, %s6349_s15  ;;  %v2033_v10 = vld [vmem:[#allocation3 + $0x10] sm:$0xff]  ;;  %v625_v12 = vpop.f32.mrf.mxu0  ;;  %v1484_v14 = vld [vmem:[#allocation3 + $0x8] sm:$0xff]  ;;  %v1174_v23 = vld [vmem:[#allocation2 + $0xa8] ss:$2 sm:$0xff] }
 0x10d   :  { %1506 = vst.msk [vmem:[#allocation4 + $0x20] sm:$0xff] %vm984_vm2, %v2033_v10  ;;  %v1168_v13 = vadd.f32 %v6823_v60, %v1166_v9  ;;  %1011 = vst.msk [vmem:[#allocation2 + $0xd0] sm:$0xff] %vm984_vm2, %v625_v12  ;;  %v1906_v16 = vld [vmem:[#allocation3 + $0xf] sm:$0xff]  ;;  %v1178_v28 = vld [vmem:[#allocation2 + $0xa9] ss:$2 sm:$0xff] }
 0x10e   :  { %1171 = vst.msk [vmem:[#allocation3 + $0x1c] sm:$0xff] %vm984_vm2, %v1169_v11  ;;  %v1653_v17 = vld [vmem:[#allocation3 + $0xa] sm:$0xff]  ;;  %v6066_v18 = vpop.f32.mrf.mxu0  ;;  %1505 = vst.msk [vmem:[#allocation4 + $0x10] sm:$0xff] %vm984_vm2, %v1484_v14  ;;  %v1181_v37 = vmax.f32 %v1174_v23, %v1178_v28  ;;  %v1654_v52 = vld [vmem:[#allocation3 + $0x12] sm:$0xff] }
 0x10f   :  { %v1170_v20 = vmax.f32 %v1168_v13, 0.0  ;;  %1948 = vrot.lane.b32.xlu1 %v1906_v16, %s6352_s9  ;;  %1014 = vst.msk [vmem:[#allocation2 + $0xe8] sm:$0xff] %vm984_vm2, %v6066_v18  ;;  %v2514_v3 = vld [vmem:[%s8814_s3 + $0x80] sm:$0xff] }
 0x110   :  { %1696 = vrot.lane.b32.xlu0 %v1653_v17, %s6350_s20  ;;  %v635_v21 = vpop.f32.mrf.mxu0  ;;  %v1176_v25 = vld [vmem:[#allocation2 + $0xb8] ss:$2 sm:$0x3f]  ;;  %v1180_v29 = vld [vmem:[#allocation2 + $0xb9] ss:$2 sm:$0x3f]  ;;  %2642 = vmatpush2.msra.mxu1 %v2514_v3 }
 0x111   :  { %1172 = vst.msk [vmem:[#allocation3 + $0x24] sm:$0x3f] %vm1115_vm3, %v1170_v20  ;;  %v1182_v38 = vmax.f32 %v1176_v25, %v1180_v29 }
 0x112   :  { %1013 = vst.msk [vmem:[#allocation2 + $0xe0] sm:$0xff] %vm984_vm2, %v635_v21  ;;  %v6069_v26 = vpop.f32.mrf.mxu0 }
 0x113   :  { %2075 = vrot.lane.b32.xlu1 %v2033_v10, %s6353_s14  ;;  %1016 = vst.msk [vmem:[#allocation2 + $0xf8] sm:$0xff] %vm984_vm2, %v6069_v26 }
 0x114   :  { %v1184_v31 = vld [vmem:[#allocation2 + $0xc4] ss:$2 sm:$0xff]  ;;  %v1186_v32 = vld [vmem:[#allocation2 + $0xd4] ss:$2 sm:$0x3f]  ;;  %v645_v33 = vpop.f32.mrf.mxu0 }
 0x115   :  { %v1780_v34 = vld [vmem:[#allocation3 + $0x16] sm:$0xff]  ;;  %v1190_v36 = vld [vmem:[#allocation2 + $0xd5] ss:$2 sm:$0x3f]  ;;  %1015 = vst.msk [vmem:[#allocation2 + $0xf0] sm:$0xff] %vm984_vm2, %v645_v33 }
 0x116   :  { %v1188_v35 = vld [vmem:[#allocation2 + $0xc5] ss:$2 sm:$0xff]  ;;  %1823 = vrot.lane.b32.xlu0 %v1780_v34, %s6351_s29  ;;  %v1192_v40 = vmax.f32 %v1186_v32, %v1190_v36  ;;  %v6072_v42 = vpop.f32.mrf.mxu0 }
 0x117   :  { %v1191_v39 = vmax.f32 %v1184_v31, %v1188_v35  ;;  %v2034_v43 = vld [vmem:[#allocation3 + $0x18] sm:$0xff]  ;;  %1571 = vrot.lane.b32.xlu1 %v1527_v41, %s6349_s15  ;;  %1018 = vst.msk [vmem:[#allocation2 + $0x108] sm:$0xff] %vm984_vm2, %v6072_v42 }
 0x118   :  { %1507 = vst.msk [vmem:[#allocation4 + $0x30] sm:$0xff] %vm984_vm2, %v2034_v43  ;;  %v1194_v45 = vmax.f32 %v1182_v38, %v1192_v40  ;;  %v655_v46 = vpop.f32.mrf.mxu0  ;;  %v1907_v47 = vld [vmem:[#allocation3 + $0x17] sm:$0xff]  ;;  %v6939_v51 = vld [vmem:[#allocation3 + $0x20] sm:$0xff] }
 0x119   :  { %v6929_v48 = vld [vmem:[#allocation3 + $0x1e] sm:$0xff]  ;;  %v1193_v49 = vmax.f32 %v1181_v37, %v1191_v39  ;;  %1017 = vst.msk [vmem:[#allocation2 + $0x100] sm:$0xff] %vm984_vm2, %v655_v46  ;;  %1508 = vst.msk [vmem:[#allocation4 + $0x40] sm:$0xff] %vm984_vm2, %v6939_v51 }
 0x11a   :  { %1950 = vrot.lane.b32.xlu0 %v1907_v47, %s6352_s9  ;;  %2435 = vst.msk [vmem:[#allocation4 + $0x8] sm:$0xff] %vm984_vm2, %v6929_v48  ;;  %v6075_v53 = vpop.f32.mrf.mxu0  ;;  %v1196_v55 = vadd.f32 %v6823_v60, %v1194_v45  ;;  %v1202_v57 = vld [vmem:[#allocation2 + $0xe0] ss:$2 sm:$0xff]  ;;  %v1206_v58 = vld [vmem:[#allocation2 + $0xe1] ss:$2 sm:$0xff] }
 0x11b   :  { %v1195_v54 = vadd.f32 %v6823_v60, %v1193_v49  ;;  %1698 = vrot.lane.b32.xlu1 %v1654_v52, %s6350_s20  ;;  %1020 = vst.msk [vmem:[#allocation2 + $0x118] sm:$0xff] %vm984_vm2, %v6075_v53  ;;  %v2160_v0 = vld [vmem:[#allocation3 + $0x1c] sm:$0xff]  ;;  %v1209_v4 = vmax.f32 %v1202_v57, %v1206_v58 }
 0x11c   :  { %v665_v59 = vpop.f32.mrf.mxu0  ;;  %v1198_v63 = vmax.f32 %v1196_v55, 0.0  ;;  %v1528_v2 = vld [vmem:[#allocation3 + $0x19] sm:$0xff]  ;;  %v1208_v6 = vld [vmem:[#allocation2 + $0xf1] ss:$2 sm:$0x3f] }
 0x11d   :  { %1019 = vst.msk [vmem:[#allocation2 + $0x110] sm:$0xff] %vm984_vm2, %v665_v59  ;;  %v1197_v62 = vmax.f32 %v1195_v54, 0.0  ;;  %v1204_v5 = vld [vmem:[#allocation2 + $0xf0] ss:$2 sm:$0x3f] }
 0x11e   :  { %2077 = vrot.lane.b32.xlu0 %v2034_v43, %s6353_s14  ;;  %v6078_v1 = vpop.f32.mrf.mxu0  ;;  %1200 = vst.msk [vmem:[#allocation3 + $0x32] sm:$0x3f] %vm1115_vm3, %v1198_v63  ;;  %v2287_v12 = vld [vmem:[#allocation3 + $0x1d] sm:$0xff]  ;;  %v1210_v14 = vmax.f32 %v1204_v5, %v1208_v6 }
 0x11f   :  { %2202 = vrot.lane.b32.xlu1 %v2160_v0, %s6354_s30  ;;  %1022 = vst.msk [vmem:[#allocation2 + $0x128] sm:$0xff] %vm984_vm2, %v6078_v1  ;;  %1199 = vst.msk [vmem:[#allocation3 + $0x2a] sm:$0xff] %vm984_vm2, %v1197_v62  ;;  %v1655_v15 = vld [vmem:[#allocation3 + $0x1a] sm:$0xff]  ;;  %v1656_v62 = vld [vmem:[#allocation3 + $0x22] sm:$0xff] }
 0x120   :  { %v1212_v7 = vld [vmem:[#allocation2 + $0xfc] ss:$2 sm:$0xff]  ;;  %v1216_v8 = vld [vmem:[#allocation2 + $0xfd] ss:$2 sm:$0xff]  ;;  %v675_v9 = vpop.f32.mrf.mxu0  ;;  %v1908_v32 = vld [vmem:[#allocation3 + $0x1f] sm:$0xff] }
 0x121   :  { %v2457_v10 = vld [vmem:[#allocation4 + $0x8] sm:$0xff]  ;;  %v1219_v11 = vmax.f32 %v1212_v7, %v1216_v8  ;;  %1021 = vst.msk [vmem:[#allocation2 + $0x120] sm:$0xff] %vm984_vm2, %v675_v9  ;;  %v1529_v53 = vld [vmem:[#allocation3 + $0x21] sm:$0xff] }
 0x122   :  { %1573 = vrot.lane.b32.xlu0 %v1528_v2, %s6349_s15  ;;  %5644 = vmatprep.mubr.msk.f32.mxu1 %vm984_vm2, %v2457_v10  ;;  %v6081_v13 = vpop.f32.mrf.mxu0 }
 0x123   :  { %2329 = vrot.lane.b32.xlu1 %v2287_v12, %s6355_s6  ;;  %1024 = vst.msk [vmem:[#allocation2 + $0x138] sm:$0xff] %vm984_vm2, %v6081_v13  ;;  %v1221_v16 = vmax.f32 %v1209_v4, %v1219_v11 }
 0x124   :  { %v1214_v17 = vld [vmem:[#allocation2 + $0x10c] ss:$2 sm:$0x3f]  ;;  %v1218_v18 = vld [vmem:[#allocation2 + $0x10d] ss:$2 sm:$0x3f]  ;;  %v685_v19 = vpop.f32.mrf.mxu0 }
 0x125   :  { %v1220_v20 = vmax.f32 %v1214_v17, %v1218_v18  ;;  %1023 = vst.msk [vmem:[#allocation2 + $0x130] sm:$0xff] %vm984_vm2, %v685_v19  ;;  %v1223_v21 = vadd.f32 %v6823_v60, %v1221_v16 }
 0x126   :  { %1700 = vrot.lane.b32.xlu0 %v1655_v15, %s6350_s20  ;;  %v6084_v22 = vpop.f32.mrf.mxu0  ;;  %v1782_v23 = vld [vmem:[#allocation3 + $0x26] sm:$0xff]  ;;  %v6984_v30 = vld [vmem:[#allocation3 + $0x2e] sm:$0xff] }
 0x127   :  { %v1222_v25 = vmax.f32 %v1210_v14, %v1220_v20  ;;  %1825 = vrot.lane.b32.xlu1 %v6929_v48, %s6351_s29  ;;  %1026 = vst.msk [vmem:[#allocation2 + $0x148] sm:$0xff] %vm984_vm2, %v6084_v22  ;;  %v6977_v26 = vld [vmem:[#allocation3 + $0x28] sm:$0xff]  ;;  %v1225_v27 = vmax.f32 %v1223_v21, 0.0  ;;  %2436 = vst.msk [vmem:[#allocation4 + $0x18] sm:$0xff] %vm984_vm2, %v1782_v23  ;;  %v6988_v34 = vld [vmem:[#allocation3 + $0x30] sm:$0xff] }
 0x128   :  { %v695_v28 = vpop.f32.mrf.mxu0  ;;  %v2161_v29 = vld [vmem:[#allocation3 + $0x24] sm:$0xff]  ;;  %1509 = vst.msk [vmem:[#allocation4 + $0x50] sm:$0xff] %vm984_vm2, %v6977_v26  ;;  %2437 = vst.msk [vmem:[#allocation4 + $0x28] sm:$0xff] %vm984_vm2, %v6984_v30  ;;  %v2162_v7 = vld [vmem:[#allocation3 + $0x2c] sm:$0xff] }
 0x129   :  { %1025 = vst.msk [vmem:[#allocation2 + $0x140] sm:$0xff] %vm984_vm2, %v695_v28  ;;  %1227 = vst.msk [vmem:[#allocation3 + $0x38] sm:$0xff] %vm984_vm2, %v1225_v27  ;;  %v1224_v31 = vadd.f32 %v6823_v60, %v1222_v25  ;;  %v1230_v36 = vld [vmem:[#allocation2 + $0x118] ss:$2 sm:$0xff]  ;;  %v1234_v37 = vld [vmem:[#allocation2 + $0x119] ss:$2 sm:$0xff] }
 0x12a   :  { %2204 = vrot.lane.b32.xlu0 %v2161_v29, %s6354_s30  ;;  %v6087_v33 = vpop.f32.mrf.mxu0  ;;  %1510 = vst.msk [vmem:[#allocation4 + $0x60] sm:$0xff] %vm984_vm2, %v6988_v34  ;;  %v2288_v38 = vld [vmem:[#allocation3 + $0x25] sm:$0xff]  ;;  %v1237_v43 = vmax.f32 %v1230_v36, %v1234_v37  ;;  %v2289_v17 = vld [vmem:[#allocation3 + $0x2d] sm:$0xff] }
 0x12b   :  { %1952 = vrot.lane.b32.xlu1 %v1908_v32, %s6352_s9  ;;  %1028 = vst.msk [vmem:[#allocation2 + $0x158] sm:$0xff] %vm984_vm2, %v6087_v33  ;;  %v1226_v35 = vmax.f32 %v1224_v31, 0.0  ;;  %v1909_v57 = vld [vmem:[#allocation3 + $0x27] sm:$0xff] }
 0x12c   :  { %v705_v39 = vpop.f32.mrf.mxu0  ;;  %v1232_v40 = vld [vmem:[#allocation2 + $0x128] ss:$2 sm:$0x3f]  ;;  %v1236_v41 = vld [vmem:[#allocation2 + $0x129] ss:$2 sm:$0x3f] }
 0x12d   :  { %1027 = vst.msk [vmem:[#allocation2 + $0x150] sm:$0xff] %vm984_vm2, %v705_v39  ;;  %v1238_v44 = vmax.f32 %v1232_v40, %v1236_v41  ;;  %v1530_v14 = vld [vmem:[#allocation3 + $0x29] sm:$0xff] }
 0x12e   :  { %2331 = vrot.lane.b32.xlu0 %v2288_v38, %s6355_s6  ;;  %1228 = vst.msk [vmem:[#allocation3 + $0x40] sm:$0x3f] %vm1115_vm3, %v1226_v35  ;;  %v6090_v42 = vpop.f32.mrf.mxu0  ;;  %v1657_v21 = vld [vmem:[#allocation3 + $0x2a] sm:$0xff] }
 0x12f   :  { %2079 = vrot.lane.b32.xlu1 %v6939_v51, %s6353_s14  ;;  %1030 = vst.msk [vmem:[#allocation2 + $0x168] sm:$0xff] %vm984_vm2, %v6090_v42  ;;  %v1910_v38 = vld [vmem:[#allocation3 + $0x2f] sm:$0xff] }
 0x130   :  { %v1240_v45 = vld [vmem:[#allocation2 + $0x134] ss:$2 sm:$0xff]  ;;  %v1242_v46 = vld [vmem:[#allocation2 + $0x144] ss:$2 sm:$0x3f]  ;;  %v715_v47 = vpop.f32.mrf.mxu0 }
 0x131   :  { %v1244_v48 = vld [vmem:[#allocation2 + $0x135] ss:$2 sm:$0xff]  ;;  %v1246_v49 = vld [vmem:[#allocation2 + $0x145] ss:$2 sm:$0x3f]  ;;  %1029 = vst.msk [vmem:[#allocation2 + $0x160] sm:$0xff] %vm984_vm2, %v715_v47 }
 0x132   :  { %1827 = vrot.lane.b32.xlu0 %v1782_v23, %s6351_s29  ;;  %v1247_v50 = vmax.f32 %v1240_v45, %v1244_v48  ;;  %v1248_v52 = vmax.f32 %v1242_v46, %v1246_v49  ;;  %v6093_v54 = vpop.f32.mrf.mxu0  ;;  %v7004_v55 = vld [vmem:[#allocation3 + $0x36] sm:$0xff] }
 0x133   :  { %1575 = vrot.lane.b32.xlu1 %v1529_v53, %s6349_s15  ;;  %1032 = vst.msk [vmem:[#allocation2 + $0x178] sm:$0xff] %vm984_vm2, %v6093_v54  ;;  %v7008_v51 = vld [vmem:[#allocation3 + $0x38] sm:$0xff]  ;;  %2438 = vst.msk [vmem:[#allocation4 + $0x38] sm:$0xff] %vm984_vm2, %v7004_v55 }
 0x134   :  { %v1250_v56 = vmax.f32 %v1238_v44, %v1248_v52  ;;  %v725_v58 = vpop.f32.mrf.mxu0  ;;  %v1249_v59 = vmax.f32 %v1237_v43, %v1247_v50  ;;  %1511 = vst.msk [vmem:[#allocation4 + $0x70] sm:$0xff] %vm984_vm2, %v7008_v51  ;;  %v1258_v2 = vld [vmem:[#allocation2 + $0x150] ss:$2 sm:$0xff]  ;;  %v1262_v3 = vld [vmem:[#allocation2 + $0x151] ss:$2 sm:$0xff]  ;;  %v2163_v35 = vld [vmem:[#allocation3 + $0x34] sm:$0xff] }
 0x135   :  { %1031 = vst.msk [vmem:[#allocation2 + $0x170] sm:$0xff] %vm984_vm2, %v725_v58  ;;  %v7016_v61 = vld [vmem:[#allocation3 + $0x3e] sm:$0xff]  ;;  %v1265_v9 = vmax.f32 %v1258_v2, %v1262_v3  ;;  %v2290_v41 = vld [vmem:[#allocation3 + $0x35] sm:$0xff] }
 0x136   :  { %1954 = vrot.lane.b32.xlu0 %v1909_v57, %s6352_s9  ;;  %v6096_v63 = vpop.f32.mrf.mxu0  ;;  %v1251_v0 = vadd.f32 %v6823_v60, %v1249_v59  ;;  %v1252_v1 = vadd.f32 %v6823_v60, %v1250_v56  ;;  %2439 = vst.msk [vmem:[#allocation4 + $0x48] sm:$0xff] %vm984_vm2, %v7016_v61  ;;  %v1531_v58 = vld [vmem:[#allocation3 + $0x31] sm:$0xff] }
 0x137   :  { %1702 = vrot.lane.b32.xlu1 %v1656_v62, %s6350_s20  ;;  %1034 = vst.msk [vmem:[#allocation2 + $0x188] sm:$0xff] %vm984_vm2, %v6096_v63 }
 0x138   :  { %v735_v4 = vpop.f32.mrf.mxu0  ;;  %v1253_v5 = vmax.f32 %v1251_v0, 0.0  ;;  %v1254_v6 = vmax.f32 %v1252_v1, 0.0  ;;  %v1260_v10 = vld [vmem:[#allocation2 + $0x160] ss:$2 sm:$0x3f] }
 0x139   :  { %1033 = vst.msk [vmem:[#allocation2 + $0x180] sm:$0xff] %vm984_vm2, %v735_v4  ;;  %v1264_v11 = vld [vmem:[#allocation2 + $0x161] ss:$2 sm:$0x3f] }
 0x13a   :  { %2081 = vrot.lane.b32.xlu0 %v6977_v26, %s6353_s14  ;;  %v6099_v8 = vpop.f32.mrf.mxu0  ;;  %1255 = vst.msk [vmem:[#allocation3 + $0x46] sm:$0xff] %vm984_vm2, %v1253_v5  ;;  %v1266_v19 = vmax.f32 %v1260_v10, %v1264_v11  ;;  %v1658_v5 = vld [vmem:[#allocation3 + $0x32] sm:$0xff] }
 0x13b   :  { %2206 = vrot.lane.b32.xlu1 %v2162_v7, %s6354_s30  ;;  %1036 = vst.msk [vmem:[#allocation2 + $0x198] sm:$0xff] %vm984_vm2, %v6099_v8 }
 0x13c   :  { %1256 = vst.msk [vmem:[#allocation3 + $0x4e] sm:$0x3f] %vm1115_vm3, %v1254_v6  ;;  %v1268_v12 = vld [vmem:[#allocation2 + $0x16c] ss:$2 sm:$0xff]  ;;  %v1272_v13 = vld [vmem:[#allocation2 + $0x16d] ss:$2 sm:$0xff]  ;;  %v745_v15 = vpop.f32.mrf.mxu0 }
 0x13d   :  { %v1275_v16 = vmax.f32 %v1268_v12, %v1272_v13  ;;  %1035 = vst.msk [vmem:[#allocation2 + $0x190] sm:$0xff] %vm984_vm2, %v745_v15 }
 0x13e   :  { %1577 = vrot.lane.b32.xlu0 %v1530_v14, %s6349_s15  ;;  %v6102_v18 = vpop.f32.mrf.mxu0  ;;  %v2164_v14 = vld [vmem:[#allocation3 + $0x3c] sm:$0xff] }
 0x13f   :  { %v1277_v20 = vmax.f32 %v1265_v9, %v1275_v16  ;;  %2333 = vrot.lane.b32.xlu1 %v2289_v17, %s6355_s6  ;;  %1038 = vst.msk [vmem:[#allocation2 + $0x1a8] sm:$0xff] %vm984_vm2, %v6102_v18 }
 0x140   :  { %v1270_v22 = vld [vmem:[#allocation2 + $0x17c] ss:$2 sm:$0x3f]  ;;  %v1274_v23 = vld [vmem:[#allocation2 + $0x17d] ss:$2 sm:$0x3f]  ;;  %v755_v25 = vpop.f32.mrf.mxu0 }
 0x141   :  { %v1276_v26 = vmax.f32 %v1270_v22, %v1274_v23  ;;  %1037 = vst.msk [vmem:[#allocation2 + $0x1a0] sm:$0xff] %vm984_vm2, %v755_v25  ;;  %v1279_v27 = vadd.f32 %v6823_v60, %v1277_v20  ;;  %v7041_v31 = vld [vmem:[#allocation3 + $0x40] sm:$0xff] }
 0x142   :  { %1704 = vrot.lane.b32.xlu0 %v1657_v21, %s6350_s20  ;;  %v6105_v28 = vpop.f32.mrf.mxu0  ;;  %v7043_v32 = vld [vmem:[#allocation3 + $0x46] sm:$0xff]  ;;  %1512 = vst.msk [vmem:[#allocation4 + $0x80] sm:$0xff] %vm984_vm2, %v7041_v31  ;;  %v2291_v23 = vld [vmem:[#allocation3 + $0x3d] sm:$0xff] }
 0x143   :  { %1829 = vrot.lane.b32.xlu1 %v6984_v30, %s6351_s29  ;;  %v1278_v29 = vmax.f32 %v1266_v19, %v1276_v26  ;;  %1040 = vst.msk [vmem:[#allocation2 + $0x1b8] sm:$0xff] %vm984_vm2, %v6105_v28  ;;  %v1281_v33 = vmax.f32 %v1279_v27, 0.0  ;;  %2440 = vst.msk [vmem:[#allocation4 + $0x58] sm:$0xff] %vm984_vm2, %v7043_v32  ;;  %v7051_v30 = vld [vmem:[#allocation3 + $0x48] sm:$0xff]  ;;  %v1532_v19 = vld [vmem:[#allocation3 + $0x39] sm:$0xff] }
 0x144   :  { %v765_v36 = vpop.f32.mrf.mxu0  ;;  %1513 = vst.msk [vmem:[#allocation4 + $0x90] sm:$0xff] %vm984_vm2, %v7051_v30  ;;  %v1286_v42 = vld [vmem:[#allocation2 + $0x188] ss:$2 sm:$0xff]  ;;  %v1290_v43 = vld [vmem:[#allocation2 + $0x189] ss:$2 sm:$0xff] }
 0x145   :  { %1039 = vst.msk [vmem:[#allocation2 + $0x1b0] sm:$0xff] %vm984_vm2, %v765_v36  ;;  %1283 = vst.msk [vmem:[#allocation3 + $0x54] sm:$0xff] %vm984_vm2, %v1281_v33  ;;  %v1280_v37 = vadd.f32 %v6823_v60, %v1278_v29  ;;  %v1293_v48 = vmax.f32 %v1286_v42, %v1290_v43  ;;  %v1659_v26 = vld [vmem:[#allocation3 + $0x3a] sm:$0xff]  ;;  %v2165_v42 = vld [vmem:[#allocation3 + $0x44] sm:$0xff] }
 0x146   :  { %2208 = vrot.lane.b32.xlu0 %v2163_v35, %s6354_s30  ;;  %v6108_v39 = vpop.f32.mrf.mxu0 }
 0x147   :  { %1956 = vrot.lane.b32.xlu1 %v1910_v38, %s6352_s9  ;;  %1042 = vst.msk [vmem:[#allocation2 + $0x1c8] sm:$0xff] %vm984_vm2, %v6108_v39  ;;  %v1282_v40 = vmax.f32 %v1280_v37, 0.0 }
 0x148   :  { %v775_v44 = vpop.f32.mrf.mxu0  ;;  %v1288_v45 = vld [vmem:[#allocation2 + $0x198] ss:$2 sm:$0x3f]  ;;  %v1292_v46 = vld [vmem:[#allocation2 + $0x199] ss:$2 sm:$0x3f] }
 0x149   :  { %1041 = vst.msk [vmem:[#allocation2 + $0x1c0] sm:$0xff] %vm984_vm2, %v775_v44  ;;  %v1294_v49 = vmax.f32 %v1288_v45, %v1292_v46  ;;  %v1912_v46 = vld [vmem:[#allocation3 + $0x3f] sm:$0xff] }
 0x14a   :  { %2335 = vrot.lane.b32.xlu0 %v2290_v41, %s6355_s6  ;;  %1284 = vst.msk [vmem:[#allocation3 + $0x5c] sm:$0x3f] %vm1115_vm3, %v1282_v40  ;;  %v6111_v47 = vpop.f32.mrf.mxu0 }
 0x14b   :  { %2083 = vrot.lane.b32.xlu1 %v6988_v34, %s6353_s14  ;;  %1044 = vst.msk [vmem:[#allocation2 + $0x1d8] sm:$0xff] %vm984_vm2, %v6111_v47 }
 0x14c   :  { %v1296_v50 = vld [vmem:[#allocation2 + $0x1a4] ss:$2 sm:$0xff]  ;;  %v1298_v52 = vld [vmem:[#allocation2 + $0x1b4] ss:$2 sm:$0x3f]  ;;  %v785_v53 = vpop.f32.mrf.mxu0 }
 0x14d   :  { %v1300_v54 = vld [vmem:[#allocation2 + $0x1a5] ss:$2 sm:$0xff]  ;;  %v1302_v56 = vld [vmem:[#allocation2 + $0x1b5] ss:$2 sm:$0x3f]  ;;  %1043 = vst.msk [vmem:[#allocation2 + $0x1d0] sm:$0xff] %vm984_vm2, %v785_v53 }
 0x14e   :  { %1831 = vrot.lane.b32.xlu0 %v7004_v55, %s6351_s29  ;;  %v7068_v57 = vld [vmem:[#allocation3 + $0x4e] sm:$0xff]  ;;  %v1303_v59 = vmax.f32 %v1296_v50, %v1300_v54  ;;  %v1304_v62 = vmax.f32 %v1298_v52, %v1302_v56  ;;  %v6114_v34 = vpop.f32.mrf.mxu0  ;;  %v1911_v55 = vld [vmem:[#allocation3 + $0x37] sm:$0xff]  ;;  %v2292_v50 = vld [vmem:[#allocation3 + $0x45] sm:$0xff] }
 0x14f   :  { %v7070_v63 = vld [vmem:[#allocation3 + $0x50] sm:$0xff]  ;;  %2441 = vst.msk [vmem:[#allocation4 + $0x68] sm:$0xff] %vm984_vm2, %v7068_v57  ;;  %1579 = vrot.lane.b32.xlu1 %v1531_v58, %s6349_s15  ;;  %1046 = vst.msk [vmem:[#allocation2 + $0x1e8] sm:$0xff] %vm984_vm2, %v6114_v34 }
 0x150   :  { %1514 = vst.msk [vmem:[#allocation4 + $0xa0] sm:$0xff] %vm984_vm2, %v7070_v63  ;;  %v1306_v0 = vmax.f32 %v1294_v49, %v1304_v62  ;;  %v795_v1 = vpop.f32.mrf.mxu0  ;;  %v1305_v2 = vmax.f32 %v1293_v48, %v1303_v59  ;;  %v1314_v9 = vld [vmem:[#allocation2 + $0x1c0] ss:$2 sm:$0xff]  ;;  %v1318_v10 = vld [vmem:[#allocation2 + $0x1c1] ss:$2 sm:$0xff] }
 0x151   :  { %1045 = vst.msk [vmem:[#allocation2 + $0x1e0] sm:$0xff] %vm984_vm2, %v795_v1  ;;  %v7080_v3 = vld [vmem:[#allocation3 + $0x56] sm:$0xff]  ;;  %v1321_v16 = vmax.f32 %v1314_v9, %v1318_v10 }
 0x152   :  { %1958 = vrot.lane.b32.xlu0 %v1911_v55, %s6352_s9  ;;  %v7082_v4 = vld [vmem:[#allocation3 + $0x58] sm:$0xff]  ;;  %v6117_v6 = vpop.f32.mrf.mxu0  ;;  %v1307_v7 = vadd.f32 %v6823_v60, %v1305_v2  ;;  %v1308_v8 = vadd.f32 %v6823_v60, %v1306_v0  ;;  %2442 = vst.msk [vmem:[#allocation4 + $0x78] sm:$0xff] %vm984_vm2, %v7080_v3 }
 0x153   :  { %1515 = vst.msk [vmem:[#allocation4 + $0xb0] sm:$0xff] %vm984_vm2, %v7082_v4  ;;  %1706 = vrot.lane.b32.xlu1 %v1658_v5, %s6350_s20  ;;  %1048 = vst.msk [vmem:[#allocation2 + $0x1f8] sm:$0xff] %vm984_vm2, %v6117_v6  ;;  %v2166_v5 = vld [vmem:[#allocation3 + $0x4c] sm:$0xff] }
 0x154   :  { %v805_v11 = vpop.f32.mrf.mxu0  ;;  %v1309_v12 = vmax.f32 %v1307_v7, 0.0  ;;  %v1310_v13 = vmax.f32 %v1308_v8, 0.0  ;;  %v1316_v17 = vld [vmem:[#allocation2 + $0x1d0] ss:$2 sm:$0x3f] }
 0x155   :  { %1047 = vst.msk [vmem:[#allocation2 + $0x1f0] sm:$0xff] %vm984_vm2, %v805_v11  ;;  %v1320_v18 = vld [vmem:[#allocation2 + $0x1d1] ss:$2 sm:$0x3f] }
 0x156   :  { %2085 = vrot.lane.b32.xlu0 %v7008_v51, %s6353_s14  ;;  %v6120_v15 = vpop.f32.mrf.mxu0  ;;  %1311 = vst.msk [vmem:[#allocation3 + $0x62] sm:$0xff] %vm984_vm2, %v1309_v12  ;;  %v1322_v27 = vmax.f32 %v1316_v17, %v1320_v18 }
 0x157   :  { %2210 = vrot.lane.b32.xlu1 %v2164_v14, %s6354_s30  ;;  %1050 = vst.msk [vmem:[#allocation2 + $0x208] sm:$0xff] %vm984_vm2, %v6120_v15  ;;  %v1533_v14 = vld [vmem:[#allocation3 + $0x41] sm:$0xff] }
 0x158   :  { %1312 = vst.msk [vmem:[#allocation3 + $0x6a] sm:$0x3f] %vm1115_vm3, %v1310_v13  ;;  %v1324_v20 = vld [vmem:[#allocation2 + $0x1dc] ss:$2 sm:$0xff]  ;;  %v1328_v51 = vld [vmem:[#allocation2 + $0x1dd] ss:$2 sm:$0xff]  ;;  %v815_v21 = vpop.f32.mrf.mxu0 }
 0x159   :  { %v1331_v22 = vmax.f32 %v1324_v20, %v1328_v51  ;;  %1049 = vst.msk [vmem:[#allocation2 + $0x200] sm:$0xff] %vm984_vm2, %v815_v21 }
 0x15a   :  { %1581 = vrot.lane.b32.xlu0 %v1532_v19, %s6349_s15  ;;  %v6123_v25 = vpop.f32.mrf.mxu0 }
 0x15b   :  { %2337 = vrot.lane.b32.xlu1 %v2291_v23, %s6355_s6  ;;  %1052 = vst.msk [vmem:[#allocation2 + $0x218] sm:$0xff] %vm984_vm2, %v6123_v25  ;;  %v1333_v28 = vmax.f32 %v1321_v16, %v1331_v22  ;;  %v7157_v16 = vld [vmem:[%s8813_s2] ss:$0 sm:$0xff]  ;;  %v1660_v25 = vld [vmem:[#allocation3 + $0x42] sm:$0xff] }
 0x15c   :  { %v1326_v29 = vld [vmem:[#allocation2 + $0x1ec] ss:$2 sm:$0x3f]  ;;  %v1330_v33 = vld [vmem:[#allocation2 + $0x1ed] ss:$2 sm:$0x3f]  ;;  %v825_v35 = vpop.f32.mrf.mxu0 }
 0x15d   :  { %v1332_v36 = vmax.f32 %v1326_v29, %v1330_v33  ;;  %1051 = vst.msk [vmem:[#allocation2 + $0x210] sm:$0xff] %vm984_vm2, %v825_v35  ;;  %v1335_v37 = vadd.f32 %v6823_v60, %v1333_v28  ;;  %v7106_v39 = vld [vmem:[#allocation3 + $0x5e] sm:$0xff] }
 0x15e   :  { %1708 = vrot.lane.b32.xlu0 %v1659_v26, %s6350_s20  ;;  %v6126_v38 = vpop.f32.mrf.mxu0  ;;  %2443 = vst.msk [vmem:[#allocation4 + $0x88] sm:$0xff] %vm984_vm2, %v7106_v39  ;;  %v7113_v44 = vld [vmem:[#allocation3 + $0x60] sm:$0xff] }
 0x15f   :  { %1833 = vrot.lane.b32.xlu1 %v7016_v61, %s6351_s29  ;;  %v1334_v40 = vmax.f32 %v1322_v27, %v1332_v36  ;;  %1054 = vst.msk [vmem:[#allocation2 + $0x228] sm:$0xff] %vm984_vm2, %v6126_v38  ;;  %v1337_v41 = vmax.f32 %v1335_v37, 0.0  ;;  %v7117_v45 = vld [vmem:[#allocation3 + $0x66] sm:$0xff]  ;;  %1516 = vst.msk [vmem:[#allocation4 + $0xc0] sm:$0xff] %vm984_vm2, %v7113_v44 }
 0x160   :  { %v835_v43 = vpop.f32.mrf.mxu0  ;;  %v7123_v48 = vld [vmem:[#allocation3 + $0x68] sm:$0xff]  ;;  %2444 = vst.msk [vmem:[#allocation4 + $0x98] sm:$0xff] %vm984_vm2, %v7117_v45 }
 0x161   :  { %1053 = vst.msk [vmem:[#allocation2 + $0x220] sm:$0xff] %vm984_vm2, %v835_v43  ;;  %1339 = vst.msk [vmem:[#allocation3 + $0x70] sm:$0xff] %vm984_vm2, %v1337_v41  ;;  %v1336_v61 = vadd.f32 %v6823_v60, %v1334_v40  ;;  %v1342_v60 = vld [vmem:[#allocation2 + $0x1f8] ss:$2 sm:$0xff]  ;;  %v1346_v52 = vld [vmem:[#allocation2 + $0x1f9] ss:$2 sm:$0xff] }
 0x162   :  { %2212 = vrot.lane.b32.xlu0 %v2165_v42, %s6354_s30  ;;  %v6129_v47 = vpop.f32.mrf.mxu0  ;;  %1517 = vst.msk [vmem:[#allocation4 + $0xd0] sm:$0xff] %vm984_vm2, %v7123_v48  ;;  %v1349_v59 = vmax.f32 %v1342_v60, %v1346_v52  ;;  %v2293_v40 = vld [vmem:[#allocation3 + $0x4d] sm:$0xff] }
 0x163   :  { %1960 = vrot.lane.b32.xlu1 %v1912_v46, %s6352_s9  ;;  %1056 = vst.msk [vmem:[#allocation2 + $0x238] sm:$0xff] %vm984_vm2, %v6129_v47  ;;  %v1338_v49 = vmax.f32 %v1336_v61, 0.0  ;;  %v1661_v42 = vld [vmem:[#allocation3 + $0x4a] sm:$0xff] }
 0x164   :  { %v845_v53 = vpop.f32.mrf.mxu0  ;;  %v1344_v54 = vld [vmem:[#allocation2 + $0x208] ss:$2 sm:$0x3f]  ;;  %v1348_v56 = vld [vmem:[#allocation2 + $0x209] ss:$2 sm:$0x3f] }
 0x165   :  { %1055 = vst.msk [vmem:[#allocation2 + $0x230] sm:$0xff] %vm984_vm2, %v845_v53  ;;  %v1350_v62 = vmax.f32 %v1344_v54, %v1348_v56 }
 0x166   :  { %2339 = vrot.lane.b32.xlu0 %v2292_v50, %s6355_s6  ;;  %1340 = vst.msk [vmem:[#allocation3 + $0x78] sm:$0x3f] %vm1115_vm3, %v1338_v49  ;;  %v6132_v58 = vpop.f32.mrf.mxu0 }
 0x167   :  { %2087 = vrot.lane.b32.xlu1 %v7041_v31, %s6353_s14  ;;  %1058 = vst.msk [vmem:[#allocation2 + $0x248] sm:$0xff] %vm984_vm2, %v6132_v58 }
 0x168   :  { %v1352_v34 = vld [vmem:[#allocation2 + $0x214] ss:$2 sm:$0xff]  ;;  %v1354_v55 = vld [vmem:[#allocation2 + $0x224] ss:$2 sm:$0x3f]  ;;  %v855_v0 = vpop.f32.mrf.mxu0 }
 0x169   :  { %v1356_v1 = vld [vmem:[#allocation2 + $0x215] ss:$2 sm:$0xff]  ;;  %v1358_v2 = vld [vmem:[#allocation2 + $0x225] ss:$2 sm:$0x3f]  ;;  %1057 = vst.msk [vmem:[#allocation2 + $0x240] sm:$0xff] %vm984_vm2, %v855_v0 }
 0x16a   :  { %1835 = vrot.lane.b32.xlu0 %v7043_v32, %s6351_s29  ;;  %v1359_v6 = vmax.f32 %v1352_v34, %v1356_v1  ;;  %v1360_v7 = vmax.f32 %v1354_v55, %v1358_v2  ;;  %v6135_v8 = vpop.f32.mrf.mxu0  ;;  %v7140_v9 = vld [vmem:[#allocation3 + $0x6e] sm:$0xff] }
 0x16b   :  { %2214 = vrot.lane.b32.xlu1 %v2166_v5, %s6354_s30  ;;  %1060 = vst.msk [vmem:[#allocation2 + $0x258] sm:$0xff] %vm984_vm2, %v6135_v8  ;;  %v7144_v31 = vld [vmem:[#allocation3 + $0x70] sm:$0xff]  ;;  %2445 = vst.msk [vmem:[#allocation4 + $0xa8] sm:$0xff] %vm984_vm2, %v7140_v9  ;;  %v1913_v32 = vld [vmem:[#allocation3 + $0x47] sm:$0xff] }
 0x16c   :  { %v1361_v10 = vmax.f32 %v1349_v59, %v1359_v6  ;;  %v1362_v11 = vmax.f32 %v1350_v62, %v1360_v7  ;;  %v865_v12 = vpop.f32.mrf.mxu0  ;;  %1518 = vst.msk [vmem:[#allocation4 + $0xe0] sm:$0xff] %vm984_vm2, %v7144_v31  ;;  %v1370_v20 = vld [vmem:[#allocation2 + $0x230] ss:$2 sm:$0xff]  ;;  %v1374_v51 = vld [vmem:[#allocation2 + $0x231] ss:$2 sm:$0xff]  ;;  %v2167_v59 = vld [vmem:[#allocation3 + $0x54] sm:$0xff] }
 0x16d   :  { %1059 = vst.msk [vmem:[#allocation2 + $0x250] sm:$0xff] %vm984_vm2, %v865_v12  ;;  %v7152_v13 = vld [vmem:[#allocation3 + $0x76] sm:$0xff]  ;;  %v1377_v28 = vmax.f32 %v1370_v20, %v1374_v51 }
 0x16e   :  { %1962 = vrot.lane.b32.xlu0 %v1913_v32, %s6352_s9  ;;  %v6138_v15 = vpop.f32.mrf.mxu0  ;;  %v1363_v17 = vadd.f32 %v7157_v16, %v1361_v10  ;;  %v1364_v18 = vadd.f32 %v7157_v16, %v1362_v11  ;;  %2446 = vst.msk [vmem:[#allocation4 + $0xb8] sm:$0xff] %vm984_vm2, %v7152_v13  ;;  %v1914_v1 = vld [vmem:[#allocation3 + $0x4f] sm:$0xff] }
 0x16f   :  { %1583 = vrot.lane.b32.xlu1 %v1533_v14, %s6349_s15  ;;  %1062 = vst.msk [vmem:[#allocation2 + $0x268] sm:$0xff] %vm984_vm2, %v6138_v15  ;;  %v2294_v6 = vld [vmem:[#allocation3 + $0x55] sm:$0xff] }
 0x170   :  { %v1568_v19 = vpop.permute.xlu0 %1567  ;;  %v875_v21 = vpop.f32.mrf.mxu0  ;;  %v1365_v22 = vmax.f32 %v1363_v17, 0.0  ;;  %v1366_v23 = vmax.f32 %v1364_v18, 0.0  ;;  %v1372_v29 = vld [vmem:[#allocation2 + $0x240] ss:$2 sm:$0x3f] }
 0x171   :  { %1631 = vst.msk [vmem:[#allocation4] sm:$0xff] %vm1630_vm4, %v1568_v19  ;;  %v1376_v33 = vld [vmem:[#allocation2 + $0x241] ss:$2 sm:$0x3f] }
 0x172   :  { %2089 = vrot.lane.b32.xlu0 %v7051_v30, %s6353_s14  ;;  %1061 = vst.msk [vmem:[#allocation2 + $0x260] sm:$0xff] %vm984_vm2, %v875_v21  ;;  %v6141_v26 = vpop.f32.mrf.mxu0  ;;  %1367 = vst.msk [vmem:[#allocation3 + $0x7e] sm:$0xff] %vm984_vm2, %v1365_v22  ;;  %v1534_v30 = vld [vmem:[#allocation3 + $0x49] sm:$0xff]  ;;  %v1378_v43 = vmax.f32 %v1372_v29, %v1376_v33  ;;  %v1915_v33 = vld [vmem:[#allocation3 + $0x57] sm:$0xff] }
 0x173   :  { %1710 = vrot.lane.b32.xlu1 %v1660_v25, %s6350_s20  ;;  %1064 = vst.msk [vmem:[#allocation2 + $0x278] sm:$0xff] %vm984_vm2, %v6141_v26 }
 0x174   :  { %v1695_v27 = vpop.permute.xlu0 %1694  ;;  %1368 = vst.msk [vmem:[#allocation3 + $0x86] sm:$0x3f] %vm1115_vm3, %v1366_v23  ;;  %v1380_v35 = vld [vmem:[#allocation2 + $0x24c] ss:$2 sm:$0xff]  ;;  %v1384_v36 = vld [vmem:[#allocation2 + $0x24d] ss:$2 sm:$0xff]  ;;  %v885_v37 = vpop.f32.mrf.mxu0 }
 0x175   :  { %1758 = vst.msk [vmem:[#allocation4] sm:$0xff] %vm1757_vm5, %v1695_v27  ;;  %v1387_v38 = vmax.f32 %v1380_v35, %v1384_v36 }
 0x176   :  { %1585 = vrot.lane.b32.xlu0 %v1534_v30, %s6349_s15  ;;  %1063 = vst.msk [vmem:[#allocation2 + $0x270] sm:$0xff] %vm984_vm2, %v885_v37  ;;  %v6144_v41 = vpop.f32.mrf.mxu0 }
 0x177   :  { %2341 = vrot.lane.b32.xlu1 %v2293_v40, %s6355_s6  ;;  %v1389_v61 = vmax.f32 %v1377_v28, %v1387_v38  ;;  %1066 = vst.msk [vmem:[#allocation2 + $0x288] sm:$0xff] %vm984_vm2, %v6144_v41  ;;  %v1662_v41 = vld [vmem:[#allocation3 + $0x52] sm:$0xff] }
 0x178   :  { %v895_v49 = vpop.f32.mrf.mxu0 }
 0x179   :  { %v1382_v46 = vld [vmem:[#allocation2 + $0x25c] ss:$2 sm:$0x3f]  ;;  %v1386_v47 = vld [vmem:[#allocation2 + $0x25d] ss:$2 sm:$0x3f]  ;;  %v1391_v60 = vadd.f32 %v7157_v16, %v1389_v61 }
 0x17a   :  { %1712 = vrot.lane.b32.xlu0 %v1661_v42, %s6350_s20  ;;  %v1388_v50 = vmax.f32 %v1382_v46, %v1386_v47  ;;  %1065 = vst.msk [vmem:[#allocation2 + $0x280] sm:$0xff] %vm984_vm2, %v895_v49  ;;  %v6147_v52 = vpop.f32.mrf.mxu0  ;;  %v7181_v53 = vld [vmem:[#allocation3 + $0x78] sm:$0xff] }
 0x17b   :  { %1837 = vrot.lane.b32.xlu1 %v7068_v57, %s6351_s29  ;;  %1068 = vst.msk [vmem:[#allocation2 + $0x298] sm:$0xff] %vm984_vm2, %v6147_v52  ;;  %v7186_v56 = vld [vmem:[#allocation3 + $0x7e] sm:$0xff]  ;;  %v1393_v58 = vmax.f32 %v1391_v60, 0.0  ;;  %1519 = vst.msk [vmem:[#allocation4 + $0xf0] sm:$0xff] %vm984_vm2, %v7181_v53 }
 0x17c   :  { %v1390_v54 = vmax.f32 %v1378_v43, %v1388_v50  ;;  %v905_v62 = vpop.f32.mrf.mxu0  ;;  %2447 = vst.msk [vmem:[#allocation4 + $0xc8] sm:$0xff] %vm984_vm2, %v7186_v56  ;;  %v7194_v57 = vld [vmem:[#allocation3 + $0x80] sm:$0xff] }
 0x17d   :  { %v1822_v34 = vpop.permute.xlu1 %1821  ;;  %1067 = vst.msk [vmem:[#allocation2 + $0x290] sm:$0xff] %vm984_vm2, %v905_v62  ;;  %1395 = vst.msk [vmem:[#allocation3 + $0x8c] sm:$0xff] %vm984_vm2, %v1393_v58  ;;  %v1398_v7 = vld [vmem:[#allocation2 + $0x268] ss:$2 sm:$0xff]  ;;  %v1402_v8 = vld [vmem:[#allocation2 + $0x269] ss:$2 sm:$0xff] }
 0x17e   :  { %v1570_v55 = vpop.permute.xlu0 %1569  ;;  %2216 = vrot.lane.b32.xlu0 %v2167_v59, %s6354_s30  ;;  %v1392_v0 = vadd.f32 %v7157_v16, %v1390_v54  ;;  %1885 = vst.msk [vmem:[#allocation4] sm:$0xff] %vm1884_vm6, %v1822_v34  ;;  %v6150_v2 = vpop.f32.mrf.mxu0  ;;  %v1405_v17 = vmax.f32 %v1398_v7, %v1402_v8  ;;  %v2168_v58 = vld [vmem:[#allocation3 + $0x5c] sm:$0xff] }
 0x17f   :  { %1632 = vst.msk [vmem:[#allocation4 + $0x10] sm:$0xff] %vm1630_vm4, %v1570_v55  ;;  %1964 = vrot.lane.b32.xlu1 %v1914_v1, %s6352_s9  ;;  %v2295_v8 = vld [vmem:[#allocation3 + $0x5d] sm:$0xff] }
 0x180   :  { %1520 = vst.msk [vmem:[#allocation4 + $0x100] sm:$0xff] %vm984_vm2, %v7194_v57  ;;  %1070 = vst.msk [vmem:[#allocation2 + $0x2a8] sm:$0xff] %vm984_vm2, %v6150_v2  ;;  %v1394_v5 = vmax.f32 %v1392_v0, 0.0  ;;  %v915_v32 = vpop.f32.mrf.mxu0 }
 0x181   :  { %v1949_v10 = vpop.permute.xlu1 %1948  ;;  %v1400_v12 = vld [vmem:[#allocation2 + $0x278] ss:$2 sm:$0x3f]  ;;  %v1404_v14 = vld [vmem:[#allocation2 + $0x279] ss:$2 sm:$0x3f] }
 0x182   :  { %v1697_v11 = vpop.permute.xlu0 %1696  ;;  %2343 = vrot.lane.b32.xlu0 %v2294_v6, %s6355_s6  ;;  %1069 = vst.msk [vmem:[#allocation2 + $0x2a0] sm:$0xff] %vm984_vm2, %v915_v32  ;;  %v6153_v15 = vpop.f32.mrf.mxu0  ;;  %v1406_v18 = vmax.f32 %v1400_v12, %v1404_v14 }
 0x183   :  { %1396 = vst.msk [vmem:[#allocation3 + $0x94] sm:$0x3f] %vm1115_vm3, %v1394_v5  ;;  %2091 = vrot.lane.b32.xlu1 %v7070_v63, %s6353_s14  ;;  %v1535_v63 = vld [vmem:[#allocation3 + $0x51] sm:$0xff] }
 0x184   :  { %2012 = vst.msk [vmem:[#allocation4] sm:$0xff] %vm2011_vm7, %v1949_v10  ;;  %v1408_v19 = vld [vmem:[#allocation2 + $0x284] ss:$2 sm:$0xff]  ;;  %v1410_v20 = vld [vmem:[#allocation2 + $0x294] ss:$2 sm:$0x3f]  ;;  %v925_v51 = vpop.f32.mrf.mxu0 }
 0x185   :  { %1759 = vst.msk [vmem:[#allocation4 + $0x10] sm:$0xff] %vm1757_vm5, %v1697_v11  ;;  %v2076_v21 = vpop.permute.xlu1 %2075  ;;  %v1412_v22 = vld [vmem:[#allocation2 + $0x285] ss:$2 sm:$0xff]  ;;  %v1414_v23 = vld [vmem:[#allocation2 + $0x295] ss:$2 sm:$0x3f] }
 0x186   :  { %1072 = vst.msk [vmem:[#allocation2 + $0x2b8] sm:$0xff] %vm984_vm2, %v6153_v15  ;;  %1839 = vrot.lane.b32.xlu0 %v7080_v3, %s6351_s29  ;;  %1071 = vst.msk [vmem:[#allocation2 + $0x2b0] sm:$0xff] %vm984_vm2, %v925_v51  ;;  %v7215_v25 = vld [vmem:[#allocation3 + $0x86] sm:$0xff]  ;;  %v1415_v26 = vmax.f32 %v1408_v19, %v1412_v22  ;;  %v1416_v27 = vmax.f32 %v1410_v20, %v1414_v23  ;;  %v6156_v28 = vpop.f32.mrf.mxu0  ;;  %v1663_v11 = vld [vmem:[#allocation3 + $0x5a] sm:$0xff] }
 0x187   :  { %2139 = vst.msk [vmem:[#allocation4] sm:$0xff] %vm2138_vm8, %v2076_v21  ;;  %v7218_v29 = vld [vmem:[#allocation3 + $0x88] sm:$0xff]  ;;  %1587 = vrot.lane.b32.xlu1 %v1535_v63, %s6349_s15 }
 0x188   :  { %2448 = vst.msk [vmem:[#allocation4 + $0xd8] sm:$0xff] %vm984_vm2, %v7215_v25  ;;  %v1824_v3 = vpop.permute.xlu0 %1823  ;;  %1074 = vst.msk [vmem:[#allocation2 + $0x2c8] sm:$0xff] %vm984_vm2, %v6156_v28  ;;  %v1417_v30 = vmax.f32 %v1405_v17, %v1415_v26  ;;  %v1418_v35 = vmax.f32 %v1406_v18, %v1416_v27  ;;  %v935_v36 = vpop.f32.mrf.mxu0  ;;  %v2169_v28 = vld [vmem:[#allocation3 + $0x64] sm:$0xff] }
 0x189   :  { %1521 = vst.msk [vmem:[#allocation4 + $0x110] sm:$0xff] %vm984_vm2, %v7218_v29  ;;  %v1572_v37 = vpop.permute.xlu1 %1571  ;;  %1073 = vst.msk [vmem:[#allocation2 + $0x2c0] sm:$0xff] %vm984_vm2, %v935_v36  ;;  %v1426_v47 = vld [vmem:[#allocation2 + $0x2a0] ss:$2 sm:$0xff]  ;;  %v1430_v49 = vld [vmem:[#allocation2 + $0x2a1] ss:$2 sm:$0xff] }
 0x18a   :  { %1886 = vst.msk [vmem:[#allocation4 + $0x10] sm:$0xff] %vm1884_vm6, %v1824_v3  ;;  %1966 = vrot.lane.b32.xlu0 %v1915_v33, %s6352_s9  ;;  %v7229_v38 = vld [vmem:[#allocation3 + $0x8e] sm:$0xff]  ;;  %v6159_v42 = vpop.f32.mrf.mxu0  ;;  %v1419_v43 = vadd.f32 %v7157_v16, %v1417_v30  ;;  %v1420_v61 = vadd.f32 %v7157_v16, %v1418_v35  ;;  %v1433_v34 = vmax.f32 %v1426_v47, %v1430_v49  ;;  %v1916_v35 = vld [vmem:[#allocation3 + $0x5f] sm:$0xff] }
 0x18b   :  { %v7231_v40 = vld [vmem:[#allocation3 + $0x90] sm:$0xff]  ;;  %1633 = vst.msk [vmem:[#allocation4 + $0x20] sm:$0xff] %vm1630_vm4, %v1572_v37  ;;  %1714 = vrot.lane.b32.xlu1 %v1662_v41, %s6350_s20 }
 0x18c   :  { %2449 = vst.msk [vmem:[#allocation4 + $0xe8] sm:$0xff] %vm984_vm2, %v7229_v38  ;;  %1522 = vst.msk [vmem:[#allocation4 + $0x120] sm:$0xff] %vm984_vm2, %v7231_v40  ;;  %v1951_v46 = vpop.permute.xlu0 %1950  ;;  %v945_v50 = vpop.f32.mrf.mxu0  ;;  %v1421_v52 = vmax.f32 %v1419_v43, 0.0  ;;  %v1422_v54 = vmax.f32 %v1420_v61, 0.0 }
 0x18d   :  { %1076 = vst.msk [vmem:[#allocation2 + $0x2d8] sm:$0xff] %vm984_vm2, %v6159_v42  ;;  %v1699_v60 = vpop.permute.xlu1 %1698  ;;  %1075 = vst.msk [vmem:[#allocation2 + $0x2d0] sm:$0xff] %vm984_vm2, %v945_v50  ;;  %v1428_v55 = vld [vmem:[#allocation2 + $0x2b0] ss:$2 sm:$0x3f] }
 0x18e   :  { %2013 = vst.msk [vmem:[#allocation4 + $0x10] sm:$0xff] %vm2011_vm7, %v1951_v46  ;;  %2093 = vrot.lane.b32.xlu0 %v7082_v4, %s6353_s14  ;;  %v6162_v59 = vpop.f32.mrf.mxu0  ;;  %v1432_v0 = vld [vmem:[#allocation2 + $0x2b1] ss:$2 sm:$0x3f]  ;;  %v1536_v4 = vld [vmem:[#allocation3 + $0x59] sm:$0xff] }
 0x18f   :  { %1760 = vst.msk [vmem:[#allocation4 + $0x20] sm:$0xff] %vm1757_vm5, %v1699_v60  ;;  %2218 = vrot.lane.b32.xlu1 %v2168_v58, %s6354_s30  ;;  %v1434_v12 = vmax.f32 %v1428_v55, %v1432_v0  ;;  %v2296_v42 = vld [vmem:[#allocation3 + $0x65] sm:$0xff] }
 0x190   :  { %v2078_v62 = vpop.permute.xlu0 %2077  ;;  %1078 = vst.msk [vmem:[#allocation2 + $0x2e8] sm:$0xff] %vm984_vm2, %v6162_v59  ;;  %1423 = vst.msk [vmem:[#allocation3 + $0x9a] sm:$0xff] %vm984_vm2, %v1421_v52  ;;  %v1436_v1 = vld [vmem:[#allocation2 + $0x2bc] ss:$2 sm:$0xff]  ;;  %v1440_v2 = vld [vmem:[#allocation2 + $0x2bd] ss:$2 sm:$0xff]  ;;  %v955_v5 = vpop.f32.mrf.mxu0 }
 0x191   :  { %1424 = vst.msk [vmem:[#allocation3 + $0xa2] sm:$0x3f] %vm1115_vm3, %v1422_v54  ;;  %v2203_v6 = vpop.permute.xlu1 %2202  ;;  %v1443_v7 = vmax.f32 %v1436_v1, %v1440_v2  ;;  %v2459_v60 = vld [vmem:[#allocation4 + $0x18] sm:$0xff] }
 0x192   :  { %2140 = vst.msk [vmem:[#allocation4 + $0x10] sm:$0xff] %vm2138_vm8, %v2078_v62  ;;  %1589 = vrot.lane.b32.xlu0 %v1536_v4, %s6349_s15  ;;  %v6165_v32 = vpop.f32.mrf.mxu0  ;;  %v1537_v4 = vld [vmem:[#allocation3 + $0x61] sm:$0xff] }
 0x193   :  { %1077 = vst.msk [vmem:[#allocation2 + $0x2e0] sm:$0xff] %vm984_vm2, %v955_v5  ;;  %2345 = vrot.lane.b32.xlu1 %v2295_v8, %s6355_s6  ;;  %v1445_v14 = vmax.f32 %v1433_v34, %v1443_v7  ;;  %1080 = vst.msk [vmem:[#allocation2 + $0x2f8] sm:$0xff] %vm984_vm2, %v6165_v32 }
 0x194   :  { %2266 = vst.msk [vmem:[#allocation4] sm:$0xff] %vm2265_vm9, %v2203_v6  ;;  %v1574_v10 = vpop.permute.xlu0 %1573  ;;  %v1438_v15 = vld [vmem:[#allocation2 + $0x2cc] ss:$2 sm:$0x3f]  ;;  %v965_v18 = vpop.f32.mrf.mxu0  ;;  %v1917_v6 = vld [vmem:[#allocation3 + $0x67] sm:$0xff] }
 0x195   :  { %1634 = vst.msk [vmem:[#allocation4 + $0x30] sm:$0xff] %vm1630_vm4, %v1574_v10  ;;  %v1442_v17 = vld [vmem:[#allocation2 + $0x2cd] ss:$2 sm:$0x3f]  ;;  %v2330_v19 = vpop.permute.xlu1 %2329  ;;  %v1447_v51 = vadd.f32 %v7157_v16, %v1445_v14 }
 0x196   :  { %1716 = vrot.lane.b32.xlu0 %v1663_v11, %s6350_s20  ;;  %v1444_v20 = vmax.f32 %v1438_v15, %v1442_v17  ;;  %1079 = vst.msk [vmem:[#allocation2 + $0x2f0] sm:$0xff] %vm984_vm2, %v965_v18  ;;  %v6168_v21 = vpop.f32.mrf.mxu0  ;;  %v1664_v10 = vld [vmem:[#allocation3 + $0x62] sm:$0xff]  ;;  %v2461_v17 = vld [vmem:[#allocation4 + $0x28] sm:$0xff] }
 0x197   :  { %2393 = vst.msk [vmem:[#allocation4] sm:$0xff] %vm2392_vm11, %v2330_v19  ;;  %v7264_v22 = vld [vmem:[#allocation3 + $0x96] sm:$0xff]  ;;  %1841 = vrot.lane.b32.xlu1 %v7106_v39, %s6351_s29  ;;  %v1449_v27 = vmax.f32 %v1447_v51, 0.0  ;;  %v2170_v51 = vld [vmem:[#allocation3 + $0x6c] sm:$0xff] }
 0x198   :  { %v1701_v23 = vpop.permute.xlu0 %1700  ;;  %v1446_v63 = vmax.f32 %v1434_v12, %v1444_v20  ;;  %1082 = vst.msk [vmem:[#allocation2 + $0x308] sm:$0xff] %vm984_vm2, %v6168_v21  ;;  %v7269_v26 = vld [vmem:[#allocation3 + $0x98] sm:$0xff]  ;;  %2450 = vst.msk [vmem:[#allocation4 + $0xf8] sm:$0xff] %vm984_vm2, %v7264_v22  ;;  %v975_v3 = vpop.f32.mrf.mxu0  ;;  %v7283_v36 = vld [vmem:[#allocation3 + $0xa0] sm:$0xff] }
 0x199   :  { %1761 = vst.msk [vmem:[#allocation4 + $0x30] sm:$0xff] %vm1757_vm5, %v1701_v23  ;;  %v1826_v33 = vpop.permute.xlu1 %1825  ;;  %v7278_v39 = vld [vmem:[#allocation3 + $0x9e] sm:$0xff]  ;;  %v1538_v21 = vld [vmem:[#allocation3 + $0x69] sm:$0xff] }
 0x19a   :  { %1523 = vst.msk [vmem:[#allocation4 + $0x130] sm:$0xff] %vm984_vm2, %v7269_v26  ;;  %2220 = vrot.lane.b32.xlu0 %v2169_v28, %s6354_s30  ;;  %1081 = vst.msk [vmem:[#allocation2 + $0x300] sm:$0xff] %vm984_vm2, %v975_v3  ;;  %v1448_v30 = vadd.f32 %v7157_v16, %v1446_v63  ;;  %v1454_v43 = vld [vmem:[#allocation2 + $0x2d8] ss:$2 sm:$0xff]  ;;  %v1458_v49 = vld [vmem:[#allocation2 + $0x2d9] ss:$2 sm:$0xff] }
 0x19b   :  { %1451 = vst.msk [vmem:[#allocation3 + $0xa8] sm:$0xff] %vm984_vm2, %v1449_v27  ;;  %2451 = vst.msk [vmem:[#allocation4 + $0x108] sm:$0xff] %vm984_vm2, %v7278_v39  ;;  %1968 = vrot.lane.b32.xlu1 %v1916_v35, %s6352_s9  ;;  %v1461_v54 = vmax.f32 %v1454_v43, %v1458_v49  ;;  %v2297_v63 = vld [vmem:[#allocation3 + $0x6d] sm:$0xff]  ;;  %v2298_v43 = vld [vmem:[#allocation3 + $0x75] sm:$0xff] }
 0x19c   :  { %1887 = vst.msk [vmem:[#allocation4 + $0x20] sm:$0xff] %vm1884_vm6, %v1826_v33  ;;  %v2205_v37 = vpop.permute.xlu0 %2204  ;;  %v1450_v41 = vmax.f32 %v1448_v30, 0.0  ;;  %v1665_v27 = vld [vmem:[#allocation3 + $0x6a] sm:$0xff] }
 0x19d   :  { %1524 = vst.msk [vmem:[#allocation4 + $0x140] sm:$0xff] %vm984_vm2, %v7283_v36  ;;  %v1456_v61 = vld [vmem:[#allocation2 + $0x2e8] ss:$2 sm:$0x3f]  ;;  %v1953_v46 = vpop.permute.xlu1 %1952 }
 0x19e   :  { %2267 = vst.msk [vmem:[#allocation4 + $0x10] sm:$0xff] %vm2265_vm9, %v2205_v37  ;;  %v2456_v47 = vld [vmem:[#allocation4] sm:$0xff]  ;;  %2347 = vrot.lane.b32.xlu0 %v2296_v42, %s6355_s6  ;;  %v1460_v50 = vld [vmem:[#allocation2 + $0x2e9] ss:$2 sm:$0x3f] }
 0x19f   :  { %1452 = vst.msk [vmem:[#allocation3 + $0xb0] sm:$0x3f] %vm1115_vm3, %v1450_v41  ;;  %2644 = vmatmul.mubr.f32.vlgmr.msra.gmra.mxu1 %v2456_v47  ;;  %2095 = vrot.lane.b32.xlu1 %v7113_v44, %s6353_s14  ;;  %v1462_v58 = vmax.f32 %v1456_v61, %v1460_v50  ;;  %v2171_v37 = vld [vmem:[#allocation3 + $0x74] sm:$0xff]  ;;  %v2463_v47 = vld [vmem:[#allocation4 + $0x38] sm:$0xff] }
 0x1a0   :  { %2014 = vst.msk [vmem:[#allocation4 + $0x20] sm:$0xff] %vm2011_vm7, %v1953_v46  ;;  %5645 = vmatprep.mubr.msk.f32.mxu1 %vm984_vm2, %v2459_v60  ;;  %v2332_v52 = vpop.permute.xlu0 %2331  ;;  %v1918_v42 = vld [vmem:[#allocation3 + $0x6f] sm:$0xff] }
 0x1a1   :  { %2394 = vst.msk [vmem:[#allocation4 + $0x10] sm:$0xff] %vm2392_vm11, %v2332_v52  ;;  %v1464_v59 = vld [vmem:[#allocation2 + $0x2f4] ss:$2 sm:$0xff]  ;;  %v1466_v62 = vld [vmem:[#allocation2 + $0x304] ss:$2 sm:$0x3f]  ;;  %v2080_v34 = vpop.permute.xlu1 %2079 }
 0x1a2   :  { %1843 = vrot.lane.b32.xlu0 %v7117_v45, %s6351_s29  ;;  %v1468_v55 = vld [vmem:[#allocation2 + $0x2f5] ss:$2 sm:$0xff]  ;;  %v1470_v0 = vld [vmem:[#allocation2 + $0x305] ss:$2 sm:$0x3f]  ;;  %2141 = vst.msk [vmem:[#allocation4 + $0x20] sm:$0xff] %vm2138_vm8, %v2080_v34 }
 0x1a3   :  { %v1471_v1 = vmax.f32 %v1464_v59, %v1468_v55  ;;  %v1472_v2 = vmax.f32 %v1466_v62, %v1470_v0  ;;  %v7301_v5 = vld [vmem:[#allocation3 + $0xa6] sm:$0xff]  ;;  %1591 = vrot.lane.b32.xlu1 %v1537_v4, %s6349_s15  ;;  %v1539_v60 = vld [vmem:[#allocation3 + $0x71] sm:$0xff]  ;;  %v2172_v55 = vld [vmem:[#allocation3 + $0x7c] sm:$0xff] }
 0x1a4   :  { %v1828_v44 = vpop.permute.xlu0 %1827  ;;  %2452 = vst.msk [vmem:[#allocation4 + $0x118] sm:$0xff] %vm984_vm2, %v7301_v5  ;;  %v2173_v4 = vld [vmem:[#allocation3 + $0x84] sm:$0xff] }
 0x1a5   :  { %1888 = vst.msk [vmem:[#allocation4 + $0x30] sm:$0xff] %vm1884_vm6, %v1828_v44  ;;  %v1473_v7 = vmax.f32 %v1461_v54, %v1471_v1  ;;  %v1474_v45 = vmax.f32 %v1462_v58, %v1472_v2  ;;  %v1576_v32 = vpop.permute.xlu1 %1575  ;;  %v1919_v54 = vld [vmem:[#allocation3 + $0x77] sm:$0xff] }
 0x1a6   :  { %v7307_v8 = vld [vmem:[#allocation3 + $0xae] sm:$0xff]  ;;  %1970 = vrot.lane.b32.xlu0 %v1917_v6, %s6352_s9  ;;  %1635 = vst.msk [vmem:[#allocation4 + $0x40] sm:$0xff] %vm1630_vm4, %v1576_v32  ;;  %v2299_v2 = vld [vmem:[#allocation3 + $0x7d] sm:$0xff] }
 0x1a7   :  { %2453 = vst.msk [vmem:[#allocation4 + $0x128] sm:$0xff] %vm984_vm2, %v7307_v8  ;;  %v1475_v11 = vadd.f32 %v7157_v16, %v1473_v7  ;;  %v1476_v12 = vadd.f32 %v7157_v16, %v1474_v45  ;;  %1718 = vrot.lane.b32.xlu1 %v1664_v10, %s6350_s20  ;;  %v1667_v45 = vld [vmem:[#allocation3 + $0x7a] sm:$0xff] }
 0x1a8   :  { %v1955_v14 = vpop.permute.xlu0 %1954  ;;  %v2458_v15 = vld [vmem:[#allocation4 + $0x10] sm:$0xff] }
 0x1a9   :  { %2015 = vst.msk [vmem:[#allocation4 + $0x30] sm:$0xff] %vm2011_vm7, %v1955_v14  ;;  %2649 = vmatmul.mubr.f32.gmra.mxu1 %v2458_v15  ;;  %v1477_v18 = vmax.f32 %v1475_v11, 0.0  ;;  %v1478_v19 = vmax.f32 %v1476_v12, 0.0  ;;  %v1703_v20 = vpop.permute.xlu1 %1702  ;;  %v1920_v10 = vld [vmem:[#allocation3 + $0x7f] sm:$0xff] }
 0x1aa   :  { %5646 = vmatprep.mubr.msk.f32.mxu1 %vm984_vm2, %v2461_v17  ;;  %2097 = vrot.lane.b32.xlu0 %v7123_v48, %s6353_s14  ;;  %1762 = vst.msk [vmem:[#allocation4 + $0x40] sm:$0xff] %vm1757_vm5, %v1703_v20  ;;  %v2300_v12 = vld [vmem:[#allocation3 + $0x85] sm:$0xff]  ;;  %v2968_v17 = vld [vmem:[%s8811_s1 + $0x48] sm:$0x7] }
 0x1ab   :  { %1479 = vst.msk [vmem:[#allocation3 + $0xb6] sm:$0xff] %vm984_vm2, %v1477_v18  ;;  %2222 = vrot.lane.b32.xlu1 %v2170_v51, %s6354_s30  ;;  %6169 = vmatprep.subr.msk.mxu1 %vm425_vm0, %v2968_v17  ;;  %v1541_v20 = vld [vmem:[#allocation3 + $0x81] sm:$0xff] }
 0x1ac   :  { %1480 = vst.msk [vmem:[#allocation3 + $0xbe] sm:$0x3f] %vm1115_vm3, %v1478_v19  ;;  %v2082_v16 = vpop.permute.xlu0 %2081  ;;  %6170 = vmatpush3.msk.msra.mxu1 %vm425_vm0, %v2968_v17 }
 0x1ad   :  { %2142 = vst.msk [vmem:[#allocation4 + $0x30] sm:$0xff] %vm2138_vm8, %v2082_v16  ;;  %v2207_v23 = vpop.permute.xlu1 %2206 }
 0x1ae   :  { %1593 = vrot.lane.b32.xlu0 %v1538_v21, %s6349_s15  ;;  %2268 = vst.msk [vmem:[#allocation4 + $0x20] sm:$0xff] %vm2265_vm9, %v2207_v23  ;;  %v1668_v21 = vld [vmem:[#allocation3 + $0x82] sm:$0xff] }
 0x1af   :  { %2349 = vrot.lane.b32.xlu1 %v2297_v63, %s6355_s6  ;;  %v2967_v63 = vld [vmem:[%s8811_s1 + $0x40] sm:$0xff] }
 0x1b0   :  { %v1578_v48 = vpop.permute.xlu0 %1577  ;;  %6171 = vmatprep.subr.mxu1 %v2967_v63 }
 0x1b1   :  { %1636 = vst.msk [vmem:[#allocation4 + $0x50] sm:$0xff] %vm1630_vm4, %v1578_v48  ;;  %v2334_v28 = vpop.permute.xlu1 %2333  ;;  %v2469_v48 = vld [vmem:[#allocation4 + $0x68] sm:$0xff]  ;;  %6172 = vmatpush3.msra.mxu1 %v2967_v63 }
 0x1b2   :  { %1720 = vrot.lane.b32.xlu0 %v1665_v27, %s6350_s20  ;;  %2395 = vst.msk [vmem:[#allocation4 + $0x20] sm:$0xff] %vm2392_vm11, %v2334_v28  ;;  %v2433_v35 = vld [vmem:[#allocation3 + $0xb6] sm:$0xff]  ;;  %v2174_v28 = vld [vmem:[#allocation3 + $0x8c] sm:$0xff] }
 0x1b3   :  { %v7331_v3 = vld [vmem:[#allocation3 + $0xbd] sm:$0xff]  ;;  %1845 = vrot.lane.b32.xlu1 %v7140_v9, %s6351_s29  ;;  %2454 = vst.msk [vmem:[#allocation4 + $0x138] sm:$0xff] %vm984_vm2, %v2433_v35 }
 0x1b4   :  { %v2434_v33 = vld [vmem:[#allocation3 + $0xbe] sm:$0xff]  ;;  %v1705_v30 = vpop.permute.xlu0 %1704 }
 0x1b5   :  { %2455 = vst.msk [vmem:[#allocation4 + $0x148] sm:$0xff] %vm984_vm2, %v2434_v33  ;;  %v1830_v41 = vpop.permute.xlu1 %1829 }
 0x1b6   :  { %4199 = vst.msk [vmem:[#allocation3 + $0xc4] sm:$0xf] %vm1481_vm10, %v6348_v24  ;;  %2224 = vrot.lane.b32.xlu0 %v2171_v37, %s6354_s30  ;;  %v2301_v37 = vld [vmem:[#allocation3 + $0x8d] sm:$0xff] }
 0x1b7   :  { %1763 = vst.msk [vmem:[#allocation4 + $0x50] sm:$0xff] %vm1757_vm5, %v1705_v30  ;;  %1972 = vrot.lane.b32.xlu1 %v1918_v42, %s6352_s9  ;;  %v1542_v30 = vld [vmem:[#allocation3 + $0x89] sm:$0xff] }
 0x1b8   :  { %1889 = vst.msk [vmem:[#allocation4 + $0x40] sm:$0xff] %vm1884_vm6, %v1830_v41  ;;  %v2209_v9 = vpop.permute.xlu0 %2208  ;;  %v1669_v42 = vld [vmem:[#allocation3 + $0x8a] sm:$0xff] }
 0x1b9   :  { %2269 = vst.msk [vmem:[#allocation4 + $0x30] sm:$0xff] %vm2265_vm9, %v2209_v9  ;;  %v1957_v61 = vpop.permute.xlu1 %1956  ;;  %v2460_v46 = vld [vmem:[#allocation4 + $0x20] sm:$0xff] }
 0x1ba   :  { %2351 = vrot.lane.b32.xlu0 %v2298_v43, %s6355_s6  ;;  %2016 = vst.msk [vmem:[#allocation4 + $0x40] sm:$0xff] %vm2011_vm7, %v1957_v61  ;;  %2654 = vmatmul.mubr.f32.gmra.mxu1 %v2460_v46  ;;  %v2175_v61 = vld [vmem:[#allocation3 + $0x94] sm:$0xff] }
 0x1bb   :  { %5647 = vmatprep.mubr.msk.f32.mxu1 %vm984_vm2, %v2463_v47  ;;  %2099 = vrot.lane.b32.xlu1 %v7144_v31, %s6353_s14  ;;  %v1666_v31 = vld [vmem:[#allocation3 + $0x72] sm:$0xff] }
 0x1bc   :  { %v2336_v49 = vpop.permute.xlu0 %2335  ;;  %v1922_v47 = vld [vmem:[#allocation3 + $0x8f] sm:$0xff] }
 0x1bd   :  { %2396 = vst.msk [vmem:[#allocation4 + $0x30] sm:$0xff] %vm2392_vm11, %v2336_v49  ;;  %v2084_v50 = vpop.permute.xlu1 %2083  ;;  %v2965_v49 = vld [vmem:[%s8811_s1 + $0x30] sm:$0xff] }
 0x1be   :  { %1847 = vrot.lane.b32.xlu0 %v7152_v13, %s6351_s29  ;;  %2143 = vst.msk [vmem:[#allocation4 + $0x40] sm:$0xff] %vm2138_vm8, %v2084_v50  ;;  %v2465_v13 = vld [vmem:[#allocation4 + $0x48] sm:$0xff] }
 0x1bf   :  { %1595 = vrot.lane.b32.xlu1 %v1539_v60, %s6349_s15 }
 0x1c0   :  { %v1832_v52 = vpop.permute.xlu0 %1831 }
 0x1c1   :  { %1890 = vst.msk [vmem:[#allocation4 + $0x50] sm:$0xff] %vm1884_vm6, %v1832_v52  ;;  %v1580_v58 = vpop.permute.xlu1 %1579 }
 0x1c2   :  { %1974 = vrot.lane.b32.xlu0 %v1919_v54, %s6352_s9  ;;  %1637 = vst.msk [vmem:[#allocation4 + $0x60] sm:$0xff] %vm1630_vm4, %v1580_v58  ;;  %v2471_v54 = vld [vmem:[#allocation4 + $0x78] sm:$0xff] }
 0x1c3   :  { %1722 = vrot.lane.b32.xlu1 %v1666_v31, %s6350_s20 }
 0x1c4   :  { %v1959_v59 = vpop.permute.xlu0 %1958  ;;  %v2462_v62 = vld [vmem:[#allocation4 + $0x30] sm:$0xff] }
 0x1c5   :  { %2017 = vst.msk [vmem:[#allocation4 + $0x50] sm:$0xff] %vm2011_vm7, %v1959_v59  ;;  %2659 = vmatmul.mubr.f32.gmra.mxu1 %v2462_v62  ;;  %v1707_v34 = vpop.permute.xlu1 %1706  ;;  %v1543_v59 = vld [vmem:[#allocation3 + $0x91] sm:$0xff] }
 0x1c6   :  { %5648 = vmatprep.mubr.msk.f32.mxu1 %vm984_vm2, %v2465_v13  ;;  %2101 = vrot.lane.b32.xlu0 %v7181_v53, %s6353_s14  ;;  %1764 = vst.msk [vmem:[#allocation4 + $0x60] sm:$0xff] %vm1757_vm5, %v1707_v34  ;;  %v1540_v53 = vld [vmem:[#allocation3 + $0x79] sm:$0xff] }
 0x1c7   :  { %2226 = vrot.lane.b32.xlu1 %v2172_v55, %s6354_s30  ;;  %v2964_v62 = vld [vmem:[%s8811_s1 + $0x28] sm:$0xff] }
 0x1c8   :  { %v2086_v0 = vpop.permute.xlu0 %2085 }
 0x1c9   :  { %2144 = vst.msk [vmem:[#allocation4 + $0x50] sm:$0xff] %vm2138_vm8, %v2086_v0  ;;  %v2211_v1 = vpop.permute.xlu1 %2210 }
 0x1ca   :  { %2228 = vrot.lane.b32.xlu0 %v2173_v4, %s6354_s30  ;;  %2270 = vst.msk [vmem:[#allocation4 + $0x40] sm:$0xff] %vm2265_vm9, %v2211_v1  ;;  %v2473_v4 = vld [vmem:[#allocation4 + $0x88] sm:$0xff] }
 0x1cb   :  { %2353 = vrot.lane.b32.xlu1 %v2299_v2, %s6355_s6  ;;  %v2176_v2 = vld [vmem:[#allocation3 + $0x9c] sm:$0xff] }
 0x1cc   :  { %v1582_v44 = vpop.permute.xlu0 %1581 }
 0x1cd   :  { %1638 = vst.msk [vmem:[#allocation4 + $0x70] sm:$0xff] %vm1630_vm4, %v1582_v44  ;;  %v2338_v6 = vpop.permute.xlu1 %2337 }
 0x1ce   :  { %1597 = vrot.lane.b32.xlu0 %v1540_v53, %s6349_s15  ;;  %2397 = vst.msk [vmem:[#allocation4 + $0x40] sm:$0xff] %vm2392_vm11, %v2338_v6  ;;  %v2963_v53 = vld [vmem:[%s8811_s1 + $0x20] sm:$0xff]  ;;  %v1544_v6 = vld [vmem:[#allocation3 + $0x99] sm:$0xff] }
 0x1cf   :  { %1849 = vrot.lane.b32.xlu1 %v7186_v56, %s6351_s29  ;;  %v2467_v56 = vld [vmem:[#allocation4 + $0x58] sm:$0xff] }
 0x1d0   :  { %v1709_v7 = vpop.permute.xlu0 %1708 }
 0x1d1   :  { %1765 = vst.msk [vmem:[#allocation4 + $0x70] sm:$0xff] %vm1757_vm5, %v1709_v7  ;;  %v1834_v32 = vpop.permute.xlu1 %1833 }
 0x1d2   :  { %1724 = vrot.lane.b32.xlu0 %v1667_v45, %s6350_s20  ;;  %1891 = vst.msk [vmem:[#allocation4 + $0x60] sm:$0xff] %vm1884_vm6, %v1834_v32  ;;  %v1671_v32 = vld [vmem:[#allocation3 + $0x9a] sm:$0xff] }
 0x1d3   :  { %1976 = vrot.lane.b32.xlu1 %v1920_v10, %s6352_s9 }
 0x1d4   :  { %v2213_v11 = vpop.permute.xlu0 %2212 }
 0x1d5   :  { %2271 = vst.msk [vmem:[#allocation4 + $0x50] sm:$0xff] %vm2265_vm9, %v2213_v11  ;;  %v1961_v14 = vpop.permute.xlu1 %1960  ;;  %v2464_v15 = vld [vmem:[#allocation4 + $0x40] sm:$0xff] }
 0x1d6   :  { %2355 = vrot.lane.b32.xlu0 %v2300_v12, %s6355_s6  ;;  %2018 = vst.msk [vmem:[#allocation4 + $0x60] sm:$0xff] %vm2011_vm7, %v1961_v14  ;;  %2664 = vmatmul.mubr.f32.gmra.mxu1 %v2464_v15  ;;  %v2962_v11 = vld [vmem:[%s8811_s1 + $0x18] sm:$0xff] }
 0x1d7   :  { %5649 = vmatprep.mubr.msk.f32.mxu1 %vm984_vm2, %v2467_v56  ;;  %2103 = vrot.lane.b32.xlu1 %v7194_v57, %s6353_s14  ;;  %v1921_v57 = vld [vmem:[#allocation3 + $0x87] sm:$0xff]  ;;  %v1924_v56 = vld [vmem:[#allocation3 + $0x9f] sm:$0xff] }
 0x1d8   :  { %v2340_v18 = vpop.permute.xlu0 %2339  ;;  %v2177_v14 = vld [vmem:[#allocation3 + $0xa4] sm:$0xff] }
 0x1d9   :  { %2398 = vst.msk [vmem:[#allocation4 + $0x50] sm:$0xff] %vm2392_vm11, %v2340_v18  ;;  %v2088_v19 = vpop.permute.xlu1 %2087  ;;  %v2304_v18 = vld [vmem:[#allocation3 + $0xa5] sm:$0xff] }
 0x1da   :  { %1851 = vrot.lane.b32.xlu0 %v7215_v25, %s6351_s29  ;;  %2145 = vst.msk [vmem:[#allocation4 + $0x60] sm:$0xff] %vm2138_vm8, %v2088_v19 }
 0x1db   :  { %1599 = vrot.lane.b32.xlu1 %v1541_v20, %s6349_s15  ;;  %v2475_v20 = vld [vmem:[#allocation4 + $0x98] sm:$0xff] }
 0x1dc   :  { %v1836_v51 = vpop.permute.xlu0 %1835 }
 0x1dd   :  { %1892 = vst.msk [vmem:[#allocation4 + $0x70] sm:$0xff] %vm1884_vm6, %v1836_v51  ;;  %v2215_v16 = vpop.permute.xlu1 %2214  ;;  %v2961_v51 = vld [vmem:[%s8811_s1 + $0x10] sm:$0xff] }
 0x1de   :  { %1978 = vrot.lane.b32.xlu0 %v1921_v57, %s6352_s9  ;;  %2272 = vst.msk [vmem:[#allocation4 + $0x60] sm:$0xff] %vm2265_vm9, %v2215_v16 }
 0x1df   :  { %1726 = vrot.lane.b32.xlu1 %v1668_v21, %s6350_s20  ;;  %v1545_v21 = vld [vmem:[#allocation3 + $0xa1] sm:$0xff] }
 0x1e0   :  { %v1963_v25 = vpop.permute.xlu0 %1962  ;;  %v2466_v23 = vld [vmem:[#allocation4 + $0x50] sm:$0xff] }
 0x1e1   :  { %2019 = vst.msk [vmem:[#allocation4 + $0x70] sm:$0xff] %vm2011_vm7, %v1963_v25  ;;  %2669 = vmatmul.mubr.f32.gmra.mxu1 %v2466_v23  ;;  %v1584_v27 = vpop.permute.xlu1 %1583  ;;  %v1925_v23 = vld [vmem:[#allocation3 + $0xa7] sm:$0xff] }
 0x1e2   :  { %5650 = vmatprep.mubr.msk.f32.mxu1 %vm984_vm2, %v2469_v48  ;;  %2105 = vrot.lane.b32.xlu0 %v7218_v29, %s6353_s14  ;;  %1639 = vst.msk [vmem:[#allocation4 + $0x80] sm:$0xff] %vm1630_vm4, %v1584_v27  ;;  %v2966_v29 = vld [vmem:[%s8811_s1 + $0x38] sm:$0xff]  ;;  %v2477_v27 = vld [vmem:[#allocation4 + $0xa8] sm:$0xff] }
 0x1e3   :  { %2230 = vrot.lane.b32.xlu1 %v2174_v28, %s6354_s30  ;;  %6173 = vmatprep.subr.mxu1 %v2966_v29  ;;  %v2052_v28 = vld [vmem:[#allocation3 + $0xa8] sm:$0xff] }
 0x1e4   :  { %v2090_v33 = vpop.permute.xlu0 %2089  ;;  %6174 = vmatpush3.msra.mxu1 %v2966_v29  ;;  %v2179_v29 = vld [vmem:[#allocation3 + $0xb4] sm:$0xff] }
 0x1e5   :  { %2146 = vst.msk [vmem:[#allocation4 + $0x70] sm:$0xff] %vm2138_vm8, %v2090_v33  ;;  %v1711_v35 = vpop.permute.xlu1 %1710  ;;  %6175 = vmatprep.subr.mxu1 %v2965_v49 }
 0x1e6   :  { %1601 = vrot.lane.b32.xlu0 %v1542_v30, %s6349_s15  ;;  %1766 = vst.msk [vmem:[#allocation4 + $0x80] sm:$0xff] %vm1757_vm5, %v1711_v35  ;;  %6176 = vmatpush3.msra.mxu1 %v2965_v49  ;;  %v2178_v30 = vld [vmem:[#allocation3 + $0xac] sm:$0xff] }
 0x1e7   :  { %2357 = vrot.lane.b32.xlu1 %v2301_v37, %s6355_s6  ;;  %6177 = vmatprep.subr.mxu1 %v2964_v62  ;;  %v2960_v37 = vld [vmem:[%s8811_s1 + $0x8] sm:$0xff]  ;;  %v2053_v49 = vld [vmem:[#allocation3 + $0xb0] sm:$0xff] }
 0x1e8   :  { %v1586_v41 = vpop.permute.xlu0 %1585  ;;  %6178 = vmatpush3.msra.mxu1 %v2964_v62 }
 0x1e9   :  { %1640 = vst.msk [vmem:[#allocation4 + $0x90] sm:$0xff] %vm1630_vm4, %v1586_v41  ;;  %v2342_v9 = vpop.permute.xlu1 %2341  ;;  %6179 = vmatprep.subr.mxu1 %v2963_v53 }
 0x1ea   :  { %1728 = vrot.lane.b32.xlu0 %v1669_v42, %s6350_s20  ;;  %2399 = vst.msk [vmem:[#allocation4 + $0x60] sm:$0xff] %vm2392_vm11, %v2342_v9  ;;  %6180 = vmatpush3.msra.mxu1 %v2963_v53  ;;  %v2305_v42 = vld [vmem:[#allocation3 + $0xad] sm:$0xff] }
 0x1eb   :  { %1853 = vrot.lane.b32.xlu1 %v7229_v38, %s6351_s29  ;;  %v2302_v38 = vld [vmem:[#allocation3 + $0x95] sm:$0xff]  ;;  %6181 = vmatprep.subr.mxu1 %v2962_v11 }
 0x1ec   :  { %v1713_v43 = vpop.permute.xlu0 %1712  ;;  %6182 = vmatpush3.msra.mxu1 %v2962_v11 }
 0x1ed   :  { %1767 = vst.msk [vmem:[#allocation4 + $0x90] sm:$0xff] %vm1757_vm5, %v1713_v43  ;;  %v1838_v46 = vpop.permute.xlu1 %1837  ;;  %6183 = vmatprep.subr.mxu1 %v2961_v51  ;;  %v2306_v43 = vld [vmem:[#allocation3 + $0xb5] sm:$0xff] }
 0x1ee   :  { %2232 = vrot.lane.b32.xlu0 %v2175_v61, %s6354_s30  ;;  %1893 = vst.msk [vmem:[#allocation4 + $0x80] sm:$0xff] %vm1884_vm6, %v1838_v46  ;;  %6184 = vmatpush3.msra.mxu1 %v2961_v51  ;;  %v2959_v46 = vld [vmem:[%s8811_s1] sm:$0xff] }
 0x1ef   :  { %1980 = vrot.lane.b32.xlu1 %v1922_v47, %s6352_s9  ;;  %6185 = vmatprep.subr.mxu1 %v2960_v37 }
 0x1f0   :  { %v2217_v50 = vpop.permute.xlu0 %2216  ;;  %6186 = vmatpush3.msra.mxu1 %v2960_v37  ;;  %v2489_v37 = vld [vmem:[#allocation4 + $0x108] sm:$0xff] }
 0x1f1   :  { %2273 = vst.msk [vmem:[#allocation4 + $0x70] sm:$0xff] %vm2265_vm9, %v2217_v50  ;;  %v1965_v60 = vpop.permute.xlu1 %1964  ;;  %v2468_v52 = vld [vmem:[#allocation4 + $0x60] sm:$0xff]  ;;  %6187 = vmatprep.subr.mxu1 %v2959_v46 }
 0x1f2   :  { %2359 = vrot.lane.b32.xlu0 %v2302_v38, %s6355_s6  ;;  %2020 = vst.msk [vmem:[#allocation4 + $0x80] sm:$0xff] %vm2011_vm7, %v1965_v60  ;;  %2674 = vmatmul.mubr.f32.gmra.mxu1 %v2468_v52  ;;  %v1926_v38 = vld [vmem:[#allocation3 + $0xaf] sm:$0xff] }
 0x1f3   :  { %5651 = vmatprep.mubr.msk.f32.mxu1 %vm984_vm2, %v2471_v54  ;;  %2107 = vrot.lane.b32.xlu1 %v7231_v40, %s6353_s14  ;;  %v1923_v40 = vld [vmem:[#allocation3 + $0x97] sm:$0xff] }
 0x1f4   :  { %v2344_v58 = vpop.permute.xlu0 %2343  ;;  %6188 = vmatpush3.msra.mxu1 %v2959_v46 }
 0x1f5   :  { %2400 = vst.msk [vmem:[#allocation4 + $0x70] sm:$0xff] %vm2392_vm11, %v2344_v58  ;;  %v2092_v31 = vpop.permute.xlu1 %2091  ;;  %v2180_v58 = vld [vmem:[#allocation3 + $0xbc] sm:$0xff] }
 0x1f6   :  { %1855 = vrot.lane.b32.xlu0 %v7264_v22, %s6351_s29  ;;  %2147 = vst.msk [vmem:[#allocation4 + $0x80] sm:$0xff] %vm2138_vm8, %v2092_v31  ;;  %v1670_v22 = vld [vmem:[#allocation3 + $0x92] sm:$0xff] }
 0x1f7   :  { %1603 = vrot.lane.b32.xlu1 %v1543_v59, %s6349_s15 }
 0x1f8   :  { %v1840_v13 = vpop.permute.xlu0 %1839 }
 0x1f9   :  { %1894 = vst.msk [vmem:[#allocation4 + $0x90] sm:$0xff] %vm1884_vm6, %v1840_v13  ;;  %v1588_v34 = vpop.permute.xlu1 %1587 }
 0x1fa   :  { %1982 = vrot.lane.b32.xlu0 %v1923_v40, %s6352_s9  ;;  %1641 = vst.msk [vmem:[#allocation4 + $0xa0] sm:$0xff] %vm1630_vm4, %v1588_v34  ;;  %v2481_v34 = vld [vmem:[#allocation4 + $0xc8] sm:$0xff] }
 0x1fb   :  { %1730 = vrot.lane.b32.xlu1 %v1670_v22, %s6350_s20 }
 0x1fc   :  { %v1967_v55 = vpop.permute.xlu0 %1966  ;;  %v2470_v0 = vld [vmem:[#allocation4 + $0x70] sm:$0xff] }
 0x1fd   :  { %2021 = vst.msk [vmem:[#allocation4 + $0x90] sm:$0xff] %vm2011_vm7, %v1967_v55  ;;  %2679 = vmatmul.mubr.f32.gmra.mxu1 %v2470_v0  ;;  %v1715_v1 = vpop.permute.xlu1 %1714 }
 0x1fe   :  { %5652 = vmatprep.mubr.msk.f32.mxu1 %vm984_vm2, %v2473_v4  ;;  %2109 = vrot.lane.b32.xlu0 %v7269_v26, %s6353_s14  ;;  %1768 = vst.msk [vmem:[#allocation4 + $0xa0] sm:$0xff] %vm1757_vm5, %v1715_v1  ;;  %v2303_v26 = vld [vmem:[#allocation3 + $0x9d] sm:$0xff] }
 0x1ff   :  { %2234 = vrot.lane.b32.xlu1 %v2176_v2, %s6354_s30 }
 0x200   :  { %v2094_v44 = vpop.permute.xlu0 %2093 }
 0x201   :  { %2148 = vst.msk [vmem:[#allocation4 + $0x90] sm:$0xff] %vm2138_vm8, %v2094_v44  ;;  %v2219_v7 = vpop.permute.xlu1 %2218 }
 0x202   :  { %1605 = vrot.lane.b32.xlu0 %v1544_v6, %s6349_s15  ;;  %2274 = vst.msk [vmem:[#allocation4 + $0x80] sm:$0xff] %vm2265_vm9, %v2219_v7 }
 0x203   :  { %2361 = vrot.lane.b32.xlu1 %v2303_v26, %s6355_s6  ;;  %v2483_v26 = vld [vmem:[#allocation4 + $0xd8] sm:$0xff] }
 0x204   :  { %v1590_v45 = vpop.permute.xlu0 %1589 }
 0x205   :  { %1642 = vst.msk [vmem:[#allocation4 + $0xb0] sm:$0xff] %vm1630_vm4, %v1590_v45  ;;  %v2346_v10 = vpop.permute.xlu1 %2345 }
 0x206   :  { %1732 = vrot.lane.b32.xlu0 %v1671_v32, %s6350_s20  ;;  %2401 = vst.msk [vmem:[#allocation4 + $0x80] sm:$0xff] %vm2392_vm11, %v2346_v10 }
 0x207   :  { %1857 = vrot.lane.b32.xlu1 %v7278_v39, %s6351_s29 }
 0x208   :  { %v1717_v12 = vpop.permute.xlu0 %1716 }
 0x209   :  { %1769 = vst.msk [vmem:[#allocation4 + $0xb0] sm:$0xff] %vm1757_vm5, %v1717_v12  ;;  %v1842_v15 = vpop.permute.xlu1 %1841 }
 0x20a   :  { %2236 = vrot.lane.b32.xlu0 %v2177_v14, %s6354_s30  ;;  %1895 = vst.msk [vmem:[#allocation4 + $0xa0] sm:$0xff] %vm1884_vm6, %v1842_v15  ;;  %v2485_v15 = vld [vmem:[#allocation4 + $0xe8] sm:$0xff] }
 0x20b   :  { %1984 = vrot.lane.b32.xlu1 %v1924_v56, %s6352_s9 }
 0x20c   :  { %v2221_v17 = vpop.permute.xlu0 %2220 }
 0x20d   :  { %2275 = vst.msk [vmem:[#allocation4 + $0x90] sm:$0xff] %vm2265_vm9, %v2221_v17  ;;  %v1969_v19 = vpop.permute.xlu1 %1968  ;;  %v2472_v39 = vld [vmem:[#allocation4 + $0x80] sm:$0xff] }
 0x20e   :  { %2363 = vrot.lane.b32.xlu0 %v2304_v18, %s6355_s6  ;;  %2022 = vst.msk [vmem:[#allocation4 + $0xa0] sm:$0xff] %vm2011_vm7, %v1969_v19  ;;  %2684 = vmatmul.mubr.f32.gmra.mxu1 %v2472_v39 }
 0x20f   :  { %5653 = vmatprep.mubr.msk.f32.mxu1 %vm984_vm2, %v2475_v20  ;;  %2111 = vrot.lane.b32.xlu1 %v7283_v36, %s6353_s14  ;;  %v1672_v36 = vld [vmem:[#allocation3 + $0xa2] sm:$0xff] }
 0x210   :  { %v2348_v57 = vpop.permute.xlu0 %2347 }
 0x211   :  { %2402 = vst.msk [vmem:[#allocation4 + $0x90] sm:$0xff] %vm2392_vm11, %v2348_v57  ;;  %v2096_v16 = vpop.permute.xlu1 %2095 }
 0x212   :  { %1859 = vrot.lane.b32.xlu0 %v7301_v5, %s6351_s29  ;;  %2149 = vst.msk [vmem:[#allocation4 + $0xa0] sm:$0xff] %vm2138_vm8, %v2096_v16 }
 0x213   :  { %1607 = vrot.lane.b32.xlu1 %v1545_v21, %s6349_s15 }
 0x214   :  { %v1844_v25 = vpop.permute.xlu0 %1843 }
 0x215   :  { %1896 = vst.msk [vmem:[#allocation4 + $0xb0] sm:$0xff] %vm1884_vm6, %v1844_v25  ;;  %v1592_v63 = vpop.permute.xlu1 %1591 }
 0x216   :  { %1986 = vrot.lane.b32.xlu0 %v1925_v23, %s6352_s9  ;;  %1643 = vst.msk [vmem:[#allocation4 + $0xc0] sm:$0xff] %vm1630_vm4, %v1592_v63  ;;  %v2487_v63 = vld [vmem:[#allocation4 + $0xf8] sm:$0xff] }
 0x217   :  { %1734 = vrot.lane.b32.xlu1 %v1672_v36, %s6350_s20 }
 0x218   :  { %v1971_v48 = vpop.permute.xlu0 %1970  ;;  %v2474_v5 = vld [vmem:[#allocation4 + $0x90] sm:$0xff] }
 0x219   :  { %2023 = vst.msk [vmem:[#allocation4 + $0xb0] sm:$0xff] %vm2011_vm7, %v1971_v48  ;;  %2689 = vmatmul.mubr.f32.gmra.mxu1 %v2474_v5  ;;  %v1719_v33 = vpop.permute.xlu1 %1718 }
 0x21a   :  { %5654 = vmatprep.mubr.msk.f32.mxu1 %vm984_vm2, %v2477_v27  ;;  %2113 = vrot.lane.b32.xlu0 %v2052_v28, %s6353_s14  ;;  %1770 = vst.msk [vmem:[#allocation4 + $0xc0] sm:$0xff] %vm1757_vm5, %v1719_v33 }
 0x21b   :  { %2238 = vrot.lane.b32.xlu1 %v2178_v30, %s6354_s30 }
 0x21c   :  { %v2098_v35 = vpop.permute.xlu0 %2097 }
 0x21d   :  { %2150 = vst.msk [vmem:[#allocation4 + $0xb0] sm:$0xff] %vm2138_vm8, %v2098_v35  ;;  %v2223_v41 = vpop.permute.xlu1 %2222 }
 0x21e   :  { %2240 = vrot.lane.b32.xlu0 %v2179_v29, %s6354_s30  ;;  %2276 = vst.msk [vmem:[#allocation4 + $0xa0] sm:$0xff] %vm2265_vm9, %v2223_v41 }
 0x21f   :  { %2365 = vrot.lane.b32.xlu1 %v2305_v42, %s6355_s6 }
 0x220   :  { %v1594_v9 = vpop.permute.xlu0 %1593 }
 0x221   :  { %1644 = vst.msk [vmem:[#allocation4 + $0xd0] sm:$0xff] %vm1630_vm4, %v1594_v9  ;;  %v2350_v61 = vpop.permute.xlu1 %2349 }
 0x222   :  { %2367 = vrot.lane.b32.xlu0 %v2306_v43, %s6355_s6  ;;  %2403 = vst.msk [vmem:[#allocation4 + $0xa0] sm:$0xff] %vm2392_vm11, %v2350_v61 }
 0x223   :  { %1861 = vrot.lane.b32.xlu1 %v7307_v8, %s6351_s29  ;;  %v2479_v8 = vld [vmem:[#allocation4 + $0xb8] sm:$0xff] }
 0x224   :  { %v1721_v47 = vpop.permute.xlu0 %1720 }
 0x225   :  { %1771 = vst.msk [vmem:[#allocation4 + $0xd0] sm:$0xff] %vm1757_vm5, %v1721_v47  ;;  %v1846_v50 = vpop.permute.xlu1 %1845 }
 0x226   :  { %2115 = vrot.lane.b32.xlu0 %v2053_v49, %s6353_s14  ;;  %1897 = vst.msk [vmem:[#allocation4 + $0xc0] sm:$0xff] %vm1884_vm6, %v1846_v50 }
 0x227   :  { %1988 = vrot.lane.b32.xlu1 %v1926_v38, %s6352_s9 }
 0x228   :  { %v2225_v60 = vpop.permute.xlu0 %2224 }
 0x229   :  { %2277 = vst.msk [vmem:[#allocation4 + $0xb0] sm:$0xff] %vm2265_vm9, %v2225_v60  ;;  %v1973_v52 = vpop.permute.xlu1 %1972  ;;  %v2476_v54 = vld [vmem:[#allocation4 + $0xa0] sm:$0xff] }
 0x22a   :  { %2369 = vrot.lane.b32.xlu0 %v7331_v3, %s6355_s6  ;;  %2024 = vst.msk [vmem:[#allocation4 + $0xc0] sm:$0xff] %vm2011_vm7, %v1973_v52  ;;  %2694 = vmatmul.mubr.f32.gmra.mxu1 %v2476_v54  ;;  %v2491_v52 = vld [vmem:[#allocation4 + $0x118] sm:$0xff] }
 0x22b   :  { %5655 = vmatprep.mubr.msk.f32.mxu1 %vm984_vm2, %v2479_v8  ;;  %2242 = vrot.lane.b32.xlu1 %v2180_v58, %s6354_s30 }
 0x22c   :  { %v2352_v31 = vpop.permute.xlu0 %2351 }
 0x22d   :  { %2404 = vst.msk [vmem:[#allocation4 + $0xb0] sm:$0xff] %vm2392_vm11, %v2352_v31  ;;  %v2100_v59 = vpop.permute.xlu1 %2099 }
 0x22e   :  { %2151 = vst.msk [vmem:[#allocation4 + $0xc0] sm:$0xff] %vm2138_vm8, %v2100_v59 }
 0x230   :  { %v1848_v62 = vpop.permute.xlu0 %1847 }
 0x231   :  { %1898 = vst.msk [vmem:[#allocation4 + $0xd0] sm:$0xff] %vm1884_vm6, %v1848_v62  ;;  %v1596_v13 = vpop.permute.xlu1 %1595 }
 0x232   :  { %1645 = vst.msk [vmem:[#allocation4 + $0xe0] sm:$0xff] %vm1630_vm4, %v1596_v13 }
 0x234   :  { %v1975_v3 = vpop.permute.xlu0 %1974  ;;  %v2478_v40 = vld [vmem:[#allocation4 + $0xb0] sm:$0xff] }
 0x235   :  { %2025 = vst.msk [vmem:[#allocation4 + $0xd0] sm:$0xff] %vm2011_vm7, %v1975_v3  ;;  %2699 = vmatmul.mubr.f32.gmra.mxu1 %v2478_v40  ;;  %v1723_v22 = vpop.permute.xlu1 %1722  ;;  %v2493_v40 = vld [vmem:[#allocation4 + $0x128] sm:$0xff] }
 0x236   :  { %5656 = vmatprep.mubr.msk.f32.mxu1 %vm984_vm2, %v2481_v34  ;;  %1772 = vst.msk [vmem:[#allocation4 + $0xe0] sm:$0xff] %vm1757_vm5, %v1723_v22 }
 0x238   :  { %v2102_v55 = vpop.permute.xlu0 %2101 }
 0x239   :  { %2152 = vst.msk [vmem:[#allocation4 + $0xd0] sm:$0xff] %vm2138_vm8, %v2102_v55  ;;  %v2227_v0 = vpop.permute.xlu1 %2226 }
 0x23a   :  { %2278 = vst.msk [vmem:[#allocation4 + $0xc0] sm:$0xff] %vm2265_vm9, %v2227_v0 }
 0x23c   :  { %v2229_v4 = vpop.permute.xlu0 %2228 }
 0x23d   :  { %2279 = vst.msk [vmem:[#allocation4 + $0xd0] sm:$0xff] %vm2265_vm9, %v2229_v4  ;;  %v2354_v1 = vpop.permute.xlu1 %2353 }
 0x23e   :  { %2405 = vst.msk [vmem:[#allocation4 + $0xc0] sm:$0xff] %vm2392_vm11, %v2354_v1 }
 0x240   :  { %v1598_v2 = vpop.permute.xlu0 %1597 }
 0x241   :  { %1646 = vst.msk [vmem:[#allocation4 + $0xf0] sm:$0xff] %vm1630_vm4, %v1598_v2  ;;  %v1850_v44 = vpop.permute.xlu1 %1849 }
 0x242   :  { %1899 = vst.msk [vmem:[#allocation4 + $0xe0] sm:$0xff] %vm1884_vm6, %v1850_v44 }
 0x244   :  { %v1725_v53 = vpop.permute.xlu0 %1724 }
 0x245   :  { %1773 = vst.msk [vmem:[#allocation4 + $0xf0] sm:$0xff] %vm1757_vm5, %v1725_v53  ;;  %v1977_v6 = vpop.permute.xlu1 %1976  ;;  %v2480_v7 = vld [vmem:[#allocation4 + $0xc0] sm:$0xff] }
 0x246   :  { %2026 = vst.msk [vmem:[#allocation4 + $0xe0] sm:$0xff] %vm2011_vm7, %v1977_v6  ;;  %2704 = vmatmul.mubr.f32.gmra.mxu1 %v2480_v7  ;;  %v7580_v6 = vld [vmem:[%s8815_s4] ss:$0 sm:$0xff] }
 0x247   :  { %5657 = vmatprep.mubr.msk.f32.mxu1 %vm984_vm2, %v2483_v26 }
 0x248   :  { %v2356_v45 = vpop.permute.xlu0 %2355 }
 0x249   :  { %2406 = vst.msk [vmem:[#allocation4 + $0xd0] sm:$0xff] %vm2392_vm11, %v2356_v45  ;;  %v2104_v32 = vpop.permute.xlu1 %2103 }
 0x24a   :  { %2153 = vst.msk [vmem:[#allocation4 + $0xe0] sm:$0xff] %vm2138_vm8, %v2104_v32 }
 0x24c   :  { %v1852_v10 = vpop.permute.xlu0 %1851 }
 0x24d   :  { %1900 = vst.msk [vmem:[#allocation4 + $0xf0] sm:$0xff] %vm1884_vm6, %v1852_v10  ;;  %v1600_v11 = vpop.permute.xlu1 %1599 }
 0x24e   :  { %1647 = vst.msk [vmem:[#allocation4 + $0x100] sm:$0xff] %vm1630_vm4, %v1600_v11 }
 0x250   :  { %v1979_v12 = vpop.permute.xlu0 %1978  ;;  %v2482_v14 = vld [vmem:[#allocation4 + $0xd0] sm:$0xff] }
 0x251   :  { %2027 = vst.msk [vmem:[#allocation4 + $0xf0] sm:$0xff] %vm2011_vm7, %v1979_v12  ;;  %2709 = vmatmul.mubr.f32.gmra.mxu1 %v2482_v14  ;;  %v1727_v56 = vpop.permute.xlu1 %1726 }
 0x252   :  { %5658 = vmatprep.mubr.msk.f32.mxu1 %vm984_vm2, %v2485_v15  ;;  %1774 = vst.msk [vmem:[#allocation4 + $0x100] sm:$0xff] %vm1757_vm5, %v1727_v56 }
 0x254   :  { %v2106_v17 = vpop.permute.xlu0 %2105 }
 0x255   :  { %2154 = vst.msk [vmem:[#allocation4 + $0xf0] sm:$0xff] %vm2138_vm8, %v2106_v17  ;;  %v2231_v18 = vpop.permute.xlu1 %2230 }
 0x256   :  { %2280 = vst.msk [vmem:[#allocation4 + $0xe0] sm:$0xff] %vm2265_vm9, %v2231_v18 }
 0x258   :  { %v1602_v19 = vpop.permute.xlu0 %1601 }
 0x259   :  { %1648 = vst.msk [vmem:[#allocation4 + $0x110] sm:$0xff] %vm1630_vm4, %v1602_v19  ;;  %v2358_v39 = vpop.permute.xlu1 %2357  ;;  %v2495_v19 = vld [vmem:[#allocation4 + $0x138] sm:$0xff] }
 0x25a   :  { %2407 = vst.msk [vmem:[#allocation4 + $0xe0] sm:$0xff] %vm2392_vm11, %v2358_v39 }
 0x25c   :  { %v1729_v20 = vpop.permute.xlu0 %1728 }
 0x25d   :  { %1775 = vst.msk [vmem:[#allocation4 + $0x110] sm:$0xff] %vm1757_vm5, %v1729_v20  ;;  %v1854_v51 = vpop.permute.xlu1 %1853 }
 0x25e   :  { %1901 = vst.msk [vmem:[#allocation4 + $0x100] sm:$0xff] %vm1884_vm6, %v1854_v51 }
 0x25f   :  { %v2645_v57 = vpop.f32.mrf.mxu1 }
 0x260   :  { %2750 = vst.msk [vmem:[#allocation5] sm:$0xff] %vm2749_vm12, %v2645_v57  ;;  %v2233_v16 = vpop.permute.xlu0 %2232  ;;  %v2497_v57 = vld [vmem:[#allocation4 + $0x148] sm:$0xff] }
 0x261   :  { %v2647_v21 = vpop.f32.mrf.mxu1  ;;  %2281 = vst.msk [vmem:[#allocation4 + $0xf0] sm:$0xff] %vm2265_vm9, %v2233_v16  ;;  %v1981_v25 = vpop.permute.xlu1 %1980  ;;  %v2484_v23 = vld [vmem:[#allocation4 + $0xe0] sm:$0xff] }
 0x262   :  { %2028 = vst.msk [vmem:[#allocation4 + $0x100] sm:$0xff] %vm2011_vm7, %v1981_v25  ;;  %2714 = vmatmul.mubr.f32.gmra.mxu1 %v2484_v23  ;;  %v2861_v25 = vld [vmem:[%s8812_s0 + $0x310] sm:$0xff] }
 0x263   :  { %5659 = vmatprep.mubr.msk.f32.mxu1 %vm984_vm2, %v2487_v63  ;;  %v2862_v63 = vld [vmem:[%s8812_s0 + $0x318] sm:$0xff] }
 0x264   :  { %v2360_v36 = vpop.permute.xlu0 %2359 }
 0x265   :  { %2408 = vst.msk [vmem:[#allocation4 + $0xf0] sm:$0xff] %vm2392_vm11, %v2360_v36  ;;  %v2108_v48 = vpop.permute.xlu1 %2107  ;;  %v2863_v36 = vld [vmem:[%s8812_s0 + $0x320] sm:$0xff] }
 0x266   :  { %2155 = vst.msk [vmem:[#allocation4 + $0x100] sm:$0xff] %vm2138_vm8, %v2108_v48  ;;  %v2864_v48 = vld [vmem:[%s8812_s0 + $0x328] sm:$0xff] }
 0x268   :  { %v1856_v5 = vpop.permute.xlu0 %1855 }
 0x269   :  { %1902 = vst.msk [vmem:[#allocation4 + $0x110] sm:$0xff] %vm1884_vm6, %v1856_v5  ;;  %v2650_v27 = vpop.f32.mrf.mxu1  ;;  %v1604_v28 = vpop.permute.xlu1 %1603  ;;  %v2865_v5 = vld [vmem:[%s8812_s0 + $0x330] sm:$0xff] }
 0x26a   :  { %2751 = vst.msk [vmem:[#allocation5 + $0x8] sm:$0xff] %vm2749_vm12, %v2650_v27  ;;  %v2866_v27 = vld [vmem:[%s8812_s0 + $0x338] sm:$0xff] }
 0x26b   :  { %1649 = vst.msk [vmem:[#allocation4 + $0x120] sm:$0xff] %vm1630_vm4, %v1604_v28  ;;  %v2652_v33 = vpop.f32.mrf.mxu1  ;;  %v2867_v28 = vld [vmem:[%s8812_s0 + $0x340] sm:$0xff] }
 0x26c   :  { %v1983_v30 = vpop.permute.xlu0 %1982  ;;  %v2486_v35 = vld [vmem:[#allocation4 + $0xf0] sm:$0xff] }
 0x26d   :  { %2029 = vst.msk [vmem:[#allocation4 + $0x110] sm:$0xff] %vm2011_vm7, %v1983_v30  ;;  %2719 = vmatmul.mubr.f32.gmra.mxu1 %v2486_v35  ;;  %v1731_v29 = vpop.permute.xlu1 %1730  ;;  %v2868_v35 = vld [vmem:[%s8812_s0 + $0x348] sm:$0xff] }
 0x26e   :  { %5660 = vmatprep.mubr.msk.f32.mxu1 %vm984_vm2, %v2489_v37  ;;  %1776 = vst.msk [vmem:[#allocation4 + $0x120] sm:$0xff] %vm1757_vm5, %v1731_v29  ;;  %v2869_v37 = vld [vmem:[%s8812_s0 + $0x350] sm:$0xff]  ;;  %v2870_v29 = vld [vmem:[%s8812_s0 + $0x358] sm:$0xff] }
 0x270   :  { %v2110_v41 = vpop.permute.xlu0 %2109 }
 0x271   :  { %2156 = vst.msk [vmem:[#allocation4 + $0x110] sm:$0xff] %vm2138_vm8, %v2110_v41  ;;  %v2235_v42 = vpop.permute.xlu1 %2234  ;;  %v2771_v22 = vld [vmem:[#allocation5] ss:$2 sm:$0x3f] }
 0x272   :  { %2282 = vst.msk [vmem:[#allocation4 + $0x100] sm:$0xff] %vm2265_vm9, %v2235_v42  ;;  %v2773_v55 = vld [vmem:[#allocation5 + $0x1] ss:$2 sm:$0x3f] }
 0x273   :  { %v2774_v44 = vmax.f32 %v2771_v22, %v2773_v55 }
 0x274   :  { %v1606_v9 = vpop.permute.xlu0 %1605 }
 0x275   :  { %1650 = vst.msk [vmem:[#allocation4 + $0x130] sm:$0xff] %vm1630_vm4, %v1606_v9  ;;  %v2362_v43 = vpop.permute.xlu1 %2361  ;;  %v2871_v9 = vld [vmem:[%s8812_s0 + $0x360] sm:$0xff] }
 0x276   :  { %2409 = vst.msk [vmem:[#allocation4 + $0x100] sm:$0xff] %vm2392_vm11, %v2362_v43 }
 0x278   :  { %v1733_v61 = vpop.permute.xlu0 %1732 }
 0x279   :  { %1777 = vst.msk [vmem:[#allocation4 + $0x130] sm:$0xff] %vm1757_vm5, %v1733_v61  ;;  %v1858_v46 = vpop.permute.xlu1 %1857 }
 0x27a   :  { %1903 = vst.msk [vmem:[#allocation4 + $0x120] sm:$0xff] %vm1884_vm6, %v1858_v46  ;;  %v2655_v47 = vpop.f32.mrf.mxu1 }
 0x27b   :  { %2752 = vst.msk [vmem:[#allocation5 + $0x10] sm:$0xff] %vm2749_vm12, %v2655_v47 }
 0x27c   :  { %v2237_v49 = vpop.permute.xlu0 %2236  ;;  %v2657_v50 = vpop.f32.mrf.mxu1 }
 0x27d   :  { %2283 = vst.msk [vmem:[#allocation4 + $0x110] sm:$0xff] %vm2265_vm9, %v2237_v49  ;;  %v1985_v38 = vpop.permute.xlu1 %1984  ;;  %v2488_v60 = vld [vmem:[#allocation4 + $0x100] sm:$0xff]  ;;  %v2872_v50 = vld [vmem:[%s8812_s0 + $0x368] sm:$0xff] }
 0x27e   :  { %2030 = vst.msk [vmem:[#allocation4 + $0x120] sm:$0xff] %vm2011_vm7, %v1985_v38  ;;  %2724 = vmatmul.mubr.f32.gmra.mxu1 %v2488_v60  ;;  %v2873_v38 = vld [vmem:[%s8812_s0 + $0x370] sm:$0xff] }
 0x27f   :  { %5661 = vmatprep.mubr.msk.f32.mxu1 %vm984_vm2, %v2491_v52 }
 0x280   :  { %v2364_v54 = vpop.permute.xlu0 %2363 }
 0x281   :  { %2410 = vst.msk [vmem:[#allocation4 + $0x110] sm:$0xff] %vm2392_vm11, %v2364_v54  ;;  %v2112_v8 = vpop.permute.xlu1 %2111 }
 0x282   :  { %2157 = vst.msk [vmem:[#allocation4 + $0x120] sm:$0xff] %vm2138_vm8, %v2112_v8  ;;  %v2874_v8 = vld [vmem:[%s8812_s0 + $0x378] sm:$0xff] }
 0x284   :  { %v1860_v58 = vpop.permute.xlu0 %1859 }
 0x285   :  { %1904 = vst.msk [vmem:[#allocation4 + $0x130] sm:$0xff] %vm1884_vm6, %v1860_v58  ;;  %v2660_v31 = vpop.f32.mrf.mxu1  ;;  %v1608_v59 = vpop.permute.xlu1 %1607  ;;  %v2875_v58 = vld [vmem:[%s8812_s0 + $0x380] sm:$0xff] }
 0x286   :  { %2753 = vst.msk [vmem:[#allocation5 + $0x18] sm:$0xff] %vm2749_vm12, %v2660_v31 }
 0x287   :  { %1651 = vst.msk [vmem:[#allocation4 + $0x140] sm:$0xff] %vm1630_vm4, %v1608_v59  ;;  %v2662_v62 = vpop.f32.mrf.mxu1  ;;  %v2876_v59 = vld [vmem:[%s8812_s0 + $0x388] sm:$0xff] }
 0x288   :  { %v1987_v13 = vpop.permute.xlu0 %1986  ;;  %v2490_v3 = vld [vmem:[#allocation4 + $0x110] sm:$0xff]  ;;  %v2877_v62 = vld [vmem:[%s8812_s0 + $0x390] sm:$0xff] }
 0x289   :  { %2031 = vst.msk [vmem:[#allocation4 + $0x130] sm:$0xff] %vm2011_vm7, %v1987_v13  ;;  %2729 = vmatmul.mubr.f32.gmra.mxu1 %v2490_v3  ;;  %v1735_v34 = vpop.permute.xlu1 %1734  ;;  %v2878_v13 = vld [vmem:[%s8812_s0 + $0x398] sm:$0xff]  ;;  %v2879_v3 = vld [vmem:[%s8812_s0 + $0x3a0] sm:$0xff] }
 0x28a   :  { %5662 = vmatprep.mubr.msk.f32.mxu1 %vm984_vm2, %v2493_v40  ;;  %1778 = vst.msk [vmem:[#allocation4 + $0x140] sm:$0xff] %vm1757_vm5, %v1735_v34  ;;  %v2880_v40 = vld [vmem:[%s8812_s0 + $0x3a8] sm:$0xff]  ;;  %v2881_v34 = vld [vmem:[%s8812_s0 + $0x3b0] sm:$0xff] }
 0x28c   :  { %v2114_v0 = vpop.permute.xlu0 %2113 }
 0x28d   :  { %2158 = vst.msk [vmem:[#allocation4 + $0x130] sm:$0xff] %vm2138_vm8, %v2114_v0  ;;  %v2776_v4 = vld [vmem:[#allocation5 + $0xe] ss:$2 sm:$0x3f]  ;;  %v2239_v2 = vpop.permute.xlu1 %2238 }
 0x28e   :  { %v2778_v1 = vld [vmem:[#allocation5 + $0xf] ss:$2 sm:$0x3f]  ;;  %2284 = vst.msk [vmem:[#allocation4 + $0x120] sm:$0xff] %vm2265_vm9, %v2239_v2 }
 0x28f   :  { %v2779_v53 = vmax.f32 %v2776_v4, %v2778_v1  ;;  %v2882_v0 = vld [vmem:[%s8812_s0 + $0x3b8] sm:$0xff]  ;;  %v2883_v4 = vld [vmem:[%s8812_s0 + $0x3c0] sm:$0xff]  ;;  %v2884_v1 = vld [vmem:[%s8812_s0 + $0x3c8] sm:$0xff] }
 0x290   :  { %v2241_v7 = vpop.permute.xlu0 %2240  ;;  %v2885_v2 = vld [vmem:[%s8812_s0 + $0x3d0] sm:$0xff] }
 0x291   :  { %v2780_v26 = vmax.f32 %v2774_v44, %v2779_v53  ;;  %2285 = vst.msk [vmem:[#allocation4 + $0x130] sm:$0xff] %vm2265_vm9, %v2241_v7  ;;  %v2366_v45 = vpop.permute.xlu1 %2365  ;;  %v2886_v53 = vld [vmem:[%s8812_s0 + $0x3d8] sm:$0xff]  ;;  %v2887_v7 = vld [vmem:[%s8812_s0 + $0x3e0] sm:$0xff] }
 0x292   :  { %2411 = vst.msk [vmem:[#allocation4 + $0x120] sm:$0xff] %vm2392_vm11, %v2366_v45  ;;  %v2888_v45 = vld [vmem:[%s8812_s0 + $0x3e8] sm:$0xff] }
 0x293   :  { %v2787_v32 = vadd.f32 %v7580_v6, %v2780_v26 }
 0x294   :  { %v2368_v10 = vpop.permute.xlu0 %2367 }
 0x295   :  { %v2788_v11 = vmax.f32 %v2787_v32, 0.0  ;;  %2412 = vst.msk [vmem:[#allocation4 + $0x130] sm:$0xff] %vm2392_vm11, %v2368_v10  ;;  %v1862_v12 = vpop.permute.xlu1 %1861  ;;  %v2889_v32 = vld [vmem:[%s8812_s0 + $0x3f0] sm:$0xff]  ;;  %v2890_v10 = vld [vmem:[%s8812_s0 + $0x3f8] sm:$0xff] }
 0x296   :  { %1905 = vst.msk [vmem:[#allocation4 + $0x140] sm:$0xff] %vm1884_vm6, %v1862_v12  ;;  %v2665_v14 = vpop.f32.mrf.mxu1  ;;  %v2892_v12 = vld [vmem:[%s8812_s0 + $0x408] sm:$0xff] }
 0x297   :  { %2790 = vst.msk [vmem:[%s8816_s5] sm:$0x3f] %vm2789_vm13, %v2788_v11  ;;  %v2891_v11 = vld [vmem:[%s8812_s0 + $0x400] sm:$0xff] }
 0x298   :  { %2754 = vst.msk [vmem:[#allocation5 + $0x20] sm:$0xff] %vm2749_vm12, %v2665_v14  ;;  %v2116_v15 = vpop.permute.xlu0 %2115  ;;  %v2667_v56 = vpop.f32.mrf.mxu1  ;;  %v2893_v14 = vld [vmem:[%s8812_s0 + $0x410] sm:$0xff] }
 0x299   :  { %v1989_v17 = vpop.permute.xlu1 %1988  ;;  %v2492_v18 = vld [vmem:[#allocation4 + $0x120] sm:$0xff]  ;;  %v2895_v56 = vld [vmem:[%s8812_s0 + $0x420] sm:$0xff] }
 0x29a   :  { %2032 = vst.msk [vmem:[#allocation4 + $0x140] sm:$0xff] %vm2011_vm7, %v1989_v17  ;;  %2734 = vmatmul.mubr.f32.gmra.mxu1 %v2492_v18 }
 0x29b   :  { %2159 = vst.msk [vmem:[#allocation4 + $0x140] sm:$0xff] %vm2138_vm8, %v2116_v15  ;;  %5663 = vmatprep.mubr.msk.f32.mxu1 %vm984_vm2, %v2495_v19  ;;  %v2894_v15 = vld [vmem:[%s8812_s0 + $0x418] sm:$0xff]  ;;  %v2896_v19 = vld [vmem:[%s8812_s0 + $0x428] sm:$0xff] }
 0x29c   :  { %v2494_v39 = vld [vmem:[#allocation4 + $0x130] sm:$0xff]  ;;  %v2370_v20 = vpop.permute.xlu0 %2369 }
 0x29d   :  { %v2243_v51 = vpop.permute.xlu1 %2242 }
 0x29e   :  { %2286 = vst.msk [vmem:[#allocation4 + $0x140] sm:$0xff] %vm2265_vm9, %v2243_v51  ;;  %2739 = vmatmul.mubr.f32.gmra.mxu1 %v2494_v39  ;;  %v2897_v39 = vld [vmem:[%s8812_s0 + $0x430] sm:$0xff] }
 0x29f   :  { %2413 = vst.msk [vmem:[#allocation4 + $0x140] sm:$0xff] %vm2392_vm11, %v2370_v20  ;;  %5664 = vmatprep.mubr.msk.f32.mxu1 %vm984_vm2, %v2497_v57  ;;  %v2792_v41 = vld [vmem:[#allocation5 + $0x1c] ss:$2 sm:$0x3f]  ;;  %v2898_v20 = vld [vmem:[%s8812_s0 + $0x438] sm:$0xff] }
 0x2a0   :  { %v2794_v42 = vld [vmem:[#allocation5 + $0x1d] ss:$2 sm:$0x3f] }
 0x2a1   :  { %v2670_v16 = vpop.f32.mrf.mxu1  ;;  %v2795_v46 = vmax.f32 %v2792_v41, %v2794_v42  ;;  %v2905_v41 = vld [vmem:[%s8812_s0 + $0x470] sm:$0xff]  ;;  %v2906_v42 = vld [vmem:[%s8812_s0 + $0x478] sm:$0xff] }
 0x2a2   :  { %2755 = vst.msk [vmem:[#allocation5 + $0x28] sm:$0xff] %vm2749_vm12, %v2670_v16  ;;  %v2899_v16 = vld [vmem:[%s8812_s0 + $0x440] sm:$0xff] }
 0x2a3   :  { %v2672_v21 = vpop.f32.mrf.mxu1 }
 0x2a6   :  { %v2496_v23 = vld [vmem:[#allocation4 + $0x140] sm:$0xff] }
 0x2a7   :  { %2744 = vmatmul.mubr.f32.gmra.mxu1 %v2496_v23 }
 0x2a8   :  { %6189 = vmatprep.mubr.msk.f32.mxu1 %vm130_vm1, %v2861_v25 }
 0x2ab   :  { %6190 = vmatmul.mubr.msk.f32.vlgmr.msra.gmra.mxu1 %vm130_vm1, %v2862_v63 }
 0x2ac   :  { %6192 = vmatprep.mubr.msk.f32.mxu1 %vm130_vm1, %v2863_v36 }
 0x2af   :  { %6193 = vmatmul.mubr.msk.f32.gmra.mxu1 %vm130_vm1, %v2864_v48  ;;  %v2900_v48 = vld [vmem:[%s8812_s0 + $0x448] sm:$0xff] }
 0x2b0   :  { %6195 = vmatprep.mubr.msk.f32.mxu1 %vm130_vm1, %v2865_v5  ;;  %v2901_v5 = vld [vmem:[%s8812_s0 + $0x450] sm:$0xff] }
 0x2b2   :  { %v2675_v33 = vpop.f32.mrf.mxu1 }
 0x2b3   :  { %2756 = vst.msk [vmem:[#allocation5 + $0x30] sm:$0xff] %vm2749_vm12, %v2675_v33  ;;  %6196 = vmatmul.mubr.msk.f32.gmra.mxu1 %vm130_vm1, %v2866_v27 }
 0x2b4   :  { %v2677_v30 = vpop.f32.mrf.mxu1  ;;  %6198 = vmatprep.mubr.msk.f32.mxu1 %vm130_vm1, %v2867_v28 }
 0x2b5   :  { %v2902_v30 = vld [vmem:[%s8812_s0 + $0x458] sm:$0xff] }
 0x2b7   :  { %6199 = vmatmul.mubr.msk.f32.gmra.mxu1 %vm130_vm1, %v2868_v35  ;;  %v2903_v35 = vld [vmem:[%s8812_s0 + $0x460] sm:$0xff] }
 0x2b8   :  { %6201 = vmatprep.mubr.msk.f32.mxu1 %vm130_vm1, %v2869_v37 }
 0x2ba   :  { %v2797_v43 = vld [vmem:[#allocation5 + $0x2a] ss:$2 sm:$0x3f]  ;;  %v2799_v61 = vld [vmem:[#allocation5 + $0x2b] ss:$2 sm:$0x3f] }
 0x2bb   :  { %6202 = vmatmul.mubr.msk.f32.gmra.mxu1 %vm130_vm1, %v2870_v29  ;;  %v2800_v47 = vmax.f32 %v2797_v43, %v2799_v61  ;;  %v2904_v29 = vld [vmem:[%s8812_s0 + $0x468] sm:$0xff]  ;;  %v2909_v61 = vld [vmem:[%s8812_s0 + $0x490] sm:$0xff] }
 0x2bc   :  { %6204 = vmatprep.mubr.msk.f32.mxu1 %vm130_vm1, %v2871_v9  ;;  %v2907_v9 = vld [vmem:[%s8812_s0 + $0x480] sm:$0xff]  ;;  %v2908_v43 = vld [vmem:[%s8812_s0 + $0x488] sm:$0xff] }
 0x2bd   :  { %v2680_v49 = vpop.f32.mrf.mxu1  ;;  %v2801_v60 = vmax.f32 %v2795_v46, %v2800_v47 }
 0x2be   :  { %2757 = vst.msk [vmem:[#allocation5 + $0x38] sm:$0xff] %vm2749_vm12, %v2680_v49  ;;  %v2910_v49 = vld [vmem:[%s8812_s0 + $0x498] sm:$0xff] }
 0x2bf   :  { %v2682_v52 = vpop.f32.mrf.mxu1  ;;  %6205 = vmatmul.mubr.msk.f32.gmra.mxu1 %vm130_vm1, %v2872_v50  ;;  %v2802_v54 = vadd.f32 %v7580_v6, %v2801_v60  ;;  %v2911_v50 = vld [vmem:[%s8812_s0 + $0x4a0] sm:$0xff]  ;;  %v2913_v60 = vld [vmem:[%s8812_s0 + $0x4b0] sm:$0xff] }
 0x2c0   :  { %6207 = vmatprep.mubr.msk.f32.mxu1 %vm130_vm1, %v2873_v38  ;;  %v2912_v38 = vld [vmem:[%s8812_s0 + $0x4a8] sm:$0xff] }
 0x2c1   :  { %v2803_v31 = vmax.f32 %v2802_v54, 0.0  ;;  %v2914_v54 = vld [vmem:[%s8812_s0 + $0x4b8] sm:$0xff] }
 0x2c3   :  { %6208 = vmatmul.mubr.msk.f32.gmra.mxu1 %vm130_vm1, %v2874_v8  ;;  %2804 = vst.msk [vmem:[%s8816_s5 + $0x6] sm:$0x3f] %vm2789_vm13, %v2803_v31  ;;  %v2915_v8 = vld [vmem:[%s8812_s0 + $0x4c0] sm:$0xff]  ;;  %v2916_v31 = vld [vmem:[%s8812_s0 + $0x4c8] sm:$0xff] }
 0x2c4   :  { %6210 = vmatprep.mubr.msk.f32.mxu1 %vm130_vm1, %v2875_v58 }
 0x2c7   :  { %6211 = vmatmul.mubr.msk.f32.gmra.mxu1 %vm130_vm1, %v2876_v59  ;;  %v2917_v59 = vld [vmem:[%s8812_s0 + $0x4d0] sm:$0xff] }
 0x2c8   :  { %6213 = vmatprep.mubr.msk.f32.mxu1 %vm130_vm1, %v2877_v62 }
 0x2cb   :  { %6214 = vmatmul.mubr.msk.f32.gmra.mxu1 %vm130_vm1, %v2878_v13 }
 0x2cc   :  { %6216 = vmatprep.mubr.msk.f32.mxu1 %vm130_vm1, %v2879_v3  ;;  %v2918_v3 = vld [vmem:[%s8812_s0 + $0x4d8] sm:$0xff] }
 0x2ce   :  { %v2685_v22 = vpop.f32.mrf.mxu1 }
 0x2cf   :  { %2758 = vst.msk [vmem:[#allocation5 + $0x40] sm:$0xff] %vm2749_vm12, %v2685_v22  ;;  %6217 = vmatmul.mubr.msk.f32.gmra.mxu1 %vm130_vm1, %v2880_v40 }
 0x2d0   :  { %v2687_v55 = vpop.f32.mrf.mxu1  ;;  %6219 = vmatprep.mubr.msk.f32.mxu1 %vm130_vm1, %v2881_v34  ;;  %v2919_v34 = vld [vmem:[%s8812_s0 + $0x4e0] sm:$0xff] }
 0x2d3   :  { %6220 = vmatmul.mubr.msk.f32.gmra.mxu1 %vm130_vm1, %v2882_v0 }
 0x2d4   :  { %6222 = vmatprep.mubr.msk.f32.mxu1 %vm130_vm1, %v2883_v4  ;;  %v2920_v4 = vld [vmem:[%s8812_s0 + $0x4e8] sm:$0xff] }
 0x2d6   :  { %v2806_v51 = vld [vmem:[#allocation5 + $0x38] ss:$2 sm:$0x3f]  ;;  %v2808_v57 = vld [vmem:[#allocation5 + $0x39] ss:$2 sm:$0x3f] }
 0x2d7   :  { %6223 = vmatmul.mubr.msk.f32.gmra.mxu1 %vm130_vm1, %v2884_v1  ;;  %v2809_v23 = vmax.f32 %v2806_v51, %v2808_v57  ;;  %v2933_v51 = vld [vmem:[%s8812_s0 + $0x550] sm:$0xff]  ;;  %v2934_v57 = vld [vmem:[%s8812_s0 + $0x558] sm:$0xff] }
 0x2d8   :  { %6225 = vmatprep.mubr.msk.f32.mxu1 %vm130_vm1, %v2885_v2  ;;  %v2921_v2 = vld [vmem:[%s8812_s0 + $0x4f0] sm:$0xff] }
 0x2d9   :  { %v2690_v44 = vpop.f32.mrf.mxu1 }
 0x2da   :  { %2759 = vst.msk [vmem:[#allocation5 + $0x48] sm:$0xff] %vm2749_vm12, %v2690_v44 }
 0x2db   :  { %v2692_v26 = vpop.f32.mrf.mxu1  ;;  %6226 = vmatmul.mubr.msk.f32.gmra.mxu1 %vm130_vm1, %v2886_v53  ;;  %v2922_v53 = vld [vmem:[%s8812_s0 + $0x4f8] sm:$0xff] }
 0x2dc   :  { %6228 = vmatprep.mubr.msk.f32.mxu1 %vm130_vm1, %v2887_v7  ;;  %v2923_v26 = vld [vmem:[%s8812_s0 + $0x500] sm:$0xff] }
 0x2df   :  { %6229 = vmatmul.mubr.msk.f32.gmra.mxu1 %vm130_vm1, %v2888_v45 }
 0x2e0   :  { %6231 = vmatprep.mubr.msk.f32.mxu1 %vm130_vm1, %v2889_v32 }
 0x2e3   :  { %6232 = vmatmul.mubr.msk.f32.gmra.mxu1 %vm130_vm1, %v2890_v10  ;;  %v2924_v10 = vld [vmem:[%s8812_s0 + $0x508] sm:$0xff] }
 0x2e4   :  { %6234 = vmatprep.mubr.msk.f32.mxu1 %vm130_vm1, %v2891_v11  ;;  %v2925_v11 = vld [vmem:[%s8812_s0 + $0x510] sm:$0xff] }
 0x2e7   :  { %6235 = vmatmul.mubr.msk.f32.gmra.mxu1 %vm130_vm1, %v2892_v12  ;;  %v2926_v12 = vld [vmem:[%s8812_s0 + $0x518] sm:$0xff] }
 0x2e8   :  { %6237 = vmatprep.mubr.msk.f32.mxu1 %vm130_vm1, %v2893_v14  ;;  %v2927_v14 = vld [vmem:[%s8812_s0 + $0x520] sm:$0xff] }
 0x2ea   :  { %v2695_v17 = vpop.f32.mrf.mxu1 }
 0x2eb   :  { %2760 = vst.msk [vmem:[#allocation5 + $0x50] sm:$0xff] %vm2749_vm12, %v2695_v17  ;;  %6238 = vmatmul.mubr.msk.f32.gmra.mxu1 %vm130_vm1, %v2894_v15  ;;  %v2929_v17 = vld [vmem:[%s8812_s0 + $0x530] sm:$0xff] }
 0x2ec   :  { %v2697_v18 = vpop.f32.mrf.mxu1  ;;  %6240 = vmatprep.mubr.msk.f32.mxu1 %vm130_vm1, %v2895_v56  ;;  %v2928_v56 = vld [vmem:[%s8812_s0 + $0x528] sm:$0xff] }
 0x2ef   :  { %6241 = vmatmul.mubr.msk.f32.gmra.mxu1 %vm130_vm1, %v2896_v19  ;;  %v2930_v19 = vld [vmem:[%s8812_s0 + $0x538] sm:$0xff] }
 0x2f0   :  { %6243 = vmatprep.mubr.msk.f32.mxu1 %vm130_vm1, %v2897_v39  ;;  %v2931_v39 = vld [vmem:[%s8812_s0 + $0x540] sm:$0xff] }
 0x2f2   :  { %v2811_v21 = vld [vmem:[#allocation5 + $0x46] ss:$2 sm:$0x3f]  ;;  %v2813_v25 = vld [vmem:[#allocation5 + $0x47] ss:$2 sm:$0x3f] }
 0x2f3   :  { %6244 = vmatmul.mubr.msk.f32.gmra.mxu1 %vm130_vm1, %v2898_v20  ;;  %v2814_v63 = vmax.f32 %v2811_v21, %v2813_v25  ;;  %v2932_v20 = vld [vmem:[%s8812_s0 + $0x548] sm:$0xff]  ;;  %v2937_v25 = vld [vmem:[%s8812_s0 + $0x570] sm:$0xff] }
 0x2f4   :  { %6246 = vmatprep.mubr.msk.f32.mxu1 %vm130_vm1, %v2899_v16  ;;  %v2935_v16 = vld [vmem:[%s8812_s0 + $0x560] sm:$0xff]  ;;  %v2936_v21 = vld [vmem:[%s8812_s0 + $0x568] sm:$0xff] }
 0x2f5   :  { %v2700_v36 = vpop.f32.mrf.mxu1  ;;  %v2815_v27 = vmax.f32 %v2809_v23, %v2814_v63 }
 0x2f6   :  { %2761 = vst.msk [vmem:[#allocation5 + $0x58] sm:$0xff] %vm2749_vm12, %v2700_v36  ;;  %v2938_v36 = vld [vmem:[%s8812_s0 + $0x578] sm:$0xff] }
 0x2f7   :  { %v2702_v28 = vpop.f32.mrf.mxu1  ;;  %6247 = vmatmul.mubr.msk.f32.gmra.mxu1 %vm130_vm1, %v2900_v48  ;;  %v2816_v33 = vadd.f32 %v7580_v6, %v2815_v27  ;;  %v2939_v48 = vld [vmem:[%s8812_s0 + $0x580] sm:$0xff]  ;;  %v2941_v27 = vld [vmem:[%s8812_s0 + $0x590] sm:$0xff] }
 0x2f8   :  { %6249 = vmatprep.mubr.msk.f32.mxu1 %vm130_vm1, %v2901_v5  ;;  %v2940_v5 = vld [vmem:[%s8812_s0 + $0x588] sm:$0xff] }
 0x2f9   :  { %v2817_v37 = vmax.f32 %v2816_v33, 0.0  ;;  %v2942_v33 = vld [vmem:[%s8812_s0 + $0x598] sm:$0xff] }
 0x2fb   :  { %6250 = vmatmul.mubr.msk.f32.gmra.mxu1 %vm130_vm1, %v2902_v30  ;;  %2818 = vst.msk [vmem:[%s8816_s5 + $0xc] sm:$0x3f] %vm2789_vm13, %v2817_v37  ;;  %v2943_v30 = vld [vmem:[%s8812_s0 + $0x5a0] sm:$0xff]  ;;  %v2944_v37 = vld [vmem:[%s8812_s0 + $0x5a8] sm:$0xff] }
 0x2fc   :  { %6252 = vmatprep.mubr.msk.f32.mxu1 %vm130_vm1, %v2903_v35 }
 0x2fd   :  { %v2820_v62 = vld [vmem:[#allocation5 + $0x54] ss:$2 sm:$0x3f]  ;;  %v2822_v13 = vld [vmem:[#allocation5 + $0x55] ss:$2 sm:$0x3f] }
 0x2fe   :  { %v2823_v55 = vmax.f32 %v2820_v62, %v2822_v13  ;;  %v2952_v62 = vld [vmem:[%s8812_s0 + $0x5e8] sm:$0xff]  ;;  %v2953_v13 = vld [vmem:[%s8812_s0 + $0x5f0] sm:$0xff] }
 0x2ff   :  { %6253 = vmatmul.mubr.msk.f32.gmra.mxu1 %vm130_vm1, %v2904_v29  ;;  %v2945_v29 = vld [vmem:[%s8812_s0 + $0x5b0] sm:$0xff] }
 0x300   :  { %6255 = vmatprep.mubr.msk.f32.mxu1 %vm130_vm1, %v2905_v41 }
 0x303   :  { %6256 = vmatmul.mubr.msk.f32.gmra.mxu1 %vm130_vm1, %v2906_v42 }
 0x304   :  { %6258 = vmatprep.mubr.msk.f32.mxu1 %vm130_vm1, %v2907_v9  ;;  %v2946_v9 = vld [vmem:[%s8812_s0 + $0x5b8] sm:$0xff] }
 0x306   :  { %v2705_v46 = vpop.f32.mrf.mxu1 }
 0x307   :  { %2762 = vst.msk [vmem:[#allocation5 + $0x60] sm:$0xff] %vm2749_vm12, %v2705_v46  ;;  %6259 = vmatmul.mubr.msk.f32.gmra.mxu1 %vm130_vm1, %v2908_v43  ;;  %v2947_v46 = vld [vmem:[%s8812_s0 + $0x5c0] sm:$0xff] }
 0x308   :  { %v2707_v47 = vpop.f32.mrf.mxu1  ;;  %6261 = vmatprep.mubr.msk.f32.mxu1 %vm130_vm1, %v2909_v61 }
 0x30b   :  { %6262 = vmatmul.mubr.msk.f32.gmra.mxu1 %vm130_vm1, %v2910_v49 }
 0x30c   :  { %6264 = vmatprep.mubr.msk.f32.mxu1 %vm130_vm1, %v2911_v50 }
 0x30f   :  { %6265 = vmatmul.mubr.msk.f32.gmra.mxu1 %vm130_vm1, %v2912_v38  ;;  %v2948_v38 = vld [vmem:[%s8812_s0 + $0x5c8] sm:$0xff] }
 0x310   :  { %6267 = vmatprep.mubr.msk.f32.mxu1 %vm130_vm1, %v2913_v60  ;;  %v2949_v60 = vld [vmem:[%s8812_s0 + $0x5d0] sm:$0xff] }
 0x311   :  { %v2710_v52 = vpop.f32.mrf.mxu1 }
 0x312   :  { %2763 = vst.msk [vmem:[#allocation5 + $0x68] sm:$0xff] %vm2749_vm12, %v2710_v52 }
 0x313   :  { %v2712_v58 = vpop.f32.mrf.mxu1  ;;  %6268 = vmatmul.mubr.msk.f32.gmra.mxu1 %vm130_vm1, %v2914_v54 }
 0x314   :  { %6270 = vmatprep.mubr.msk.f32.mxu1 %vm130_vm1, %v2915_v8  ;;  %v2950_v8 = vld [vmem:[%s8812_s0 + $0x5d8] sm:$0xff]  ;;  %v2951_v58 = vld [vmem:[%s8812_s0 + $0x5e0] sm:$0xff] }
 0x317   :  { %6271 = vmatmul.mubr.msk.f32.gmra.mxu1 %vm130_vm1, %v2916_v31 }
 0x318   :  { %6273 = vmatprep.mubr.msk.f32.mxu1 %vm130_vm1, %v2917_v59 }
 0x319   :  { %v2825_v40 = vld [vmem:[#allocation5 + $0x62] ss:$2 sm:$0x3f]  ;;  %v2827_v22 = vld [vmem:[#allocation5 + $0x63] ss:$2 sm:$0x3f] }
 0x31a   :  { %v2828_v0 = vmax.f32 %v2825_v40, %v2827_v22  ;;  %v2955_v22 = vld [vmem:[%s8812_s0 + $0x600] sm:$0xff] }
 0x31b   :  { %6274 = vmatmul.mubr.msk.f32.gmra.mxu1 %vm130_vm1, %v2918_v3 }
 0x31c   :  { %6276 = vmatprep.mubr.msk.f32.mxu1 %vm130_vm1, %v2919_v34  ;;  %v2829_v1 = vmax.f32 %v2823_v55, %v2828_v0  ;;  %v2954_v34 = vld [vmem:[%s8812_s0 + $0x5f8] sm:$0xff]  ;;  %v2956_v55 = vld [vmem:[%s8812_s0 + $0x608] sm:$0xff]  ;;  %v2957_v0 = vld [vmem:[%s8812_s0 + $0x610] sm:$0xff] }
 0x31e   :  { %v2830_v44 = vadd.f32 %v7580_v6, %v2829_v1  ;;  %v2958_v1 = vld [vmem:[%s8812_s0 + $0x618] sm:$0xff] }
 0x31f   :  { %6277 = vmatmul.mubr.msk.f32.gmra.mxu1 %vm130_vm1, %v2920_v4 }
 0x320   :  { %6279 = vmatprep.mubr.msk.f32.mxu1 %vm130_vm1, %v2921_v2  ;;  %v2831_v7 = vmax.f32 %v2830_v44, 0.0 }
 0x322   :  { %v2715_v45 = vpop.f32.mrf.mxu1  ;;  %2832 = vst.msk [vmem:[%s8816_s5 + $0x12] sm:$0x3f] %vm2789_vm13, %v2831_v7 }
 0x323   :  { %2764 = vst.msk [vmem:[#allocation5 + $0x70] sm:$0xff] %vm2749_vm12, %v2715_v45  ;;  %6280 = vmatmul.mubr.msk.f32.gmra.mxu1 %vm130_vm1, %v2922_v53 }
 0x324   :  { %v2717_v32 = vpop.f32.mrf.mxu1  ;;  %6282 = vmatprep.mubr.msk.f32.mxu1 %vm130_vm1, %v2923_v26 }
 0x327   :  { %6283 = vmatmul.mubr.msk.f32.gmra.mxu1 %vm130_vm1, %v2924_v10 }
 0x328   :  { %6285 = vmatprep.mubr.msk.f32.mxu1 %vm130_vm1, %v2925_v11 }
 0x32b   :  { %6286 = vmatmul.mubr.msk.f32.gmra.mxu1 %vm130_vm1, %v2926_v12 }
 0x32c   :  { %6288 = vmatprep.mubr.msk.f32.mxu1 %vm130_vm1, %v2927_v14 }
 0x32d   :  { %v2720_v15 = vpop.f32.mrf.mxu1 }
 0x32e   :  { %2765 = vst.msk [vmem:[#allocation5 + $0x78] sm:$0xff] %vm2749_vm12, %v2720_v15 }
 0x32f   :  { %v2722_v18 = vpop.f32.mrf.mxu1  ;;  %6289 = vmatmul.mubr.msk.f32.gmra.mxu1 %vm130_vm1, %v2928_v56 }
 0x330   :  { %6291 = vmatprep.mubr.msk.f32.mxu1 %vm130_vm1, %v2929_v17 }
 0x333   :  { %6292 = vmatmul.mubr.msk.f32.gmra.mxu1 %vm130_vm1, %v2930_v19 }
 0x334   :  { %6294 = vmatprep.mubr.msk.f32.mxu1 %vm130_vm1, %v2931_v39 }
 0x335   :  { %v2834_v41 = vld [vmem:[#allocation5 + $0x70] ss:$2 sm:$0x3f]  ;;  %v2836_v42 = vld [vmem:[#allocation5 + $0x71] ss:$2 sm:$0x3f] }
 0x336   :  { %v2837_v47 = vmax.f32 %v2834_v41, %v2836_v42 }
 0x337   :  { %6295 = vmatmul.mubr.msk.f32.gmra.mxu1 %vm130_vm1, %v2932_v20 }
 0x338   :  { %6297 = vmatprep.mubr.msk.f32.mxu1 %vm130_vm1, %v2933_v51 }
 0x33b   :  { %6298 = vmatmul.mubr.msk.f32.gmra.mxu1 %vm130_vm1, %v2934_v57 }
 0x33c   :  { %6300 = vmatprep.mubr.msk.f32.mxu1 %vm130_vm1, %v2935_v16 }
 0x33e   :  { %v2725_v23 = vpop.f32.mrf.mxu1 }
 0x33f   :  { %2766 = vst.msk [vmem:[#allocation5 + $0x80] sm:$0xff] %vm2749_vm12, %v2725_v23  ;;  %6301 = vmatmul.mubr.msk.f32.gmra.mxu1 %vm130_vm1, %v2936_v21 }
 0x340   :  { %v2727_v63 = vpop.f32.mrf.mxu1  ;;  %6303 = vmatprep.mubr.msk.f32.mxu1 %vm130_vm1, %v2937_v25 }
 0x343   :  { %6304 = vmatmul.mubr.msk.f32.gmra.mxu1 %vm130_vm1, %v2938_v36 }
 0x344   :  { %6306 = vmatprep.mubr.msk.f32.mxu1 %vm130_vm1, %v2939_v48 }
 0x347   :  { %6307 = vmatmul.mubr.msk.f32.gmra.mxu1 %vm130_vm1, %v2940_v5 }
 0x348   :  { %6309 = vmatprep.mubr.msk.f32.mxu1 %vm130_vm1, %v2941_v27 }
 0x349   :  { %v2730_v28 = vpop.f32.mrf.mxu1 }
 0x34a   :  { %2767 = vst.msk [vmem:[#allocation5 + $0x88] sm:$0xff] %vm2749_vm12, %v2730_v28 }
 0x34b   :  { %v2732_v35 = vpop.f32.mrf.mxu1  ;;  %6310 = vmatmul.mubr.msk.f32.gmra.mxu1 %vm130_vm1, %v2942_v33 }
 0x34c   :  { %6312 = vmatprep.mubr.msk.f32.mxu1 %vm130_vm1, %v2943_v30 }
 0x34f   :  { %6313 = vmatmul.mubr.msk.f32.gmra.mxu1 %vm130_vm1, %v2944_v37  ;;  %v8045_v37 = vld [vmem:[%s8813_s2] ss:$0 sm:$0xff] }
 0x350   :  { %6315 = vmatprep.mubr.msk.f32.mxu1 %vm130_vm1, %v2945_v29 }
 0x351   :  { %v2839_v43 = vld [vmem:[#allocation5 + $0x7e] ss:$2 sm:$0x3f]  ;;  %v2841_v61 = vld [vmem:[#allocation5 + $0x7f] ss:$2 sm:$0x3f] }
 0x352   :  { %v2842_v49 = vmax.f32 %v2839_v43, %v2841_v61 }
 0x353   :  { %6316 = vmatmul.mubr.msk.f32.gmra.mxu1 %vm130_vm1, %v2946_v9 }
 0x354   :  { %v2843_v50 = vmax.f32 %v2837_v47, %v2842_v49  ;;  %6318 = vmatprep.mubr.msk.f32.mxu1 %vm130_vm1, %v2947_v46 }
 0x356   :  { %v2844_v52 = vadd.f32 %v7580_v6, %v2843_v50  ;;  %v5223_v50 = vld [vmem:[%s8814_s3 + $0x78] sm:$0xff] }
 0x357   :  { %6319 = vmatmul.mubr.msk.f32.gmra.mxu1 %vm130_vm1, %v2948_v38  ;;  %5290 = vmatpush1.msra.mxu0 %v5223_v50 }
 0x358   :  { %v2845_v54 = vmax.f32 %v2844_v52, 0.0  ;;  %6321 = vmatprep.mubr.msk.f32.mxu1 %vm130_vm1, %v2949_v60  ;;  %5291 = vmatprep.subr.mxu0 %v6348_v24 }
 0x35a   :  { %2846 = vst.msk [vmem:[%s8816_s5 + $0x18] sm:$0x3f] %vm2789_vm13, %v2845_v54  ;;  %v2735_v31 = vpop.f32.mrf.mxu1 }
 0x35b   :  { %2768 = vst.msk [vmem:[#allocation5 + $0x90] sm:$0xff] %vm2749_vm12, %v2735_v31  ;;  %6322 = vmatmul.mubr.msk.f32.gmra.mxu1 %vm130_vm1, %v2950_v8  ;;  %v5222_v31 = vld [vmem:[%s8814_s3 + $0x70] sm:$0xff] }
 0x35c   :  { %v2737_v59 = vpop.f32.mrf.mxu1  ;;  %6324 = vmatprep.mubr.msk.f32.mxu1 %vm130_vm1, %v2951_v58  ;;  %5292 = vmatpush1.msra.mxu0 %v5222_v31  ;;  %v5211_v31 = vld [vmem:[%s8814_s3 + $0x18] sm:$0xff] }
 0x35d   :  { %v5221_v59 = vld [vmem:[%s8814_s3 + $0x68] sm:$0xff]  ;;  %5293 = vmatprep.subr.mxu0 %v6348_v24 }
 0x35e   :  { %v2740_v3 = vpop.f32.mrf.mxu1  ;;  %5294 = vmatpush1.msra.mxu0 %v5221_v59 }
 0x35f   :  { %2769 = vst.msk [vmem:[#allocation5 + $0x98] sm:$0xff] %vm2749_vm12, %v2740_v3  ;;  %6325 = vmatmul.mubr.msk.f32.gmra.mxu1 %vm130_vm1, %v2952_v62  ;;  %5295 = vmatprep.subr.mxu0 %v6348_v24 }
 0x360   :  { %v2742_v40 = vpop.f32.mrf.mxu1  ;;  %6327 = vmatprep.mubr.msk.f32.mxu1 %vm130_vm1, %v2953_v13 }
 0x362   :  { %v2848_v7 = vld [vmem:[#allocation5 + $0x8c] ss:$2 sm:$0x3f]  ;;  %v2850_v26 = vld [vmem:[#allocation5 + $0x8d] ss:$2 sm:$0x3f] }
 0x363   :  { %6328 = vmatmul.mubr.msk.f32.gmra.mxu1 %vm130_vm1, %v2954_v34  ;;  %v2851_v11 = vmax.f32 %v2848_v7, %v2850_v26 }
 0x364   :  { %6330 = vmatprep.mubr.msk.f32.mxu1 %vm130_vm1, %v2955_v22 }
 0x367   :  { %v2745_v4 = vpop.f32.mrf.mxu1  ;;  %6331 = vmatmul.mubr.msk.f32.gmra.mxu1 %vm130_vm1, %v2956_v55 }
 0x368   :  { %2770 = vst.msk [vmem:[#allocation5 + $0xa0] sm:$0xff] %vm2749_vm12, %v2745_v4  ;;  %6333 = vmatprep.mubr.msk.f32.mxu1 %vm130_vm1, %v2957_v0 }
 0x369   :  { %v2747_v2 = vpop.f32.mrf.mxu1 }
 0x36b   :  { %v6191_v44 = vpop.f32.mrf.mxu1  ;;  %6334 = vmatmul.mubr.msk.f32.gmra.mxu1 %vm130_vm1, %v2958_v1 }
 0x36c   :  { %3822 = vst.msk [vmem:[#allocation2 + $0x8] sm:$0xff] %vm984_vm2, %v6191_v44  ;;  %v5220_v44 = vld [vmem:[%s8814_s3 + $0x60] sm:$0xff] }
 0x36d   :  { %v3332_v53 = vpop.f32.mrf.mxu1  ;;  %5296 = vmatpush1.msra.mxu0 %v5220_v44 }
 0x36e   :  { %3821 = vst.msk [vmem:[#allocation2] sm:$0xff] %vm984_vm2, %v3332_v53  ;;  %5297 = vmatprep.subr.mxu0 %v6348_v24 }
 0x36f   :  { %v6194_v45 = vpop.f32.mrf.mxu1  ;;  %v2853_v32 = vld [vmem:[#allocation5 + $0x9a] ss:$2 sm:$0x3f]  ;;  %v2855_v10 = vld [vmem:[#allocation5 + $0x9b] ss:$2 sm:$0x3f] }
 0x370   :  { %3824 = vst.msk [vmem:[#allocation2 + $0x18] sm:$0xff] %vm984_vm2, %v6194_v45  ;;  %v2856_v12 = vmax.f32 %v2853_v32, %v2855_v10 }
 0x371   :  { %v3342_v14 = vpop.f32.mrf.mxu1 }
 0x372   :  { %3823 = vst.msk [vmem:[#allocation2 + $0x10] sm:$0xff] %vm984_vm2, %v3342_v14  ;;  %v2857_v15 = vmax.f32 %v2851_v11, %v2856_v12  ;;  %v5219_v14 = vld [vmem:[%s8814_s3 + $0x58] sm:$0xff] }
 0x373   :  { %v6197_v56 = vpop.f32.mrf.mxu1  ;;  %5298 = vmatpush1.msra.mxu0 %v5219_v14 }
 0x374   :  { %3826 = vst.msk [vmem:[#allocation2 + $0x28] sm:$0xff] %vm984_vm2, %v6197_v56  ;;  %v2858_v17 = vadd.f32 %v7580_v6, %v2857_v15  ;;  %v5218_v15 = vld [vmem:[%s8814_s3 + $0x50] sm:$0xff]  ;;  %5299 = vmatprep.subr.mxu0 %v6348_v24 }
 0x375   :  { %v3352_v18 = vpop.f32.mrf.mxu1  ;;  %v3919_v51 = vld [vmem:[#allocation2] ss:$2 sm:$0xff]  ;;  %v3921_v57 = vld [vmem:[#allocation2 + $0x1] ss:$2 sm:$0xff]  ;;  %5300 = vmatpush1.msra.mxu0 %v5218_v15 }
 0x376   :  { %3825 = vst.msk [vmem:[#allocation2 + $0x20] sm:$0xff] %vm984_vm2, %v3352_v18  ;;  %v2859_v19 = vmax.f32 %v2858_v17, 0.0  ;;  %v3923_v23 = vmax.f32 %v3919_v51, %v3921_v57  ;;  %5301 = vmatprep.subr.mxu0 %v6348_v24  ;;  %v5216_v57 = vld [vmem:[%s8814_s3 + $0x40] sm:$0xff] }
 0x377   :  { %v6200_v39 = vpop.f32.mrf.mxu1 }
 0x378   :  { %3828 = vst.msk [vmem:[#allocation2 + $0x38] sm:$0xff] %vm984_vm2, %v6200_v39 }
 0x379   :  { %2860 = vst.msk [vmem:[%s8816_s5 + $0x1e] sm:$0x3f] %vm2789_vm13, %v2859_v19  ;;  %v3362_v20 = vpop.f32.mrf.mxu1  ;;  %v3920_v36 = vld [vmem:[#allocation2 + $0x10] ss:$2 sm:$0x3f]  ;;  %v5217_v19 = vld [vmem:[%s8814_s3 + $0x48] sm:$0xff] }
 0x37a   :  { %3827 = vst.msk [vmem:[#allocation2 + $0x30] sm:$0xff] %vm984_vm2, %v3362_v20  ;;  %v3922_v48 = vld [vmem:[#allocation2 + $0x11] ss:$2 sm:$0x3f]  ;;  %5302 = vmatpush1.msra.mxu0 %v5217_v19 }
 0x37b   :  { %v6203_v16 = vpop.f32.mrf.mxu1  ;;  %v3924_v35 = vmax.f32 %v3920_v36, %v3922_v48  ;;  %5303 = vmatprep.subr.mxu0 %v6348_v24 }
 0x37c   :  { %3830 = vst.msk [vmem:[#allocation2 + $0x48] sm:$0xff] %vm984_vm2, %v6203_v16  ;;  %5304 = vmatpush1.msra.mxu0 %v5216_v57 }
 0x37d   :  { %v3925_v6 = vld [vmem:[#allocation2 + $0x1c] ss:$2 sm:$0xff]  ;;  %v3927_v21 = vld [vmem:[#allocation2 + $0x1d] ss:$2 sm:$0xff]  ;;  %v3372_v25 = vpop.f32.mrf.mxu1  ;;  %5305 = vmatprep.subr.mxu0 %v6348_v24 }
 0x37e   :  { %v3929_v63 = vmax.f32 %v3925_v6, %v3927_v21  ;;  %3829 = vst.msk [vmem:[#allocation2 + $0x40] sm:$0xff] %vm984_vm2, %v3372_v25 }
 0x37f   :  { %v6206_v5 = vpop.f32.mrf.mxu1 }
 0x380   :  { %v3931_v27 = vmax.f32 %v3923_v23, %v3929_v63  ;;  %3832 = vst.msk [vmem:[#allocation2 + $0x58] sm:$0xff] %vm984_vm2, %v6206_v5  ;;  %v5215_v63 = vld [vmem:[%s8814_s3 + $0x38] sm:$0xff] }
 0x381   :  { %v3926_v28 = vld [vmem:[#allocation2 + $0x2c] ss:$2 sm:$0x3f]  ;;  %v3928_v33 = vld [vmem:[#allocation2 + $0x2d] ss:$2 sm:$0x3f]  ;;  %v3382_v30 = vpop.f32.mrf.mxu1  ;;  %5306 = vmatpush1.msra.mxu0 %v5215_v63 }
 0x382   :  { %v3933_v29 = vadd.f32 %v8045_v37, %v3931_v27  ;;  %v3930_v41 = vmax.f32 %v3926_v28, %v3928_v33  ;;  %3831 = vst.msk [vmem:[#allocation2 + $0x50] sm:$0xff] %vm984_vm2, %v3382_v30  ;;  %v5214_v28 = vld [vmem:[%s8814_s3 + $0x30] sm:$0xff]  ;;  %5307 = vmatprep.subr.mxu0 %v6348_v24  ;;  %v5224_v63 = vld [vmem:[%s8814_s3 + $0x80] sm:$0xff] }
 0x383   :  { %v6209_v42 = vpop.f32.mrf.mxu1  ;;  %5308 = vmatpush1.msra.mxu0 %v5214_v28 }
 0x384   :  { %v3935_v9 = vmax.f32 %v3933_v29, 0.0  ;;  %v3932_v43 = vmax.f32 %v3924_v35, %v3930_v41  ;;  %3834 = vst.msk [vmem:[#allocation2 + $0x68] sm:$0xff] %vm984_vm2, %v6209_v42  ;;  %5309 = vmatprep.subr.mxu0 %v6348_v24 }
 0x385   :  { %v3392_v61 = vpop.f32.mrf.mxu1  ;;  %v3939_v60 = vld [vmem:[#allocation2 + $0x38] ss:$2 sm:$0xff]  ;;  %v3941_v52 = vld [vmem:[#allocation2 + $0x39] ss:$2 sm:$0xff] }
 0x386   :  { %3937 = vst.msk [vmem:[#allocation3] sm:$0xff] %vm984_vm2, %v3935_v9  ;;  %v3934_v46 = vadd.f32 %v8045_v37, %v3932_v43  ;;  %3833 = vst.msk [vmem:[#allocation2 + $0x60] sm:$0xff] %vm984_vm2, %v3392_v61  ;;  %v3943_v55 = vmax.f32 %v3939_v60, %v3941_v52  ;;  %v5212_v52 = vld [vmem:[%s8814_s3 + $0x20] sm:$0xff] }
 0x387   :  { %v6212_v47 = vpop.f32.mrf.mxu1 }
 0x388   :  { %v3936_v49 = vmax.f32 %v3934_v46, 0.0  ;;  %3836 = vst.msk [vmem:[#allocation2 + $0x78] sm:$0xff] %vm984_vm2, %v6212_v47 }
 0x389   :  { %v3402_v38 = vpop.f32.mrf.mxu1  ;;  %v3940_v54 = vld [vmem:[#allocation2 + $0x48] ss:$2 sm:$0x3f]  ;;  %v3942_v58 = vld [vmem:[#allocation2 + $0x49] ss:$2 sm:$0x3f] }
 0x38a   :  { %3938 = vst.msk [vmem:[#allocation3 + $0x8] sm:$0x3f] %vm1115_vm3, %v3936_v49  ;;  %v3944_v0 = vmax.f32 %v3940_v54, %v3942_v58 }
 0x38b   :  { %3835 = vst.msk [vmem:[#allocation2 + $0x70] sm:$0xff] %vm984_vm2, %v3402_v38  ;;  %v6215_v8 = vpop.f32.mrf.mxu1  ;;  %v5213_v38 = vld [vmem:[%s8814_s3 + $0x28] sm:$0xff] }
 0x38c   :  { %3838 = vst.msk [vmem:[#allocation2 + $0x88] sm:$0xff] %vm984_vm2, %v6215_v8  ;;  %5310 = vmatpush1.msra.mxu0 %v5213_v38 }
 0x38d   :  { %v3945_v62 = vld [vmem:[#allocation2 + $0x54] ss:$2 sm:$0xff]  ;;  %v3946_v13 = vld [vmem:[#allocation2 + $0x64] ss:$2 sm:$0x3f]  ;;  %v3412_v3 = vpop.f32.mrf.mxu1  ;;  %5311 = vmatprep.subr.mxu0 %v6348_v24 }
 0x38e   :  { %v4200_v40 = vld [vmem:[#allocation3] sm:$0xff]  ;;  %v3948_v22 = vld [vmem:[#allocation2 + $0x65] ss:$2 sm:$0x3f]  ;;  %3837 = vst.msk [vmem:[#allocation2 + $0x80] sm:$0xff] %vm984_vm2, %v3412_v3  ;;  %5312 = vmatpush1.msra.mxu0 %v5212_v52 }
 0x38f   :  { %v3947_v34 = vld [vmem:[#allocation2 + $0x55] ss:$2 sm:$0xff]  ;;  %4221 = vst.msk [vmem:[#allocation4] sm:$0xff] %vm984_vm2, %v4200_v40  ;;  %v3950_v1 = vmax.f32 %v3946_v13, %v3948_v22  ;;  %v6218_v2 = vpop.f32.mrf.mxu1  ;;  %5313 = vmatprep.subr.mxu0 %v6348_v24 }
 0x390   :  { %v3949_v4 = vmax.f32 %v3945_v62, %v3947_v34  ;;  %3840 = vst.msk [vmem:[#allocation2 + $0x98] sm:$0xff] %vm984_vm2, %v6218_v2  ;;  %5314 = vmatpush1.msra.mxu0 %v5211_v31  ;;  %v5210_v34 = vld [vmem:[%s8814_s3 + $0x10] sm:$0xff] }
 0x391   :  { %v3952_v7 = vmax.f32 %v3944_v0, %v3950_v1  ;;  %v3422_v26 = vpop.f32.mrf.mxu1  ;;  %v4368_v45 = vld [vmem:[#allocation3 + $0x2] sm:$0xff]  ;;  %5315 = vmatprep.subr.mxu0 %v6348_v24  ;;  %v5209_v1 = vld [vmem:[%s8814_s3 + $0x8] sm:$0xff] }
 0x392   :  { %v3951_v53 = vmax.f32 %v3943_v55, %v3949_v4  ;;  %3839 = vst.msk [vmem:[#allocation2 + $0x90] sm:$0xff] %vm984_vm2, %v3422_v26  ;;  %4410 = vrot.lane.b32.xlu0 %v4368_v45, %s6350_s20  ;;  %v4242_v32 = vld [vmem:[#allocation3 + $0x1] sm:$0xff]  ;;  %5316 = vmatpush1.msra.mxu0 %v5210_v34 }
 0x393   :  { %v3954_v11 = vadd.f32 %v8045_v37, %v3952_v7  ;;  %4284 = vrot.lane.b32.xlu1 %v4242_v32, %s6349_s15  ;;  %v6221_v12 = vpop.f32.mrf.mxu1  ;;  %v3959_v39 = vld [vmem:[#allocation2 + $0x70] ss:$2 sm:$0xff]  ;;  %v3961_v20 = vld [vmem:[#allocation2 + $0x71] ss:$2 sm:$0xff]  ;;  %5317 = vmatprep.subr.mxu0 %v6348_v24 }
 0x394   :  { %v3953_v10 = vadd.f32 %v8045_v37, %v3951_v53  ;;  %3842 = vst.msk [vmem:[#allocation2 + $0xa8] sm:$0xff] %vm984_vm2, %v6221_v12  ;;  %v3963_v25 = vmax.f32 %v3959_v39, %v3961_v20  ;;  %5318 = vmatpush1.msra.mxu0 %v5209_v1 }
 0x395   :  { %v3956_v17 = vmax.f32 %v3954_v11, 0.0  ;;  %v3432_v18 = vpop.f32.mrf.mxu1  ;;  %v3960_v36 = vld [vmem:[#allocation2 + $0x80] ss:$2 sm:$0x3f]  ;;  %5319 = vmatprep.subr.mxu0 %v6348_v24 }
 0x396   :  { %v3955_v56 = vmax.f32 %v3953_v10, 0.0  ;;  %3841 = vst.msk [vmem:[#allocation2 + $0xa0] sm:$0xff] %vm984_vm2, %v3432_v18  ;;  %v3962_v48 = vld [vmem:[#allocation2 + $0x81] ss:$2 sm:$0x3f] }
 0x397   :  { %3958 = vst.msk [vmem:[#allocation3 + $0x16] sm:$0x3f] %vm1115_vm3, %v3956_v17  ;;  %v6224_v51 = vpop.f32.mrf.mxu1  ;;  %v3964_v29 = vmax.f32 %v3960_v36, %v3962_v48  ;;  %v5208_v17 = vld [vmem:[%s8814_s3] sm:$0xff] }
 0x398   :  { %3957 = vst.msk [vmem:[#allocation3 + $0xe] sm:$0xff] %vm984_vm2, %v3955_v56  ;;  %3844 = vst.msk [vmem:[#allocation2 + $0xb8] sm:$0xff] %vm984_vm2, %v6224_v51  ;;  %5320 = vmatpush1.msra.mxu0 %v5208_v17 }
 0x399   :  { %v3965_v16 = vld [vmem:[#allocation2 + $0x8c] ss:$2 sm:$0xff]  ;;  %v3967_v6 = vld [vmem:[#allocation2 + $0x8d] ss:$2 sm:$0xff]  ;;  %v3442_v21 = vpop.f32.mrf.mxu1  ;;  %5349 = vmatprep.subr.mxu0 %v6348_v24 }
 0x39a   :  { %v3969_v23 = vmax.f32 %v3965_v16, %v3967_v6  ;;  %3843 = vst.msk [vmem:[#allocation2 + $0xb0] sm:$0xff] %vm984_vm2, %v3442_v21  ;;  %v5225_v6 = vld [vmem:[%s8814_s3 + $0x88] sm:$0xff] }
 0x39b   :  { %v6227_v5 = vpop.f32.mrf.mxu1  ;;  %5350 = vmatpush2.msra.mxu0 %v5225_v6 }
 0x39c   :  { %v3971_v27 = vmax.f32 %v3963_v25, %v3969_v23  ;;  %3846 = vst.msk [vmem:[#allocation2 + $0xc8] sm:$0xff] %vm984_vm2, %v6227_v5  ;;  %5351 = vmatprep.subr.mxu0 %v6348_v24 }
 0x39d   :  { %v3966_v33 = vld [vmem:[#allocation2 + $0x9c] ss:$2 sm:$0x3f]  ;;  %v3968_v30 = vld [vmem:[#allocation2 + $0x9d] ss:$2 sm:$0x3f]  ;;  %v3452_v35 = vpop.f32.mrf.mxu1  ;;  %5352 = vmatpush2.msra.mxu0 %v5224_v63 }
 0x39e   :  { %v3973_v41 = vadd.f32 %v8045_v37, %v3971_v27  ;;  %v3970_v42 = vmax.f32 %v3966_v33, %v3968_v30  ;;  %3845 = vst.msk [vmem:[#allocation2 + $0xc0] sm:$0xff] %vm984_vm2, %v3452_v35 }
 0x39f   :  { %v4620_v9 = vld [vmem:[#allocation3 + $0xf] sm:$0xff]  ;;  %v6230_v46 = vpop.f32.mrf.mxu1 }
 0x3a0   :  { %v4494_v43 = vld [vmem:[#allocation3 + $0xe] sm:$0xff]  ;;  %4662 = vrot.lane.b32.xlu0 %v4620_v9, %s6352_s9  ;;  %v3975_v47 = vmax.f32 %v3973_v41, 0.0  ;;  %v3972_v49 = vmax.f32 %v3964_v29, %v3970_v42  ;;  %3848 = vst.msk [vmem:[#allocation2 + $0xd8] sm:$0xff] %vm984_vm2, %v6230_v46 }
 0x3a1   :  { %v4746_v61 = vld [vmem:[#allocation3 + $0x10] sm:$0xff]  ;;  %4536 = vrot.lane.b32.xlu1 %v4494_v43, %s6351_s29  ;;  %v4201_v50 = vld [vmem:[#allocation3 + $0x8] sm:$0xff]  ;;  %v3462_v60 = vpop.f32.mrf.mxu1  ;;  %v3979_v3 = vld [vmem:[#allocation2 + $0xa8] ss:$2 sm:$0xff] }
 0x3a2   :  { %4223 = vst.msk [vmem:[#allocation4 + $0x20] sm:$0xff] %vm984_vm2, %v4746_v61  ;;  %4222 = vst.msk [vmem:[#allocation4 + $0x10] sm:$0xff] %vm984_vm2, %v4201_v50  ;;  %v3974_v54 = vadd.f32 %v8045_v37, %v3972_v49  ;;  %v4243_v8 = vld [vmem:[#allocation3 + $0x9] sm:$0xff]  ;;  %v4244_v13 = vld [vmem:[#allocation3 + $0x11] sm:$0xff] }
 0x3a3   :  { %3977 = vst.msk [vmem:[#allocation3 + $0x1c] sm:$0xff] %vm984_vm2, %v3975_v47  ;;  %3847 = vst.msk [vmem:[#allocation2 + $0xd0] sm:$0xff] %vm984_vm2, %v3462_v60  ;;  %v6233_v58 = vpop.f32.mrf.mxu1  ;;  %v4369_v40 = vld [vmem:[#allocation3 + $0xa] sm:$0xff]  ;;  %v3981_v22 = vld [vmem:[#allocation2 + $0xa9] ss:$2 sm:$0xff] }
 0x3a4   :  { %4788 = vrot.lane.b32.xlu0 %v4746_v61, %s6353_s14  ;;  %v3976_v59 = vmax.f32 %v3974_v54, 0.0  ;;  %3850 = vst.msk [vmem:[#allocation2 + $0xe8] sm:$0xff] %vm984_vm2, %v6233_v58  ;;  %v3983_v26 = vmax.f32 %v3979_v3, %v3981_v22  ;;  %v4370_v10 = vld [vmem:[#allocation3 + $0x12] sm:$0xff] }
 0x3a5   :  { %4286 = vrot.lane.b32.xlu1 %v4243_v8, %s6349_s15  ;;  %v3472_v62 = vpop.f32.mrf.mxu1  ;;  %v3980_v55 = vld [vmem:[#allocation2 + $0xb8] ss:$2 sm:$0x3f]  ;;  %v3982_v4 = vld [vmem:[#allocation2 + $0xb9] ss:$2 sm:$0x3f] }
 0x3a6   :  { %3978 = vst.msk [vmem:[#allocation3 + $0x24] sm:$0x3f] %vm1115_vm3, %v3976_v59  ;;  %v3984_v11 = vmax.f32 %v3980_v55, %v3982_v4 }
 0x3a7   :  { %3849 = vst.msk [vmem:[#allocation2 + $0xe0] sm:$0xff] %vm984_vm2, %v3472_v62  ;;  %v6236_v0 = vpop.f32.mrf.mxu1 }
 0x3a8   :  { %4288 = vrot.lane.b32.xlu0 %v4244_v13, %s6349_s15  ;;  %3852 = vst.msk [vmem:[#allocation2 + $0xf8] sm:$0xff] %vm984_vm2, %v6236_v0 }
 0x3a9   :  { %4412 = vrot.lane.b32.xlu1 %v4369_v40, %s6350_s20  ;;  %v3482_v53 = vpop.f32.mrf.mxu1 }
 0x3aa   :  { %v3985_v2 = vld [vmem:[#allocation2 + $0xc4] ss:$2 sm:$0xff]  ;;  %v3986_v44 = vld [vmem:[#allocation2 + $0xd4] ss:$2 sm:$0x3f]  ;;  %3851 = vst.msk [vmem:[#allocation2 + $0xf0] sm:$0xff] %vm984_vm2, %v3482_v53 }
 0x3ab   :  { %v4495_v7 = vld [vmem:[#allocation3 + $0x16] sm:$0xff]  ;;  %v3988_v32 = vld [vmem:[#allocation2 + $0xd5] ss:$2 sm:$0x3f]  ;;  %v6239_v15 = vpop.f32.mrf.mxu1 }
 0x3ac   :  { %v3987_v45 = vld [vmem:[#allocation2 + $0xc5] ss:$2 sm:$0xff]  ;;  %v3990_v14 = vmax.f32 %v3986_v44, %v3988_v32  ;;  %4414 = vrot.lane.b32.xlu0 %v4370_v10, %s6350_s20  ;;  %3854 = vst.msk [vmem:[#allocation2 + $0x108] sm:$0xff] %vm984_vm2, %v6239_v15 }
 0x3ad   :  { %v3989_v12 = vmax.f32 %v3985_v2, %v3987_v45  ;;  %4538 = vrot.lane.b32.xlu1 %v4495_v7, %s6351_s29  ;;  %v4747_v56 = vld [vmem:[#allocation3 + $0x18] sm:$0xff]  ;;  %v3492_v39 = vpop.f32.mrf.mxu1  ;;  %v8159_v16 = vld [vmem:[#allocation3 + $0x20] sm:$0xff] }
 0x3ae   :  { %4224 = vst.msk [vmem:[#allocation4 + $0x30] sm:$0xff] %vm984_vm2, %v4747_v56  ;;  %v3992_v19 = vmax.f32 %v3984_v11, %v3990_v14  ;;  %v4872_v20 = vld [vmem:[#allocation3 + $0x1c] sm:$0xff]  ;;  %3853 = vst.msk [vmem:[#allocation2 + $0x100] sm:$0xff] %vm984_vm2, %v3492_v39 }
 0x3af   :  { %v3991_v18 = vmax.f32 %v3983_v26, %v3989_v12  ;;  %v4621_v51 = vld [vmem:[#allocation3 + $0x17] sm:$0xff]  ;;  %v6242_v23 = vpop.f32.mrf.mxu1  ;;  %4225 = vst.msk [vmem:[#allocation4 + $0x40] sm:$0xff] %vm984_vm2, %v8159_v16  ;;  %v4622_v59 = vld [vmem:[#allocation3 + $0x1f] sm:$0xff] }
 0x3b0   :  { %v5124_v57 = vld [vmem:[#allocation3 + $0x1e] sm:$0xff]  ;;  %v3994_v25 = vadd.f32 %v8045_v37, %v3992_v19  ;;  %4914 = vrot.lane.b32.xlu0 %v4872_v20, %s6354_s30  ;;  %3856 = vst.msk [vmem:[#allocation2 + $0x118] sm:$0xff] %vm984_vm2, %v6242_v23 }
 0x3b1   :  { %v3993_v21 = vadd.f32 %v8045_v37, %v3991_v18  ;;  %4664 = vrot.lane.b32.xlu1 %v4621_v51, %s6352_s9  ;;  %5145 = vst.msk [vmem:[#allocation4 + $0x8] sm:$0xff] %vm984_vm2, %v5124_v57  ;;  %v3999_v5 = vld [vmem:[#allocation2 + $0xe0] ss:$2 sm:$0xff]  ;;  %v4001_v27 = vld [vmem:[#allocation2 + $0xe1] ss:$2 sm:$0xff]  ;;  %v3502_v28 = vpop.f32.mrf.mxu1  ;;  %v4246_v10 = vld [vmem:[#allocation3 + $0x21] sm:$0xff] }
 0x3b2   :  { %v3996_v48 = vmax.f32 %v3994_v25, 0.0  ;;  %3855 = vst.msk [vmem:[#allocation2 + $0x110] sm:$0xff] %vm984_vm2, %v3502_v28  ;;  %v4998_v33 = vld [vmem:[#allocation3 + $0x1d] sm:$0xff]  ;;  %v4003_v35 = vmax.f32 %v3999_v5, %v4001_v27 }
 0x3b3   :  { %v3995_v36 = vmax.f32 %v3993_v21, 0.0  ;;  %v6245_v30 = vpop.f32.mrf.mxu1  ;;  %v4000_v29 = vld [vmem:[#allocation2 + $0xf0] ss:$2 sm:$0x3f] }
 0x3b4   :  { %3998 = vst.msk [vmem:[#allocation3 + $0x32] sm:$0x3f] %vm1115_vm3, %v3996_v48  ;;  %5040 = vrot.lane.b32.xlu0 %v4998_v33, %s6355_s6  ;;  %v4002_v41 = vld [vmem:[#allocation2 + $0xf1] ss:$2 sm:$0x3f]  ;;  %v4245_v24 = vld [vmem:[#allocation3 + $0x19] sm:$0xff] }
 0x3b5   :  { %3997 = vst.msk [vmem:[#allocation3 + $0x2a] sm:$0xff] %vm984_vm2, %v3995_v36  ;;  %4790 = vrot.lane.b32.xlu1 %v4747_v56, %s6353_s14  ;;  %3858 = vst.msk [vmem:[#allocation2 + $0x128] sm:$0xff] %vm984_vm2, %v6245_v30  ;;  %v4005_v42 = vld [vmem:[#allocation2 + $0xfc] ss:$2 sm:$0xff]  ;;  %v4007_v9 = vld [vmem:[#allocation2 + $0xfd] ss:$2 sm:$0xff]  ;;  %v3512_v43 = vpop.f32.mrf.mxu1  ;;  %v4004_v49 = vmax.f32 %v4000_v29, %v4002_v41 }
 0x3b6   :  { %v4009_v61 = vmax.f32 %v4005_v42, %v4007_v9  ;;  %3857 = vst.msk [vmem:[#allocation2 + $0x120] sm:$0xff] %vm984_vm2, %v3512_v43  ;;  %v4371_v58 = vld [vmem:[#allocation3 + $0x1a] sm:$0xff]  ;;  %v4372_v51 = vld [vmem:[#allocation3 + $0x22] sm:$0xff] }
 0x3b7   :  { %v6248_v47 = vpop.f32.mrf.mxu1 }
 0x3b8   :  { %v5167_v46 = vld [vmem:[#allocation4 + $0x8] sm:$0xff]  ;;  %v4011_v50 = vmax.f32 %v4003_v35, %v4009_v61  ;;  %4540 = vrot.lane.b32.xlu0 %v5124_v57, %s6351_s29  ;;  %3860 = vst.msk [vmem:[#allocation2 + $0x138] sm:$0xff] %vm984_vm2, %v6248_v47 }
 0x3b9   :  { %4290 = vrot.lane.b32.xlu1 %v4245_v24, %s6349_s15  ;;  %5765 = vmatprep.mubr.msk.f32.mxu0 %vm984_vm2, %v5167_v46  ;;  %v4006_v38 = vld [vmem:[#allocation2 + $0x10c] ss:$2 sm:$0x3f]  ;;  %v4008_v60 = vld [vmem:[#allocation2 + $0x10d] ss:$2 sm:$0x3f]  ;;  %v3522_v52 = vpop.f32.mrf.mxu1 }
 0x3ba   :  { %v4013_v54 = vadd.f32 %v8045_v37, %v4011_v50  ;;  %v4010_v8 = vmax.f32 %v4006_v38, %v4008_v60  ;;  %3859 = vst.msk [vmem:[#allocation2 + $0x130] sm:$0xff] %vm984_vm2, %v3522_v52 }
 0x3bb   :  { %v6251_v62 = vpop.f32.mrf.mxu1 }
 0x3bc   :  { %v4497_v31 = vld [vmem:[#allocation3 + $0x26] sm:$0xff]  ;;  %v4015_v13 = vmax.f32 %v4013_v54, 0.0  ;;  %v4012_v3 = vmax.f32 %v4004_v49, %v4010_v8  ;;  %4666 = vrot.lane.b32.xlu0 %v4622_v59, %s6352_s9  ;;  %3862 = vst.msk [vmem:[#allocation2 + $0x148] sm:$0xff] %vm984_vm2, %v6251_v62  ;;  %v8196_v34 = vld [vmem:[#allocation3 + $0x2e] sm:$0xff] }
 0x3bd   :  { %4416 = vrot.lane.b32.xlu1 %v4371_v58, %s6350_s20  ;;  %5146 = vst.msk [vmem:[#allocation4 + $0x18] sm:$0xff] %vm984_vm2, %v4497_v31  ;;  %v8194_v40 = vld [vmem:[#allocation3 + $0x28] sm:$0xff]  ;;  %v3532_v22 = vpop.f32.mrf.mxu1  ;;  %5147 = vst.msk [vmem:[#allocation4 + $0x28] sm:$0xff] %vm984_vm2, %v8196_v34  ;;  %v8205_v4 = vld [vmem:[#allocation3 + $0x30] sm:$0xff] }
 0x3be   :  { %4226 = vst.msk [vmem:[#allocation4 + $0x50] sm:$0xff] %vm984_vm2, %v8194_v40  ;;  %4017 = vst.msk [vmem:[#allocation3 + $0x38] sm:$0xff] %vm984_vm2, %v4015_v13  ;;  %v4014_v55 = vadd.f32 %v8045_v37, %v4012_v3  ;;  %v4873_v0 = vld [vmem:[#allocation3 + $0x24] sm:$0xff]  ;;  %v4874_v27 = vld [vmem:[#allocation3 + $0x2c] sm:$0xff] }
 0x3bf   :  { %3861 = vst.msk [vmem:[#allocation2 + $0x140] sm:$0xff] %vm984_vm2, %v3532_v22  ;;  %v6254_v1 = vpop.f32.mrf.mxu1  ;;  %4227 = vst.msk [vmem:[#allocation4 + $0x60] sm:$0xff] %vm984_vm2, %v8205_v4  ;;  %v4019_v44 = vld [vmem:[#allocation2 + $0x118] ss:$2 sm:$0xff]  ;;  %v4021_v53 = vld [vmem:[#allocation2 + $0x119] ss:$2 sm:$0xff] }
 0x3c0   :  { %v4016_v2 = vmax.f32 %v4014_v55, 0.0  ;;  %4792 = vrot.lane.b32.xlu0 %v8159_v16, %s6353_s14  ;;  %3864 = vst.msk [vmem:[#allocation2 + $0x158] sm:$0xff] %vm984_vm2, %v6254_v1  ;;  %v4999_v7 = vld [vmem:[#allocation3 + $0x25] sm:$0xff]  ;;  %v4023_v12 = vmax.f32 %v4019_v44, %v4021_v53  ;;  %v5000_v42 = vld [vmem:[#allocation3 + $0x2d] sm:$0xff] }
 0x3c1   :  { %4916 = vrot.lane.b32.xlu1 %v4873_v0, %s6354_s30  ;;  %v3542_v26 = vpop.f32.mrf.mxu1  ;;  %v4020_v45 = vld [vmem:[#allocation2 + $0x128] ss:$2 sm:$0x3f]  ;;  %v4022_v32 = vld [vmem:[#allocation2 + $0x129] ss:$2 sm:$0x3f] }
 0x3c2   :  { %4018 = vst.msk [vmem:[#allocation3 + $0x40] sm:$0x3f] %vm1115_vm3, %v4016_v2  ;;  %v4024_v14 = vmax.f32 %v4020_v45, %v4022_v32  ;;  %v4623_v63 = vld [vmem:[#allocation3 + $0x27] sm:$0xff] }
 0x3c3   :  { %3863 = vst.msk [vmem:[#allocation2 + $0x150] sm:$0xff] %vm984_vm2, %v3542_v26  ;;  %v6257_v11 = vpop.f32.mrf.mxu1  ;;  %v4247_v38 = vld [vmem:[#allocation3 + $0x29] sm:$0xff] }
 0x3c4   :  { %4292 = vrot.lane.b32.xlu0 %v4246_v10, %s6349_s15  ;;  %3866 = vst.msk [vmem:[#allocation2 + $0x168] sm:$0xff] %vm984_vm2, %v6257_v11  ;;  %v4373_v62 = vld [vmem:[#allocation3 + $0x2a] sm:$0xff] }
 0x3c5   :  { %5042 = vrot.lane.b32.xlu1 %v4999_v7, %s6355_s6  ;;  %v3552_v17 = vpop.f32.mrf.mxu1  ;;  %v8220_v16 = vld [vmem:[#allocation3 + $0x36] sm:$0xff] }
 0x3c6   :  { %v4025_v15 = vld [vmem:[#allocation2 + $0x134] ss:$2 sm:$0xff]  ;;  %v4026_v56 = vld [vmem:[#allocation2 + $0x144] ss:$2 sm:$0x3f]  ;;  %3865 = vst.msk [vmem:[#allocation2 + $0x160] sm:$0xff] %vm984_vm2, %v3552_v17 }
 0x3c7   :  { %v4027_v18 = vld [vmem:[#allocation2 + $0x135] ss:$2 sm:$0xff]  ;;  %v4028_v19 = vld [vmem:[#allocation2 + $0x145] ss:$2 sm:$0x3f]  ;;  %v6260_v57 = vpop.f32.mrf.mxu1  ;;  %5148 = vst.msk [vmem:[#allocation4 + $0x38] sm:$0xff] %vm984_vm2, %v8220_v16 }
 0x3c8   :  { %v4029_v39 = vmax.f32 %v4025_v15, %v4027_v18  ;;  %v4030_v20 = vmax.f32 %v4026_v56, %v4028_v19  ;;  %4418 = vrot.lane.b32.xlu0 %v4372_v51, %s6350_s20  ;;  %3868 = vst.msk [vmem:[#allocation2 + $0x178] sm:$0xff] %vm984_vm2, %v6260_v57  ;;  %v8224_v6 = vld [vmem:[#allocation3 + $0x38] sm:$0xff] }
 0x3c9   :  { %4542 = vrot.lane.b32.xlu1 %v4497_v31, %s6351_s29  ;;  %v3562_v23 = vpop.f32.mrf.mxu1  ;;  %4228 = vst.msk [vmem:[#allocation4 + $0x70] sm:$0xff] %vm984_vm2, %v8224_v6  ;;  %v8231_v36 = vld [vmem:[#allocation3 + $0x3e] sm:$0xff]  ;;  %v4875_v2 = vld [vmem:[#allocation3 + $0x34] sm:$0xff] }
 0x3ca   :  { %v4031_v21 = vmax.f32 %v4023_v12, %v4029_v39  ;;  %v4032_v25 = vmax.f32 %v4024_v14, %v4030_v20  ;;  %3867 = vst.msk [vmem:[#allocation2 + $0x170] sm:$0xff] %vm984_vm2, %v3562_v23  ;;  %5149 = vst.msk [vmem:[#allocation4 + $0x48] sm:$0xff] %vm984_vm2, %v8231_v36  ;;  %v4039_v35 = vld [vmem:[#allocation2 + $0x150] ss:$2 sm:$0xff]  ;;  %v4041_v29 = vld [vmem:[#allocation2 + $0x151] ss:$2 sm:$0xff] }
 0x3cb   :  { %v6263_v28 = vpop.f32.mrf.mxu1  ;;  %v4043_v43 = vmax.f32 %v4039_v35, %v4041_v29  ;;  %v5001_v45 = vld [vmem:[#allocation3 + $0x35] sm:$0xff] }
 0x3cc   :  { %v4033_v48 = vadd.f32 %v8045_v37, %v4031_v21  ;;  %v4034_v5 = vadd.f32 %v8045_v37, %v4032_v25  ;;  %4918 = vrot.lane.b32.xlu0 %v4874_v27, %s6354_s30  ;;  %3870 = vst.msk [vmem:[#allocation2 + $0x188] sm:$0xff] %vm984_vm2, %v6263_v28  ;;  %v4248_v15 = vld [vmem:[#allocation3 + $0x31] sm:$0xff]  ;;  %v4876_v35 = vld [vmem:[#allocation3 + $0x3c] sm:$0xff] }
 0x3cd   :  { %4668 = vrot.lane.b32.xlu1 %v4623_v63, %s6352_s9  ;;  %v3572_v41 = vpop.f32.mrf.mxu1  ;;  %v4040_v61 = vld [vmem:[#allocation2 + $0x160] ss:$2 sm:$0x3f]  ;;  %v4042_v24 = vld [vmem:[#allocation2 + $0x161] ss:$2 sm:$0x3f] }
 0x3ce   :  { %v4035_v33 = vmax.f32 %v4033_v48, 0.0  ;;  %v4036_v30 = vmax.f32 %v4034_v5, 0.0  ;;  %3869 = vst.msk [vmem:[#allocation2 + $0x180] sm:$0xff] %vm984_vm2, %v3572_v41  ;;  %v4044_v52 = vmax.f32 %v4040_v61, %v4042_v24  ;;  %v4374_v21 = vld [vmem:[#allocation3 + $0x32] sm:$0xff] }
 0x3cf   :  { %v6266_v9 = vpop.f32.mrf.mxu1 }
 0x3d0   :  { %4037 = vst.msk [vmem:[#allocation3 + $0x46] sm:$0xff] %vm984_vm2, %v4035_v33  ;;  %5044 = vrot.lane.b32.xlu0 %v5000_v42, %s6355_s6  ;;  %3872 = vst.msk [vmem:[#allocation2 + $0x198] sm:$0xff] %vm984_vm2, %v6266_v9 }
 0x3d1   :  { %4038 = vst.msk [vmem:[#allocation3 + $0x4e] sm:$0x3f] %vm1115_vm3, %v4036_v30  ;;  %4794 = vrot.lane.b32.xlu1 %v8194_v40, %s6353_s14  ;;  %v4045_v46 = vld [vmem:[#allocation2 + $0x16c] ss:$2 sm:$0xff]  ;;  %v4047_v47 = vld [vmem:[#allocation2 + $0x16d] ss:$2 sm:$0xff]  ;;  %v3582_v49 = vpop.f32.mrf.mxu1 }
 0x3d2   :  { %v4049_v50 = vmax.f32 %v4045_v46, %v4047_v47  ;;  %3871 = vst.msk [vmem:[#allocation2 + $0x190] sm:$0xff] %vm984_vm2, %v3582_v49  ;;  %v4624_v40 = vld [vmem:[#allocation3 + $0x2f] sm:$0xff]  ;;  %v5002_v47 = vld [vmem:[#allocation3 + $0x3d] sm:$0xff] }
 0x3d3   :  { %v6269_v60 = vpop.f32.mrf.mxu1 }
 0x3d4   :  { %v4051_v54 = vmax.f32 %v4043_v43, %v4049_v50  ;;  %4544 = vrot.lane.b32.xlu0 %v8196_v34, %s6351_s29  ;;  %3874 = vst.msk [vmem:[#allocation2 + $0x1a8] sm:$0xff] %vm984_vm2, %v6269_v60 }
 0x3d5   :  { %4294 = vrot.lane.b32.xlu1 %v4247_v38, %s6349_s15  ;;  %v4046_v8 = vld [vmem:[#allocation2 + $0x17c] ss:$2 sm:$0x3f]  ;;  %v4048_v58 = vld [vmem:[#allocation2 + $0x17d] ss:$2 sm:$0x3f]  ;;  %v3592_v31 = vpop.f32.mrf.mxu1 }
 0x3d6   :  { %v4053_v59 = vadd.f32 %v8045_v37, %v4051_v54  ;;  %v4050_v13 = vmax.f32 %v4046_v8, %v4048_v58  ;;  %3873 = vst.msk [vmem:[#allocation2 + $0x1a0] sm:$0xff] %vm984_vm2, %v3592_v31  ;;  %v4249_v58 = vld [vmem:[#allocation3 + $0x39] sm:$0xff] }
 0x3d7   :  { %v8254_v3 = vld [vmem:[#allocation3 + $0x40] sm:$0xff]  ;;  %v6272_v22 = vpop.f32.mrf.mxu1 }
 0x3d8   :  { %v8257_v55 = vld [vmem:[#allocation3 + $0x46] sm:$0xff]  ;;  %4229 = vst.msk [vmem:[#allocation4 + $0x80] sm:$0xff] %vm984_vm2, %v8254_v3  ;;  %v4055_v34 = vmax.f32 %v4053_v59, 0.0  ;;  %4670 = vrot.lane.b32.xlu0 %v4624_v40, %s6352_s9  ;;  %v4052_v0 = vmax.f32 %v4044_v52, %v4050_v13  ;;  %3876 = vst.msk [vmem:[#allocation2 + $0x1b8] sm:$0xff] %vm984_vm2, %v6272_v22 }
 0x3d9   :  { %4420 = vrot.lane.b32.xlu1 %v4373_v62, %s6350_s20  ;;  %5150 = vst.msk [vmem:[#allocation4 + $0x58] sm:$0xff] %vm984_vm2, %v8257_v55  ;;  %v3602_v1 = vpop.f32.mrf.mxu1  ;;  %v4209_v53 = vld [vmem:[#allocation3 + $0x48] sm:$0xff]  ;;  %v4059_v32 = vld [vmem:[#allocation2 + $0x188] ss:$2 sm:$0xff]  ;;  %v4061_v10 = vld [vmem:[#allocation2 + $0x189] ss:$2 sm:$0xff] }
 0x3da   :  { %4057 = vst.msk [vmem:[#allocation3 + $0x54] sm:$0xff] %vm984_vm2, %v4055_v34  ;;  %v4054_v44 = vadd.f32 %v8045_v37, %v4052_v0  ;;  %3875 = vst.msk [vmem:[#allocation2 + $0x1b0] sm:$0xff] %vm984_vm2, %v3602_v1  ;;  %v4375_v34 = vld [vmem:[#allocation3 + $0x3a] sm:$0xff] }
 0x3db   :  { %v6275_v7 = vpop.f32.mrf.mxu1  ;;  %4230 = vst.msk [vmem:[#allocation4 + $0x90] sm:$0xff] %vm984_vm2, %v4209_v53 }
 0x3dc   :  { %4796 = vrot.lane.b32.xlu0 %v8205_v4, %s6353_s14  ;;  %v4056_v26 = vmax.f32 %v4054_v44, 0.0  ;;  %3878 = vst.msk [vmem:[#allocation2 + $0x1c8] sm:$0xff] %vm984_vm2, %v6275_v7  ;;  %v4063_v4 = vmax.f32 %v4059_v32, %v4061_v10  ;;  %v4626_v44 = vld [vmem:[#allocation3 + $0x3f] sm:$0xff] }
 0x3dd   :  { %4920 = vrot.lane.b32.xlu1 %v4875_v2, %s6354_s30  ;;  %v3612_v11 = vpop.f32.mrf.mxu1  ;;  %v4060_v12 = vld [vmem:[#allocation2 + $0x198] ss:$2 sm:$0x3f]  ;;  %v4062_v14 = vld [vmem:[#allocation2 + $0x199] ss:$2 sm:$0x3f] }
 0x3de   :  { %4058 = vst.msk [vmem:[#allocation3 + $0x5c] sm:$0x3f] %vm1115_vm3, %v4056_v26  ;;  %v4064_v17 = vmax.f32 %v4060_v12, %v4062_v14  ;;  %v4877_v10 = vld [vmem:[#allocation3 + $0x44] sm:$0xff] }
 0x3df   :  { %3877 = vst.msk [vmem:[#allocation2 + $0x1c0] sm:$0xff] %vm984_vm2, %v3612_v11  ;;  %v6278_v56 = vpop.f32.mrf.mxu1 }
 0x3e0   :  { %4296 = vrot.lane.b32.xlu0 %v4248_v15, %s6349_s15  ;;  %3880 = vst.msk [vmem:[#allocation2 + $0x1d8] sm:$0xff] %vm984_vm2, %v6278_v56  ;;  %v5003_v56 = vld [vmem:[#allocation3 + $0x45] sm:$0xff] }
 0x3e1   :  { %5046 = vrot.lane.b32.xlu1 %v5001_v45, %s6355_s6  ;;  %v4065_v18 = vld [vmem:[#allocation2 + $0x1a4] ss:$2 sm:$0xff]  ;;  %v4066_v19 = vld [vmem:[#allocation2 + $0x1b4] ss:$2 sm:$0x3f]  ;;  %v3622_v39 = vpop.f32.mrf.mxu1 }
 0x3e2   :  { %v4067_v20 = vld [vmem:[#allocation2 + $0x1a5] ss:$2 sm:$0xff]  ;;  %v4068_v51 = vld [vmem:[#allocation2 + $0x1b5] ss:$2 sm:$0x3f]  ;;  %3879 = vst.msk [vmem:[#allocation2 + $0x1d0] sm:$0xff] %vm984_vm2, %v3622_v39 }
 0x3e3   :  { %v8279_v57 = vld [vmem:[#allocation3 + $0x4e] sm:$0xff]  ;;  %v4069_v25 = vmax.f32 %v4065_v18, %v4067_v20  ;;  %v4070_v23 = vmax.f32 %v4066_v19, %v4068_v51  ;;  %v6281_v63 = vpop.f32.mrf.mxu1 }
 0x3e4   :  { %v8283_v48 = vld [vmem:[#allocation3 + $0x50] sm:$0xff]  ;;  %5151 = vst.msk [vmem:[#allocation4 + $0x68] sm:$0xff] %vm984_vm2, %v8279_v57  ;;  %4422 = vrot.lane.b32.xlu0 %v4374_v21, %s6350_s20  ;;  %3882 = vst.msk [vmem:[#allocation2 + $0x1e8] sm:$0xff] %vm984_vm2, %v6281_v63 }
 0x3e5   :  { %4546 = vrot.lane.b32.xlu1 %v8220_v16, %s6351_s29  ;;  %4231 = vst.msk [vmem:[#allocation4 + $0xa0] sm:$0xff] %vm984_vm2, %v8283_v48  ;;  %v4071_v5 = vmax.f32 %v4063_v4, %v4069_v25  ;;  %v4072_v27 = vmax.f32 %v4064_v17, %v4070_v23  ;;  %v3632_v28 = vpop.f32.mrf.mxu1  ;;  %v4625_v16 = vld [vmem:[#allocation3 + $0x37] sm:$0xff]  ;;  %v4878_v39 = vld [vmem:[#allocation3 + $0x4c] sm:$0xff] }
 0x3e6   :  { %3881 = vst.msk [vmem:[#allocation2 + $0x1e0] sm:$0xff] %vm984_vm2, %v3632_v28  ;;  %v8292_v33 = vld [vmem:[#allocation3 + $0x56] sm:$0xff] }
 0x3e7   :  { %v8294_v30 = vld [vmem:[#allocation3 + $0x58] sm:$0xff]  ;;  %v4073_v29 = vadd.f32 %v8045_v37, %v4071_v5  ;;  %v4074_v41 = vadd.f32 %v8045_v37, %v4072_v27  ;;  %v6284_v42 = vpop.f32.mrf.mxu1  ;;  %5152 = vst.msk [vmem:[#allocation4 + $0x78] sm:$0xff] %vm984_vm2, %v8292_v33  ;;  %v4250_v27 = vld [vmem:[#allocation3 + $0x41] sm:$0xff] }
 0x3e8   :  { %4232 = vst.msk [vmem:[#allocation4 + $0xb0] sm:$0xff] %vm984_vm2, %v8294_v30  ;;  %4922 = vrot.lane.b32.xlu0 %v4876_v35, %s6354_s30  ;;  %3884 = vst.msk [vmem:[#allocation2 + $0x1f8] sm:$0xff] %vm984_vm2, %v6284_v42  ;;  %v4079_v61 = vld [vmem:[#allocation2 + $0x1c0] ss:$2 sm:$0xff]  ;;  %v4081_v24 = vld [vmem:[#allocation2 + $0x1c1] ss:$2 sm:$0xff] }
 0x3e9   :  { %4672 = vrot.lane.b32.xlu1 %v4625_v16, %s6352_s9  ;;  %v4075_v9 = vmax.f32 %v4073_v29, 0.0  ;;  %v4076_v43 = vmax.f32 %v4074_v41, 0.0  ;;  %v3642_v46 = vpop.f32.mrf.mxu1  ;;  %v4083_v50 = vmax.f32 %v4079_v61, %v4081_v24  ;;  %v4080_v38 = vld [vmem:[#allocation2 + $0x1d0] ss:$2 sm:$0x3f] }
 0x3ea   :  { %3883 = vst.msk [vmem:[#allocation2 + $0x1f0] sm:$0xff] %vm984_vm2, %v3642_v46  ;;  %v4082_v60 = vld [vmem:[#allocation2 + $0x1d1] ss:$2 sm:$0x3f]  ;;  %v8370_v46 = vld [vmem:[%s8813_s2] ss:$0 sm:$0xff] }
 0x3eb   :  { %4077 = vst.msk [vmem:[#allocation3 + $0x62] sm:$0xff] %vm984_vm2, %v4075_v9  ;;  %v6287_v49 = vpop.f32.mrf.mxu1  ;;  %v4084_v59 = vmax.f32 %v4080_v38, %v4082_v60  ;;  %v4376_v24 = vld [vmem:[#allocation3 + $0x42] sm:$0xff] }
 0x3ec   :  { %4078 = vst.msk [vmem:[#allocation3 + $0x6a] sm:$0x3f] %vm1115_vm3, %v4076_v43  ;;  %5048 = vrot.lane.b32.xlu0 %v5002_v47, %s6355_s6 }
 0x3ed   :  { %4798 = vrot.lane.b32.xlu1 %v8224_v6, %s6353_s14  ;;  %3886 = vst.msk [vmem:[#allocation2 + $0x208] sm:$0xff] %vm984_vm2, %v6287_v49  ;;  %v4085_v52 = vld [vmem:[#allocation2 + $0x1dc] ss:$2 sm:$0xff]  ;;  %v4087_v54 = vld [vmem:[#allocation2 + $0x1dd] ss:$2 sm:$0xff]  ;;  %v3652_v8 = vpop.f32.mrf.mxu1 }
 0x3ee   :  { %v4089_v31 = vmax.f32 %v4085_v52, %v4087_v54  ;;  %3885 = vst.msk [vmem:[#allocation2 + $0x200] sm:$0xff] %vm984_vm2, %v3652_v8 }
 0x3ef   :  { %v6290_v6 = vpop.f32.mrf.mxu1 }
 0x3f0   :  { %4548 = vrot.lane.b32.xlu0 %v8231_v36, %s6351_s29  ;;  %v4091_v62 = vmax.f32 %v4083_v50, %v4089_v31  ;;  %3888 = vst.msk [vmem:[#allocation2 + $0x218] sm:$0xff] %vm984_vm2, %v6290_v6  ;;  %v4753_v6 = vld [vmem:[#allocation3 + $0x48] sm:$0xff] }
 0x3f1   :  { %4298 = vrot.lane.b32.xlu1 %v4249_v58, %s6349_s15  ;;  %v4086_v13 = vld [vmem:[#allocation2 + $0x1ec] ss:$2 sm:$0x3f]  ;;  %v4088_v40 = vld [vmem:[#allocation2 + $0x1ed] ss:$2 sm:$0x3f]  ;;  %v3662_v22 = vpop.f32.mrf.mxu1 }
 0x3f2   :  { %v4093_v0 = vadd.f32 %v8045_v37, %v4091_v62  ;;  %v4090_v1 = vmax.f32 %v4086_v13, %v4088_v40  ;;  %3887 = vst.msk [vmem:[#allocation2 + $0x210] sm:$0xff] %vm984_vm2, %v3662_v22  ;;  %v8319_v2 = vld [vmem:[#allocation3 + $0x5e] sm:$0xff] }
 0x3f3   :  { %v6293_v53 = vpop.f32.mrf.mxu1  ;;  %v8322_v36 = vld [vmem:[#allocation3 + $0x60] sm:$0xff]  ;;  %5153 = vst.msk [vmem:[#allocation4 + $0x88] sm:$0xff] %vm984_vm2, %v8319_v2  ;;  %v8337_v12 = vld [vmem:[#allocation3 + $0x68] sm:$0xff] }
 0x3f4   :  { %4674 = vrot.lane.b32.xlu0 %v4626_v44, %s6352_s9  ;;  %v4095_v7 = vmax.f32 %v4093_v0, 0.0  ;;  %v4092_v26 = vmax.f32 %v4084_v59, %v4090_v1  ;;  %3890 = vst.msk [vmem:[#allocation2 + $0x228] sm:$0xff] %vm984_vm2, %v6293_v53  ;;  %v8328_v45 = vld [vmem:[#allocation3 + $0x66] sm:$0xff]  ;;  %4233 = vst.msk [vmem:[#allocation4 + $0xc0] sm:$0xff] %vm984_vm2, %v8322_v36 }
 0x3f5   :  { %4424 = vrot.lane.b32.xlu1 %v4375_v34, %s6350_s20  ;;  %v3672_v32 = vpop.f32.mrf.mxu1  ;;  %5154 = vst.msk [vmem:[#allocation4 + $0x98] sm:$0xff] %vm984_vm2, %v8328_v45  ;;  %4234 = vst.msk [vmem:[#allocation4 + $0xd0] sm:$0xff] %vm984_vm2, %v8337_v12  ;;  %v4099_v4 = vld [vmem:[#allocation2 + $0x1f8] ss:$2 sm:$0xff]  ;;  %v4101_v17 = vld [vmem:[#allocation2 + $0x1f9] ss:$2 sm:$0xff] }
 0x3f6   :  { %4097 = vst.msk [vmem:[#allocation3 + $0x70] sm:$0xff] %vm984_vm2, %v4095_v7  ;;  %v4094_v11 = vadd.f32 %v8045_v37, %v4092_v26  ;;  %3889 = vst.msk [vmem:[#allocation2 + $0x220] sm:$0xff] %vm984_vm2, %v3672_v32  ;;  %v5004_v59 = vld [vmem:[#allocation3 + $0x4d] sm:$0xff] }
 0x3f7   :  { %v6296_v14 = vpop.f32.mrf.mxu1  ;;  %v4251_v44 = vld [vmem:[#allocation3 + $0x49] sm:$0xff] }
 0x3f8   :  { %4800 = vrot.lane.b32.xlu0 %v8254_v3, %s6353_s14  ;;  %v4096_v15 = vmax.f32 %v4094_v11, 0.0  ;;  %3892 = vst.msk [vmem:[#allocation2 + $0x238] sm:$0xff] %vm984_vm2, %v6296_v14  ;;  %v4103_v3 = vmax.f32 %v4099_v4, %v4101_v17  ;;  %v4628_v17 = vld [vmem:[#allocation3 + $0x4f] sm:$0xff] }
 0x3f9   :  { %4924 = vrot.lane.b32.xlu1 %v4877_v10, %s6354_s30  ;;  %v3682_v37 = vpop.f32.mrf.mxu1  ;;  %v4100_v18 = vld [vmem:[#allocation2 + $0x208] ss:$2 sm:$0x3f]  ;;  %v4102_v19 = vld [vmem:[#allocation2 + $0x209] ss:$2 sm:$0x3f] }
 0x3fa   :  { %4098 = vst.msk [vmem:[#allocation3 + $0x78] sm:$0x3f] %vm1115_vm3, %v4096_v15  ;;  %v4104_v51 = vmax.f32 %v4100_v18, %v4102_v19  ;;  %v4377_v15 = vld [vmem:[#allocation3 + $0x4a] sm:$0xff] }
 0x3fb   :  { %3891 = vst.msk [vmem:[#allocation2 + $0x230] sm:$0xff] %vm984_vm2, %v3682_v37  ;;  %v6299_v20 = vpop.f32.mrf.mxu1 }
 0x3fc   :  { %4926 = vrot.lane.b32.xlu0 %v4878_v39, %s6354_s30  ;;  %3894 = vst.msk [vmem:[#allocation2 + $0x248] sm:$0xff] %vm984_vm2, %v6299_v20 }
 0x3fd   :  { %5050 = vrot.lane.b32.xlu1 %v5003_v56, %s6355_s6  ;;  %v4105_v21 = vld [vmem:[#allocation2 + $0x214] ss:$2 sm:$0xff]  ;;  %v4106_v25 = vld [vmem:[#allocation2 + $0x224] ss:$2 sm:$0x3f]  ;;  %v3692_v23 = vpop.f32.mrf.mxu1 }
 0x3fe   :  { %v4107_v63 = vld [vmem:[#allocation2 + $0x215] ss:$2 sm:$0xff]  ;;  %v4108_v5 = vld [vmem:[#allocation2 + $0x225] ss:$2 sm:$0x3f]  ;;  %3893 = vst.msk [vmem:[#allocation2 + $0x240] sm:$0xff] %vm984_vm2, %v3692_v23 }
 0x3ff   :  { %v4109_v28 = vmax.f32 %v4105_v21, %v4107_v63  ;;  %v4110_v16 = vmax.f32 %v4106_v25, %v4108_v5  ;;  %v6302_v35 = vpop.f32.mrf.mxu1  ;;  %v8353_v29 = vld [vmem:[#allocation3 + $0x6e] sm:$0xff] }
 0x400   :  { %4300 = vrot.lane.b32.xlu0 %v4250_v27, %s6349_s15  ;;  %3896 = vst.msk [vmem:[#allocation2 + $0x258] sm:$0xff] %vm984_vm2, %v6302_v35  ;;  %v8357_v41 = vld [vmem:[#allocation3 + $0x70] sm:$0xff]  ;;  %5155 = vst.msk [vmem:[#allocation4 + $0xa8] sm:$0xff] %vm984_vm2, %v8353_v29 }
 0x401   :  { %4550 = vrot.lane.b32.xlu1 %v8257_v55, %s6351_s29  ;;  %v4111_v42 = vmax.f32 %v4103_v3, %v4109_v28  ;;  %v4112_v9 = vmax.f32 %v4104_v51, %v4110_v16  ;;  %v3702_v43 = vpop.f32.mrf.mxu1  ;;  %4235 = vst.msk [vmem:[#allocation4 + $0xe0] sm:$0xff] %vm984_vm2, %v8357_v41  ;;  %v4627_v55 = vld [vmem:[#allocation3 + $0x47] sm:$0xff]  ;;  %v8364_v61 = vld [vmem:[#allocation3 + $0x76] sm:$0xff] }
 0x402   :  { %3895 = vst.msk [vmem:[#allocation2 + $0x250] sm:$0xff] %vm984_vm2, %v3702_v43  ;;  %5156 = vst.msk [vmem:[#allocation4 + $0xb8] sm:$0xff] %vm984_vm2, %v8364_v61  ;;  %v4119_v8 = vld [vmem:[#allocation2 + $0x230] ss:$2 sm:$0xff]  ;;  %v4121_v58 = vld [vmem:[#allocation2 + $0x231] ss:$2 sm:$0xff] }
 0x403   :  { %v4113_v47 = vadd.f32 %v8370_v46, %v4111_v42  ;;  %v4114_v49 = vadd.f32 %v8370_v46, %v4112_v9  ;;  %v6305_v50 = vpop.f32.mrf.mxu1  ;;  %v4123_v13 = vmax.f32 %v4119_v8, %v4121_v58  ;;  %v4879_v21 = vld [vmem:[#allocation3 + $0x54] sm:$0xff] }
 0x404   :  { %4426 = vrot.lane.b32.xlu0 %v4376_v24, %s6350_s20  ;;  %v4411_v38 = vpop.permute.xlu0 %4410  ;;  %3898 = vst.msk [vmem:[#allocation2 + $0x268] sm:$0xff] %vm984_vm2, %v6305_v50  ;;  %v4252_v16 = vld [vmem:[#allocation3 + $0x51] sm:$0xff] }
 0x405   :  { %4676 = vrot.lane.b32.xlu1 %v4627_v55, %s6352_s9  ;;  %v4285_v60 = vpop.permute.xlu1 %4284  ;;  %v4115_v52 = vmax.f32 %v4113_v47, 0.0  ;;  %v4116_v54 = vmax.f32 %v4114_v49, 0.0  ;;  %v3712_v31 = vpop.f32.mrf.mxu1  ;;  %v4120_v40 = vld [vmem:[#allocation2 + $0x240] ss:$2 sm:$0x3f] }
 0x406   :  { %4347 = vst.msk [vmem:[#allocation4] sm:$0xff] %vm1630_vm4, %v4285_v60  ;;  %v4122_v22 = vld [vmem:[#allocation2 + $0x241] ss:$2 sm:$0x3f] }
 0x407   :  { %3897 = vst.msk [vmem:[#allocation2 + $0x260] sm:$0xff] %vm984_vm2, %v3712_v31  ;;  %4117 = vst.msk [vmem:[#allocation3 + $0x7e] sm:$0xff] %vm984_vm2, %v4115_v52  ;;  %v6308_v62 = vpop.f32.mrf.mxu1  ;;  %v4124_v26 = vmax.f32 %v4120_v40, %v4122_v22  ;;  %v5005_v35 = vld [vmem:[#allocation3 + $0x55] sm:$0xff] }
 0x408   :  { %4473 = vst.msk [vmem:[#allocation4] sm:$0xff] %vm1757_vm5, %v4411_v38  ;;  %5052 = vrot.lane.b32.xlu0 %v5004_v59, %s6355_s6  ;;  %v4378_v38 = vld [vmem:[#allocation3 + $0x52] sm:$0xff] }
 0x409   :  { %4802 = vrot.lane.b32.xlu1 %v4753_v6, %s6353_s14  ;;  %4118 = vst.msk [vmem:[#allocation3 + $0x86] sm:$0x3f] %vm1115_vm3, %v4116_v54  ;;  %v4125_v34 = vld [vmem:[#allocation2 + $0x24c] ss:$2 sm:$0xff]  ;;  %v4127_v0 = vld [vmem:[#allocation2 + $0x24d] ss:$2 sm:$0xff]  ;;  %v3722_v1 = vpop.f32.mrf.mxu1 }
 0x40a   :  { %3900 = vst.msk [vmem:[#allocation2 + $0x278] sm:$0xff] %vm984_vm2, %v6308_v62  ;;  %v4129_v53 = vmax.f32 %v4125_v34, %v4127_v0  ;;  %3899 = vst.msk [vmem:[#allocation2 + $0x270] sm:$0xff] %vm984_vm2, %v3722_v1 }
 0x40b   :  { %v6311_v7 = vpop.f32.mrf.mxu1 }
 0x40c   :  { %4552 = vrot.lane.b32.xlu0 %v8279_v57, %s6351_s29  ;;  %v4131_v32 = vmax.f32 %v4123_v13, %v4129_v53  ;;  %3902 = vst.msk [vmem:[#allocation2 + $0x288] sm:$0xff] %vm984_vm2, %v6311_v7 }
 0x40d   :  { %4302 = vrot.lane.b32.xlu1 %v4251_v44, %s6349_s15  ;;  %v3732_v14 = vpop.f32.mrf.mxu1 }
 0x40e   :  { %v4126_v10 = vld [vmem:[#allocation2 + $0x25c] ss:$2 sm:$0x3f]  ;;  %v4128_v11 = vld [vmem:[#allocation2 + $0x25d] ss:$2 sm:$0x3f]  ;;  %v4133_v56 = vadd.f32 %v8370_v46, %v4131_v32 }
 0x40f   :  { %v4130_v4 = vmax.f32 %v4126_v10, %v4128_v11  ;;  %3901 = vst.msk [vmem:[#allocation2 + $0x280] sm:$0xff] %vm984_vm2, %v3732_v14  ;;  %v6314_v37 = vpop.f32.mrf.mxu1  ;;  %v8394_v18 = vld [vmem:[#allocation3 + $0x78] sm:$0xff] }
 0x410   :  { %v8396_v57 = vld [vmem:[#allocation3 + $0x7e] sm:$0xff]  ;;  %4678 = vrot.lane.b32.xlu0 %v4628_v17, %s6352_s9  ;;  %v4135_v19 = vmax.f32 %v4133_v56, 0.0  ;;  %3904 = vst.msk [vmem:[#allocation2 + $0x298] sm:$0xff] %vm984_vm2, %v6314_v37  ;;  %4236 = vst.msk [vmem:[#allocation4 + $0xf0] sm:$0xff] %vm984_vm2, %v8394_v18 }
 0x411   :  { %4428 = vrot.lane.b32.xlu1 %v4377_v15, %s6350_s20  ;;  %v4132_v39 = vmax.f32 %v4124_v26, %v4130_v4  ;;  %v8400_v20 = vld [vmem:[#allocation3 + $0x80] sm:$0xff]  ;;  %5157 = vst.msk [vmem:[#allocation4 + $0xc8] sm:$0xff] %vm984_vm2, %v8396_v57  ;;  %v3742_v23 = vpop.f32.mrf.mxu1 }
 0x412   :  { %v4663_v3 = vpop.permute.xlu0 %4662  ;;  %4237 = vst.msk [vmem:[#allocation4 + $0x100] sm:$0xff] %vm984_vm2, %v8400_v20  ;;  %4137 = vst.msk [vmem:[#allocation3 + $0x8c] sm:$0xff] %vm984_vm2, %v4135_v19  ;;  %v4139_v42 = vld [vmem:[#allocation2 + $0x268] ss:$2 sm:$0xff]  ;;  %v4141_v9 = vld [vmem:[#allocation2 + $0x269] ss:$2 sm:$0xff] }
 0x413   :  { %v4537_v51 = vpop.permute.xlu1 %4536  ;;  %v4134_v25 = vadd.f32 %v8370_v46, %v4132_v39  ;;  %3903 = vst.msk [vmem:[#allocation2 + $0x290] sm:$0xff] %vm984_vm2, %v3742_v23  ;;  %v6317_v5 = vpop.f32.mrf.mxu1  ;;  %v4143_v60 = vmax.f32 %v4139_v42, %v4141_v9  ;;  %v4880_v26 = vld [vmem:[#allocation3 + $0x5c] sm:$0xff] }
 0x414   :  { %4599 = vst.msk [vmem:[#allocation4] sm:$0xff] %vm1884_vm6, %v4537_v51  ;;  %4804 = vrot.lane.b32.xlu0 %v8283_v48, %s6353_s14  ;;  %v5006_v39 = vld [vmem:[#allocation3 + $0x5d] sm:$0xff] }
 0x415   :  { %4725 = vst.msk [vmem:[#allocation4] sm:$0xff] %vm2011_vm7, %v4663_v3  ;;  %4928 = vrot.lane.b32.xlu1 %v4879_v21, %s6354_s30  ;;  %v4136_v63 = vmax.f32 %v4134_v25, 0.0  ;;  %v3752_v43 = vpop.f32.mrf.mxu1  ;;  %v4379_v9 = vld [vmem:[#allocation3 + $0x5a] sm:$0xff] }
 0x416   :  { %v4789_v27 = vpop.permute.xlu0 %4788  ;;  %3906 = vst.msk [vmem:[#allocation2 + $0x2a8] sm:$0xff] %vm984_vm2, %v6317_v5  ;;  %v4140_v48 = vld [vmem:[#allocation2 + $0x278] ss:$2 sm:$0x3f]  ;;  %3905 = vst.msk [vmem:[#allocation2 + $0x2a0] sm:$0xff] %vm984_vm2, %v3752_v43 }
 0x417   :  { %v4287_v28 = vpop.permute.xlu1 %4286  ;;  %4851 = vst.msk [vmem:[#allocation4] sm:$0xff] %vm2138_vm8, %v4789_v27  ;;  %v4142_v55 = vld [vmem:[#allocation2 + $0x279] ss:$2 sm:$0x3f]  ;;  %v6320_v24 = vpop.f32.mrf.mxu1 }
 0x418   :  { %4348 = vst.msk [vmem:[#allocation4 + $0x10] sm:$0xff] %vm1630_vm4, %v4287_v28  ;;  %4304 = vrot.lane.b32.xlu0 %v4252_v16, %s6349_s15  ;;  %v4144_v52 = vmax.f32 %v4140_v48, %v4142_v55 }
 0x419   :  { %4138 = vst.msk [vmem:[#allocation3 + $0x94] sm:$0x3f] %vm1115_vm3, %v4136_v63  ;;  %5054 = vrot.lane.b32.xlu1 %v5005_v35, %s6355_s6  ;;  %v8424_v50 = vld [vmem:[#allocation3 + $0x86] sm:$0xff]  ;;  %v3762_v58 = vpop.f32.mrf.mxu1 }
 0x41a   :  { %v4289_v47 = vpop.permute.xlu0 %4288  ;;  %3908 = vst.msk [vmem:[#allocation2 + $0x2b8] sm:$0xff] %vm984_vm2, %v6320_v24  ;;  %v4145_v54 = vld [vmem:[#allocation2 + $0x284] ss:$2 sm:$0xff]  ;;  %v4146_v8 = vld [vmem:[#allocation2 + $0x294] ss:$2 sm:$0x3f] }
 0x41b   :  { %v4413_v49 = vpop.permute.xlu1 %4412  ;;  %4349 = vst.msk [vmem:[#allocation4 + $0x20] sm:$0xff] %vm1630_vm4, %v4289_v47  ;;  %v4147_v31 = vld [vmem:[#allocation2 + $0x285] ss:$2 sm:$0xff]  ;;  %v4148_v6 = vld [vmem:[#allocation2 + $0x295] ss:$2 sm:$0x3f]  ;;  %v6323_v40 = vpop.f32.mrf.mxu1 }
 0x41c   :  { %4474 = vst.msk [vmem:[#allocation4 + $0x10] sm:$0xff] %vm1757_vm5, %v4413_v49  ;;  %v8433_v59 = vld [vmem:[#allocation3 + $0x88] sm:$0xff]  ;;  %4430 = vrot.lane.b32.xlu0 %v4378_v38, %s6350_s20  ;;  %v4149_v62 = vmax.f32 %v4145_v54, %v4147_v31  ;;  %v4150_v13 = vmax.f32 %v4146_v8, %v4148_v6  ;;  %v4630_v38 = vld [vmem:[#allocation3 + $0x5f] sm:$0xff] }
 0x41d   :  { %5158 = vst.msk [vmem:[#allocation4 + $0xd8] sm:$0xff] %vm984_vm2, %v8424_v50  ;;  %4554 = vrot.lane.b32.xlu1 %v8292_v33, %s6351_s29  ;;  %3907 = vst.msk [vmem:[#allocation2 + $0x2b0] sm:$0xff] %vm984_vm2, %v3762_v58  ;;  %v4629_v33 = vld [vmem:[#allocation3 + $0x57] sm:$0xff]  ;;  %v3772_v53 = vpop.f32.mrf.mxu1 }
 0x41e   :  { %4238 = vst.msk [vmem:[#allocation4 + $0x110] sm:$0xff] %vm984_vm2, %v8433_v59  ;;  %v4415_v22 = vpop.permute.xlu0 %4414  ;;  %3910 = vst.msk [vmem:[#allocation2 + $0x2c8] sm:$0xff] %vm984_vm2, %v6323_v40  ;;  %v4151_v1 = vmax.f32 %v4143_v60, %v4149_v62  ;;  %v4152_v44 = vmax.f32 %v4144_v52, %v4150_v13  ;;  %v4159_v17 = vld [vmem:[#allocation2 + $0x2a0] ss:$2 sm:$0xff]  ;;  %v4161_v37 = vld [vmem:[#allocation2 + $0x2a1] ss:$2 sm:$0xff] }
 0x41f   :  { %v4539_v34 = vpop.permute.xlu1 %4538  ;;  %4475 = vst.msk [vmem:[#allocation4 + $0x20] sm:$0xff] %vm1757_vm5, %v4415_v22  ;;  %v6326_v11 = vpop.f32.mrf.mxu1  ;;  %v4163_v25 = vmax.f32 %v4159_v17, %v4161_v37  ;;  %v5169_v22 = vld [vmem:[#allocation4 + $0x18] sm:$0xff] }
 0x420   :  { %v8439_v0 = vld [vmem:[#allocation3 + $0x8e] sm:$0xff]  ;;  %4600 = vst.msk [vmem:[#allocation4 + $0x10] sm:$0xff] %vm1884_vm6, %v4539_v34  ;;  %4930 = vrot.lane.b32.xlu0 %v4880_v26, %s6354_s30  ;;  %v4153_v32 = vadd.f32 %v8370_v46, %v4151_v1  ;;  %v4154_v10 = vadd.f32 %v8370_v46, %v4152_v44  ;;  %v4881_v34 = vld [vmem:[#allocation3 + $0x64] sm:$0xff] }
 0x421   :  { %v8443_v7 = vld [vmem:[#allocation3 + $0x90] sm:$0xff]  ;;  %5159 = vst.msk [vmem:[#allocation4 + $0xe8] sm:$0xff] %vm984_vm2, %v8439_v0  ;;  %4680 = vrot.lane.b32.xlu1 %v4629_v33, %s6352_s9  ;;  %3909 = vst.msk [vmem:[#allocation2 + $0x2c0] sm:$0xff] %vm984_vm2, %v3772_v53  ;;  %v3782_v19 = vpop.f32.mrf.mxu1  ;;  %v5007_v26 = vld [vmem:[#allocation3 + $0x65] sm:$0xff] }
 0x422   :  { %4239 = vst.msk [vmem:[#allocation4 + $0x120] sm:$0xff] %vm984_vm2, %v8443_v7  ;;  %v4915_v14 = vpop.permute.xlu0 %4914  ;;  %3912 = vst.msk [vmem:[#allocation2 + $0x2d8] sm:$0xff] %vm984_vm2, %v6326_v11  ;;  %v4155_v56 = vmax.f32 %v4153_v32, 0.0  ;;  %v4156_v4 = vmax.f32 %v4154_v10, 0.0  ;;  %v4254_v11 = vld [vmem:[#allocation3 + $0x61] sm:$0xff] }
 0x423   :  { %v4665_v15 = vpop.permute.xlu1 %4664  ;;  %4977 = vst.msk [vmem:[#allocation4] sm:$0xff] %vm2265_vm9, %v4915_v14  ;;  %v6329_v3 = vpop.f32.mrf.mxu1 }
 0x424   :  { %4726 = vst.msk [vmem:[#allocation4 + $0x10] sm:$0xff] %vm2011_vm7, %v4665_v15  ;;  %5056 = vrot.lane.b32.xlu0 %v5006_v39, %s6355_s6  ;;  %v4160_v23 = vld [vmem:[#allocation2 + $0x2b0] ss:$2 sm:$0x3f] }
 0x425   :  { %4806 = vrot.lane.b32.xlu1 %v8294_v30, %s6353_s14  ;;  %3911 = vst.msk [vmem:[#allocation2 + $0x2d0] sm:$0xff] %vm984_vm2, %v3782_v19  ;;  %4157 = vst.msk [vmem:[#allocation3 + $0x9a] sm:$0xff] %vm984_vm2, %v4155_v56  ;;  %v4162_v63 = vld [vmem:[#allocation2 + $0x2b1] ss:$2 sm:$0x3f]  ;;  %v4253_v30 = vld [vmem:[#allocation3 + $0x59] sm:$0xff]  ;;  %v3792_v28 = vpop.f32.mrf.mxu1 }
 0x426   :  { %4158 = vst.msk [vmem:[#allocation3 + $0xa2] sm:$0x3f] %vm1115_vm3, %v4156_v4  ;;  %v5041_v21 = vpop.permute.xlu0 %5040  ;;  %v4164_v43 = vmax.f32 %v4160_v23, %v4162_v63 }
 0x427   :  { %v4791_v51 = vpop.permute.xlu1 %4790  ;;  %3914 = vst.msk [vmem:[#allocation2 + $0x2e8] sm:$0xff] %vm984_vm2, %v6329_v3  ;;  %3913 = vst.msk [vmem:[#allocation2 + $0x2e0] sm:$0xff] %vm984_vm2, %v3792_v28  ;;  %v6332_v35 = vpop.f32.mrf.mxu1  ;;  %v4631_v28 = vld [vmem:[#allocation3 + $0x67] sm:$0xff] }
 0x428   :  { %4852 = vst.msk [vmem:[#allocation4 + $0x10] sm:$0xff] %vm2138_vm8, %v4791_v51  ;;  %v4165_v5 = vld [vmem:[#allocation2 + $0x2bc] ss:$2 sm:$0xff]  ;;  %v4167_v27 = vld [vmem:[#allocation2 + $0x2bd] ss:$2 sm:$0xff]  ;;  %4556 = vrot.lane.b32.xlu0 %v8319_v2, %s6351_s29  ;;  %v4380_v51 = vld [vmem:[#allocation3 + $0x62] sm:$0xff] }
 0x429   :  { %5103 = vst.msk [vmem:[#allocation4] sm:$0xff] %vm2392_vm11, %v5041_v21  ;;  %4306 = vrot.lane.b32.xlu1 %v4253_v30, %s6349_s15  ;;  %v4169_v16 = vmax.f32 %v4165_v5, %v4167_v27  ;;  %v3802_v49 = vpop.f32.mrf.mxu1 }
 0x42a   :  { %3916 = vst.msk [vmem:[#allocation2 + $0x2f8] sm:$0xff] %vm984_vm2, %v6332_v35  ;;  %v4541_v55 = vpop.permute.xlu0 %4540  ;;  %3915 = vst.msk [vmem:[#allocation2 + $0x2f0] sm:$0xff] %vm984_vm2, %v3802_v49 }
 0x42b   :  { %v4291_v42 = vpop.permute.xlu1 %4290  ;;  %v4171_v48 = vmax.f32 %v4163_v25, %v4169_v16  ;;  %4601 = vst.msk [vmem:[#allocation4 + $0x20] sm:$0xff] %vm1884_vm6, %v4541_v55  ;;  %v6335_v54 = vpop.f32.mrf.mxu1 }
 0x42c   :  { %4350 = vst.msk [vmem:[#allocation4 + $0x30] sm:$0xff] %vm1630_vm4, %v4291_v42  ;;  %v4166_v24 = vld [vmem:[#allocation2 + $0x2cc] ss:$2 sm:$0x3f]  ;;  %4682 = vrot.lane.b32.xlu0 %v4630_v38, %s6352_s9  ;;  %v4882_v42 = vld [vmem:[#allocation3 + $0x6c] sm:$0xff] }
 0x42d   :  { %v4168_v47 = vld [vmem:[#allocation2 + $0x2cd] ss:$2 sm:$0x3f]  ;;  %4432 = vrot.lane.b32.xlu1 %v4379_v9, %s6350_s20  ;;  %v4173_v2 = vadd.f32 %v8370_v46, %v4171_v48  ;;  %3918 = vst.msk [vmem:[#allocation2 + $0x308] sm:$0xff] %vm984_vm2, %v6335_v54  ;;  %v3812_v33 = vpop.f32.mrf.mxu1  ;;  %v4255_v54 = vld [vmem:[#allocation3 + $0x69] sm:$0xff] }
 0x42e   :  { %v4170_v60 = vmax.f32 %v4166_v24, %v4168_v47  ;;  %v8476_v52 = vld [vmem:[#allocation3 + $0x96] sm:$0xff]  ;;  %v8484_v13 = vld [vmem:[#allocation3 + $0x9e] sm:$0xff]  ;;  %v4667_v40 = vpop.permute.xlu0 %4666  ;;  %3917 = vst.msk [vmem:[#allocation2 + $0x300] sm:$0xff] %vm984_vm2, %v3812_v33 }
 0x42f   :  { %5160 = vst.msk [vmem:[#allocation4 + $0xf8] sm:$0xff] %vm984_vm2, %v8476_v52  ;;  %v4417_v8 = vpop.permute.xlu1 %4416  ;;  %v4175_v31 = vmax.f32 %v4173_v2, 0.0  ;;  %v8482_v62 = vld [vmem:[#allocation3 + $0x98] sm:$0xff]  ;;  %5161 = vst.msk [vmem:[#allocation4 + $0x108] sm:$0xff] %vm984_vm2, %v8484_v13  ;;  %v8497_v44 = vld [vmem:[#allocation3 + $0xa0] sm:$0xff] }
 0x430   :  { %v5166_v58 = vld [vmem:[#allocation4] sm:$0xff]  ;;  %v4172_v6 = vmax.f32 %v4164_v43, %v4170_v60  ;;  %4476 = vst.msk [vmem:[#allocation4 + $0x30] sm:$0xff] %vm1757_vm5, %v4417_v8  ;;  %4808 = vrot.lane.b32.xlu0 %v8322_v36, %s6353_s14  ;;  %v5171_v47 = vld [vmem:[#allocation4 + $0x28] sm:$0xff] }
 0x431   :  { %5354 = vmatmul.mubr.f32.vlgmr.msra.gmra.mxu0 %v5166_v58  ;;  %4240 = vst.msk [vmem:[#allocation4 + $0x130] sm:$0xff] %vm984_vm2, %v8482_v62  ;;  %4932 = vrot.lane.b32.xlu1 %v4881_v34, %s6354_s30  ;;  %4177 = vst.msk [vmem:[#allocation3 + $0xa8] sm:$0xff] %vm984_vm2, %v4175_v31  ;;  %v4179_v14 = vld [vmem:[#allocation2 + $0x2d8] ss:$2 sm:$0xff]  ;;  %v4181_v15 = vld [vmem:[#allocation2 + $0x2d9] ss:$2 sm:$0xff] }
 0x432   :  { %4727 = vst.msk [vmem:[#allocation4 + $0x20] sm:$0xff] %vm2011_vm7, %v4667_v40  ;;  %5766 = vmatprep.mubr.msk.f32.mxu0 %vm984_vm2, %v5169_v22  ;;  %v4174_v1 = vadd.f32 %v8370_v46, %v4172_v6  ;;  %v4793_v10 = vpop.permute.xlu0 %4792  ;;  %v4180_v56 = vld [vmem:[#allocation2 + $0x2e8] ss:$2 sm:$0x3f]  ;;  %v4183_v37 = vmax.f32 %v4179_v14, %v4181_v15  ;;  %v5008_v2 = vld [vmem:[#allocation3 + $0x6d] sm:$0xff] }
 0x433   :  { %4241 = vst.msk [vmem:[#allocation4 + $0x140] sm:$0xff] %vm984_vm2, %v8497_v44  ;;  %v4917_v53 = vpop.permute.xlu1 %4916  ;;  %v4182_v36 = vld [vmem:[#allocation2 + $0x2e9] ss:$2 sm:$0x3f]  ;;  %v4381_v58 = vld [vmem:[#allocation3 + $0x6a] sm:$0xff] }
 0x434   :  { %v4176_v32 = vmax.f32 %v4174_v1, 0.0  ;;  %4978 = vst.msk [vmem:[#allocation4 + $0x10] sm:$0xff] %vm2265_vm9, %v4917_v53  ;;  %4308 = vrot.lane.b32.xlu0 %v4254_v11, %s6349_s15  ;;  %v4184_v19 = vmax.f32 %v4180_v56, %v4182_v36  ;;  %v4632_v31 = vld [vmem:[#allocation3 + $0x6f] sm:$0xff]  ;;  %v5173_v1 = vld [vmem:[#allocation4 + $0x38] sm:$0xff]  ;;  %v4633_v36 = vld [vmem:[#allocation3 + $0x77] sm:$0xff] }
 0x435   :  { %4853 = vst.msk [vmem:[#allocation4 + $0x20] sm:$0xff] %vm2138_vm8, %v4793_v10  ;;  %5058 = vrot.lane.b32.xlu1 %v5007_v26, %s6355_s6  ;;  %v4185_v39 = vld [vmem:[#allocation2 + $0x2f4] ss:$2 sm:$0xff]  ;;  %v4186_v3 = vld [vmem:[#allocation2 + $0x304] ss:$2 sm:$0x3f] }
 0x436   :  { %4178 = vst.msk [vmem:[#allocation3 + $0xb0] sm:$0x3f] %vm1115_vm3, %v4176_v32  ;;  %v4293_v17 = vpop.permute.xlu0 %4292  ;;  %v4187_v21 = vld [vmem:[#allocation2 + $0x2f5] ss:$2 sm:$0xff]  ;;  %v5009_v32 = vld [vmem:[#allocation3 + $0x75] sm:$0xff] }
 0x437   :  { %v5043_v4 = vpop.permute.xlu1 %5042  ;;  %4351 = vst.msk [vmem:[#allocation4 + $0x40] sm:$0xff] %vm1630_vm4, %v4293_v17  ;;  %v4188_v25 = vld [vmem:[#allocation2 + $0x305] ss:$2 sm:$0x3f]  ;;  %v4189_v23 = vmax.f32 %v4185_v39, %v4187_v21  ;;  %v4885_v21 = vld [vmem:[#allocation3 + $0x84] sm:$0xff] }
 0x438   :  { %5104 = vst.msk [vmem:[#allocation4 + $0x10] sm:$0xff] %vm2392_vm11, %v5043_v4  ;;  %4434 = vrot.lane.b32.xlu0 %v4380_v51, %s6350_s20  ;;  %v4190_v63 = vmax.f32 %v4186_v3, %v4188_v25  ;;  %v8513_v30 = vld [vmem:[#allocation3 + $0xa6] sm:$0xff]  ;;  %v4256_v10 = vld [vmem:[#allocation3 + $0x71] sm:$0xff]  ;;  %v4884_v4 = vld [vmem:[#allocation3 + $0x7c] sm:$0xff] }
 0x439   :  { %4558 = vrot.lane.b32.xlu1 %v8328_v45, %s6351_s29  ;;  %5162 = vst.msk [vmem:[#allocation4 + $0x118] sm:$0xff] %vm984_vm2, %v8513_v30  ;;  %v4191_v16 = vmax.f32 %v4183_v37, %v4189_v23  ;;  %v5010_v39 = vld [vmem:[#allocation3 + $0x7d] sm:$0xff] }
 0x43a   :  { %v4419_v27 = vpop.permute.xlu0 %4418  ;;  %v4192_v35 = vmax.f32 %v4184_v19, %v4190_v63  ;;  %v5175_v19 = vld [vmem:[#allocation4 + $0x48] sm:$0xff]  ;;  %v4257_v63 = vld [vmem:[#allocation3 + $0x79] sm:$0xff] }
 0x43b   :  { %v4543_v5 = vpop.permute.xlu1 %4542  ;;  %4477 = vst.msk [vmem:[#allocation4 + $0x40] sm:$0xff] %vm1757_vm5, %v4419_v27  ;;  %v4193_v9 = vadd.f32 %v8370_v46, %v4191_v16  ;;  %v4383_v16 = vld [vmem:[#allocation3 + $0x7a] sm:$0xff] }
 0x43c   :  { %4602 = vst.msk [vmem:[#allocation4 + $0x30] sm:$0xff] %vm1884_vm6, %v4543_v5  ;;  %4934 = vrot.lane.b32.xlu0 %v4882_v42, %s6354_s30  ;;  %v4194_v43 = vadd.f32 %v8370_v46, %v4192_v35 }
 0x43d   :  { %v8518_v45 = vld [vmem:[#allocation3 + $0xae] sm:$0xff]  ;;  %4684 = vrot.lane.b32.xlu1 %v4631_v28, %s6352_s9  ;;  %v4195_v49 = vmax.f32 %v4193_v9, 0.0  ;;  %v5011_v9 = vld [vmem:[#allocation3 + $0x85] sm:$0xff] }
 0x43e   :  { %5163 = vst.msk [vmem:[#allocation4 + $0x128] sm:$0xff] %vm984_vm2, %v8518_v45  ;;  %v4919_v24 = vpop.permute.xlu0 %4918  ;;  %v4196_v38 = vmax.f32 %v4194_v43, 0.0  ;;  %v4258_v43 = vld [vmem:[#allocation3 + $0x81] sm:$0xff] }
 0x43f   :  { %v4669_v48 = vpop.permute.xlu1 %4668  ;;  %v5168_v55 = vld [vmem:[#allocation4 + $0x10] sm:$0xff]  ;;  %4979 = vst.msk [vmem:[#allocation4 + $0x20] sm:$0xff] %vm2265_vm9, %v4919_v24  ;;  %v4384_v24 = vld [vmem:[#allocation3 + $0x82] sm:$0xff] }
 0x440   :  { %4728 = vst.msk [vmem:[#allocation4 + $0x30] sm:$0xff] %vm2011_vm7, %v4669_v48  ;;  %5359 = vmatmul.mubr.f32.gmra.mxu0 %v5168_v55  ;;  %5060 = vrot.lane.b32.xlu0 %v5008_v2, %s6355_s6 }
 0x441   :  { %5767 = vmatprep.mubr.msk.f32.mxu0 %vm984_vm2, %v5171_v47  ;;  %4810 = vrot.lane.b32.xlu1 %v8337_v12, %s6353_s14  ;;  %4197 = vst.msk [vmem:[#allocation3 + $0xb6] sm:$0xff] %vm984_vm2, %v4195_v49  ;;  %v4635_v49 = vld [vmem:[#allocation3 + $0x87] sm:$0xff] }
 0x442   :  { %4198 = vst.msk [vmem:[#allocation3 + $0xbe] sm:$0x3f] %vm1115_vm3, %v4196_v38  ;;  %v5045_v60 = vpop.permute.xlu0 %5044  ;;  %v4886_v38 = vld [vmem:[#allocation3 + $0x8c] sm:$0xff] }
 0x443   :  { %v4795_v46 = vpop.permute.xlu1 %4794  ;;  %5105 = vst.msk [vmem:[#allocation4 + $0x20] sm:$0xff] %vm2392_vm11, %v5045_v60 }
 0x444   :  { %4854 = vst.msk [vmem:[#allocation4 + $0x30] sm:$0xff] %vm2138_vm8, %v4795_v46  ;;  %4560 = vrot.lane.b32.xlu0 %v8353_v29, %s6351_s29  ;;  %v4883_v29 = vld [vmem:[#allocation3 + $0x74] sm:$0xff] }
 0x445   :  { %4310 = vrot.lane.b32.xlu1 %v4255_v54, %s6349_s15  ;;  %v5012_v54 = vld [vmem:[#allocation3 + $0x8d] sm:$0xff] }
 0x446   :  { %v4545_v8 = vpop.permute.xlu0 %4544 }
 0x447   :  { %v4295_v12 = vpop.permute.xlu1 %4294  ;;  %4603 = vst.msk [vmem:[#allocation4 + $0x40] sm:$0xff] %vm1884_vm6, %v4545_v8 }
 0x448   :  { %4352 = vst.msk [vmem:[#allocation4 + $0x50] sm:$0xff] %vm1630_vm4, %v4295_v12  ;;  %4686 = vrot.lane.b32.xlu0 %v4632_v31, %s6352_s9  ;;  %v5143_v40 = vld [vmem:[#allocation3 + $0xb6] sm:$0xff] }
 0x449   :  { %4436 = vrot.lane.b32.xlu1 %v4381_v58, %s6350_s20  ;;  %v5144_v22 = vld [vmem:[#allocation3 + $0xbe] sm:$0xff]  ;;  %5164 = vst.msk [vmem:[#allocation4 + $0x138] sm:$0xff] %vm984_vm2, %v5143_v40  ;;  %v4259_v58 = vld [vmem:[#allocation3 + $0x89] sm:$0xff] }
 0x44a   :  { %v4671_v34 = vpop.permute.xlu0 %4670  ;;  %v5170_v33 = vld [vmem:[#allocation4 + $0x20] sm:$0xff]  ;;  %5165 = vst.msk [vmem:[#allocation4 + $0x148] sm:$0xff] %vm984_vm2, %v5144_v22 }
 0x44b   :  { %v4421_v6 = vpop.permute.xlu1 %4420  ;;  %4729 = vst.msk [vmem:[#allocation4 + $0x40] sm:$0xff] %vm2011_vm7, %v4671_v34  ;;  %5364 = vmatmul.mubr.f32.gmra.mxu0 %v5170_v33  ;;  %v4636_v40 = vld [vmem:[#allocation3 + $0x8f] sm:$0xff] }
 0x44c   :  { %4478 = vst.msk [vmem:[#allocation4 + $0x50] sm:$0xff] %vm1757_vm5, %v4421_v6  ;;  %5768 = vmatprep.mubr.msk.f32.mxu0 %vm984_vm2, %v5173_v1  ;;  %4812 = vrot.lane.b32.xlu0 %v8357_v41, %s6353_s14  ;;  %v4382_v41 = vld [vmem:[#allocation3 + $0x72] sm:$0xff] }
 0x44d   :  { %4936 = vrot.lane.b32.xlu1 %v4883_v29, %s6354_s30  ;;  %v4887_v29 = vld [vmem:[#allocation3 + $0x94] sm:$0xff] }
 0x44e   :  { %v4797_v26 = vpop.permute.xlu0 %4796 }
 0x44f   :  { %v4921_v53 = vpop.permute.xlu1 %4920  ;;  %4855 = vst.msk [vmem:[#allocation4 + $0x40] sm:$0xff] %vm2138_vm8, %v4797_v26  ;;  %v5013_v26 = vld [vmem:[#allocation3 + $0x95] sm:$0xff] }
 0x450   :  { %4980 = vst.msk [vmem:[#allocation4 + $0x30] sm:$0xff] %vm2265_vm9, %v4921_v53  ;;  %4312 = vrot.lane.b32.xlu0 %v4256_v10, %s6349_s15 }
 0x451   :  { %5062 = vrot.lane.b32.xlu1 %v5009_v32, %s6355_s6  ;;  %v4260_v32 = vld [vmem:[#allocation3 + $0x91] sm:$0xff] }
 0x452   :  { %v4297_v14 = vpop.permute.xlu0 %4296 }
 0x453   :  { %v5047_v11 = vpop.permute.xlu1 %5046  ;;  %4353 = vst.msk [vmem:[#allocation4 + $0x60] sm:$0xff] %vm1630_vm4, %v4297_v14  ;;  %v4386_v14 = vld [vmem:[#allocation3 + $0x92] sm:$0xff] }
 0x454   :  { %5106 = vst.msk [vmem:[#allocation4 + $0x30] sm:$0xff] %vm2392_vm11, %v5047_v11  ;;  %4438 = vrot.lane.b32.xlu0 %v4382_v41, %s6350_s20 }
 0x455   :  { %4562 = vrot.lane.b32.xlu1 %v8364_v61, %s6351_s29 }
 0x456   :  { %v4423_v56 = vpop.permute.xlu0 %4422 }
 0x457   :  { %v4547_v15 = vpop.permute.xlu1 %4546  ;;  %4479 = vst.msk [vmem:[#allocation4 + $0x60] sm:$0xff] %vm1757_vm5, %v4423_v56  ;;  %v4888_v56 = vld [vmem:[#allocation3 + $0x9c] sm:$0xff] }
 0x458   :  { %4604 = vst.msk [vmem:[#allocation4 + $0x50] sm:$0xff] %vm1884_vm6, %v4547_v15  ;;  %4938 = vrot.lane.b32.xlu0 %v4884_v4, %s6354_s30  ;;  %v4637_v15 = vld [vmem:[#allocation3 + $0x97] sm:$0xff] }
 0x459   :  { %4688 = vrot.lane.b32.xlu1 %v4633_v36, %s6352_s9 }
 0x45a   :  { %v4923_v61 = vpop.permute.xlu0 %4922 }
 0x45b   :  { %v4673_v17 = vpop.permute.xlu1 %4672  ;;  %v5172_v37 = vld [vmem:[#allocation4 + $0x30] sm:$0xff]  ;;  %4981 = vst.msk [vmem:[#allocation4 + $0x40] sm:$0xff] %vm2265_vm9, %v4923_v61 }
 0x45c   :  { %4730 = vst.msk [vmem:[#allocation4 + $0x50] sm:$0xff] %vm2011_vm7, %v4673_v17  ;;  %5369 = vmatmul.mubr.f32.gmra.mxu0 %v5172_v37  ;;  %5064 = vrot.lane.b32.xlu0 %v5010_v39, %s6355_s6  ;;  %v5014_v37 = vld [vmem:[#allocation3 + $0x9d] sm:$0xff] }
 0x45d   :  { %5769 = vmatprep.mubr.msk.f32.mxu0 %vm984_vm2, %v5175_v19  ;;  %4814 = vrot.lane.b32.xlu1 %v8394_v18, %s6353_s14  ;;  %v4634_v18 = vld [vmem:[#allocation3 + $0x7f] sm:$0xff] }
 0x45e   :  { %v5049_v51 = vpop.permute.xlu0 %5048  ;;  %v4261_v39 = vld [vmem:[#allocation3 + $0x99] sm:$0xff] }
 0x45f   :  { %v4799_v3 = vpop.permute.xlu1 %4798  ;;  %5107 = vst.msk [vmem:[#allocation4 + $0x40] sm:$0xff] %vm2392_vm11, %v5049_v51 }
 0x460   :  { %4856 = vst.msk [vmem:[#allocation4 + $0x50] sm:$0xff] %vm2138_vm8, %v4799_v3  ;;  %4564 = vrot.lane.b32.xlu0 %v8396_v57, %s6351_s29  ;;  %v5177_v57 = vld [vmem:[#allocation4 + $0x58] sm:$0xff] }
 0x461   :  { %4940 = vrot.lane.b32.xlu1 %v4885_v21, %s6354_s30  ;;  %v4387_v21 = vld [vmem:[#allocation3 + $0x9a] sm:$0xff] }
 0x462   :  { %v4549_v23 = vpop.permute.xlu0 %4548 }
 0x463   :  { %v4299_v25 = vpop.permute.xlu1 %4298  ;;  %4605 = vst.msk [vmem:[#allocation4 + $0x60] sm:$0xff] %vm1884_vm6, %v4549_v23 }
 0x464   :  { %4354 = vst.msk [vmem:[#allocation4 + $0x70] sm:$0xff] %vm1630_vm4, %v4299_v25  ;;  %4690 = vrot.lane.b32.xlu0 %v4634_v18, %s6352_s9  ;;  %v4889_v18 = vld [vmem:[#allocation3 + $0xa4] sm:$0xff] }
 0x465   :  { %4314 = vrot.lane.b32.xlu1 %v4257_v63, %s6349_s15 }
 0x466   :  { %v4675_v27 = vpop.permute.xlu0 %4674  ;;  %v5174_v28 = vld [vmem:[#allocation4 + $0x40] sm:$0xff] }
 0x467   :  { %v4425_v5 = vpop.permute.xlu1 %4424  ;;  %4731 = vst.msk [vmem:[#allocation4 + $0x60] sm:$0xff] %vm2011_vm7, %v4675_v27  ;;  %5374 = vmatmul.mubr.f32.gmra.mxu0 %v5174_v28  ;;  %v5015_v28 = vld [vmem:[#allocation3 + $0xa5] sm:$0xff] }
 0x468   :  { %4480 = vst.msk [vmem:[#allocation4 + $0x70] sm:$0xff] %vm1757_vm5, %v4425_v5  ;;  %5770 = vmatprep.mubr.msk.f32.mxu0 %vm984_vm2, %v5177_v57  ;;  %4816 = vrot.lane.b32.xlu0 %v8400_v20, %s6353_s14 }
 0x469   :  { %4440 = vrot.lane.b32.xlu1 %v4383_v16, %s6350_s20  ;;  %v4262_v16 = vld [vmem:[#allocation3 + $0xa1] sm:$0xff] }
 0x46a   :  { %v4801_v42 = vpop.permute.xlu0 %4800 }
 0x46b   :  { %v4925_v35 = vpop.permute.xlu1 %4924  ;;  %4857 = vst.msk [vmem:[#allocation4 + $0x60] sm:$0xff] %vm2138_vm8, %v4801_v42 }
 0x46c   :  { %4982 = vst.msk [vmem:[#allocation4 + $0x50] sm:$0xff] %vm2265_vm9, %v4925_v35  ;;  %4316 = vrot.lane.b32.xlu0 %v4258_v43, %s6349_s15  ;;  %v4639_v43 = vld [vmem:[#allocation3 + $0xa7] sm:$0xff] }
 0x46d   :  { %5066 = vrot.lane.b32.xlu1 %v5011_v9, %s6355_s6 }
 0x46e   :  { %v4927_v55 = vpop.permute.xlu0 %4926 }
 0x46f   :  { %v5051_v48 = vpop.permute.xlu1 %5050  ;;  %4983 = vst.msk [vmem:[#allocation4 + $0x60] sm:$0xff] %vm2265_vm9, %v4927_v55 }
 0x470   :  { %5108 = vst.msk [vmem:[#allocation4 + $0x50] sm:$0xff] %vm2392_vm11, %v5051_v48  ;;  %4442 = vrot.lane.b32.xlu0 %v4384_v24, %s6350_s20  ;;  %v4890_v48 = vld [vmem:[#allocation3 + $0xac] sm:$0xff] }
 0x471   :  { %4566 = vrot.lane.b32.xlu1 %v8424_v50, %s6351_s29  ;;  %v5179_v50 = vld [vmem:[#allocation4 + $0x68] sm:$0xff] }
 0x472   :  { %v4301_v47 = vpop.permute.xlu0 %4300 }
 0x473   :  { %v4551_v20 = vpop.permute.xlu1 %4550  ;;  %4355 = vst.msk [vmem:[#allocation4 + $0x80] sm:$0xff] %vm1630_vm4, %v4301_v47  ;;  %v4765_v47 = vld [vmem:[#allocation3 + $0xa8] sm:$0xff] }
 0x474   :  { %4606 = vst.msk [vmem:[#allocation4 + $0x70] sm:$0xff] %vm1884_vm6, %v4551_v20  ;;  %4942 = vrot.lane.b32.xlu0 %v4886_v38, %s6354_s30  ;;  %v5187_v20 = vld [vmem:[#allocation4 + $0xa8] sm:$0xff] }
 0x475   :  { %4692 = vrot.lane.b32.xlu1 %v4635_v49, %s6352_s9  ;;  %v5016_v49 = vld [vmem:[#allocation3 + $0xad] sm:$0xff] }
 0x476   :  { %v4427_v60 = vpop.permute.xlu0 %4426 }
 0x477   :  { %v4677_v2 = vpop.permute.xlu1 %4676  ;;  %v5176_v46 = vld [vmem:[#allocation4 + $0x50] sm:$0xff]  ;;  %4481 = vst.msk [vmem:[#allocation4 + $0x80] sm:$0xff] %vm1757_vm5, %v4427_v60 }
 0x478   :  { %4732 = vst.msk [vmem:[#allocation4 + $0x70] sm:$0xff] %vm2011_vm7, %v4677_v2  ;;  %5379 = vmatmul.mubr.f32.gmra.mxu0 %v5176_v46  ;;  %5068 = vrot.lane.b32.xlu0 %v5012_v54, %s6355_s6  ;;  %v4891_v46 = vld [vmem:[#allocation3 + $0xb4] sm:$0xff] }
 0x479   :  { %5771 = vmatprep.mubr.msk.f32.mxu0 %vm984_vm2, %v5179_v50  ;;  %4818 = vrot.lane.b32.xlu1 %v8433_v59, %s6353_s14  ;;  %v4385_v59 = vld [vmem:[#allocation3 + $0x8a] sm:$0xff]  ;;  %v5017_v54 = vld [vmem:[#allocation3 + $0xb5] sm:$0xff] }
 0x47a   :  { %v5053_v8 = vpop.permute.xlu0 %5052 }
 0x47b   :  { %v4803_v12 = vpop.permute.xlu1 %4802  ;;  %5109 = vst.msk [vmem:[#allocation4 + $0x60] sm:$0xff] %vm2392_vm11, %v5053_v8 }
 0x47c   :  { %4858 = vst.msk [vmem:[#allocation4 + $0x70] sm:$0xff] %vm2138_vm8, %v4803_v12  ;;  %4568 = vrot.lane.b32.xlu0 %v8439_v0, %s6351_s29  ;;  %v5181_v0 = vld [vmem:[#allocation4 + $0x78] sm:$0xff]  ;;  %v4640_v12 = vld [vmem:[#allocation3 + $0xaf] sm:$0xff] }
 0x47d   :  { %4318 = vrot.lane.b32.xlu1 %v4259_v58, %s6349_s15 }
 0x47e   :  { %v4553_v6 = vpop.permute.xlu0 %4552 }
 0x47f   :  { %v4303_v31 = vpop.permute.xlu1 %4302  ;;  %4607 = vst.msk [vmem:[#allocation4 + $0x80] sm:$0xff] %vm1884_vm6, %v4553_v6  ;;  %v4766_v6 = vld [vmem:[#allocation3 + $0xb0] sm:$0xff] }
 0x480   :  { %4356 = vst.msk [vmem:[#allocation4 + $0x90] sm:$0xff] %vm1630_vm4, %v4303_v31  ;;  %4694 = vrot.lane.b32.xlu0 %v4636_v40, %s6352_s9 }
 0x481   :  { %4444 = vrot.lane.b32.xlu1 %v4385_v59, %s6350_s20  ;;  %v4892_v59 = vld [vmem:[#allocation3 + $0xbc] sm:$0xff] }
 0x482   :  { %v4679_v34 = vpop.permute.xlu0 %4678  ;;  %v5178_v33 = vld [vmem:[#allocation4 + $0x60] sm:$0xff] }
 0x483   :  { %v4429_v22 = vpop.permute.xlu1 %4428  ;;  %4733 = vst.msk [vmem:[#allocation4 + $0x80] sm:$0xff] %vm2011_vm7, %v4679_v34  ;;  %5384 = vmatmul.mubr.f32.gmra.mxu0 %v5178_v33  ;;  %v5018_v34 = vld [vmem:[#allocation3 + $0xbd] sm:$0xff] }
 0x484   :  { %4482 = vst.msk [vmem:[#allocation4 + $0x90] sm:$0xff] %vm1757_vm5, %v4429_v22  ;;  %5772 = vmatprep.mubr.msk.f32.mxu0 %vm984_vm2, %v5181_v0  ;;  %4820 = vrot.lane.b32.xlu0 %v8443_v7, %s6353_s14 }
 0x485   :  { %4944 = vrot.lane.b32.xlu1 %v4887_v29, %s6354_s30 }
 0x486   :  { %v4805_v53 = vpop.permute.xlu0 %4804 }
 0x487   :  { %v4929_v1 = vpop.permute.xlu1 %4928  ;;  %4859 = vst.msk [vmem:[#allocation4 + $0x80] sm:$0xff] %vm2138_vm8, %v4805_v53 }
 0x488   :  { %4984 = vst.msk [vmem:[#allocation4 + $0x70] sm:$0xff] %vm2265_vm9, %v4929_v1  ;;  %4320 = vrot.lane.b32.xlu0 %v4260_v32, %s6349_s15 }
 0x489   :  { %5070 = vrot.lane.b32.xlu1 %v5013_v26, %s6355_s6 }
 0x48a   :  { %v4305_v11 = vpop.permute.xlu0 %4304 }
 0x48b   :  { %v5055_v10 = vpop.permute.xlu1 %5054  ;;  %4357 = vst.msk [vmem:[#allocation4 + $0xa0] sm:$0xff] %vm1630_vm4, %v4305_v11 }
 0x48c   :  { %5110 = vst.msk [vmem:[#allocation4 + $0x70] sm:$0xff] %vm2392_vm11, %v5055_v10  ;;  %4446 = vrot.lane.b32.xlu0 %v4386_v14, %s6350_s20  ;;  %v5191_v10 = vld [vmem:[#allocation4 + $0xc8] sm:$0xff] }
 0x48d   :  { %4570 = vrot.lane.b32.xlu1 %v8476_v52, %s6351_s29  ;;  %v5183_v52 = vld [vmem:[#allocation4 + $0x88] sm:$0xff] }
 0x48e   :  { %v4431_v41 = vpop.permute.xlu0 %4430 }
 0x48f   :  { %v4555_v7 = vpop.permute.xlu1 %4554  ;;  %4483 = vst.msk [vmem:[#allocation4 + $0xa0] sm:$0xff] %vm1757_vm5, %v4431_v41 }
 0x490   :  { %4608 = vst.msk [vmem:[#allocation4 + $0x90] sm:$0xff] %vm1884_vm6, %v4555_v7  ;;  %4946 = vrot.lane.b32.xlu0 %v4888_v56, %s6354_s30 }
 0x491   :  { %4696 = vrot.lane.b32.xlu1 %v4637_v15, %s6352_s9 }
 0x492   :  { %v4931_v17 = vpop.permute.xlu0 %4930 }
 0x493   :  { %v4681_v36 = vpop.permute.xlu1 %4680  ;;  %v5180_v4 = vld [vmem:[#allocation4 + $0x70] sm:$0xff]  ;;  %4985 = vst.msk [vmem:[#allocation4 + $0x80] sm:$0xff] %vm2265_vm9, %v4931_v17 }
 0x494   :  { %4734 = vst.msk [vmem:[#allocation4 + $0x90] sm:$0xff] %vm2011_vm7, %v4681_v36  ;;  %5389 = vmatmul.mubr.f32.gmra.mxu0 %v5180_v4  ;;  %5072 = vrot.lane.b32.xlu0 %v5014_v37, %s6355_s6  ;;  %v5193_v4 = vld [vmem:[#allocation4 + $0xd8] sm:$0xff] }
 0x495   :  { %5773 = vmatprep.mubr.msk.f32.mxu0 %vm984_vm2, %v5183_v52  ;;  %4822 = vrot.lane.b32.xlu1 %v8482_v62, %s6353_s14  ;;  %v4638_v62 = vld [vmem:[#allocation3 + $0x9f] sm:$0xff] }
 0x496   :  { %v5057_v19 = vpop.permute.xlu0 %5056 }
 0x497   :  { %v4807_v61 = vpop.permute.xlu1 %4806  ;;  %5111 = vst.msk [vmem:[#allocation4 + $0x80] sm:$0xff] %vm2392_vm11, %v5057_v19 }
 0x498   :  { %4860 = vst.msk [vmem:[#allocation4 + $0x90] sm:$0xff] %vm2138_vm8, %v4807_v61  ;;  %4572 = vrot.lane.b32.xlu0 %v8484_v13, %s6351_s29  ;;  %v5185_v13 = vld [vmem:[#allocation4 + $0x98] sm:$0xff] }
 0x499   :  { %4322 = vrot.lane.b32.xlu1 %v4261_v39, %s6349_s15 }
 0x49a   :  { %v4557_v51 = vpop.permute.xlu0 %4556 }
 0x49b   :  { %v4307_v3 = vpop.permute.xlu1 %4306  ;;  %4609 = vst.msk [vmem:[#allocation4 + $0xa0] sm:$0xff] %vm1884_vm6, %v4557_v51 }
 0x49c   :  { %4358 = vst.msk [vmem:[#allocation4 + $0xb0] sm:$0xff] %vm1630_vm4, %v4307_v3  ;;  %4698 = vrot.lane.b32.xlu0 %v4638_v62, %s6352_s9  ;;  %v5195_v62 = vld [vmem:[#allocation4 + $0xe8] sm:$0xff] }
 0x49d   :  { %4448 = vrot.lane.b32.xlu1 %v4387_v21, %s6350_s20 }
 0x49e   :  { %v4683_v23 = vpop.permute.xlu0 %4682  ;;  %v5182_v63 = vld [vmem:[#allocation4 + $0x80] sm:$0xff] }
 0x49f   :  { %v4433_v25 = vpop.permute.xlu1 %4432  ;;  %4735 = vst.msk [vmem:[#allocation4 + $0xa0] sm:$0xff] %vm2011_vm7, %v4683_v23  ;;  %5394 = vmatmul.mubr.f32.gmra.mxu0 %v5182_v63 }
 0x4a0   :  { %4484 = vst.msk [vmem:[#allocation4 + $0xb0] sm:$0xff] %vm1757_vm5, %v4433_v25  ;;  %5774 = vmatprep.mubr.msk.f32.mxu0 %vm984_vm2, %v5185_v13  ;;  %4824 = vrot.lane.b32.xlu0 %v8497_v44, %s6353_s14  ;;  %v4388_v44 = vld [vmem:[#allocation3 + $0xa2] sm:$0xff] }
 0x4a1   :  { %4948 = vrot.lane.b32.xlu1 %v4889_v18, %s6354_s30 }
 0x4a2   :  { %v4809_v27 = vpop.permute.xlu0 %4808 }
 0x4a3   :  { %v4933_v5 = vpop.permute.xlu1 %4932  ;;  %4861 = vst.msk [vmem:[#allocation4 + $0xa0] sm:$0xff] %vm2138_vm8, %v4809_v27 }
 0x4a4   :  { %4986 = vst.msk [vmem:[#allocation4 + $0x90] sm:$0xff] %vm2265_vm9, %v4933_v5  ;;  %4324 = vrot.lane.b32.xlu0 %v4262_v16, %s6349_s15 }
 0x4a5   :  { %5074 = vrot.lane.b32.xlu1 %v5015_v28, %s6355_s6 }
 0x4a6   :  { %v4309_v35 = vpop.permute.xlu0 %4308 }
 0x4a7   :  { %v5059_v57 = vpop.permute.xlu1 %5058  ;;  %4359 = vst.msk [vmem:[#allocation4 + $0xc0] sm:$0xff] %vm1630_vm4, %v4309_v35 }
 0x4a8   :  { %5112 = vst.msk [vmem:[#allocation4 + $0x90] sm:$0xff] %vm2392_vm11, %v5059_v57  ;;  %4450 = vrot.lane.b32.xlu0 %v4388_v44, %s6350_s20  ;;  %v5197_v57 = vld [vmem:[#allocation4 + $0xf8] sm:$0xff] }
 0x4a9   :  { %4574 = vrot.lane.b32.xlu1 %v8513_v30, %s6351_s29 }
 0x4aa   :  { %v4435_v9 = vpop.permute.xlu0 %4434 }
 0x4ab   :  { %v4559_v42 = vpop.permute.xlu1 %4558  ;;  %4485 = vst.msk [vmem:[#allocation4 + $0xc0] sm:$0xff] %vm1757_vm5, %v4435_v9 }
 0x4ac   :  { %4610 = vst.msk [vmem:[#allocation4 + $0xb0] sm:$0xff] %vm1884_vm6, %v4559_v42  ;;  %4950 = vrot.lane.b32.xlu0 %v4890_v48, %s6354_s30 }
 0x4ad   :  { %4700 = vrot.lane.b32.xlu1 %v4639_v43, %s6352_s9 }
 0x4ae   :  { %v4935_v30 = vpop.permute.xlu0 %4934 }
 0x4af   :  { %v4685_v55 = vpop.permute.xlu1 %4684  ;;  %v5184_v24 = vld [vmem:[#allocation4 + $0x90] sm:$0xff]  ;;  %4987 = vst.msk [vmem:[#allocation4 + $0xa0] sm:$0xff] %vm2265_vm9, %v4935_v30 }
 0x4b0   :  { %4736 = vst.msk [vmem:[#allocation4 + $0xb0] sm:$0xff] %vm2011_vm7, %v4685_v55  ;;  %5399 = vmatmul.mubr.f32.gmra.mxu0 %v5184_v24  ;;  %5076 = vrot.lane.b32.xlu0 %v5016_v49, %s6355_s6  ;;  %v5199_v49 = vld [vmem:[#allocation4 + $0x108] sm:$0xff] }
 0x4b1   :  { %5775 = vmatprep.mubr.msk.f32.mxu0 %vm984_vm2, %v5187_v20  ;;  %4826 = vrot.lane.b32.xlu1 %v4765_v47, %s6353_s14 }
 0x4b2   :  { %v5061_v2 = vpop.permute.xlu0 %5060 }
 0x4b3   :  { %v4811_v38 = vpop.permute.xlu1 %4810  ;;  %5113 = vst.msk [vmem:[#allocation4 + $0xa0] sm:$0xff] %vm2392_vm11, %v5061_v2 }
 0x4b4   :  { %4862 = vst.msk [vmem:[#allocation4 + $0xb0] sm:$0xff] %vm2138_vm8, %v4811_v38  ;;  %4576 = vrot.lane.b32.xlu0 %v8518_v45, %s6351_s29  ;;  %v5189_v45 = vld [vmem:[#allocation4 + $0xb8] sm:$0xff] }
 0x4b5   :  { %4952 = vrot.lane.b32.xlu1 %v4891_v46, %s6354_s30 }
 0x4b6   :  { %v4561_v50 = vpop.permute.xlu0 %4560 }
 0x4b7   :  { %v4311_v60 = vpop.permute.xlu1 %4310  ;;  %4611 = vst.msk [vmem:[#allocation4 + $0xc0] sm:$0xff] %vm1884_vm6, %v4561_v50 }
 0x4b8   :  { %4360 = vst.msk [vmem:[#allocation4 + $0xd0] sm:$0xff] %vm1630_vm4, %v4311_v60  ;;  %4702 = vrot.lane.b32.xlu0 %v4640_v12, %s6352_s9 }
 0x4b9   :  { %5078 = vrot.lane.b32.xlu1 %v5017_v54, %s6355_s6 }
 0x4ba   :  { %v4687_v58 = vpop.permute.xlu0 %4686  ;;  %v5186_v31 = vld [vmem:[#allocation4 + $0xa0] sm:$0xff] }
 0x4bb   :  { %v4437_v8 = vpop.permute.xlu1 %4436  ;;  %4737 = vst.msk [vmem:[#allocation4 + $0xc0] sm:$0xff] %vm2011_vm7, %v4687_v58  ;;  %5404 = vmatmul.mubr.f32.gmra.mxu0 %v5186_v31  ;;  %v5201_v31 = vld [vmem:[#allocation4 + $0x118] sm:$0xff] }
 0x4bc   :  { %4486 = vst.msk [vmem:[#allocation4 + $0xd0] sm:$0xff] %vm1757_vm5, %v4437_v8  ;;  %5776 = vmatprep.mubr.msk.f32.mxu0 %vm984_vm2, %v5189_v45  ;;  %4954 = vrot.lane.b32.xlu0 %v4892_v59, %s6354_s30 }
 0x4bd   :  { %4828 = vrot.lane.b32.xlu1 %v4766_v6, %s6353_s14 }
 0x4be   :  { %v4813_v22 = vpop.permute.xlu0 %4812 }
 0x4bf   :  { %v4937_v40 = vpop.permute.xlu1 %4936  ;;  %4863 = vst.msk [vmem:[#allocation4 + $0xc0] sm:$0xff] %vm2138_vm8, %v4813_v22 }
 0x4c0   :  { %4988 = vst.msk [vmem:[#allocation4 + $0xb0] sm:$0xff] %vm2265_vm9, %v4937_v40 }
 0x4c1   :  { %5080 = vrot.lane.b32.xlu1 %v5018_v34, %s6355_s6 }
 0x4c2   :  { %v4313_v29 = vpop.permute.xlu0 %4312 }
 0x4c3   :  { %v5063_v33 = vpop.permute.xlu1 %5062  ;;  %4361 = vst.msk [vmem:[#allocation4 + $0xe0] sm:$0xff] %vm1630_vm4, %v4313_v29 }
 0x4c4   :  { %5114 = vst.msk [vmem:[#allocation4 + $0xb0] sm:$0xff] %vm2392_vm11, %v5063_v33 }
 0x4c6   :  { %v4439_v1 = vpop.permute.xlu0 %4438 }
 0x4c7   :  { %v4563_v0 = vpop.permute.xlu1 %4562  ;;  %4487 = vst.msk [vmem:[#allocation4 + $0xe0] sm:$0xff] %vm1757_vm5, %v4439_v1 }
 0x4c8   :  { %4612 = vst.msk [vmem:[#allocation4 + $0xd0] sm:$0xff] %vm1884_vm6, %v4563_v0 }
 0x4ca   :  { %v4939_v32 = vpop.permute.xlu0 %4938 }
 0x4cb   :  { %v4689_v53 = vpop.permute.xlu1 %4688  ;;  %v5188_v26 = vld [vmem:[#allocation4 + $0xb0] sm:$0xff]  ;;  %4989 = vst.msk [vmem:[#allocation4 + $0xc0] sm:$0xff] %vm2265_vm9, %v4939_v32 }
 0x4cc   :  { %4738 = vst.msk [vmem:[#allocation4 + $0xd0] sm:$0xff] %vm2011_vm7, %v4689_v53  ;;  %5409 = vmatmul.mubr.f32.gmra.mxu0 %v5188_v26  ;;  %v5203_v26 = vld [vmem:[#allocation4 + $0x128] sm:$0xff] }
 0x4cd   :  { %5777 = vmatprep.mubr.msk.f32.mxu0 %vm984_vm2, %v5191_v10 }
 0x4ce   :  { %v5065_v14 = vpop.permute.xlu0 %5064 }
 0x4cf   :  { %v4815_v11 = vpop.permute.xlu1 %4814  ;;  %5115 = vst.msk [vmem:[#allocation4 + $0xc0] sm:$0xff] %vm2392_vm11, %v5065_v14 }
 0x4d0   :  { %4864 = vst.msk [vmem:[#allocation4 + $0xd0] sm:$0xff] %vm2138_vm8, %v4815_v11 }
 0x4d2   :  { %v4565_v41 = vpop.permute.xlu0 %4564 }
 0x4d3   :  { %v4941_v7 = vpop.permute.xlu1 %4940  ;;  %4613 = vst.msk [vmem:[#allocation4 + $0xe0] sm:$0xff] %vm1884_vm6, %v4565_v41 }
 0x4d4   :  { %4990 = vst.msk [vmem:[#allocation4 + $0xd0] sm:$0xff] %vm2265_vm9, %v4941_v7 }
 0x4d6   :  { %v4691_v56 = vpop.permute.xlu0 %4690  ;;  %v5190_v36 = vld [vmem:[#allocation4 + $0xc0] sm:$0xff] }
 0x4d7   :  { %v4315_v15 = vpop.permute.xlu1 %4314  ;;  %4739 = vst.msk [vmem:[#allocation4 + $0xe0] sm:$0xff] %vm2011_vm7, %v4691_v56  ;;  %5414 = vmatmul.mubr.f32.gmra.mxu0 %v5190_v36 }
 0x4d8   :  { %4362 = vst.msk [vmem:[#allocation4 + $0xf0] sm:$0xff] %vm1630_vm4, %v4315_v15  ;;  %5778 = vmatprep.mubr.msk.f32.mxu0 %vm984_vm2, %v5193_v4 }
 0x4da   :  { %v4817_v52 = vpop.permute.xlu0 %4816 }
 0x4db   :  { %v4441_v17 = vpop.permute.xlu1 %4440  ;;  %4865 = vst.msk [vmem:[#allocation4 + $0xe0] sm:$0xff] %vm2138_vm8, %v4817_v52  ;;  %v8754_v52 = vld [vmem:[%s8815_s4] ss:$0 sm:$0xff] }
 0x4dc   :  { %4488 = vst.msk [vmem:[#allocation4 + $0xf0] sm:$0xff] %vm1757_vm5, %v4441_v17 }
 0x4de   :  { %v4317_v61 = vpop.permute.xlu0 %4316 }
 0x4df   :  { %v5067_v37 = vpop.permute.xlu1 %5066  ;;  %4363 = vst.msk [vmem:[#allocation4 + $0x100] sm:$0xff] %vm1630_vm4, %v4317_v61 }
 0x4e0   :  { %5116 = vst.msk [vmem:[#allocation4 + $0xd0] sm:$0xff] %vm2392_vm11, %v5067_v37 }
 0x4e2   :  { %v4443_v39 = vpop.permute.xlu0 %4442 }
 0x4e3   :  { %v4567_v19 = vpop.permute.xlu1 %4566  ;;  %4489 = vst.msk [vmem:[#allocation4 + $0x100] sm:$0xff] %vm1757_vm5, %v4443_v39 }
 0x4e4   :  { %4614 = vst.msk [vmem:[#allocation4 + $0xf0] sm:$0xff] %vm1884_vm6, %v4567_v19 }
 0x4e6   :  { %v4943_v21 = vpop.permute.xlu0 %4942 }
 0x4e7   :  { %v4693_v3 = vpop.permute.xlu1 %4692  ;;  %v5192_v51 = vld [vmem:[#allocation4 + $0xd0] sm:$0xff]  ;;  %4991 = vst.msk [vmem:[#allocation4 + $0xe0] sm:$0xff] %vm2265_vm9, %v4943_v21 }
 0x4e8   :  { %4740 = vst.msk [vmem:[#allocation4 + $0xf0] sm:$0xff] %vm2011_vm7, %v4693_v3  ;;  %5419 = vmatmul.mubr.f32.gmra.mxu0 %v5192_v51 }
 0x4e9   :  { %5779 = vmatprep.mubr.msk.f32.mxu0 %vm984_vm2, %v5195_v62  ;;  %v5205_v62 = vld [vmem:[#allocation4 + $0x138] sm:$0xff] }
 0x4ea   :  { %v5069_v23 = vpop.permute.xlu0 %5068 }
 0x4eb   :  { %v4819_v25 = vpop.permute.xlu1 %4818  ;;  %5117 = vst.msk [vmem:[#allocation4 + $0xe0] sm:$0xff] %vm2392_vm11, %v5069_v23 }
 0x4ec   :  { %4866 = vst.msk [vmem:[#allocation4 + $0xf0] sm:$0xff] %vm2138_vm8, %v4819_v25 }
 0x4ee   :  { %v4569_v18 = vpop.permute.xlu0 %4568 }
 0x4ef   :  { %v4319_v63 = vpop.permute.xlu1 %4318  ;;  %4615 = vst.msk [vmem:[#allocation4 + $0x100] sm:$0xff] %vm1884_vm6, %v4569_v18 }
 0x4f0   :  { %4364 = vst.msk [vmem:[#allocation4 + $0x110] sm:$0xff] %vm1630_vm4, %v4319_v63 }
 0x4f1   :  { %v5355_v13 = vpop.f32.mrf.mxu0 }
 0x4f2   :  { %5459 = vst.msk [vmem:[#allocation5] sm:$0xff] %vm2749_vm12, %v5355_v13  ;;  %v4695_v28 = vpop.permute.xlu0 %4694  ;;  %v5194_v16 = vld [vmem:[#allocation4 + $0xe0] sm:$0xff]  ;;  %v5207_v13 = vld [vmem:[#allocation4 + $0x148] sm:$0xff] }
 0x4f3   :  { %v5357_v5 = vpop.f32.mrf.mxu0  ;;  %v4445_v27 = vpop.permute.xlu1 %4444  ;;  %4741 = vst.msk [vmem:[#allocation4 + $0x100] sm:$0xff] %vm2011_vm7, %v4695_v28  ;;  %5424 = vmatmul.mubr.f32.gmra.mxu0 %v5194_v16 }
 0x4f4   :  { %4490 = vst.msk [vmem:[#allocation4 + $0x110] sm:$0xff] %vm1757_vm5, %v4445_v27  ;;  %5780 = vmatprep.mubr.msk.f32.mxu0 %vm984_vm2, %v5197_v57 }
 0x4f6   :  { %v4821_v44 = vpop.permute.xlu0 %4820 }
 0x4f7   :  { %v4945_v35 = vpop.permute.xlu1 %4944  ;;  %4867 = vst.msk [vmem:[#allocation4 + $0x100] sm:$0xff] %vm2138_vm8, %v4821_v44 }
 0x4f8   :  { %4992 = vst.msk [vmem:[#allocation4 + $0xf0] sm:$0xff] %vm2265_vm9, %v4945_v35 }
 0x4fa   :  { %v4321_v9 = vpop.permute.xlu0 %4320 }
 0x4fb   :  { %v5071_v42 = vpop.permute.xlu1 %5070  ;;  %4365 = vst.msk [vmem:[#allocation4 + $0x120] sm:$0xff] %vm1630_vm4, %v4321_v9 }
 0x4fc   :  { %5118 = vst.msk [vmem:[#allocation4 + $0xf0] sm:$0xff] %vm2392_vm11, %v5071_v42 }
 0x4fe   :  { %v4447_v48 = vpop.permute.xlu0 %4446 }
 0x4ff   :  { %v4571_v43 = vpop.permute.xlu1 %4570  ;;  %4491 = vst.msk [vmem:[#allocation4 + $0x120] sm:$0xff] %vm1757_vm5, %v4447_v48 }
 0x500   :  { %4616 = vst.msk [vmem:[#allocation4 + $0x110] sm:$0xff] %vm1884_vm6, %v4571_v43  ;;  %v5360_v55 = vpop.f32.mrf.mxu0 }
 0x501   :  { %5460 = vst.msk [vmem:[#allocation5 + $0x8] sm:$0xff] %vm2749_vm12, %v5360_v55 }
 0x502   :  { %v5362_v24 = vpop.f32.mrf.mxu0  ;;  %v4947_v47 = vpop.permute.xlu0 %4946 }
 0x503   :  { %v4697_v30 = vpop.permute.xlu1 %4696  ;;  %v5196_v20 = vld [vmem:[#allocation4 + $0xf0] sm:$0xff]  ;;  %4993 = vst.msk [vmem:[#allocation4 + $0x100] sm:$0xff] %vm2265_vm9, %v4947_v47 }
 0x504   :  { %4742 = vst.msk [vmem:[#allocation4 + $0x110] sm:$0xff] %vm2011_vm7, %v4697_v30  ;;  %5429 = vmatmul.mubr.f32.gmra.mxu0 %v5196_v20 }
 0x505   :  { %5781 = vmatprep.mubr.msk.f32.mxu0 %vm984_vm2, %v5199_v49 }
 0x506   :  { %v5073_v2 = vpop.permute.xlu0 %5072 }
 0x507   :  { %v4823_v38 = vpop.permute.xlu1 %4822  ;;  %5119 = vst.msk [vmem:[#allocation4 + $0x100] sm:$0xff] %vm2392_vm11, %v5073_v2 }
 0x508   :  { %4868 = vst.msk [vmem:[#allocation4 + $0x110] sm:$0xff] %vm2138_vm8, %v4823_v38  ;;  %v5480_v32 = vld [vmem:[#allocation5] ss:$2 sm:$0x3f] }
 0x509   :  { %v5481_v10 = vld [vmem:[#allocation5 + $0x1] ss:$2 sm:$0x3f] }
 0x50a   :  { %v4573_v60 = vpop.permute.xlu0 %4572  ;;  %v5482_v15 = vmax.f32 %v5480_v32, %v5481_v10 }
 0x50b   :  { %v4323_v46 = vpop.permute.xlu1 %4322  ;;  %4617 = vst.msk [vmem:[#allocation4 + $0x120] sm:$0xff] %vm1884_vm6, %v4573_v60  ;;  %v5365_v50 = vpop.f32.mrf.mxu0 }
 0x50c   :  { %4366 = vst.msk [vmem:[#allocation4 + $0x130] sm:$0xff] %vm1630_vm4, %v4323_v46 }
 0x50d   :  { %5461 = vst.msk [vmem:[#allocation5 + $0x10] sm:$0xff] %vm2749_vm12, %v5365_v50  ;;  %v5367_v54 = vpop.f32.mrf.mxu0 }
 0x50e   :  { %v4699_v8 = vpop.permute.xlu0 %4698  ;;  %v5198_v58 = vld [vmem:[#allocation4 + $0x100] sm:$0xff] }
 0x50f   :  { %v4449_v12 = vpop.permute.xlu1 %4448  ;;  %4743 = vst.msk [vmem:[#allocation4 + $0x120] sm:$0xff] %vm2011_vm7, %v4699_v8  ;;  %5434 = vmatmul.mubr.f32.gmra.mxu0 %v5198_v58 }
 0x510   :  { %4492 = vst.msk [vmem:[#allocation4 + $0x130] sm:$0xff] %vm1757_vm5, %v4449_v12  ;;  %5782 = vmatprep.mubr.msk.f32.mxu0 %vm984_vm2, %v5201_v31 }
 0x512   :  { %v4825_v45 = vpop.permute.xlu0 %4824 }
 0x513   :  { %v4949_v6 = vpop.permute.xlu1 %4948  ;;  %4869 = vst.msk [vmem:[#allocation4 + $0x120] sm:$0xff] %vm2138_vm8, %v4825_v45 }
 0x514   :  { %4994 = vst.msk [vmem:[#allocation4 + $0x110] sm:$0xff] %vm2265_vm9, %v4949_v6 }
 0x516   :  { %v4325_v40 = vpop.permute.xlu0 %4324 }
 0x517   :  { %v5075_v59 = vpop.permute.xlu1 %5074  ;;  %4367 = vst.msk [vmem:[#allocation4 + $0x140] sm:$0xff] %vm1630_vm4, %v4325_v40 }
 0x518   :  { %5120 = vst.msk [vmem:[#allocation4 + $0x110] sm:$0xff] %vm2392_vm11, %v5075_v59 }
 0x51a   :  { %v4451_v34 = vpop.permute.xlu0 %4450 }
 0x51b   :  { %v4575_v22 = vpop.permute.xlu1 %4574  ;;  %4493 = vst.msk [vmem:[#allocation4 + $0x140] sm:$0xff] %vm1757_vm5, %v4451_v34 }
 0x51c   :  { %4618 = vst.msk [vmem:[#allocation4 + $0x130] sm:$0xff] %vm1884_vm6, %v4575_v22  ;;  %v5370_v33 = vpop.f32.mrf.mxu0 }
 0x51d   :  { %5462 = vst.msk [vmem:[#allocation5 + $0x18] sm:$0xff] %vm2749_vm12, %v5370_v33 }
 0x51e   :  { %v5372_v29 = vpop.f32.mrf.mxu0  ;;  %v4951_v53 = vpop.permute.xlu0 %4950 }
 0x51f   :  { %v4701_v0 = vpop.permute.xlu1 %4700  ;;  %v5200_v1 = vld [vmem:[#allocation4 + $0x110] sm:$0xff]  ;;  %4995 = vst.msk [vmem:[#allocation4 + $0x120] sm:$0xff] %vm2265_vm9, %v4951_v53 }
 0x520   :  { %4744 = vst.msk [vmem:[#allocation4 + $0x130] sm:$0xff] %vm2011_vm7, %v4701_v0  ;;  %5439 = vmatmul.mubr.f32.gmra.mxu0 %v5200_v1 }
 0x521   :  { %5783 = vmatprep.mubr.msk.f32.mxu0 %vm984_vm2, %v5203_v26 }
 0x522   :  { %v5077_v41 = vpop.permute.xlu0 %5076 }
 0x523   :  { %v4827_v11 = vpop.permute.xlu1 %4826  ;;  %5121 = vst.msk [vmem:[#allocation4 + $0x120] sm:$0xff] %vm2392_vm11, %v5077_v41 }
 0x524   :  { %v5483_v14 = vld [vmem:[#allocation5 + $0xe] ss:$2 sm:$0x3f]  ;;  %v5484_v7 = vld [vmem:[#allocation5 + $0xf] ss:$2 sm:$0x3f] }
 0x525   :  { %4870 = vst.msk [vmem:[#allocation4 + $0x130] sm:$0xff] %vm2138_vm8, %v4827_v11  ;;  %v5485_v56 = vmax.f32 %v5483_v14, %v5484_v7 }
 0x526   :  { %v4577_v17 = vpop.permute.xlu0 %4576 }
 0x527   :  { %v5486_v36 = vmax.f32 %v5482_v15, %v5485_v56  ;;  %v4953_v4 = vpop.permute.xlu1 %4952  ;;  %4619 = vst.msk [vmem:[#allocation4 + $0x140] sm:$0xff] %vm1884_vm6, %v4577_v17  ;;  %v5375_v61 = vpop.f32.mrf.mxu0 }
 0x528   :  { %4996 = vst.msk [vmem:[#allocation4 + $0x130] sm:$0xff] %vm2265_vm9, %v4953_v4 }
 0x529   :  { %v5487_v37 = vadd.f32 %v8754_v52, %v5486_v36  ;;  %5463 = vst.msk [vmem:[#allocation5 + $0x20] sm:$0xff] %vm2749_vm12, %v5375_v61  ;;  %v5377_v39 = vpop.f32.mrf.mxu0 }
 0x52a   :  { %v4703_v51 = vpop.permute.xlu0 %4702  ;;  %v5202_v21 = vld [vmem:[#allocation4 + $0x120] sm:$0xff] }
 0x52b   :  { %v5488_v19 = vmax.f32 %v5487_v37, 0.0  ;;  %v5079_v3 = vpop.permute.xlu1 %5078  ;;  %4745 = vst.msk [vmem:[#allocation4 + $0x140] sm:$0xff] %vm2011_vm7, %v4703_v51  ;;  %5444 = vmatmul.mubr.f32.gmra.mxu0 %v5202_v21 }
 0x52c   :  { %5122 = vst.msk [vmem:[#allocation4 + $0x130] sm:$0xff] %vm2392_vm11, %v5079_v3  ;;  %5784 = vmatprep.mubr.msk.f32.mxu0 %vm984_vm2, %v5205_v62 }
 0x52d   :  { %5489 = vst.msk [vmem:[%s8816_s5 + $0x24] sm:$0x3f] %vm2789_vm13, %v5488_v19 }
 0x52e   :  { %v4955_v23 = vpop.permute.xlu0 %4954 }
 0x52f   :  { %v4829_v25 = vpop.permute.xlu1 %4828 }
 0x530   :  { %4871 = vst.msk [vmem:[#allocation4 + $0x140] sm:$0xff] %vm2138_vm8, %v4829_v25  ;;  %v5490_v35 = vld [vmem:[#allocation5 + $0x1c] ss:$2 sm:$0x3f] }
 0x531   :  { %4997 = vst.msk [vmem:[#allocation4 + $0x140] sm:$0xff] %vm2265_vm9, %v4955_v23  ;;  %v5491_v44 = vld [vmem:[#allocation5 + $0x1d] ss:$2 sm:$0x3f] }
 0x532   :  { %v5492_v43 = vmax.f32 %v5490_v35, %v5491_v44 }
 0x533   :  { %v5081_v63 = vpop.permute.xlu1 %5080  ;;  %v5204_v18 = vld [vmem:[#allocation4 + $0x130] sm:$0xff] }
 0x534   :  { %5123 = vst.msk [vmem:[#allocation4 + $0x140] sm:$0xff] %vm2392_vm11, %v5081_v63  ;;  %5449 = vmatmul.mubr.f32.gmra.mxu0 %v5204_v18 }
 0x535   :  { %5785 = vmatprep.mubr.msk.f32.mxu0 %vm984_vm2, %v5207_v13 }
 0x538   :  { %v5380_v5 = vpop.f32.mrf.mxu0 }
 0x539   :  { %5464 = vst.msk [vmem:[#allocation5 + $0x28] sm:$0xff] %vm2749_vm12, %v5380_v5 }
 0x53a   :  { %v5382_v27 = vpop.f32.mrf.mxu0 }
 0x53b   :  { %v5206_v28 = vld [vmem:[#allocation4 + $0x140] sm:$0xff] }
 0x53c   :  { %5454 = vmatmul.mubr.f32.gmra.mxu0 %v5206_v28 }
 0x543   :  { %v5385_v16 = vpop.f32.mrf.mxu0 }
 0x544   :  { %5465 = vst.msk [vmem:[#allocation5 + $0x30] sm:$0xff] %vm2749_vm12, %v5385_v16 }
 0x545   :  { %v5387_v57 = vpop.f32.mrf.mxu0 }
 0x54b   :  { %v5493_v42 = vld [vmem:[#allocation5 + $0x2a] ss:$2 sm:$0x3f]  ;;  %v5494_v9 = vld [vmem:[#allocation5 + $0x2b] ss:$2 sm:$0x3f] }
 0x54c   :  { %v5495_v48 = vmax.f32 %v5493_v42, %v5494_v9 }
 0x54e   :  { %v5496_v55 = vmax.f32 %v5492_v43, %v5495_v48 }
 0x550   :  { %v5497_v24 = vadd.f32 %v8754_v52, %v5496_v55 }
 0x552   :  { %v5498_v30 = vmax.f32 %v5497_v24, 0.0 }
 0x554   :  { %v5390_v20 = vpop.f32.mrf.mxu0  ;;  %5499 = vst.msk [vmem:[%s8816_s5 + $0x2a] sm:$0x3f] %vm2789_vm13, %v5498_v30 }
 0x555   :  { %5466 = vst.msk [vmem:[#allocation5 + $0x38] sm:$0xff] %vm2749_vm12, %v5390_v20 }
 0x556   :  { %v5392_v47 = vpop.f32.mrf.mxu0 }
 0x55f   :  { %v5395_v49 = vpop.f32.mrf.mxu0 }
 0x560   :  { %5467 = vst.msk [vmem:[#allocation5 + $0x40] sm:$0xff] %vm2749_vm12, %v5395_v49 }
 0x561   :  { %v5397_v38 = vpop.f32.mrf.mxu0 }
 0x567   :  { %v5500_v54 = vld [vmem:[#allocation5 + $0x38] ss:$2 sm:$0x3f]  ;;  %v5501_v12 = vld [vmem:[#allocation5 + $0x39] ss:$2 sm:$0x3f] }
 0x568   :  { %v5502_v31 = vmax.f32 %v5500_v54, %v5501_v12 }
 0x570   :  { %v5400_v2 = vpop.f32.mrf.mxu0 }
 0x571   :  { %5468 = vst.msk [vmem:[#allocation5 + $0x48] sm:$0xff] %vm2749_vm12, %v5400_v2 }
 0x572   :  { %v5402_v46 = vpop.f32.mrf.mxu0 }
 0x57b   :  { %v5405_v60 = vpop.f32.mrf.mxu0 }
 0x57c   :  { %5469 = vst.msk [vmem:[#allocation5 + $0x50] sm:$0xff] %vm2749_vm12, %v5405_v60 }
 0x57d   :  { %v5407_v50 = vpop.f32.mrf.mxu0 }
 0x583   :  { %v5503_v8 = vld [vmem:[#allocation5 + $0x46] ss:$2 sm:$0x3f]  ;;  %v5504_v58 = vld [vmem:[#allocation5 + $0x47] ss:$2 sm:$0x3f] }
 0x584   :  { %v5505_v6 = vmax.f32 %v5503_v8, %v5504_v58 }
 0x586   :  { %v5506_v45 = vmax.f32 %v5502_v31, %v5505_v6 }
 0x588   :  { %v5507_v59 = vadd.f32 %v8754_v52, %v5506_v45 }
 0x58a   :  { %v5508_v40 = vmax.f32 %v5507_v59, 0.0 }
 0x58c   :  { %v5410_v22 = vpop.f32.mrf.mxu0  ;;  %5509 = vst.msk [vmem:[%s8816_s5 + $0x30] sm:$0x3f] %vm2789_vm13, %v5508_v40 }
 0x58d   :  { %5470 = vst.msk [vmem:[#allocation5 + $0x58] sm:$0xff] %vm2749_vm12, %v5410_v22 }
 0x58e   :  { %v5412_v34 = vpop.f32.mrf.mxu0 }
 0x594   :  { %v5510_v53 = vld [vmem:[#allocation5 + $0x54] ss:$2 sm:$0x3f]  ;;  %v5511_v26 = vld [vmem:[#allocation5 + $0x55] ss:$2 sm:$0x3f] }
 0x595   :  { %v5512_v11 = vmax.f32 %v5510_v53, %v5511_v26 }
 0x597   :  { %v5415_v33 = vpop.f32.mrf.mxu0 }
 0x598   :  { %5471 = vst.msk [vmem:[#allocation5 + $0x60] sm:$0xff] %vm2749_vm12, %v5415_v33 }
 0x599   :  { %v5417_v29 = vpop.f32.mrf.mxu0 }
 0x5a8   :  { %v5420_v0 = vpop.f32.mrf.mxu0 }
 0x5a9   :  { %5472 = vst.msk [vmem:[#allocation5 + $0x68] sm:$0xff] %vm2749_vm12, %v5420_v0 }
 0x5aa   :  { %v5422_v1 = vpop.f32.mrf.mxu0 }
 0x5b0   :  { %v5513_v32 = vld [vmem:[#allocation5 + $0x62] ss:$2 sm:$0x3f]  ;;  %v5514_v10 = vld [vmem:[#allocation5 + $0x63] ss:$2 sm:$0x3f] }
 0x5b1   :  { %v5515_v14 = vmax.f32 %v5513_v32, %v5514_v10 }
 0x5b3   :  { %v5516_v7 = vmax.f32 %v5512_v11, %v5515_v14  ;;  %v5425_v15 = vpop.f32.mrf.mxu0 }
 0x5b4   :  { %5473 = vst.msk [vmem:[#allocation5 + $0x70] sm:$0xff] %vm2749_vm12, %v5425_v15 }
 0x5b5   :  { %v5517_v41 = vadd.f32 %v8754_v52, %v5516_v7  ;;  %v5427_v36 = vpop.f32.mrf.mxu0 }
 0x5b7   :  { %v5518_v56 = vmax.f32 %v5517_v41, 0.0 }
 0x5b9   :  { %5519 = vst.msk [vmem:[%s8816_s5 + $0x36] sm:$0x3f] %vm2789_vm13, %v5518_v56 }
 0x5c4   :  { %v5430_v4 = vpop.f32.mrf.mxu0 }
 0x5c5   :  { %5474 = vst.msk [vmem:[#allocation5 + $0x78] sm:$0xff] %vm2749_vm12, %v5430_v4 }
 0x5c6   :  { %v5432_v17 = vpop.f32.mrf.mxu0 }
 0x5cc   :  { %v5520_v3 = vld [vmem:[#allocation5 + $0x70] ss:$2 sm:$0x3f]  ;;  %v5521_v51 = vld [vmem:[#allocation5 + $0x71] ss:$2 sm:$0x3f] }
 0x5cd   :  { %v5522_v25 = vmax.f32 %v5520_v3, %v5521_v51 }
 0x5cf   :  { %v5435_v37 = vpop.f32.mrf.mxu0 }
 0x5d0   :  { %5475 = vst.msk [vmem:[#allocation5 + $0x80] sm:$0xff] %vm2749_vm12, %v5435_v37 }
 0x5d1   :  { %v5437_v61 = vpop.f32.mrf.mxu0 }
 0x5e0   :  { %v5440_v19 = vpop.f32.mrf.mxu0 }
 0x5e1   :  { %5476 = vst.msk [vmem:[#allocation5 + $0x88] sm:$0xff] %vm2749_vm12, %v5440_v19 }
 0x5e2   :  { %v5442_v39 = vpop.f32.mrf.mxu0 }
 0x5e8   :  { %v5523_v21 = vld [vmem:[#allocation5 + $0x7e] ss:$2 sm:$0x3f]  ;;  %v5524_v62 = vld [vmem:[#allocation5 + $0x7f] ss:$2 sm:$0x3f] }
 0x5e9   :  { %v5525_v23 = vmax.f32 %v5523_v21, %v5524_v62 }
 0x5eb   :  { %v5526_v63 = vmax.f32 %v5522_v25, %v5525_v23  ;;  %v5445_v13 = vpop.f32.mrf.mxu0 }
 0x5ec   :  { %5477 = vst.msk [vmem:[#allocation5 + $0x90] sm:$0xff] %vm2749_vm12, %v5445_v13 }
 0x5ed   :  { %v5527_v18 = vadd.f32 %v8754_v52, %v5526_v63  ;;  %v5447_v27 = vpop.f32.mrf.mxu0 }
 0x5ef   :  { %v5528_v5 = vmax.f32 %v5527_v18, 0.0 }
 0x5f1   :  { %5529 = vst.msk [vmem:[%s8816_s5 + $0x3c] sm:$0x3f] %vm2789_vm13, %v5528_v5 }
 0x5f3   :  { %v5530_v44 = vld [vmem:[#allocation5 + $0x8c] ss:$2 sm:$0x3f]  ;;  %v5531_v42 = vld [vmem:[#allocation5 + $0x8d] ss:$2 sm:$0x3f] }
 0x5f4   :  { %v5450_v28 = vpop.f32.mrf.mxu0  ;;  %v5532_v48 = vmax.f32 %v5530_v44, %v5531_v42 }
 0x5f5   :  { %5478 = vst.msk [vmem:[#allocation5 + $0x98] sm:$0xff] %vm2749_vm12, %v5450_v28 }
 0x5f6   :  { %v5452_v16 = vpop.f32.mrf.mxu0 }
 0x5fc   :  { %v5455_v57 = vpop.f32.mrf.mxu0 }
 0x5fd   :  { %5479 = vst.msk [vmem:[#allocation5 + $0xa0] sm:$0xff] %vm2749_vm12, %v5455_v57 }
 0x5fe   :  { %v5457_v35 = vpop.f32.mrf.mxu0 }
 0x604   :  { %v5533_v9 = vld [vmem:[#allocation5 + $0x9a] ss:$2 sm:$0x3f]  ;;  %v5534_v43 = vld [vmem:[#allocation5 + $0x9b] ss:$2 sm:$0x3f] }
 0x605   :  { %v5535_v55 = vmax.f32 %v5533_v9, %v5534_v43 }
 0x607   :  { %v5536_v24 = vmax.f32 %v5532_v48, %v5535_v55 }
 0x609   :  { %v5537_v30 = vadd.f32 %v8754_v52, %v5536_v24 }
 0x60b   :  { %v5538_v20 = vmax.f32 %v5537_v30, 0.0 }
 0x60d   :  { %5539 = vst.msk [vmem:[%s8816_s5 + $0x42] sm:$0x3f] %vm2789_vm13, %v5538_v20 }

</bundles_post_ra>
